<compile_context>
chip_gen: v7x
topology: tpu7x:2x2x1
jax: 0.10.0
libtpu: 0.0.40
codegen_flags: <defaults>
</compile_context>

<pallas_src>
import math
import functools

import jax
import jax.numpy as jnp
from jax.experimental import pallas as pl
from jax.experimental.pallas import tpu as pltpu

EXPANSION = 4          # BottleneckV1
BN_EPS = 1e-5

_VMEM = pl.BlockSpec(memory_space=pltpu.MemorySpace.VMEM)


def _round_up(x, m):
    return ((x + m - 1) // m) * m


def _pick_tile(dim, align, candidates):
    """Pick a tile that divides the padded dim; prefer larger MXU-friendly tiles."""
    d = _round_up(dim, align)
    for c in candidates:
        if d >= c and d % c == 0:
            return c, d
    return d, d   # single tile covering the whole (padded) dim


# ----------------------------- Pallas kernels ------------------------------

def _mm_bias_kernel(a_ref, b_ref, c_ref, o_ref, acc_ref, *, relu):
    # o = [relu](A @ B + shift), accumulated over the K grid axis in f32.
    k = pl.program_id(2)

    @pl.when(k == 0)
    def _():
        acc_ref[...] = jnp.zeros_like(acc_ref)

    acc_ref[...] += jnp.dot(a_ref[...], b_ref[...],
                            preferred_element_type=jnp.float32)

    @pl.when(k == pl.num_programs(2) - 1)
    def _():
        out = acc_ref[...] + c_ref[...]
        if relu:
            out = jnp.maximum(out, 0.0)
        o_ref[...] = out.astype(o_ref.dtype)


def _mm_bias_res_kernel(a_ref, b_ref, c_ref, r_ref, o_ref, acc_ref, *, relu):
    # o = [relu](A @ B + shift + residual)
    k = pl.program_id(2)

    @pl.when(k == 0)
    def _():
        acc_ref[...] = jnp.zeros_like(acc_ref)

    acc_ref[...] += jnp.dot(a_ref[...], b_ref[...],
                            preferred_element_type=jnp.float32)

    @pl.when(k == pl.num_programs(2) - 1)
    def _():
        out = acc_ref[...] + c_ref[...] + r_ref[...].astype(jnp.float32)
        if relu:
            out = jnp.maximum(out, 0.0)
        o_ref[...] = out.astype(o_ref.dtype)


def _gap_kernel(x_ref, o_ref):
    # x: (N, H*W, C) -> mean over spatial, accumulate in f32.
    o_ref[...] = jnp.mean(x_ref[...].astype(jnp.float32), axis=1)


# ----------------------------- kernel wrappers ------------------------------

def _pad2(x, rows, cols):
    pr, pc = rows - x.shape[0], cols - x.shape[1]
    if pr or pc:
        x = jnp.pad(x, ((0, pr), (0, pc)))
    return x


def _fused_matmul(A, B, shift, residual=None, relu=True, out_dtype=jnp.bfloat16):
    """relu((A @ B) + shift [+ residual]) with a gridded, K-accumulating kernel.

    A: (M, K) activations, B: (K, N) BN-folded weights (bf16), shift: (N,) f32.
    Output is lane-dense: N is padded to a multiple of 128 and sliced after.
    """
    M, K = A.shape
    K2, N = B.shape
    assert K == K2, (A.shape, B.shape)

    TM, Mp = _pick_tile(M, 8, (256, 128))
    TN, Np = _pick_tile(N, 128, (256, 128))
    TK, Kp = _pick_tile(K, 128, (512, 384, 256, 128))

    A = _pad2(A.astype(jnp.bfloat16), Mp, Kp)
    B = _pad2(B.astype(jnp.bfloat16), Kp, Np)
    c = jnp.pad(shift.astype(jnp.float32), (0, Np - N)).reshape(1, Np)

    grid = (Mp // TM, Np // TN, Kp // TK)
    in_specs = [
        pl.BlockSpec((TM, TK), lambda i, j, k: (i, k)),
        pl.BlockSpec((TK, TN), lambda i, j, k: (k, j)),
        pl.BlockSpec((1, TN), lambda i, j, k: (0, j)),
    ]
    args = [A, B, c]
    io_alias = {}
    if residual is not None:
        r = _pad2(residual.astype(jnp.bfloat16), Mp, Np)
        in_specs.append(pl.BlockSpec((TM, TN), lambda i, j, k: (i, j)))
        args.append(r)
        if out_dtype == jnp.bfloat16:
            io_alias = {3: 0}          # alias residual buffer with the output
        kern = functools.partial(_mm_bias_res_kernel, relu=relu)
    else:
        kern = functools.partial(_mm_bias_kernel, relu=relu)

    out = pl.pallas_call(
        kern,
        out_shape=jax.ShapeDtypeStruct((Mp, Np), out_dtype),
        grid_spec=pltpu.PrefetchScalarGridSpec(
            num_scalar_prefetch=0,
            grid=grid,
            in_specs=in_specs,
            out_specs=pl.BlockSpec((TM, TN), lambda i, j, k: (i, j)),
            scratch_shapes=[pltpu.VMEM((TM, TN), jnp.float32)],
        ),
        compiler_params=pltpu.CompilerParams(
            dimension_semantics=("parallel", "parallel", "arbitrary"),
            vmem_limit_bytes=32 * 1024 * 1024,
        ),
        input_output_aliases=io_alias,
    )(*args)

    if Mp != M or Np != N:
        out = out[:M, :N]
    return out


def _im2col(x, kh, kw, stride, padding):
    # TODO(synk): for 3x3 convs this still materializes the KxK taps through
    # HBM; a tap-axis grid with direct offsets into the padded NHWC input (or
    # allow_input_fusion) would remove the blow-up entirely.
    N, H, W, C = x.shape
    if padding > 0:
        x = jnp.pad(x, ((0, 0), (padding, padding), (padding, padding), (0, 0)))
    Hp, Wp = H + 2 * padding, W + 2 * padding
    OH = (Hp - kh) // stride + 1
    OW = (Wp - kw) // stride + 1
    cols = []
    for i in range(kh):
        for j in range(kw):
            cols.append(x[:, i:i + stride * (OH - 1) + 1:stride,
                            j:j + stride * (OW - 1) + 1:stride, :])
    A = jnp.concatenate(cols, axis=-1).reshape(N * OH * OW, kh * kw * C)
    return A, OH, OW


def conv_bn(x, cw, stride, padding, relu=True, residual=None):
    """x: NHWC bf16.  cw: prepared conv (BN folded): {'w': (KH*KW*Cin, Cout) bf16,
    'shift': (Cout,) f32, 'kh', 'kw'}.  Conv + BN [+ residual] [+ ReLU]."""
    N = x.shape[0]
    kh, kw = cw['kh'], cw['kw']
    if kh == 1 and kw == 1:
        # 1x1 conv: no im2col, just (strided) reshape.
        if stride > 1:
            x = x[:, ::stride, ::stride, :]
        OH, OW = x.shape[1], x.shape[2]
        A = x.reshape(N * OH * OW, x.shape[3])
    else:
        A, OH, OW = _im2col(x, kh, kw, stride, padding)
    res = None if residual is None else residual.reshape(A.shape[0], -1)
    out = _fused_matmul(A, cw['w'], cw['shift'], residual=res, relu=relu)
    cout = cw['w'].shape[1]
    return out.reshape(N, OH, OW, cout)


def maxpool2d(x, k=3, stride=2, padding=1):
    # Fused chain of jnp.maximum over strided slices (single HBM read/write,
    # XLA fuses); avoids stacking k*k windows through HBM.
    N, H, W, C = x.shape
    xp = jnp.pad(x, ((0, 0), (padding, padding), (padding, padding), (0, 0)),
                 constant_values=-jnp.inf)
    Hp, Wp = H + 2 * padding, W + 2 * padding
    OH = (Hp - k) // stride + 1
    OW = (Wp - k) // stride + 1
    out = None
    for i in range(k):
        for j in range(k):
            s = xp[:, i:i + stride * (OH - 1) + 1:stride,
                     j:j + stride * (OW - 1) + 1:stride, :]
            out = s if out is None else jnp.maximum(out, s)
    return out


def global_avg_pool(x):
    # Final feature map is tiny (N, h*w, C) -> whole-array VMEM kernel is fine.
    N, H, W, C = x.shape
    xr = x.reshape(N, H * W, C)
    return pl.pallas_call(
        _gap_kernel,
        out_shape=jax.ShapeDtypeStruct((N, C), jnp.float32),
        in_specs=[_VMEM],
        out_specs=_VMEM,
    )(xr)


# ----------------------------- parameter init ------------------------------

def _init_conv(key, cout, cin, kh, kw):
    # matches: m.weight.data.normal_(0, sqrt(2. / (kh*kw*cout)))
    std = math.sqrt(2.0 / (kh * kw * cout))
    return std * jax.random.normal(key, (cout, cin, kh, kw), jnp.float32)


def _init_bn(c):
    # matches: weight.fill_(1), bias.zero_(); running stats at defaults
    return dict(gamma=jnp.ones((c,), jnp.float32),
                beta=jnp.zeros((c,), jnp.float32),
                mean=jnp.zeros((c,), jnp.float32),
                var=jnp.ones((c,), jnp.float32))


def init_resnet_params(key, layers=(1, 1, 1, 1), num_classes=10):
    keys = iter(jax.random.split(key, 256))
    params = {}
    params['conv1'] = _init_conv(next(keys), 64, 3, 7, 7)
    params['bn1'] = _init_bn(64)
    inplanes = 64
    layer_params = []
    for planes, nblocks, stride in zip((64, 128, 256, 512), layers, (1, 2, 2, 2)):
        blocks = []
        for bi in range(nblocks):
            s = stride if bi == 0 else 1
            blk = {
                'conv1': _init_conv(next(keys), planes, inplanes, 1, 1),
                'bn1': _init_bn(planes),
                'conv2': _init_conv(next(keys), planes, planes, 3, 3),
                'bn2': _init_bn(planes),
                'conv3': _init_conv(next(keys), planes * EXPANSION, planes, 1, 1),
                'bn3': _init_bn(planes * EXPANSION),
                'stride': s,
                'down': None,
            }
            if s != 1 or inplanes != planes * EXPANSION:
                blk['down'] = {
                    'conv': _init_conv(next(keys), planes * EXPANSION, inplanes, 1, 1),
                    'bn': _init_bn(planes * EXPANSION),
                }
            blocks.append(blk)
            inplanes = planes * EXPANSION
        layer_params.append(blocks)
    params['layers'] = layer_params
    feat = 512 * EXPANSION
    bound = 1.0 / math.sqrt(feat)
    params['fc_w'] = jax.random.uniform(next(keys), (num_classes, feat),
                                        jnp.float32, -bound, bound)
    params['fc_b'] = jax.random.uniform(next(keys), (num_classes,),
                                        jnp.float32, -bound, bound)
    return params


def _fold_conv_bn(w_pt, bn):
    """Fold BN into the conv weights: W' = W*scale (per Cout), keep only shift."""
    cout, cin, kh, kw = w_pt.shape
    scale = bn['gamma'] * jax.lax.rsqrt(bn['var'] + BN_EPS)
    shift = bn['beta'] - bn['mean'] * scale
    w2 = jnp.transpose(w_pt, (2, 3, 1, 0)).reshape(kh * kw * cin, cout)
    w2 = (w2 * scale[None, :]).astype(jnp.bfloat16)
    return dict(w=w2, shift=shift.astype(jnp.float32), kh=int(kh), kw=int(kw))


def prepare_params(params):
    """One-time prep: fold BN, pre-lay-out weights as (KH*KW*Cin, Cout) bf16."""
    prep = {'conv1': _fold_conv_bn(params['conv1'], params['bn1'])}
    layers = []
    for blocks in params['layers']:
        pblocks = []
        for blk in blocks:
            pb = dict(
                conv1=_fold_conv_bn(blk['conv1'], blk['bn1']),
                conv2=_fold_conv_bn(blk['conv2'], blk['bn2']),
                conv3=_fold_conv_bn(blk['conv3'], blk['bn3']),
                stride=blk['stride'],
                down=None,
            )
            if blk['down'] is not None:
                pb['down'] = _fold_conv_bn(blk['down']['conv'], blk['down']['bn'])
            pblocks.append(pb)
        layers.append(pblocks)
    prep['layers'] = layers
    prep['fc'] = dict(w=params['fc_w'].T.astype(jnp.bfloat16),
                      shift=params['fc_b'].astype(jnp.float32))
    return prep


# ----------------------------- forward pass --------------------------------

def bottleneck_forward(x, blk):
    s = blk['stride']
    out = conv_bn(x, blk['conv1'], stride=1, padding=0, relu=True)
    out = conv_bn(out, blk['conv2'], stride=s, padding=1, relu=True)
    if blk['down'] is not None:
        identity = conv_bn(x, blk['down'], stride=s, padding=0, relu=False)
    else:
        identity = x
    # conv3 + bn3 + residual add + final relu fused into one gridded matmul
    out = conv_bn(out, blk['conv3'], stride=1, padding=0,
                  relu=True, residual=identity)
    return out


def resnet_forward(prep, x_nchw):
    x = jnp.transpose(x_nchw, (0, 2, 3, 1)).astype(jnp.bfloat16)   # NCHW -> NHWC
    x = conv_bn(x, prep['conv1'], stride=2, padding=3, relu=True)
    x = maxpool2d(x, k=3, stride=2, padding=1)
    for blocks in prep['layers']:
        for blk in blocks:
            x = bottleneck_forward(x, blk)
    x = global_avg_pool(x)                                          # (N, 512*exp) f32
    # final_drop = 0.0 -> self.drop is None -> no dropout
    logits = _fused_matmul(x.astype(jnp.bfloat16), prep['fc']['w'],
                           prep['fc']['shift'], relu=False,
                           out_dtype=jnp.float32)
    return logits


if __name__ == "__main__":
    key = jax.random.PRNGKey(0)
    pkey, xkey = jax.random.split(key)
    params = init_resnet_params(pkey, layers=(1, 1, 1, 1), num_classes=10)
    prep = prepare_params(params)
    x = jax.random.normal(xkey, (2, 3, 32, 32), jnp.float32)        # NCHW input
    fwd = jax.jit(functools.partial(resnet_forward, prep))
    out = jax.block_until_ready(fwd(x))
    assert out.shape == (2, 10), out.shape
    assert bool(jnp.all(jnp.isfinite(out)))
    print("KERNEL_OK")
</pallas_src>

<mosaic_0001>
module attributes {stable_mosaic.version = 11 : i64} {
  func.func @_mm_bias_kernel(%arg0: i32, %arg1: i32, %arg2: i32, %arg3: memref<256x256xbf16, #tpu.memory_space<vmem>>, %arg4: memref<256x128xbf16, #tpu.memory_space<vmem>>, %arg5: memref<1x128xf32, #tpu.memory_space<vmem>>, %arg6: memref<256x128xbf16, #tpu.memory_space<vmem>>, %arg7: memref<256x128xf32, #tpu.memory_space<vmem>>) attributes {dimension_semantics = [#tpu.dimension_semantics<parallel>, #tpu.dimension_semantics<parallel>, #tpu.dimension_semantics<arbitrary>], iteration_bounds = array<i64: 2, 1, 1>, scalar_prefetch = 0 : i64, scratch_operands = 1 : i64, tpu.core_type = #tpu.core_type<tc>, window_params = [{transform_indices = @transform_0, window_bounds = array<i64: 256, 256>}, {transform_indices = @transform_1, window_bounds = array<i64: 256, 128>}, {transform_indices = @transform_2, window_bounds = array<i64: 1, 128>}, {transform_indices = @transform_3, window_bounds = array<i64: 256, 128>}]} {
    %c0_i32 = arith.constant 0 : i32
    %0 = arith.cmpi eq, %arg2, %c0_i32 : i32
    %1 = arith.extui %0 : i1 to i32
    %c0_i32_0 = arith.constant 0 : i32
    %2 = arith.cmpi ne, %1, %c0_i32_0 : i32
    scf.if %2 {
      %cst_10 = arith.constant 0.000000e+00 : f32
      %12 = vector.broadcast %cst_10 : f32 to vector<256x128xf32>
      %c0_11 = arith.constant 0 : index
      %c0_12 = arith.constant 0 : index
      %13 = vector.load %arg7[%c0_11, %c0_12] : memref<256x128xf32, #tpu.memory_space<vmem>>, vector<256x128xf32>
      tpu.vector_store %arg7[%c0_11, %c0_12], %12 {strides = array<i32>} : memref<256x128xf32, #tpu.memory_space<vmem>>, vector<256x128xf32>,
    } else {
    }
    %c0 = arith.constant 0 : index
    %c0_1 = arith.constant 0 : index
    %3 = vector.load %arg7[%c0, %c0_1] : memref<256x128xf32, #tpu.memory_space<vmem>>, vector<256x128xf32>
    %c0_2 = arith.constant 0 : index
    %c0_3 = arith.constant 0 : index
    %4 = vector.load %arg3[%c0_2, %c0_3] : memref<256x256xbf16, #tpu.memory_space<vmem>>, vector<256x256xbf16>
    %c0_4 = arith.constant 0 : index
    %c0_5 = arith.constant 0 : index
    %5 = vector.load %arg4[%c0_4, %c0_5] : memref<256x128xbf16, #tpu.memory_space<vmem>>, vector<256x128xbf16>
    %cst = arith.constant dense<0.000000e+00> : vector<256x128xf32>
    %6 = tpu.matmul %4, %5, %cst {dimension_numbers = #tpu.dot_dimension_numbers<[1], [0], [0], [1], [0, 0, 1, 1], [], []>} : vector<256x256xbf16>, vector<256x128xbf16>, vector<256x128xf32> -> vector<256x128xf32>
    %7 = arith.addf %3, %6 : vector<256x128xf32>
    %c0_6 = arith.constant 0 : index
    %c0_7 = arith.constant 0 : index
    %8 = vector.load %arg7[%c0_6, %c0_7] : memref<256x128xf32, #tpu.memory_space<vmem>>, vector<256x128xf32>
    tpu.vector_store %arg7[%c0_6, %c0_7], %7 {strides = array<i32>} : memref<256x128xf32, #tpu.memory_space<vmem>>, vector<256x128xf32>,
    %c0_i32_8 = arith.constant 0 : i32
    %9 = arith.cmpi eq, %arg2, %c0_i32_8 : i32
    %10 = arith.extui %9 : i1 to i32
    %c0_i32_9 = arith.constant 0 : i32
    %11 = arith.cmpi ne, %10, %c0_i32_9 : i32
    scf.if %11 {
      %c0_10 = arith.constant 0 : index
      %c0_11 = arith.constant 0 : index
      %12 = vector.load %arg7[%c0_10, %c0_11] : memref<256x128xf32, #tpu.memory_space<vmem>>, vector<256x128xf32>
      %c0_12 = arith.constant 0 : index
      %c0_13 = arith.constant 0 : index
      %13 = vector.load %arg5[%c0_12, %c0_13] : memref<1x128xf32, #tpu.memory_space<vmem>>, vector<1x128xf32>
      %14 = vector.broadcast %13 : vector<1x128xf32> to vector<256x128xf32>
      %15 = arith.addf %12, %14 : vector<256x128xf32>
      %cst_14 = arith.constant 0.000000e+00 : f32
      %16 = vector.broadcast %cst_14 : f32 to vector<256x128xf32>
      %17 = arith.maximumf %15, %16 : vector<256x128xf32>
      %18 = arith.truncf %17 : vector<256x128xf32> to vector<256x128xbf16>
      %c0_15 = arith.constant 0 : index
      %c0_16 = arith.constant 0 : index
      %19 = vector.load %arg6[%c0_15, %c0_16] : memref<256x128xbf16, #tpu.memory_space<vmem>>, vector<256x128xbf16>
      tpu.vector_store %arg6[%c0_15, %c0_16], %18 {strides = array<i32>} : memref<256x128xbf16, #tpu.memory_space<vmem>>, vector<256x128xbf16>,
    } else {
    }
    return
  }
  func.func @transform_0(%arg0: i32, %arg1: i32, %arg2: i32) -> (i32, i32) {
    %c0_i32 = arith.constant 0 : i32
    return %arg0, %arg2 : i32, i32
  }
  func.func @transform_1(%arg0: i32, %arg1: i32, %arg2: i32) -> (i32, i32) {
    %c0_i32 = arith.constant 0 : i32
    return %arg2, %arg1 : i32, i32
  }
  func.func @transform_2(%arg0: i32, %arg1: i32, %arg2: i32) -> (i32, i32) {
    %c0_i32 = arith.constant 0 : i32
    %c0_i32_0 = arith.constant 0 : i32
    return %c0_i32, %arg1 : i32, i32
  }
  func.func @transform_3(%arg0: i32, %arg1: i32, %arg2: i32) -> (i32, i32) {
    %c0_i32 = arith.constant 0 : i32
    return %arg0, %arg1 : i32, i32
  }
}

module attributes {stable_mosaic.version = 11 : i64} {
  func.func @_mm_bias_kernel(%arg0: i32, %arg1: i32, %arg2: i32, %arg3: memref<128x128xbf16, #tpu.memory_space<vmem>>, %arg4: memref<128x128xbf16, #tpu.memory_space<vmem>>, %arg5: memref<1x128xf32, #tpu.memory_space<vmem>>, %arg6: memref<128x128xbf16, #tpu.memory_space<vmem>>, %arg7: memref<128x128xf32, #tpu.memory_space<vmem>>) attributes {dimension_semantics = [#tpu.dimension_semantics<parallel>, #tpu.dimension_semantics<parallel>, #tpu.dimension_semantics<arbitrary>], iteration_bounds = array<i64: 1, 1, 1>, scalar_prefetch = 0 : i64, scratch_operands = 1 : i64, tpu.core_type = #tpu.core_type<tc>, window_params = [{transform_indices = @transform_0, window_bounds = array<i64: 128, 128>}, {transform_indices = @transform_1, window_bounds = array<i64: 128, 128>}, {transform_indices = @transform_2, window_bounds = array<i64: 1, 128>}, {transform_indices = @transform_3, window_bounds = array<i64: 128, 128>}]} {
    %c0_i32 = arith.constant 0 : i32
    %0 = arith.cmpi eq, %arg2, %c0_i32 : i32
    %1 = arith.extui %0 : i1 to i32
    %c0_i32_0 = arith.constant 0 : i32
    %2 = arith.cmpi ne, %1, %c0_i32_0 : i32
    scf.if %2 {
      %cst_10 = arith.constant 0.000000e+00 : f32
      %12 = vector.broadcast %cst_10 : f32 to vector<128x128xf32>
      %c0_11 = arith.constant 0 : index
      %c0_12 = arith.constant 0 : index
      %13 = vector.load %arg7[%c0_11, %c0_12] : memref<128x128xf32, #tpu.memory_space<vmem>>, vector<128x128xf32>
      tpu.vector_store %arg7[%c0_11, %c0_12], %12 {strides = array<i32>} : memref<128x128xf32, #tpu.memory_space<vmem>>, vector<128x128xf32>,
    } else {
    }
    %c0 = arith.constant 0 : index
    %c0_1 = arith.constant 0 : index
    %3 = vector.load %arg7[%c0, %c0_1] : memref<128x128xf32, #tpu.memory_space<vmem>>, vector<128x128xf32>
    %c0_2 = arith.constant 0 : index
    %c0_3 = arith.constant 0 : index
    %4 = vector.load %arg3[%c0_2, %c0_3] : memref<128x128xbf16, #tpu.memory_space<vmem>>, vector<128x128xbf16>
    %c0_4 = arith.constant 0 : index
    %c0_5 = arith.constant 0 : index
    %5 = vector.load %arg4[%c0_4, %c0_5] : memref<128x128xbf16, #tpu.memory_space<vmem>>, vector<128x128xbf16>
    %cst = arith.constant dense<0.000000e+00> : vector<128x128xf32>
    %6 = tpu.matmul %4, %5, %cst {dimension_numbers = #tpu.dot_dimension_numbers<[1], [0], [0], [1], [0, 0, 1, 1], [], []>} : vector<128x128xbf16>, vector<128x128xbf16>, vector<128x128xf32> -> vector<128x128xf32>
    %7 = arith.addf %3, %6 : vector<128x128xf32>
    %c0_6 = arith.constant 0 : index
    %c0_7 = arith.constant 0 : index
    %8 = vector.load %arg7[%c0_6, %c0_7] : memref<128x128xf32, #tpu.memory_space<vmem>>, vector<128x128xf32>
    tpu.vector_store %arg7[%c0_6, %c0_7], %7 {strides = array<i32>} : memref<128x128xf32, #tpu.memory_space<vmem>>, vector<128x128xf32>,
    %c0_i32_8 = arith.constant 0 : i32
    %9 = arith.cmpi eq, %arg2, %c0_i32_8 : i32
    %10 = arith.extui %9 : i1 to i32
    %c0_i32_9 = arith.constant 0 : i32
    %11 = arith.cmpi ne, %10, %c0_i32_9 : i32
    scf.if %11 {
      %c0_10 = arith.constant 0 : index
      %c0_11 = arith.constant 0 : index
      %12 = vector.load %arg7[%c0_10, %c0_11] : memref<128x128xf32, #tpu.memory_space<vmem>>, vector<128x128xf32>
      %c0_12 = arith.constant 0 : index
      %c0_13 = arith.constant 0 : index
      %13 = vector.load %arg5[%c0_12, %c0_13] : memref<1x128xf32, #tpu.memory_space<vmem>>, vector<1x128xf32>
      %14 = vector.broadcast %13 : vector<1x128xf32> to vector<128x128xf32>
      %15 = arith.addf %12, %14 : vector<128x128xf32>
      %cst_14 = arith.constant 0.000000e+00 : f32
      %16 = vector.broadcast %cst_14 : f32 to vector<128x128xf32>
      %17 = arith.maximumf %15, %16 : vector<128x128xf32>
      %18 = arith.truncf %17 : vector<128x128xf32> to vector<128x128xbf16>
      %c0_15 = arith.constant 0 : index
      %c0_16 = arith.constant 0 : index
      %19 = vector.load %arg6[%c0_15, %c0_16] : memref<128x128xbf16, #tpu.memory_space<vmem>>, vector<128x128xbf16>
      tpu.vector_store %arg6[%c0_15, %c0_16], %18 {strides = array<i32>} : memref<128x128xbf16, #tpu.memory_space<vmem>>, vector<128x128xbf16>,
    } else {
    }
    return
  }
  func.func @transform_0(%arg0: i32, %arg1: i32, %arg2: i32) -> (i32, i32) {
    %c0_i32 = arith.constant 0 : i32
    return %arg0, %arg2 : i32, i32
  }
  func.func @transform_1(%arg0: i32, %arg1: i32, %arg2: i32) -> (i32, i32) {
    %c0_i32 = arith.constant 0 : i32
    return %arg2, %arg1 : i32, i32
  }
  func.func @transform_2(%arg0: i32, %arg1: i32, %arg2: i32) -> (i32, i32) {
    %c0_i32 = arith.constant 0 : i32
    %c0_i32_0 = arith.constant 0 : i32
    return %c0_i32, %arg1 : i32, i32
  }
  func.func @transform_3(%arg0: i32, %arg1: i32, %arg2: i32) -> (i32, i32) {
    %c0_i32 = arith.constant 0 : i32
    return %arg0, %arg1 : i32, i32
  }
}

module attributes {stable_mosaic.version = 11 : i64} {
  func.func @_mm_bias_kernel(%arg0: i32, %arg1: i32, %arg2: i32, %arg3: memref<128x128xbf16, #tpu.memory_space<vmem>>, %arg4: memref<128x128xbf16, #tpu.memory_space<vmem>>, %arg5: memref<1x128xf32, #tpu.memory_space<vmem>>, %arg6: memref<128x128xbf16, #tpu.memory_space<vmem>>, %arg7: memref<128x128xf32, #tpu.memory_space<vmem>>) attributes {dimension_semantics = [#tpu.dimension_semantics<parallel>, #tpu.dimension_semantics<parallel>, #tpu.dimension_semantics<arbitrary>], iteration_bounds = array<i64: 1, 1, 5>, scalar_prefetch = 0 : i64, scratch_operands = 1 : i64, tpu.core_type = #tpu.core_type<tc>, window_params = [{transform_indices = @transform_0, window_bounds = array<i64: 128, 128>}, {transform_indices = @transform_1, window_bounds = array<i64: 128, 128>}, {transform_indices = @transform_2, window_bounds = array<i64: 1, 128>}, {transform_indices = @transform_3, window_bounds = array<i64: 128, 128>}]} {
    %c0_i32 = arith.constant 0 : i32
    %0 = arith.cmpi eq, %arg2, %c0_i32 : i32
    %1 = arith.extui %0 : i1 to i32
    %c0_i32_0 = arith.constant 0 : i32
    %2 = arith.cmpi ne, %1, %c0_i32_0 : i32
    scf.if %2 {
      %cst_9 = arith.constant 0.000000e+00 : f32
      %12 = vector.broadcast %cst_9 : f32 to vector<128x128xf32>
      %c0_10 = arith.constant 0 : index
      %c0_11 = arith.constant 0 : index
      %13 = vector.load %arg7[%c0_10, %c0_11] : memref<128x128xf32, #tpu.memory_space<vmem>>, vector<128x128xf32>
      tpu.vector_store %arg7[%c0_10, %c0_11], %12 {strides = array<i32>} : memref<128x128xf32, #tpu.memory_space<vmem>>, vector<128x128xf32>,
    } else {
    }
    %c0 = arith.constant 0 : index
    %c0_1 = arith.constant 0 : index
    %3 = vector.load %arg7[%c0, %c0_1] : memref<128x128xf32, #tpu.memory_space<vmem>>, vector<128x128xf32>
    %c0_2 = arith.constant 0 : index
    %c0_3 = arith.constant 0 : index
    %4 = vector.load %arg3[%c0_2, %c0_3] : memref<128x128xbf16, #tpu.memory_space<vmem>>, vector<128x128xbf16>
    %c0_4 = arith.constant 0 : index
    %c0_5 = arith.constant 0 : index
    %5 = vector.load %arg4[%c0_4, %c0_5] : memref<128x128xbf16, #tpu.memory_space<vmem>>, vector<128x128xbf16>
    %cst = arith.constant dense<0.000000e+00> : vector<128x128xf32>
    %6 = tpu.matmul %4, %5, %cst {dimension_numbers = #tpu.dot_dimension_numbers<[1], [0], [0], [1], [0, 0, 1, 1], [], []>} : vector<128x128xbf16>, vector<128x128xbf16>, vector<128x128xf32> -> vector<128x128xf32>
    %7 = arith.addf %3, %6 : vector<128x128xf32>
    %c0_6 = arith.constant 0 : index
    %c0_7 = arith.constant 0 : index
    %8 = vector.load %arg7[%c0_6, %c0_7] : memref<128x128xf32, #tpu.memory_space<vmem>>, vector<128x128xf32>
    tpu.vector_store %arg7[%c0_6, %c0_7], %7 {strides = array<i32>} : memref<128x128xf32, #tpu.memory_space<vmem>>, vector<128x128xf32>,
    %c4_i32 = arith.constant 4 : i32
    %9 = arith.cmpi eq, %arg2, %c4_i32 : i32
    %10 = arith.extui %9 : i1 to i32
    %c0_i32_8 = arith.constant 0 : i32
    %11 = arith.cmpi ne, %10, %c0_i32_8 : i32
    scf.if %11 {
      %c0_9 = arith.constant 0 : index
      %c0_10 = arith.constant 0 : index
      %12 = vector.load %arg7[%c0_9, %c0_10] : memref<128x128xf32, #tpu.memory_space<vmem>>, vector<128x128xf32>
      %c0_11 = arith.constant 0 : index
      %c0_12 = arith.constant 0 : index
      %13 = vector.load %arg5[%c0_11, %c0_12] : memref<1x128xf32, #tpu.memory_space<vmem>>, vector<1x128xf32>
      %14 = vector.broadcast %13 : vector<1x128xf32> to vector<128x128xf32>
      %15 = arith.addf %12, %14 : vector<128x128xf32>
      %cst_13 = arith.constant 0.000000e+00 : f32
      %16 = vector.broadcast %cst_13 : f32 to vector<128x128xf32>
      %17 = arith.maximumf %15, %16 : vector<128x128xf32>
      %18 = arith.truncf %17 : vector<128x128xf32> to vector<128x128xbf16>
      %c0_14 = arith.constant 0 : index
      %c0_15 = arith.constant 0 : index
      %19 = vector.load %arg6[%c0_14, %c0_15] : memref<128x128xbf16, #tpu.memory_space<vmem>>, vector<128x128xbf16>
      tpu.vector_store %arg6[%c0_14, %c0_15], %18 {strides = array<i32>} : memref<128x128xbf16, #tpu.memory_space<vmem>>, vector<128x128xbf16>,
    } else {
    }
    return
  }
  func.func @transform_0(%arg0: i32, %arg1: i32, %arg2: i32) -> (i32, i32) {
    %c0_i32 = arith.constant 0 : i32
    return %arg0, %arg2 : i32, i32
  }
  func.func @transform_1(%arg0: i32, %arg1: i32, %arg2: i32) -> (i32, i32) {
    %c0_i32 = arith.constant 0 : i32
    return %arg2, %arg1 : i32, i32
  }
  func.func @transform_2(%arg0: i32, %arg1: i32, %arg2: i32) -> (i32, i32) {
    %c0_i32 = arith.constant 0 : i32
    %c0_i32_0 = arith.constant 0 : i32
    return %c0_i32, %arg1 : i32, i32
  }
  func.func @transform_3(%arg0: i32, %arg1: i32, %arg2: i32) -> (i32, i32) {
    %c0_i32 = arith.constant 0 : i32
    return %arg0, %arg1 : i32, i32
  }
}

module attributes {stable_mosaic.version = 11 : i64} {
  func.func @_mm_bias_kernel(%arg0: i32, %arg1: i32, %arg2: i32, %arg3: memref<128x128xbf16, #tpu.memory_space<vmem>>, %arg4: memref<128x256xbf16, #tpu.memory_space<vmem>>, %arg5: memref<1x256xf32, #tpu.memory_space<vmem>>, %arg6: memref<128x256xbf16, #tpu.memory_space<vmem>>, %arg7: memref<128x256xf32, #tpu.memory_space<vmem>>) attributes {dimension_semantics = [#tpu.dimension_semantics<parallel>, #tpu.dimension_semantics<parallel>, #tpu.dimension_semantics<arbitrary>], iteration_bounds = array<i64: 1, 1, 1>, scalar_prefetch = 0 : i64, scratch_operands = 1 : i64, tpu.core_type = #tpu.core_type<tc>, window_params = [{transform_indices = @transform_0, window_bounds = array<i64: 128, 128>}, {transform_indices = @transform_1, window_bounds = array<i64: 128, 256>}, {transform_indices = @transform_2, window_bounds = array<i64: 1, 256>}, {transform_indices = @transform_3, window_bounds = array<i64: 128, 256>}]} {
    %c0_i32 = arith.constant 0 : i32
    %0 = arith.cmpi eq, %arg2, %c0_i32 : i32
    %1 = arith.extui %0 : i1 to i32
    %c0_i32_0 = arith.constant 0 : i32
    %2 = arith.cmpi ne, %1, %c0_i32_0 : i32
    scf.if %2 {
      %cst_10 = arith.constant 0.000000e+00 : f32
      %12 = vector.broadcast %cst_10 : f32 to vector<128x256xf32>
      %c0_11 = arith.constant 0 : index
      %c0_12 = arith.constant 0 : index
      %13 = vector.load %arg7[%c0_11, %c0_12] : memref<128x256xf32, #tpu.memory_space<vmem>>, vector<128x256xf32>
      tpu.vector_store %arg7[%c0_11, %c0_12], %12 {strides = array<i32>} : memref<128x256xf32, #tpu.memory_space<vmem>>, vector<128x256xf32>,
    } else {
    }
    %c0 = arith.constant 0 : index
    %c0_1 = arith.constant 0 : index
    %3 = vector.load %arg7[%c0, %c0_1] : memref<128x256xf32, #tpu.memory_space<vmem>>, vector<128x256xf32>
    %c0_2 = arith.constant 0 : index
    %c0_3 = arith.constant 0 : index
    %4 = vector.load %arg3[%c0_2, %c0_3] : memref<128x128xbf16, #tpu.memory_space<vmem>>, vector<128x128xbf16>
    %c0_4 = arith.constant 0 : index
    %c0_5 = arith.constant 0 : index
    %5 = vector.load %arg4[%c0_4, %c0_5] : memref<128x256xbf16, #tpu.memory_space<vmem>>, vector<128x256xbf16>
    %cst = arith.constant dense<0.000000e+00> : vector<128x256xf32>
    %6 = tpu.matmul %4, %5, %cst {dimension_numbers = #tpu.dot_dimension_numbers<[1], [0], [0], [1], [0, 0, 1, 1], [], []>} : vector<128x128xbf16>, vector<128x256xbf16>, vector<128x256xf32> -> vector<128x256xf32>
    %7 = arith.addf %3, %6 : vector<128x256xf32>
    %c0_6 = arith.constant 0 : index
    %c0_7 = arith.constant 0 : index
    %8 = vector.load %arg7[%c0_6, %c0_7] : memref<128x256xf32, #tpu.memory_space<vmem>>, vector<128x256xf32>
    tpu.vector_store %arg7[%c0_6, %c0_7], %7 {strides = array<i32>} : memref<128x256xf32, #tpu.memory_space<vmem>>, vector<128x256xf32>,
    %c0_i32_8 = arith.constant 0 : i32
    %9 = arith.cmpi eq, %arg2, %c0_i32_8 : i32
    %10 = arith.extui %9 : i1 to i32
    %c0_i32_9 = arith.constant 0 : i32
    %11 = arith.cmpi ne, %10, %c0_i32_9 : i32
    scf.if %11 {
      %c0_10 = arith.constant 0 : index
      %c0_11 = arith.constant 0 : index
      %12 = vector.load %arg7[%c0_10, %c0_11] : memref<128x256xf32, #tpu.memory_space<vmem>>, vector<128x256xf32>
      %c0_12 = arith.constant 0 : index
      %c0_13 = arith.constant 0 : index
      %13 = vector.load %arg5[%c0_12, %c0_13] : memref<1x256xf32, #tpu.memory_space<vmem>>, vector<1x256xf32>
      %14 = vector.broadcast %13 : vector<1x256xf32> to vector<128x256xf32>
      %15 = arith.addf %12, %14 : vector<128x256xf32>
      %16 = arith.truncf %15 : vector<128x256xf32> to vector<128x256xbf16>
      %c0_14 = arith.constant 0 : index
      %c0_15 = arith.constant 0 : index
      %17 = vector.load %arg6[%c0_14, %c0_15] : memref<128x256xbf16, #tpu.memory_space<vmem>>, vector<128x256xbf16>
      tpu.vector_store %arg6[%c0_14, %c0_15], %16 {strides = array<i32>} : memref<128x256xbf16, #tpu.memory_space<vmem>>, vector<128x256xbf16>,
    } else {
    }
    return
  }
  func.func @transform_0(%arg0: i32, %arg1: i32, %arg2: i32) -> (i32, i32) {
    %c0_i32 = arith.constant 0 : i32
    return %arg0, %arg2 : i32, i32
  }
  func.func @transform_1(%arg0: i32, %arg1: i32, %arg2: i32) -> (i32, i32) {
    %c0_i32 = arith.constant 0 : i32
    return %arg2, %arg1 : i32, i32
  }
  func.func @transform_2(%arg0: i32, %arg1: i32, %arg2: i32) -> (i32, i32) {
    %c0_i32 = arith.constant 0 : i32
    %c0_i32_0 = arith.constant 0 : i32
    return %c0_i32, %arg1 : i32, i32
  }
  func.func @transform_3(%arg0: i32, %arg1: i32, %arg2: i32) -> (i32, i32) {
    %c0_i32 = arith.constant 0 : i32
    return %arg0, %arg1 : i32, i32
  }
}

module attributes {stable_mosaic.version = 11 : i64} {
  func.func @_mm_bias_res_kernel(%arg0: i32, %arg1: i32, %arg2: i32, %arg3: memref<128x128xbf16, #tpu.memory_space<vmem>>, %arg4: memref<128x256xbf16, #tpu.memory_space<vmem>>, %arg5: memref<1x256xf32, #tpu.memory_space<vmem>>, %arg6: memref<128x256xbf16, #tpu.memory_space<vmem>>, %arg7: memref<128x256xbf16, #tpu.memory_space<vmem>>, %arg8: memref<128x256xf32, #tpu.memory_space<vmem>>) attributes {dimension_semantics = [#tpu.dimension_semantics<parallel>, #tpu.dimension_semantics<parallel>, #tpu.dimension_semantics<arbitrary>], iteration_bounds = array<i64: 1, 1, 1>, scalar_prefetch = 0 : i64, scratch_operands = 1 : i64, tpu.core_type = #tpu.core_type<tc>, window_params = [{transform_indices = @transform_0, window_bounds = array<i64: 128, 128>}, {transform_indices = @transform_1, window_bounds = array<i64: 128, 256>}, {transform_indices = @transform_2, window_bounds = array<i64: 1, 256>}, {transform_indices = @transform_3, window_bounds = array<i64: 128, 256>}, {transform_indices = @transform_4, window_bounds = array<i64: 128, 256>}]} {
    %c0_i32 = arith.constant 0 : i32
    %0 = arith.cmpi eq, %arg2, %c0_i32 : i32
    %1 = arith.extui %0 : i1 to i32
    %c0_i32_0 = arith.constant 0 : i32
    %2 = arith.cmpi ne, %1, %c0_i32_0 : i32
    scf.if %2 {
      %cst_10 = arith.constant 0.000000e+00 : f32
      %12 = vector.broadcast %cst_10 : f32 to vector<128x256xf32>
      %c0_11 = arith.constant 0 : index
      %c0_12 = arith.constant 0 : index
      %13 = vector.load %arg8[%c0_11, %c0_12] : memref<128x256xf32, #tpu.memory_space<vmem>>, vector<128x256xf32>
      tpu.vector_store %arg8[%c0_11, %c0_12], %12 {strides = array<i32>} : memref<128x256xf32, #tpu.memory_space<vmem>>, vector<128x256xf32>,
    } else {
    }
    %c0 = arith.constant 0 : index
    %c0_1 = arith.constant 0 : index
    %3 = vector.load %arg8[%c0, %c0_1] : memref<128x256xf32, #tpu.memory_space<vmem>>, vector<128x256xf32>
    %c0_2 = arith.constant 0 : index
    %c0_3 = arith.constant 0 : index
    %4 = vector.load %arg3[%c0_2, %c0_3] : memref<128x128xbf16, #tpu.memory_space<vmem>>, vector<128x128xbf16>
    %c0_4 = arith.constant 0 : index
    %c0_5 = arith.constant 0 : index
    %5 = vector.load %arg4[%c0_4, %c0_5] : memref<128x256xbf16, #tpu.memory_space<vmem>>, vector<128x256xbf16>
    %cst = arith.constant dense<0.000000e+00> : vector<128x256xf32>
    %6 = tpu.matmul %4, %5, %cst {dimension_numbers = #tpu.dot_dimension_numbers<[1], [0], [0], [1], [0, 0, 1, 1], [], []>} : vector<128x128xbf16>, vector<128x256xbf16>, vector<128x256xf32> -> vector<128x256xf32>
    %7 = arith.addf %3, %6 : vector<128x256xf32>
    %c0_6 = arith.constant 0 : index
    %c0_7 = arith.constant 0 : index
    %8 = vector.load %arg8[%c0_6, %c0_7] : memref<128x256xf32, #tpu.memory_space<vmem>>, vector<128x256xf32>
    tpu.vector_store %arg8[%c0_6, %c0_7], %7 {strides = array<i32>} : memref<128x256xf32, #tpu.memory_space<vmem>>, vector<128x256xf32>,
    %c0_i32_8 = arith.constant 0 : i32
    %9 = arith.cmpi eq, %arg2, %c0_i32_8 : i32
    %10 = arith.extui %9 : i1 to i32
    %c0_i32_9 = arith.constant 0 : i32
    %11 = arith.cmpi ne, %10, %c0_i32_9 : i32
    scf.if %11 {
      %c0_10 = arith.constant 0 : index
      %c0_11 = arith.constant 0 : index
      %12 = vector.load %arg8[%c0_10, %c0_11] : memref<128x256xf32, #tpu.memory_space<vmem>>, vector<128x256xf32>
      %c0_12 = arith.constant 0 : index
      %c0_13 = arith.constant 0 : index
      %13 = vector.load %arg5[%c0_12, %c0_13] : memref<1x256xf32, #tpu.memory_space<vmem>>, vector<1x256xf32>
      %14 = vector.broadcast %13 : vector<1x256xf32> to vector<128x256xf32>
      %15 = arith.addf %12, %14 : vector<128x256xf32>
      %c0_14 = arith.constant 0 : index
      %c0_15 = arith.constant 0 : index
      %16 = vector.load %arg6[%c0_14, %c0_15] : memref<128x256xbf16, #tpu.memory_space<vmem>>, vector<128x256xbf16>
      %17 = arith.extf %16 : vector<128x256xbf16> to vector<128x256xf32>
      %18 = arith.addf %15, %17 : vector<128x256xf32>
      %cst_16 = arith.constant 0.000000e+00 : f32
      %19 = vector.broadcast %cst_16 : f32 to vector<128x256xf32>
      %20 = arith.maximumf %18, %19 : vector<128x256xf32>
      %21 = arith.truncf %20 : vector<128x256xf32> to vector<128x256xbf16>
      %c0_17 = arith.constant 0 : index
      %c0_18 = arith.constant 0 : index
      %22 = vector.load %arg7[%c0_17, %c0_18] : memref<128x256xbf16, #tpu.memory_space<vmem>>, vector<128x256xbf16>
      tpu.vector_store %arg7[%c0_17, %c0_18], %21 {strides = array<i32>} : memref<128x256xbf16, #tpu.memory_space<vmem>>, vector<128x256xbf16>,
    } else {
    }
    return
  }
  func.func @transform_0(%arg0: i32, %arg1: i32, %arg2: i32) -> (i32, i32) {
    %c0_i32 = arith.constant 0 : i32
    return %arg0, %arg2 : i32, i32
  }
  func.func @transform_1(%arg0: i32, %arg1: i32, %arg2: i32) -> (i32, i32) {
    %c0_i32 = arith.constant 0 : i32
    return %arg2, %arg1 : i32, i32
  }
  func.func @transform_2(%arg0: i32, %arg1: i32, %arg2: i32) -> (i32, i32) {
    %c0_i32 = arith.constant 0 : i32
    %c0_i32_0 = arith.constant 0 : i32
    return %c0_i32, %arg1 : i32, i32
  }
  func.func @transform_3(%arg0: i32, %arg1: i32, %arg2: i32) -> (i32, i32) {
    %c0_i32 = arith.constant 0 : i32
    return %arg0, %arg1 : i32, i32
  }
  func.func @transform_4(%arg0: i32, %arg1: i32, %arg2: i32) -> (i32, i32) {
    %c0_i32 = arith.constant 0 : i32
    return %arg0, %arg1 : i32, i32
  }
}

module attributes {stable_mosaic.version = 11 : i64} {
  func.func @_mm_bias_kernel(%arg0: i32, %arg1: i32, %arg2: i32, %arg3: memref<128x256xbf16, #tpu.memory_space<vmem>>, %arg4: memref<256x128xbf16, #tpu.memory_space<vmem>>, %arg5: memref<1x128xf32, #tpu.memory_space<vmem>>, %arg6: memref<128x128xbf16, #tpu.memory_space<vmem>>, %arg7: memref<128x128xf32, #tpu.memory_space<vmem>>) attributes {dimension_semantics = [#tpu.dimension_semantics<parallel>, #tpu.dimension_semantics<parallel>, #tpu.dimension_semantics<arbitrary>], iteration_bounds = array<i64: 1, 1, 1>, scalar_prefetch = 0 : i64, scratch_operands = 1 : i64, tpu.core_type = #tpu.core_type<tc>, window_params = [{transform_indices = @transform_0, window_bounds = array<i64: 128, 256>}, {transform_indices = @transform_1, window_bounds = array<i64: 256, 128>}, {transform_indices = @transform_2, window_bounds = array<i64: 1, 128>}, {transform_indices = @transform_3, window_bounds = array<i64: 128, 128>}]} {
    %c0_i32 = arith.constant 0 : i32
    %0 = arith.cmpi eq, %arg2, %c0_i32 : i32
    %1 = arith.extui %0 : i1 to i32
    %c0_i32_0 = arith.constant 0 : i32
    %2 = arith.cmpi ne, %1, %c0_i32_0 : i32
    scf.if %2 {
      %cst_10 = arith.constant 0.000000e+00 : f32
      %12 = vector.broadcast %cst_10 : f32 to vector<128x128xf32>
      %c0_11 = arith.constant 0 : index
      %c0_12 = arith.constant 0 : index
      %13 = vector.load %arg7[%c0_11, %c0_12] : memref<128x128xf32, #tpu.memory_space<vmem>>, vector<128x128xf32>
      tpu.vector_store %arg7[%c0_11, %c0_12], %12 {strides = array<i32>} : memref<128x128xf32, #tpu.memory_space<vmem>>, vector<128x128xf32>,
    } else {
    }
    %c0 = arith.constant 0 : index
    %c0_1 = arith.constant 0 : index
    %3 = vector.load %arg7[%c0, %c0_1] : memref<128x128xf32, #tpu.memory_space<vmem>>, vector<128x128xf32>
    %c0_2 = arith.constant 0 : index
    %c0_3 = arith.constant 0 : index
    %4 = vector.load %arg3[%c0_2, %c0_3] : memref<128x256xbf16, #tpu.memory_space<vmem>>, vector<128x256xbf16>
    %c0_4 = arith.constant 0 : index
    %c0_5 = arith.constant 0 : index
    %5 = vector.load %arg4[%c0_4, %c0_5] : memref<256x128xbf16, #tpu.memory_space<vmem>>, vector<256x128xbf16>
    %cst = arith.constant dense<0.000000e+00> : vector<128x128xf32>
    %6 = tpu.matmul %4, %5, %cst {dimension_numbers = #tpu.dot_dimension_numbers<[1], [0], [0], [1], [0, 0, 1, 1], [], []>} : vector<128x256xbf16>, vector<256x128xbf16>, vector<128x128xf32> -> vector<128x128xf32>
    %7 = arith.addf %3, %6 : vector<128x128xf32>
    %c0_6 = arith.constant 0 : index
    %c0_7 = arith.constant 0 : index
    %8 = vector.load %arg7[%c0_6, %c0_7] : memref<128x128xf32, #tpu.memory_space<vmem>>, vector<128x128xf32>
    tpu.vector_store %arg7[%c0_6, %c0_7], %7 {strides = array<i32>} : memref<128x128xf32, #tpu.memory_space<vmem>>, vector<128x128xf32>,
    %c0_i32_8 = arith.constant 0 : i32
    %9 = arith.cmpi eq, %arg2, %c0_i32_8 : i32
    %10 = arith.extui %9 : i1 to i32
    %c0_i32_9 = arith.constant 0 : i32
    %11 = arith.cmpi ne, %10, %c0_i32_9 : i32
    scf.if %11 {
      %c0_10 = arith.constant 0 : index
      %c0_11 = arith.constant 0 : index
      %12 = vector.load %arg7[%c0_10, %c0_11] : memref<128x128xf32, #tpu.memory_space<vmem>>, vector<128x128xf32>
      %c0_12 = arith.constant 0 : index
      %c0_13 = arith.constant 0 : index
      %13 = vector.load %arg5[%c0_12, %c0_13] : memref<1x128xf32, #tpu.memory_space<vmem>>, vector<1x128xf32>
      %14 = vector.broadcast %13 : vector<1x128xf32> to vector<128x128xf32>
      %15 = arith.addf %12, %14 : vector<128x128xf32>
      %cst_14 = arith.constant 0.000000e+00 : f32
      %16 = vector.broadcast %cst_14 : f32 to vector<128x128xf32>
      %17 = arith.maximumf %15, %16 : vector<128x128xf32>
      %18 = arith.truncf %17 : vector<128x128xf32> to vector<128x128xbf16>
      %c0_15 = arith.constant 0 : index
      %c0_16 = arith.constant 0 : index
      %19 = vector.load %arg6[%c0_15, %c0_16] : memref<128x128xbf16, #tpu.memory_space<vmem>>, vector<128x128xbf16>
      tpu.vector_store %arg6[%c0_15, %c0_16], %18 {strides = array<i32>} : memref<128x128xbf16, #tpu.memory_space<vmem>>, vector<128x128xbf16>,
    } else {
    }
    return
  }
  func.func @transform_0(%arg0: i32, %arg1: i32, %arg2: i32) -> (i32, i32) {
    %c0_i32 = arith.constant 0 : i32
    return %arg0, %arg2 : i32, i32
  }
  func.func @transform_1(%arg0: i32, %arg1: i32, %arg2: i32) -> (i32, i32) {
    %c0_i32 = arith.constant 0 : i32
    return %arg2, %arg1 : i32, i32
  }
  func.func @transform_2(%arg0: i32, %arg1: i32, %arg2: i32) -> (i32, i32) {
    %c0_i32 = arith.constant 0 : i32
    %c0_i32_0 = arith.constant 0 : i32
    return %c0_i32, %arg1 : i32, i32
  }
  func.func @transform_3(%arg0: i32, %arg1: i32, %arg2: i32) -> (i32, i32) {
    %c0_i32 = arith.constant 0 : i32
    return %arg0, %arg1 : i32, i32
  }
}

module attributes {stable_mosaic.version = 11 : i64} {
  func.func @_mm_bias_kernel(%arg0: i32, %arg1: i32, %arg2: i32, %arg3: memref<32x384xbf16, #tpu.memory_space<vmem>>, %arg4: memref<384x128xbf16, #tpu.memory_space<vmem>>, %arg5: memref<1x128xf32, #tpu.memory_space<vmem>>, %arg6: memref<32x128xbf16, #tpu.memory_space<vmem>>, %arg7: memref<32x128xf32, #tpu.memory_space<vmem>>) attributes {dimension_semantics = [#tpu.dimension_semantics<parallel>, #tpu.dimension_semantics<parallel>, #tpu.dimension_semantics<arbitrary>], iteration_bounds = array<i64: 1, 1, 3>, scalar_prefetch = 0 : i64, scratch_operands = 1 : i64, tpu.core_type = #tpu.core_type<tc>, window_params = [{transform_indices = @transform_0, window_bounds = array<i64: 32, 384>}, {transform_indices = @transform_1, window_bounds = array<i64: 384, 128>}, {transform_indices = @transform_2, window_bounds = array<i64: 1, 128>}, {transform_indices = @transform_3, window_bounds = array<i64: 32, 128>}]} {
    %c0_i32 = arith.constant 0 : i32
    %0 = arith.cmpi eq, %arg2, %c0_i32 : i32
    %1 = arith.extui %0 : i1 to i32
    %c0_i32_0 = arith.constant 0 : i32
    %2 = arith.cmpi ne, %1, %c0_i32_0 : i32
    scf.if %2 {
      %cst_9 = arith.constant 0.000000e+00 : f32
      %12 = vector.broadcast %cst_9 : f32 to vector<32x128xf32>
      %c0_10 = arith.constant 0 : index
      %c0_11 = arith.constant 0 : index
      %13 = vector.load %arg7[%c0_10, %c0_11] : memref<32x128xf32, #tpu.memory_space<vmem>>, vector<32x128xf32>
      tpu.vector_store %arg7[%c0_10, %c0_11], %12 {strides = array<i32>} : memref<32x128xf32, #tpu.memory_space<vmem>>, vector<32x128xf32>,
    } else {
    }
    %c0 = arith.constant 0 : index
    %c0_1 = arith.constant 0 : index
    %3 = vector.load %arg7[%c0, %c0_1] : memref<32x128xf32, #tpu.memory_space<vmem>>, vector<32x128xf32>
    %c0_2 = arith.constant 0 : index
    %c0_3 = arith.constant 0 : index
    %4 = vector.load %arg3[%c0_2, %c0_3] : memref<32x384xbf16, #tpu.memory_space<vmem>>, vector<32x384xbf16>
    %c0_4 = arith.constant 0 : index
    %c0_5 = arith.constant 0 : index
    %5 = vector.load %arg4[%c0_4, %c0_5] : memref<384x128xbf16, #tpu.memory_space<vmem>>, vector<384x128xbf16>
    %cst = arith.constant dense<0.000000e+00> : vector<32x128xf32>
    %6 = tpu.matmul %4, %5, %cst {dimension_numbers = #tpu.dot_dimension_numbers<[1], [0], [0], [1], [0, 0, 1, 1], [], []>} : vector<32x384xbf16>, vector<384x128xbf16>, vector<32x128xf32> -> vector<32x128xf32>
    %7 = arith.addf %3, %6 : vector<32x128xf32>
    %c0_6 = arith.constant 0 : index
    %c0_7 = arith.constant 0 : index
    %8 = vector.load %arg7[%c0_6, %c0_7] : memref<32x128xf32, #tpu.memory_space<vmem>>, vector<32x128xf32>
    tpu.vector_store %arg7[%c0_6, %c0_7], %7 {strides = array<i32>} : memref<32x128xf32, #tpu.memory_space<vmem>>, vector<32x128xf32>,
    %c2_i32 = arith.constant 2 : i32
    %9 = arith.cmpi eq, %arg2, %c2_i32 : i32
    %10 = arith.extui %9 : i1 to i32
    %c0_i32_8 = arith.constant 0 : i32
    %11 = arith.cmpi ne, %10, %c0_i32_8 : i32
    scf.if %11 {
      %c0_9 = arith.constant 0 : index
      %c0_10 = arith.constant 0 : index
      %12 = vector.load %arg7[%c0_9, %c0_10] : memref<32x128xf32, #tpu.memory_space<vmem>>, vector<32x128xf32>
      %c0_11 = arith.constant 0 : index
      %c0_12 = arith.constant 0 : index
      %13 = vector.load %arg5[%c0_11, %c0_12] : memref<1x128xf32, #tpu.memory_space<vmem>>, vector<1x128xf32>
      %14 = vector.broadcast %13 : vector<1x128xf32> to vector<32x128xf32>
      %15 = arith.addf %12, %14 : vector<32x128xf32>
      %cst_13 = arith.constant 0.000000e+00 : f32
      %16 = vector.broadcast %cst_13 : f32 to vector<32x128xf32>
      %17 = arith.maximumf %15, %16 : vector<32x128xf32>
      %18 = arith.truncf %17 : vector<32x128xf32> to vector<32x128xbf16>
      %c0_14 = arith.constant 0 : index
      %c0_15 = arith.constant 0 : index
      %19 = vector.load %arg6[%c0_14, %c0_15] : memref<32x128xbf16, #tpu.memory_space<vmem>>, vector<32x128xbf16>
      tpu.vector_store %arg6[%c0_14, %c0_15], %18 {strides = array<i32>} : memref<32x128xbf16, #tpu.memory_space<vmem>>, vector<32x128xbf16>,
    } else {
    }
    return
  }
  func.func @transform_0(%arg0: i32, %arg1: i32, %arg2: i32) -> (i32, i32) {
    %c0_i32 = arith.constant 0 : i32
    return %arg0, %arg2 : i32, i32
  }
  func.func @transform_1(%arg0: i32, %arg1: i32, %arg2: i32) -> (i32, i32) {
    %c0_i32 = arith.constant 0 : i32
    return %arg2, %arg1 : i32, i32
  }
  func.func @transform_2(%arg0: i32, %arg1: i32, %arg2: i32) -> (i32, i32) {
    %c0_i32 = arith.constant 0 : i32
    %c0_i32_0 = arith.constant 0 : i32
    return %c0_i32, %arg1 : i32, i32
  }
  func.func @transform_3(%arg0: i32, %arg1: i32, %arg2: i32) -> (i32, i32) {
    %c0_i32 = arith.constant 0 : i32
    return %arg0, %arg1 : i32, i32
  }
}

module attributes {stable_mosaic.version = 11 : i64} {
  func.func @_mm_bias_kernel(%arg0: i32, %arg1: i32, %arg2: i32, %arg3: memref<32x256xbf16, #tpu.memory_space<vmem>>, %arg4: memref<256x256xbf16, #tpu.memory_space<vmem>>, %arg5: memref<1x256xf32, #tpu.memory_space<vmem>>, %arg6: memref<32x256xbf16, #tpu.memory_space<vmem>>, %arg7: memref<32x256xf32, #tpu.memory_space<vmem>>) attributes {dimension_semantics = [#tpu.dimension_semantics<parallel>, #tpu.dimension_semantics<parallel>, #tpu.dimension_semantics<arbitrary>], iteration_bounds = array<i64: 1, 2, 1>, scalar_prefetch = 0 : i64, scratch_operands = 1 : i64, tpu.core_type = #tpu.core_type<tc>, window_params = [{transform_indices = @transform_0, window_bounds = array<i64: 32, 256>}, {transform_indices = @transform_1, window_bounds = array<i64: 256, 256>}, {transform_indices = @transform_2, window_bounds = array<i64: 1, 256>}, {transform_indices = @transform_3, window_bounds = array<i64: 32, 256>}]} {
    %c0_i32 = arith.constant 0 : i32
    %0 = arith.cmpi eq, %arg2, %c0_i32 : i32
    %1 = arith.extui %0 : i1 to i32
    %c0_i32_0 = arith.constant 0 : i32
    %2 = arith.cmpi ne, %1, %c0_i32_0 : i32
    scf.if %2 {
      %cst_10 = arith.constant 0.000000e+00 : f32
      %12 = vector.broadcast %cst_10 : f32 to vector<32x256xf32>
      %c0_11 = arith.constant 0 : index
      %c0_12 = arith.constant 0 : index
      %13 = vector.load %arg7[%c0_11, %c0_12] : memref<32x256xf32, #tpu.memory_space<vmem>>, vector<32x256xf32>
      tpu.vector_store %arg7[%c0_11, %c0_12], %12 {strides = array<i32>} : memref<32x256xf32, #tpu.memory_space<vmem>>, vector<32x256xf32>,
    } else {
    }
    %c0 = arith.constant 0 : index
    %c0_1 = arith.constant 0 : index
    %3 = vector.load %arg7[%c0, %c0_1] : memref<32x256xf32, #tpu.memory_space<vmem>>, vector<32x256xf32>
    %c0_2 = arith.constant 0 : index
    %c0_3 = arith.constant 0 : index
    %4 = vector.load %arg3[%c0_2, %c0_3] : memref<32x256xbf16, #tpu.memory_space<vmem>>, vector<32x256xbf16>
    %c0_4 = arith.constant 0 : index
    %c0_5 = arith.constant 0 : index
    %5 = vector.load %arg4[%c0_4, %c0_5] : memref<256x256xbf16, #tpu.memory_space<vmem>>, vector<256x256xbf16>
    %cst = arith.constant dense<0.000000e+00> : vector<32x256xf32>
    %6 = tpu.matmul %4, %5, %cst {dimension_numbers = #tpu.dot_dimension_numbers<[1], [0], [0], [1], [0, 0, 1, 1], [], []>} : vector<32x256xbf16>, vector<256x256xbf16>, vector<32x256xf32> -> vector<32x256xf32>
    %7 = arith.addf %3, %6 : vector<32x256xf32>
    %c0_6 = arith.constant 0 : index
    %c0_7 = arith.constant 0 : index
    %8 = vector.load %arg7[%c0_6, %c0_7] : memref<32x256xf32, #tpu.memory_space<vmem>>, vector<32x256xf32>
    tpu.vector_store %arg7[%c0_6, %c0_7], %7 {strides = array<i32>} : memref<32x256xf32, #tpu.memory_space<vmem>>, vector<32x256xf32>,
    %c0_i32_8 = arith.constant 0 : i32
    %9 = arith.cmpi eq, %arg2, %c0_i32_8 : i32
    %10 = arith.extui %9 : i1 to i32
    %c0_i32_9 = arith.constant 0 : i32
    %11 = arith.cmpi ne, %10, %c0_i32_9 : i32
    scf.if %11 {
      %c0_10 = arith.constant 0 : index
      %c0_11 = arith.constant 0 : index
      %12 = vector.load %arg7[%c0_10, %c0_11] : memref<32x256xf32, #tpu.memory_space<vmem>>, vector<32x256xf32>
      %c0_12 = arith.constant 0 : index
      %c0_13 = arith.constant 0 : index
      %13 = vector.load %arg5[%c0_12, %c0_13] : memref<1x256xf32, #tpu.memory_space<vmem>>, vector<1x256xf32>
      %14 = vector.broadcast %13 : vector<1x256xf32> to vector<32x256xf32>
      %15 = arith.addf %12, %14 : vector<32x256xf32>
      %16 = arith.truncf %15 : vector<32x256xf32> to vector<32x256xbf16>
      %c0_14 = arith.constant 0 : index
      %c0_15 = arith.constant 0 : index
      %17 = vector.load %arg6[%c0_14, %c0_15] : memref<32x256xbf16, #tpu.memory_space<vmem>>, vector<32x256xbf16>
      tpu.vector_store %arg6[%c0_14, %c0_15], %16 {strides = array<i32>} : memref<32x256xbf16, #tpu.memory_space<vmem>>, vector<32x256xbf16>,
    } else {
    }
    return
  }
  func.func @transform_0(%arg0: i32, %arg1: i32, %arg2: i32) -> (i32, i32) {
    %c0_i32 = arith.constant 0 : i32
    return %arg0, %arg2 : i32, i32
  }
  func.func @transform_1(%arg0: i32, %arg1: i32, %arg2: i32) -> (i32, i32) {
    %c0_i32 = arith.constant 0 : i32
    return %arg2, %arg1 : i32, i32
  }
  func.func @transform_2(%arg0: i32, %arg1: i32, %arg2: i32) -> (i32, i32) {
    %c0_i32 = arith.constant 0 : i32
    %c0_i32_0 = arith.constant 0 : i32
    return %c0_i32, %arg1 : i32, i32
  }
  func.func @transform_3(%arg0: i32, %arg1: i32, %arg2: i32) -> (i32, i32) {
    %c0_i32 = arith.constant 0 : i32
    return %arg0, %arg1 : i32, i32
  }
}

module attributes {stable_mosaic.version = 11 : i64} {
  func.func @_mm_bias_res_kernel(%arg0: i32, %arg1: i32, %arg2: i32, %arg3: memref<32x128xbf16, #tpu.memory_space<vmem>>, %arg4: memref<128x256xbf16, #tpu.memory_space<vmem>>, %arg5: memref<1x256xf32, #tpu.memory_space<vmem>>, %arg6: memref<32x256xbf16, #tpu.memory_space<vmem>>, %arg7: memref<32x256xbf16, #tpu.memory_space<vmem>>, %arg8: memref<32x256xf32, #tpu.memory_space<vmem>>) attributes {dimension_semantics = [#tpu.dimension_semantics<parallel>, #tpu.dimension_semantics<parallel>, #tpu.dimension_semantics<arbitrary>], iteration_bounds = array<i64: 1, 2, 1>, scalar_prefetch = 0 : i64, scratch_operands = 1 : i64, tpu.core_type = #tpu.core_type<tc>, window_params = [{transform_indices = @transform_0, window_bounds = array<i64: 32, 128>}, {transform_indices = @transform_1, window_bounds = array<i64: 128, 256>}, {transform_indices = @transform_2, window_bounds = array<i64: 1, 256>}, {transform_indices = @transform_3, window_bounds = array<i64: 32, 256>}, {transform_indices = @transform_4, window_bounds = array<i64: 32, 256>}]} {
    %c0_i32 = arith.constant 0 : i32
    %0 = arith.cmpi eq, %arg2, %c0_i32 : i32
    %1 = arith.extui %0 : i1 to i32
    %c0_i32_0 = arith.constant 0 : i32
    %2 = arith.cmpi ne, %1, %c0_i32_0 : i32
    scf.if %2 {
      %cst_10 = arith.constant 0.000000e+00 : f32
      %12 = vector.broadcast %cst_10 : f32 to vector<32x256xf32>
      %c0_11 = arith.constant 0 : index
      %c0_12 = arith.constant 0 : index
      %13 = vector.load %arg8[%c0_11, %c0_12] : memref<32x256xf32, #tpu.memory_space<vmem>>, vector<32x256xf32>
      tpu.vector_store %arg8[%c0_11, %c0_12], %12 {strides = array<i32>} : memref<32x256xf32, #tpu.memory_space<vmem>>, vector<32x256xf32>,
    } else {
    }
    %c0 = arith.constant 0 : index
    %c0_1 = arith.constant 0 : index
    %3 = vector.load %arg8[%c0, %c0_1] : memref<32x256xf32, #tpu.memory_space<vmem>>, vector<32x256xf32>
    %c0_2 = arith.constant 0 : index
    %c0_3 = arith.constant 0 : index
    %4 = vector.load %arg3[%c0_2, %c0_3] : memref<32x128xbf16, #tpu.memory_space<vmem>>, vector<32x128xbf16>
    %c0_4 = arith.constant 0 : index
    %c0_5 = arith.constant 0 : index
    %5 = vector.load %arg4[%c0_4, %c0_5] : memref<128x256xbf16, #tpu.memory_space<vmem>>, vector<128x256xbf16>
    %cst = arith.constant dense<0.000000e+00> : vector<32x256xf32>
    %6 = tpu.matmul %4, %5, %cst {dimension_numbers = #tpu.dot_dimension_numbers<[1], [0], [0], [1], [0, 0, 1, 1], [], []>} : vector<32x128xbf16>, vector<128x256xbf16>, vector<32x256xf32> -> vector<32x256xf32>
    %7 = arith.addf %3, %6 : vector<32x256xf32>
    %c0_6 = arith.constant 0 : index
    %c0_7 = arith.constant 0 : index
    %8 = vector.load %arg8[%c0_6, %c0_7] : memref<32x256xf32, #tpu.memory_space<vmem>>, vector<32x256xf32>
    tpu.vector_store %arg8[%c0_6, %c0_7], %7 {strides = array<i32>} : memref<32x256xf32, #tpu.memory_space<vmem>>, vector<32x256xf32>,
    %c0_i32_8 = arith.constant 0 : i32
    %9 = arith.cmpi eq, %arg2, %c0_i32_8 : i32
    %10 = arith.extui %9 : i1 to i32
    %c0_i32_9 = arith.constant 0 : i32
    %11 = arith.cmpi ne, %10, %c0_i32_9 : i32
    scf.if %11 {
      %c0_10 = arith.constant 0 : index
      %c0_11 = arith.constant 0 : index
      %12 = vector.load %arg8[%c0_10, %c0_11] : memref<32x256xf32, #tpu.memory_space<vmem>>, vector<32x256xf32>
      %c0_12 = arith.constant 0 : index
      %c0_13 = arith.constant 0 : index
      %13 = vector.load %arg5[%c0_12, %c0_13] : memref<1x256xf32, #tpu.memory_space<vmem>>, vector<1x256xf32>
      %14 = vector.broadcast %13 : vector<1x256xf32> to vector<32x256xf32>
      %15 = arith.addf %12, %14 : vector<32x256xf32>
      %c0_14 = arith.constant 0 : index
      %c0_15 = arith.constant 0 : index
      %16 = vector.load %arg6[%c0_14, %c0_15] : memref<32x256xbf16, #tpu.memory_space<vmem>>, vector<32x256xbf16>
      %17 = arith.extf %16 : vector<32x256xbf16> to vector<32x256xf32>
      %18 = arith.addf %15, %17 : vector<32x256xf32>
      %cst_16 = arith.constant 0.000000e+00 : f32
      %19 = vector.broadcast %cst_16 : f32 to vector<32x256xf32>
      %20 = arith.maximumf %18, %19 : vector<32x256xf32>
      %21 = arith.truncf %20 : vector<32x256xf32> to vector<32x256xbf16>
      %c0_17 = arith.constant 0 : index
      %c0_18 = arith.constant 0 : index
      %22 = vector.load %arg7[%c0_17, %c0_18] : memref<32x256xbf16, #tpu.memory_space<vmem>>, vector<32x256xbf16>
      tpu.vector_store %arg7[%c0_17, %c0_18], %21 {strides = array<i32>} : memref<32x256xbf16, #tpu.memory_space<vmem>>, vector<32x256xbf16>,
    } else {
    }
    return
  }
  func.func @transform_0(%arg0: i32, %arg1: i32, %arg2: i32) -> (i32, i32) {
    %c0_i32 = arith.constant 0 : i32
    return %arg0, %arg2 : i32, i32
  }
  func.func @transform_1(%arg0: i32, %arg1: i32, %arg2: i32) -> (i32, i32) {
    %c0_i32 = arith.constant 0 : i32
    return %arg2, %arg1 : i32, i32
  }
  func.func @transform_2(%arg0: i32, %arg1: i32, %arg2: i32) -> (i32, i32) {
    %c0_i32 = arith.constant 0 : i32
    %c0_i32_0 = arith.constant 0 : i32
    return %c0_i32, %arg1 : i32, i32
  }
  func.func @transform_3(%arg0: i32, %arg1: i32, %arg2: i32) -> (i32, i32) {
    %c0_i32 = arith.constant 0 : i32
    return %arg0, %arg1 : i32, i32
  }
  func.func @transform_4(%arg0: i32, %arg1: i32, %arg2: i32) -> (i32, i32) {
    %c0_i32 = arith.constant 0 : i32
    return %arg0, %arg1 : i32, i32
  }
}

module attributes {stable_mosaic.version = 11 : i64} {
  func.func @_mm_bias_kernel(%arg0: i32, %arg1: i32, %arg2: i32, %arg3: memref<32x512xbf16, #tpu.memory_space<vmem>>, %arg4: memref<512x256xbf16, #tpu.memory_space<vmem>>, %arg5: memref<1x256xf32, #tpu.memory_space<vmem>>, %arg6: memref<32x256xbf16, #tpu.memory_space<vmem>>, %arg7: memref<32x256xf32, #tpu.memory_space<vmem>>) attributes {dimension_semantics = [#tpu.dimension_semantics<parallel>, #tpu.dimension_semantics<parallel>, #tpu.dimension_semantics<arbitrary>], iteration_bounds = array<i64: 1, 1, 1>, scalar_prefetch = 0 : i64, scratch_operands = 1 : i64, tpu.core_type = #tpu.core_type<tc>, window_params = [{transform_indices = @transform_0, window_bounds = array<i64: 32, 512>}, {transform_indices = @transform_1, window_bounds = array<i64: 512, 256>}, {transform_indices = @transform_2, window_bounds = array<i64: 1, 256>}, {transform_indices = @transform_3, window_bounds = array<i64: 32, 256>}]} {
    %c0_i32 = arith.constant 0 : i32
    %0 = arith.cmpi eq, %arg2, %c0_i32 : i32
    %1 = arith.extui %0 : i1 to i32
    %c0_i32_0 = arith.constant 0 : i32
    %2 = arith.cmpi ne, %1, %c0_i32_0 : i32
    scf.if %2 {
      %cst_10 = arith.constant 0.000000e+00 : f32
      %12 = vector.broadcast %cst_10 : f32 to vector<32x256xf32>
      %c0_11 = arith.constant 0 : index
      %c0_12 = arith.constant 0 : index
      %13 = vector.load %arg7[%c0_11, %c0_12] : memref<32x256xf32, #tpu.memory_space<vmem>>, vector<32x256xf32>
      tpu.vector_store %arg7[%c0_11, %c0_12], %12 {strides = array<i32>} : memref<32x256xf32, #tpu.memory_space<vmem>>, vector<32x256xf32>,
    } else {
    }
    %c0 = arith.constant 0 : index
    %c0_1 = arith.constant 0 : index
    %3 = vector.load %arg7[%c0, %c0_1] : memref<32x256xf32, #tpu.memory_space<vmem>>, vector<32x256xf32>
    %c0_2 = arith.constant 0 : index
    %c0_3 = arith.constant 0 : index
    %4 = vector.load %arg3[%c0_2, %c0_3] : memref<32x512xbf16, #tpu.memory_space<vmem>>, vector<32x512xbf16>
    %c0_4 = arith.constant 0 : index
    %c0_5 = arith.constant 0 : index
    %5 = vector.load %arg4[%c0_4, %c0_5] : memref<512x256xbf16, #tpu.memory_space<vmem>>, vector<512x256xbf16>
    %cst = arith.constant dense<0.000000e+00> : vector<32x256xf32>
    %6 = tpu.matmul %4, %5, %cst {dimension_numbers = #tpu.dot_dimension_numbers<[1], [0], [0], [1], [0, 0, 1, 1], [], []>} : vector<32x512xbf16>, vector<512x256xbf16>, vector<32x256xf32> -> vector<32x256xf32>
    %7 = arith.addf %3, %6 : vector<32x256xf32>
    %c0_6 = arith.constant 0 : index
    %c0_7 = arith.constant 0 : index
    %8 = vector.load %arg7[%c0_6, %c0_7] : memref<32x256xf32, #tpu.memory_space<vmem>>, vector<32x256xf32>
    tpu.vector_store %arg7[%c0_6, %c0_7], %7 {strides = array<i32>} : memref<32x256xf32, #tpu.memory_space<vmem>>, vector<32x256xf32>,
    %c0_i32_8 = arith.constant 0 : i32
    %9 = arith.cmpi eq, %arg2, %c0_i32_8 : i32
    %10 = arith.extui %9 : i1 to i32
    %c0_i32_9 = arith.constant 0 : i32
    %11 = arith.cmpi ne, %10, %c0_i32_9 : i32
    scf.if %11 {
      %c0_10 = arith.constant 0 : index
      %c0_11 = arith.constant 0 : index
      %12 = vector.load %arg7[%c0_10, %c0_11] : memref<32x256xf32, #tpu.memory_space<vmem>>, vector<32x256xf32>
      %c0_12 = arith.constant 0 : index
      %c0_13 = arith.constant 0 : index
      %13 = vector.load %arg5[%c0_12, %c0_13] : memref<1x256xf32, #tpu.memory_space<vmem>>, vector<1x256xf32>
      %14 = vector.broadcast %13 : vector<1x256xf32> to vector<32x256xf32>
      %15 = arith.addf %12, %14 : vector<32x256xf32>
      %cst_14 = arith.constant 0.000000e+00 : f32
      %16 = vector.broadcast %cst_14 : f32 to vector<32x256xf32>
      %17 = arith.maximumf %15, %16 : vector<32x256xf32>
      %18 = arith.truncf %17 : vector<32x256xf32> to vector<32x256xbf16>
      %c0_15 = arith.constant 0 : index
      %c0_16 = arith.constant 0 : index
      %19 = vector.load %arg6[%c0_15, %c0_16] : memref<32x256xbf16, #tpu.memory_space<vmem>>, vector<32x256xbf16>
      tpu.vector_store %arg6[%c0_15, %c0_16], %18 {strides = array<i32>} : memref<32x256xbf16, #tpu.memory_space<vmem>>, vector<32x256xbf16>,
    } else {
    }
    return
  }
  func.func @transform_0(%arg0: i32, %arg1: i32, %arg2: i32) -> (i32, i32) {
    %c0_i32 = arith.constant 0 : i32
    return %arg0, %arg2 : i32, i32
  }
  func.func @transform_1(%arg0: i32, %arg1: i32, %arg2: i32) -> (i32, i32) {
    %c0_i32 = arith.constant 0 : i32
    return %arg2, %arg1 : i32, i32
  }
  func.func @transform_2(%arg0: i32, %arg1: i32, %arg2: i32) -> (i32, i32) {
    %c0_i32 = arith.constant 0 : i32
    %c0_i32_0 = arith.constant 0 : i32
    return %c0_i32, %arg1 : i32, i32
  }
  func.func @transform_3(%arg0: i32, %arg1: i32, %arg2: i32) -> (i32, i32) {
    %c0_i32 = arith.constant 0 : i32
    return %arg0, %arg1 : i32, i32
  }
}

module attributes {stable_mosaic.version = 11 : i64} {
  func.func @_mm_bias_kernel(%arg0: i32, %arg1: i32, %arg2: i32, %arg3: memref<8x384xbf16, #tpu.memory_space<vmem>>, %arg4: memref<384x256xbf16, #tpu.memory_space<vmem>>, %arg5: memref<1x256xf32, #tpu.memory_space<vmem>>, %arg6: memref<8x256xbf16, #tpu.memory_space<vmem>>, %arg7: memref<8x256xf32, #tpu.memory_space<vmem>>) attributes {dimension_semantics = [#tpu.dimension_semantics<parallel>, #tpu.dimension_semantics<parallel>, #tpu.dimension_semantics<arbitrary>], iteration_bounds = array<i64: 1, 1, 6>, scalar_prefetch = 0 : i64, scratch_operands = 1 : i64, tpu.core_type = #tpu.core_type<tc>, window_params = [{transform_indices = @transform_0, window_bounds = array<i64: 8, 384>}, {transform_indices = @transform_1, window_bounds = array<i64: 384, 256>}, {transform_indices = @transform_2, window_bounds = array<i64: 1, 256>}, {transform_indices = @transform_3, window_bounds = array<i64: 8, 256>}]} {
    %c0_i32 = arith.constant 0 : i32
    %0 = arith.cmpi eq, %arg2, %c0_i32 : i32
    %1 = arith.extui %0 : i1 to i32
    %c0_i32_0 = arith.constant 0 : i32
    %2 = arith.cmpi ne, %1, %c0_i32_0 : i32
    scf.if %2 {
      %cst_9 = arith.constant 0.000000e+00 : f32
      %12 = vector.broadcast %cst_9 : f32 to vector<8x256xf32>
      %c0_10 = arith.constant 0 : index
      %c0_11 = arith.constant 0 : index
      %13 = vector.load %arg7[%c0_10, %c0_11] : memref<8x256xf32, #tpu.memory_space<vmem>>, vector<8x256xf32>
      tpu.vector_store %arg7[%c0_10, %c0_11], %12 {strides = array<i32>} : memref<8x256xf32, #tpu.memory_space<vmem>>, vector<8x256xf32>,
    } else {
    }
    %c0 = arith.constant 0 : index
    %c0_1 = arith.constant 0 : index
    %3 = vector.load %arg7[%c0, %c0_1] : memref<8x256xf32, #tpu.memory_space<vmem>>, vector<8x256xf32>
    %c0_2 = arith.constant 0 : index
    %c0_3 = arith.constant 0 : index
    %4 = vector.load %arg3[%c0_2, %c0_3] : memref<8x384xbf16, #tpu.memory_space<vmem>>, vector<8x384xbf16>
    %c0_4 = arith.constant 0 : index
    %c0_5 = arith.constant 0 : index
    %5 = vector.load %arg4[%c0_4, %c0_5] : memref<384x256xbf16, #tpu.memory_space<vmem>>, vector<384x256xbf16>
    %cst = arith.constant dense<0.000000e+00> : vector<8x256xf32>
    %6 = tpu.matmul %4, %5, %cst {dimension_numbers = #tpu.dot_dimension_numbers<[1], [0], [0], [1], [0, 0, 1, 1], [], []>} : vector<8x384xbf16>, vector<384x256xbf16>, vector<8x256xf32> -> vector<8x256xf32>
    %7 = arith.addf %3, %6 : vector<8x256xf32>
    %c0_6 = arith.constant 0 : index
    %c0_7 = arith.constant 0 : index
    %8 = vector.load %arg7[%c0_6, %c0_7] : memref<8x256xf32, #tpu.memory_space<vmem>>, vector<8x256xf32>
    tpu.vector_store %arg7[%c0_6, %c0_7], %7 {strides = array<i32>} : memref<8x256xf32, #tpu.memory_space<vmem>>, vector<8x256xf32>,
    %c5_i32 = arith.constant 5 : i32
    %9 = arith.cmpi eq, %arg2, %c5_i32 : i32
    %10 = arith.extui %9 : i1 to i32
    %c0_i32_8 = arith.constant 0 : i32
    %11 = arith.cmpi ne, %10, %c0_i32_8 : i32
    scf.if %11 {
      %c0_9 = arith.constant 0 : index
      %c0_10 = arith.constant 0 : index
      %12 = vector.load %arg7[%c0_9, %c0_10] : memref<8x256xf32, #tpu.memory_space<vmem>>, vector<8x256xf32>
      %c0_11 = arith.constant 0 : index
      %c0_12 = arith.constant 0 : index
      %13 = vector.load %arg5[%c0_11, %c0_12] : memref<1x256xf32, #tpu.memory_space<vmem>>, vector<1x256xf32>
      %14 = vector.broadcast %13 : vector<1x256xf32> to vector<8x256xf32>
      %15 = arith.addf %12, %14 : vector<8x256xf32>
      %cst_13 = arith.constant 0.000000e+00 : f32
      %16 = vector.broadcast %cst_13 : f32 to vector<8x256xf32>
      %17 = arith.maximumf %15, %16 : vector<8x256xf32>
      %18 = arith.truncf %17 : vector<8x256xf32> to vector<8x256xbf16>
      %c0_14 = arith.constant 0 : index
      %c0_15 = arith.constant 0 : index
      %19 = vector.load %arg6[%c0_14, %c0_15] : memref<8x256xbf16, #tpu.memory_space<vmem>>, vector<8x256xbf16>
      tpu.vector_store %arg6[%c0_14, %c0_15], %18 {strides = array<i32>} : memref<8x256xbf16, #tpu.memory_space<vmem>>, vector<8x256xbf16>,
    } else {
    }
    return
  }
  func.func @transform_0(%arg0: i32, %arg1: i32, %arg2: i32) -> (i32, i32) {
    %c0_i32 = arith.constant 0 : i32
    return %arg0, %arg2 : i32, i32
  }
  func.func @transform_1(%arg0: i32, %arg1: i32, %arg2: i32) -> (i32, i32) {
    %c0_i32 = arith.constant 0 : i32
    return %arg2, %arg1 : i32, i32
  }
  func.func @transform_2(%arg0: i32, %arg1: i32, %arg2: i32) -> (i32, i32) {
    %c0_i32 = arith.constant 0 : i32
    %c0_i32_0 = arith.constant 0 : i32
    return %c0_i32, %arg1 : i32, i32
  }
  func.func @transform_3(%arg0: i32, %arg1: i32, %arg2: i32) -> (i32, i32) {
    %c0_i32 = arith.constant 0 : i32
    return %arg0, %arg1 : i32, i32
  }
}

module attributes {stable_mosaic.version = 11 : i64} {
  func.func @_mm_bias_kernel(%arg0: i32, %arg1: i32, %arg2: i32, %arg3: memref<8x512xbf16, #tpu.memory_space<vmem>>, %arg4: memref<512x256xbf16, #tpu.memory_space<vmem>>, %arg5: memref<1x256xf32, #tpu.memory_space<vmem>>, %arg6: memref<8x256xbf16, #tpu.memory_space<vmem>>, %arg7: memref<8x256xf32, #tpu.memory_space<vmem>>) attributes {dimension_semantics = [#tpu.dimension_semantics<parallel>, #tpu.dimension_semantics<parallel>, #tpu.dimension_semantics<arbitrary>], iteration_bounds = array<i64: 1, 4, 1>, scalar_prefetch = 0 : i64, scratch_operands = 1 : i64, tpu.core_type = #tpu.core_type<tc>, window_params = [{transform_indices = @transform_0, window_bounds = array<i64: 8, 512>}, {transform_indices = @transform_1, window_bounds = array<i64: 512, 256>}, {transform_indices = @transform_2, window_bounds = array<i64: 1, 256>}, {transform_indices = @transform_3, window_bounds = array<i64: 8, 256>}]} {
    %c0_i32 = arith.constant 0 : i32
    %0 = arith.cmpi eq, %arg2, %c0_i32 : i32
    %1 = arith.extui %0 : i1 to i32
    %c0_i32_0 = arith.constant 0 : i32
    %2 = arith.cmpi ne, %1, %c0_i32_0 : i32
    scf.if %2 {
      %cst_10 = arith.constant 0.000000e+00 : f32
      %12 = vector.broadcast %cst_10 : f32 to vector<8x256xf32>
      %c0_11 = arith.constant 0 : index
      %c0_12 = arith.constant 0 : index
      %13 = vector.load %arg7[%c0_11, %c0_12] : memref<8x256xf32, #tpu.memory_space<vmem>>, vector<8x256xf32>
      tpu.vector_store %arg7[%c0_11, %c0_12], %12 {strides = array<i32>} : memref<8x256xf32, #tpu.memory_space<vmem>>, vector<8x256xf32>,
    } else {
    }
    %c0 = arith.constant 0 : index
    %c0_1 = arith.constant 0 : index
    %3 = vector.load %arg7[%c0, %c0_1] : memref<8x256xf32, #tpu.memory_space<vmem>>, vector<8x256xf32>
    %c0_2 = arith.constant 0 : index
    %c0_3 = arith.constant 0 : index
    %4 = vector.load %arg3[%c0_2, %c0_3] : memref<8x512xbf16, #tpu.memory_space<vmem>>, vector<8x512xbf16>
    %c0_4 = arith.constant 0 : index
    %c0_5 = arith.constant 0 : index
    %5 = vector.load %arg4[%c0_4, %c0_5] : memref<512x256xbf16, #tpu.memory_space<vmem>>, vector<512x256xbf16>
    %cst = arith.constant dense<0.000000e+00> : vector<8x256xf32>
    %6 = tpu.matmul %4, %5, %cst {dimension_numbers = #tpu.dot_dimension_numbers<[1], [0], [0], [1], [0, 0, 1, 1], [], []>} : vector<8x512xbf16>, vector<512x256xbf16>, vector<8x256xf32> -> vector<8x256xf32>
    %7 = arith.addf %3, %6 : vector<8x256xf32>
    %c0_6 = arith.constant 0 : index
    %c0_7 = arith.constant 0 : index
    %8 = vector.load %arg7[%c0_6, %c0_7] : memref<8x256xf32, #tpu.memory_space<vmem>>, vector<8x256xf32>
    tpu.vector_store %arg7[%c0_6, %c0_7], %7 {strides = array<i32>} : memref<8x256xf32, #tpu.memory_space<vmem>>, vector<8x256xf32>,
    %c0_i32_8 = arith.constant 0 : i32
    %9 = arith.cmpi eq, %arg2, %c0_i32_8 : i32
    %10 = arith.extui %9 : i1 to i32
    %c0_i32_9 = arith.constant 0 : i32
    %11 = arith.cmpi ne, %10, %c0_i32_9 : i32
    scf.if %11 {
      %c0_10 = arith.constant 0 : index
      %c0_11 = arith.constant 0 : index
      %12 = vector.load %arg7[%c0_10, %c0_11] : memref<8x256xf32, #tpu.memory_space<vmem>>, vector<8x256xf32>
      %c0_12 = arith.constant 0 : index
      %c0_13 = arith.constant 0 : index
      %13 = vector.load %arg5[%c0_12, %c0_13] : memref<1x256xf32, #tpu.memory_space<vmem>>, vector<1x256xf32>
      %14 = vector.broadcast %13 : vector<1x256xf32> to vector<8x256xf32>
      %15 = arith.addf %12, %14 : vector<8x256xf32>
      %16 = arith.truncf %15 : vector<8x256xf32> to vector<8x256xbf16>
      %c0_14 = arith.constant 0 : index
      %c0_15 = arith.constant 0 : index
      %17 = vector.load %arg6[%c0_14, %c0_15] : memref<8x256xbf16, #tpu.memory_space<vmem>>, vector<8x256xbf16>
      tpu.vector_store %arg6[%c0_14, %c0_15], %16 {strides = array<i32>} : memref<8x256xbf16, #tpu.memory_space<vmem>>, vector<8x256xbf16>,
    } else {
    }
    return
  }
  func.func @transform_0(%arg0: i32, %arg1: i32, %arg2: i32) -> (i32, i32) {
    %c0_i32 = arith.constant 0 : i32
    return %arg0, %arg2 : i32, i32
  }
  func.func @transform_1(%arg0: i32, %arg1: i32, %arg2: i32) -> (i32, i32) {
    %c0_i32 = arith.constant 0 : i32
    return %arg2, %arg1 : i32, i32
  }
  func.func @transform_2(%arg0: i32, %arg1: i32, %arg2: i32) -> (i32, i32) {
    %c0_i32 = arith.constant 0 : i32
    %c0_i32_0 = arith.constant 0 : i32
    return %c0_i32, %arg1 : i32, i32
  }
  func.func @transform_3(%arg0: i32, %arg1: i32, %arg2: i32) -> (i32, i32) {
    %c0_i32 = arith.constant 0 : i32
    return %arg0, %arg1 : i32, i32
  }
}

module attributes {stable_mosaic.version = 11 : i64} {
  func.func @_mm_bias_res_kernel(%arg0: i32, %arg1: i32, %arg2: i32, %arg3: memref<8x256xbf16, #tpu.memory_space<vmem>>, %arg4: memref<256x256xbf16, #tpu.memory_space<vmem>>, %arg5: memref<1x256xf32, #tpu.memory_space<vmem>>, %arg6: memref<8x256xbf16, #tpu.memory_space<vmem>>, %arg7: memref<8x256xbf16, #tpu.memory_space<vmem>>, %arg8: memref<8x256xf32, #tpu.memory_space<vmem>>) attributes {dimension_semantics = [#tpu.dimension_semantics<parallel>, #tpu.dimension_semantics<parallel>, #tpu.dimension_semantics<arbitrary>], iteration_bounds = array<i64: 1, 4, 1>, scalar_prefetch = 0 : i64, scratch_operands = 1 : i64, tpu.core_type = #tpu.core_type<tc>, window_params = [{transform_indices = @transform_0, window_bounds = array<i64: 8, 256>}, {transform_indices = @transform_1, window_bounds = array<i64: 256, 256>}, {transform_indices = @transform_2, window_bounds = array<i64: 1, 256>}, {transform_indices = @transform_3, window_bounds = array<i64: 8, 256>}, {transform_indices = @transform_4, window_bounds = array<i64: 8, 256>}]} {
    %c0_i32 = arith.constant 0 : i32
    %0 = arith.cmpi eq, %arg2, %c0_i32 : i32
    %1 = arith.extui %0 : i1 to i32
    %c0_i32_0 = arith.constant 0 : i32
    %2 = arith.cmpi ne, %1, %c0_i32_0 : i32
    scf.if %2 {
      %cst_10 = arith.constant 0.000000e+00 : f32
      %12 = vector.broadcast %cst_10 : f32 to vector<8x256xf32>
      %c0_11 = arith.constant 0 : index
      %c0_12 = arith.constant 0 : index
      %13 = vector.load %arg8[%c0_11, %c0_12] : memref<8x256xf32, #tpu.memory_space<vmem>>, vector<8x256xf32>
      tpu.vector_store %arg8[%c0_11, %c0_12], %12 {strides = array<i32>} : memref<8x256xf32, #tpu.memory_space<vmem>>, vector<8x256xf32>,
    } else {
    }
    %c0 = arith.constant 0 : index
    %c0_1 = arith.constant 0 : index
    %3 = vector.load %arg8[%c0, %c0_1] : memref<8x256xf32, #tpu.memory_space<vmem>>, vector<8x256xf32>
    %c0_2 = arith.constant 0 : index
    %c0_3 = arith.constant 0 : index
    %4 = vector.load %arg3[%c0_2, %c0_3] : memref<8x256xbf16, #tpu.memory_space<vmem>>, vector<8x256xbf16>
    %c0_4 = arith.constant 0 : index
    %c0_5 = arith.constant 0 : index
    %5 = vector.load %arg4[%c0_4, %c0_5] : memref<256x256xbf16, #tpu.memory_space<vmem>>, vector<256x256xbf16>
    %cst = arith.constant dense<0.000000e+00> : vector<8x256xf32>
    %6 = tpu.matmul %4, %5, %cst {dimension_numbers = #tpu.dot_dimension_numbers<[1], [0], [0], [1], [0, 0, 1, 1], [], []>} : vector<8x256xbf16>, vector<256x256xbf16>, vector<8x256xf32> -> vector<8x256xf32>
    %7 = arith.addf %3, %6 : vector<8x256xf32>
    %c0_6 = arith.constant 0 : index
    %c0_7 = arith.constant 0 : index
    %8 = vector.load %arg8[%c0_6, %c0_7] : memref<8x256xf32, #tpu.memory_space<vmem>>, vector<8x256xf32>
    tpu.vector_store %arg8[%c0_6, %c0_7], %7 {strides = array<i32>} : memref<8x256xf32, #tpu.memory_space<vmem>>, vector<8x256xf32>,
    %c0_i32_8 = arith.constant 0 : i32
    %9 = arith.cmpi eq, %arg2, %c0_i32_8 : i32
    %10 = arith.extui %9 : i1 to i32
    %c0_i32_9 = arith.constant 0 : i32
    %11 = arith.cmpi ne, %10, %c0_i32_9 : i32
    scf.if %11 {
      %c0_10 = arith.constant 0 : index
      %c0_11 = arith.constant 0 : index
      %12 = vector.load %arg8[%c0_10, %c0_11] : memref<8x256xf32, #tpu.memory_space<vmem>>, vector<8x256xf32>
      %c0_12 = arith.constant 0 : index
      %c0_13 = arith.constant 0 : index
      %13 = vector.load %arg5[%c0_12, %c0_13] : memref<1x256xf32, #tpu.memory_space<vmem>>, vector<1x256xf32>
      %14 = vector.broadcast %13 : vector<1x256xf32> to vector<8x256xf32>
      %15 = arith.addf %12, %14 : vector<8x256xf32>
      %c0_14 = arith.constant 0 : index
      %c0_15 = arith.constant 0 : index
      %16 = vector.load %arg6[%c0_14, %c0_15] : memref<8x256xbf16, #tpu.memory_space<vmem>>, vector<8x256xbf16>
      %17 = arith.extf %16 : vector<8x256xbf16> to vector<8x256xf32>
      %18 = arith.addf %15, %17 : vector<8x256xf32>
      %cst_16 = arith.constant 0.000000e+00 : f32
      %19 = vector.broadcast %cst_16 : f32 to vector<8x256xf32>
      %20 = arith.maximumf %18, %19 : vector<8x256xf32>
      %21 = arith.truncf %20 : vector<8x256xf32> to vector<8x256xbf16>
      %c0_17 = arith.constant 0 : index
      %c0_18 = arith.constant 0 : index
      %22 = vector.load %arg7[%c0_17, %c0_18] : memref<8x256xbf16, #tpu.memory_space<vmem>>, vector<8x256xbf16>
      tpu.vector_store %arg7[%c0_17, %c0_18], %21 {strides = array<i32>} : memref<8x256xbf16, #tpu.memory_space<vmem>>, vector<8x256xbf16>,
    } else {
    }
    return
  }
  func.func @transform_0(%arg0: i32, %arg1: i32, %arg2: i32) -> (i32, i32) {
    %c0_i32 = arith.constant 0 : i32
    return %arg0, %arg2 : i32, i32
  }
  func.func @transform_1(%arg0: i32, %arg1: i32, %arg2: i32) -> (i32, i32) {
    %c0_i32 = arith.constant 0 : i32
    return %arg2, %arg1 : i32, i32
  }
  func.func @transform_2(%arg0: i32, %arg1: i32, %arg2: i32) -> (i32, i32) {
    %c0_i32 = arith.constant 0 : i32
    %c0_i32_0 = arith.constant 0 : i32
    return %c0_i32, %arg1 : i32, i32
  }
  func.func @transform_3(%arg0: i32, %arg1: i32, %arg2: i32) -> (i32, i32) {
    %c0_i32 = arith.constant 0 : i32
    return %arg0, %arg1 : i32, i32
  }
  func.func @transform_4(%arg0: i32, %arg1: i32, %arg2: i32) -> (i32, i32) {
    %c0_i32 = arith.constant 0 : i32
    return %arg0, %arg1 : i32, i32
  }
}

module attributes {stable_mosaic.version = 11 : i64} {
  func.func @_mm_bias_kernel(%arg0: i32, %arg1: i32, %arg2: i32, %arg3: memref<8x512xbf16, #tpu.memory_space<vmem>>, %arg4: memref<512x256xbf16, #tpu.memory_space<vmem>>, %arg5: memref<1x256xf32, #tpu.memory_space<vmem>>, %arg6: memref<8x256xbf16, #tpu.memory_space<vmem>>, %arg7: memref<8x256xf32, #tpu.memory_space<vmem>>) attributes {dimension_semantics = [#tpu.dimension_semantics<parallel>, #tpu.dimension_semantics<parallel>, #tpu.dimension_semantics<arbitrary>], iteration_bounds = array<i64: 1, 2, 2>, scalar_prefetch = 0 : i64, scratch_operands = 1 : i64, tpu.core_type = #tpu.core_type<tc>, window_params = [{transform_indices = @transform_0, window_bounds = array<i64: 8, 512>}, {transform_indices = @transform_1, window_bounds = array<i64: 512, 256>}, {transform_indices = @transform_2, window_bounds = array<i64: 1, 256>}, {transform_indices = @transform_3, window_bounds = array<i64: 8, 256>}]} {
    %c0_i32 = arith.constant 0 : i32
    %0 = arith.cmpi eq, %arg2, %c0_i32 : i32
    %1 = arith.extui %0 : i1 to i32
    %c0_i32_0 = arith.constant 0 : i32
    %2 = arith.cmpi ne, %1, %c0_i32_0 : i32
    scf.if %2 {
      %cst_9 = arith.constant 0.000000e+00 : f32
      %12 = vector.broadcast %cst_9 : f32 to vector<8x256xf32>
      %c0_10 = arith.constant 0 : index
      %c0_11 = arith.constant 0 : index
      %13 = vector.load %arg7[%c0_10, %c0_11] : memref<8x256xf32, #tpu.memory_space<vmem>>, vector<8x256xf32>
      tpu.vector_store %arg7[%c0_10, %c0_11], %12 {strides = array<i32>} : memref<8x256xf32, #tpu.memory_space<vmem>>, vector<8x256xf32>,
    } else {
    }
    %c0 = arith.constant 0 : index
    %c0_1 = arith.constant 0 : index
    %3 = vector.load %arg7[%c0, %c0_1] : memref<8x256xf32, #tpu.memory_space<vmem>>, vector<8x256xf32>
    %c0_2 = arith.constant 0 : index
    %c0_3 = arith.constant 0 : index
    %4 = vector.load %arg3[%c0_2, %c0_3] : memref<8x512xbf16, #tpu.memory_space<vmem>>, vector<8x512xbf16>
    %c0_4 = arith.constant 0 : index
    %c0_5 = arith.constant 0 : index
    %5 = vector.load %arg4[%c0_4, %c0_5] : memref<512x256xbf16, #tpu.memory_space<vmem>>, vector<512x256xbf16>
    %cst = arith.constant dense<0.000000e+00> : vector<8x256xf32>
    %6 = tpu.matmul %4, %5, %cst {dimension_numbers = #tpu.dot_dimension_numbers<[1], [0], [0], [1], [0, 0, 1, 1], [], []>} : vector<8x512xbf16>, vector<512x256xbf16>, vector<8x256xf32> -> vector<8x256xf32>
    %7 = arith.addf %3, %6 : vector<8x256xf32>
    %c0_6 = arith.constant 0 : index
    %c0_7 = arith.constant 0 : index
    %8 = vector.load %arg7[%c0_6, %c0_7] : memref<8x256xf32, #tpu.memory_space<vmem>>, vector<8x256xf32>
    tpu.vector_store %arg7[%c0_6, %c0_7], %7 {strides = array<i32>} : memref<8x256xf32, #tpu.memory_space<vmem>>, vector<8x256xf32>,
    %c1_i32 = arith.constant 1 : i32
    %9 = arith.cmpi eq, %arg2, %c1_i32 : i32
    %10 = arith.extui %9 : i1 to i32
    %c0_i32_8 = arith.constant 0 : i32
    %11 = arith.cmpi ne, %10, %c0_i32_8 : i32
    scf.if %11 {
      %c0_9 = arith.constant 0 : index
      %c0_10 = arith.constant 0 : index
      %12 = vector.load %arg7[%c0_9, %c0_10] : memref<8x256xf32, #tpu.memory_space<vmem>>, vector<8x256xf32>
      %c0_11 = arith.constant 0 : index
      %c0_12 = arith.constant 0 : index
      %13 = vector.load %arg5[%c0_11, %c0_12] : memref<1x256xf32, #tpu.memory_space<vmem>>, vector<1x256xf32>
      %14 = vector.broadcast %13 : vector<1x256xf32> to vector<8x256xf32>
      %15 = arith.addf %12, %14 : vector<8x256xf32>
      %cst_13 = arith.constant 0.000000e+00 : f32
      %16 = vector.broadcast %cst_13 : f32 to vector<8x256xf32>
      %17 = arith.maximumf %15, %16 : vector<8x256xf32>
      %18 = arith.truncf %17 : vector<8x256xf32> to vector<8x256xbf16>
      %c0_14 = arith.constant 0 : index
      %c0_15 = arith.constant 0 : index
      %19 = vector.load %arg6[%c0_14, %c0_15] : memref<8x256xbf16, #tpu.memory_space<vmem>>, vector<8x256xbf16>
      tpu.vector_store %arg6[%c0_14, %c0_15], %18 {strides = array<i32>} : memref<8x256xbf16, #tpu.memory_space<vmem>>, vector<8x256xbf16>,
    } else {
    }
    return
  }
  func.func @transform_0(%arg0: i32, %arg1: i32, %arg2: i32) -> (i32, i32) {
    %c0_i32 = arith.constant 0 : i32
    return %arg0, %arg2 : i32, i32
  }
  func.func @transform_1(%arg0: i32, %arg1: i32, %arg2: i32) -> (i32, i32) {
    %c0_i32 = arith.constant 0 : i32
    return %arg2, %arg1 : i32, i32
  }
  func.func @transform_2(%arg0: i32, %arg1: i32, %arg2: i32) -> (i32, i32) {
    %c0_i32 = arith.constant 0 : i32
    %c0_i32_0 = arith.constant 0 : i32
    return %c0_i32, %arg1 : i32, i32
  }
  func.func @transform_3(%arg0: i32, %arg1: i32, %arg2: i32) -> (i32, i32) {
    %c0_i32 = arith.constant 0 : i32
    return %arg0, %arg1 : i32, i32
  }
}

module attributes {stable_mosaic.version = 11 : i64} {
  func.func @_mm_bias_kernel(%arg0: i32, %arg1: i32, %arg2: i32, %arg3: memref<8x512xbf16, #tpu.memory_space<vmem>>, %arg4: memref<512x256xbf16, #tpu.memory_space<vmem>>, %arg5: memref<1x256xf32, #tpu.memory_space<vmem>>, %arg6: memref<8x256xbf16, #tpu.memory_space<vmem>>, %arg7: memref<8x256xf32, #tpu.memory_space<vmem>>) attributes {dimension_semantics = [#tpu.dimension_semantics<parallel>, #tpu.dimension_semantics<parallel>, #tpu.dimension_semantics<arbitrary>], iteration_bounds = array<i64: 1, 2, 9>, scalar_prefetch = 0 : i64, scratch_operands = 1 : i64, tpu.core_type = #tpu.core_type<tc>, window_params = [{transform_indices = @transform_0, window_bounds = array<i64: 8, 512>}, {transform_indices = @transform_1, window_bounds = array<i64: 512, 256>}, {transform_indices = @transform_2, window_bounds = array<i64: 1, 256>}, {transform_indices = @transform_3, window_bounds = array<i64: 8, 256>}]} {
    %c0_i32 = arith.constant 0 : i32
    %0 = arith.cmpi eq, %arg2, %c0_i32 : i32
    %1 = arith.extui %0 : i1 to i32
    %c0_i32_0 = arith.constant 0 : i32
    %2 = arith.cmpi ne, %1, %c0_i32_0 : i32
    scf.if %2 {
      %cst_9 = arith.constant 0.000000e+00 : f32
      %12 = vector.broadcast %cst_9 : f32 to vector<8x256xf32>
      %c0_10 = arith.constant 0 : index
      %c0_11 = arith.constant 0 : index
      %13 = vector.load %arg7[%c0_10, %c0_11] : memref<8x256xf32, #tpu.memory_space<vmem>>, vector<8x256xf32>
      tpu.vector_store %arg7[%c0_10, %c0_11], %12 {strides = array<i32>} : memref<8x256xf32, #tpu.memory_space<vmem>>, vector<8x256xf32>,
    } else {
    }
    %c0 = arith.constant 0 : index
    %c0_1 = arith.constant 0 : index
    %3 = vector.load %arg7[%c0, %c0_1] : memref<8x256xf32, #tpu.memory_space<vmem>>, vector<8x256xf32>
    %c0_2 = arith.constant 0 : index
    %c0_3 = arith.constant 0 : index
    %4 = vector.load %arg3[%c0_2, %c0_3] : memref<8x512xbf16, #tpu.memory_space<vmem>>, vector<8x512xbf16>
    %c0_4 = arith.constant 0 : index
    %c0_5 = arith.constant 0 : index
    %5 = vector.load %arg4[%c0_4, %c0_5] : memref<512x256xbf16, #tpu.memory_space<vmem>>, vector<512x256xbf16>
    %cst = arith.constant dense<0.000000e+00> : vector<8x256xf32>
    %6 = tpu.matmul %4, %5, %cst {dimension_numbers = #tpu.dot_dimension_numbers<[1], [0], [0], [1], [0, 0, 1, 1], [], []>} : vector<8x512xbf16>, vector<512x256xbf16>, vector<8x256xf32> -> vector<8x256xf32>
    %7 = arith.addf %3, %6 : vector<8x256xf32>
    %c0_6 = arith.constant 0 : index
    %c0_7 = arith.constant 0 : index
    %8 = vector.load %arg7[%c0_6, %c0_7] : memref<8x256xf32, #tpu.memory_space<vmem>>, vector<8x256xf32>
    tpu.vector_store %arg7[%c0_6, %c0_7], %7 {strides = array<i32>} : memref<8x256xf32, #tpu.memory_space<vmem>>, vector<8x256xf32>,
    %c8_i32 = arith.constant 8 : i32
    %9 = arith.cmpi eq, %arg2, %c8_i32 : i32
    %10 = arith.extui %9 : i1 to i32
    %c0_i32_8 = arith.constant 0 : i32
    %11 = arith.cmpi ne, %10, %c0_i32_8 : i32
    scf.if %11 {
      %c0_9 = arith.constant 0 : index
      %c0_10 = arith.constant 0 : index
      %12 = vector.load %arg7[%c0_9, %c0_10] : memref<8x256xf32, #tpu.memory_space<vmem>>, vector<8x256xf32>
      %c0_11 = arith.constant 0 : index
      %c0_12 = arith.constant 0 : index
      %13 = vector.load %arg5[%c0_11, %c0_12] : memref<1x256xf32, #tpu.memory_space<vmem>>, vector<1x256xf32>
      %14 = vector.broadcast %13 : vector<1x256xf32> to vector<8x256xf32>
      %15 = arith.addf %12, %14 : vector<8x256xf32>
      %cst_13 = arith.constant 0.000000e+00 : f32
      %16 = vector.broadcast %cst_13 : f32 to vector<8x256xf32>
      %17 = arith.maximumf %15, %16 : vector<8x256xf32>
      %18 = arith.truncf %17 : vector<8x256xf32> to vector<8x256xbf16>
      %c0_14 = arith.constant 0 : index
      %c0_15 = arith.constant 0 : index
      %19 = vector.load %arg6[%c0_14, %c0_15] : memref<8x256xbf16, #tpu.memory_space<vmem>>, vector<8x256xbf16>
      tpu.vector_store %arg6[%c0_14, %c0_15], %18 {strides = array<i32>} : memref<8x256xbf16, #tpu.memory_space<vmem>>, vector<8x256xbf16>,
    } else {
    }
    return
  }
  func.func @transform_0(%arg0: i32, %arg1: i32, %arg2: i32) -> (i32, i32) {
    %c0_i32 = arith.constant 0 : i32
    return %arg0, %arg2 : i32, i32
  }
  func.func @transform_1(%arg0: i32, %arg1: i32, %arg2: i32) -> (i32, i32) {
    %c0_i32 = arith.constant 0 : i32
    return %arg2, %arg1 : i32, i32
  }
  func.func @transform_2(%arg0: i32, %arg1: i32, %arg2: i32) -> (i32, i32) {
    %c0_i32 = arith.constant 0 : i32
    %c0_i32_0 = arith.constant 0 : i32
    return %c0_i32, %arg1 : i32, i32
  }
  func.func @transform_3(%arg0: i32, %arg1: i32, %arg2: i32) -> (i32, i32) {
    %c0_i32 = arith.constant 0 : i32
    return %arg0, %arg1 : i32, i32
  }
}

module attributes {stable_mosaic.version = 11 : i64} {
  func.func @_mm_bias_kernel(%arg0: i32, %arg1: i32, %arg2: i32, %arg3: memref<8x512xbf16, #tpu.memory_space<vmem>>, %arg4: memref<512x256xbf16, #tpu.memory_space<vmem>>, %arg5: memref<1x256xf32, #tpu.memory_space<vmem>>, %arg6: memref<8x256xbf16, #tpu.memory_space<vmem>>, %arg7: memref<8x256xf32, #tpu.memory_space<vmem>>) attributes {dimension_semantics = [#tpu.dimension_semantics<parallel>, #tpu.dimension_semantics<parallel>, #tpu.dimension_semantics<arbitrary>], iteration_bounds = array<i64: 1, 8, 2>, scalar_prefetch = 0 : i64, scratch_operands = 1 : i64, tpu.core_type = #tpu.core_type<tc>, window_params = [{transform_indices = @transform_0, window_bounds = array<i64: 8, 512>}, {transform_indices = @transform_1, window_bounds = array<i64: 512, 256>}, {transform_indices = @transform_2, window_bounds = array<i64: 1, 256>}, {transform_indices = @transform_3, window_bounds = array<i64: 8, 256>}]} {
    %c0_i32 = arith.constant 0 : i32
    %0 = arith.cmpi eq, %arg2, %c0_i32 : i32
    %1 = arith.extui %0 : i1 to i32
    %c0_i32_0 = arith.constant 0 : i32
    %2 = arith.cmpi ne, %1, %c0_i32_0 : i32
    scf.if %2 {
      %cst_9 = arith.constant 0.000000e+00 : f32
      %12 = vector.broadcast %cst_9 : f32 to vector<8x256xf32>
      %c0_10 = arith.constant 0 : index
      %c0_11 = arith.constant 0 : index
      %13 = vector.load %arg7[%c0_10, %c0_11] : memref<8x256xf32, #tpu.memory_space<vmem>>, vector<8x256xf32>
      tpu.vector_store %arg7[%c0_10, %c0_11], %12 {strides = array<i32>} : memref<8x256xf32, #tpu.memory_space<vmem>>, vector<8x256xf32>,
    } else {
    }
    %c0 = arith.constant 0 : index
    %c0_1 = arith.constant 0 : index
    %3 = vector.load %arg7[%c0, %c0_1] : memref<8x256xf32, #tpu.memory_space<vmem>>, vector<8x256xf32>
    %c0_2 = arith.constant 0 : index
    %c0_3 = arith.constant 0 : index
    %4 = vector.load %arg3[%c0_2, %c0_3] : memref<8x512xbf16, #tpu.memory_space<vmem>>, vector<8x512xbf16>
    %c0_4 = arith.constant 0 : index
    %c0_5 = arith.constant 0 : index
    %5 = vector.load %arg4[%c0_4, %c0_5] : memref<512x256xbf16, #tpu.memory_space<vmem>>, vector<512x256xbf16>
    %cst = arith.constant dense<0.000000e+00> : vector<8x256xf32>
    %6 = tpu.matmul %4, %5, %cst {dimension_numbers = #tpu.dot_dimension_numbers<[1], [0], [0], [1], [0, 0, 1, 1], [], []>} : vector<8x512xbf16>, vector<512x256xbf16>, vector<8x256xf32> -> vector<8x256xf32>
    %7 = arith.addf %3, %6 : vector<8x256xf32>
    %c0_6 = arith.constant 0 : index
    %c0_7 = arith.constant 0 : index
    %8 = vector.load %arg7[%c0_6, %c0_7] : memref<8x256xf32, #tpu.memory_space<vmem>>, vector<8x256xf32>
    tpu.vector_store %arg7[%c0_6, %c0_7], %7 {strides = array<i32>} : memref<8x256xf32, #tpu.memory_space<vmem>>, vector<8x256xf32>,
    %c1_i32 = arith.constant 1 : i32
    %9 = arith.cmpi eq, %arg2, %c1_i32 : i32
    %10 = arith.extui %9 : i1 to i32
    %c0_i32_8 = arith.constant 0 : i32
    %11 = arith.cmpi ne, %10, %c0_i32_8 : i32
    scf.if %11 {
      %c0_9 = arith.constant 0 : index
      %c0_10 = arith.constant 0 : index
      %12 = vector.load %arg7[%c0_9, %c0_10] : memref<8x256xf32, #tpu.memory_space<vmem>>, vector<8x256xf32>
      %c0_11 = arith.constant 0 : index
      %c0_12 = arith.constant 0 : index
      %13 = vector.load %arg5[%c0_11, %c0_12] : memref<1x256xf32, #tpu.memory_space<vmem>>, vector<1x256xf32>
      %14 = vector.broadcast %13 : vector<1x256xf32> to vector<8x256xf32>
      %15 = arith.addf %12, %14 : vector<8x256xf32>
      %16 = arith.truncf %15 : vector<8x256xf32> to vector<8x256xbf16>
      %c0_13 = arith.constant 0 : index
      %c0_14 = arith.constant 0 : index
      %17 = vector.load %arg6[%c0_13, %c0_14] : memref<8x256xbf16, #tpu.memory_space<vmem>>, vector<8x256xbf16>
      tpu.vector_store %arg6[%c0_13, %c0_14], %16 {strides = array<i32>} : memref<8x256xbf16, #tpu.memory_space<vmem>>, vector<8x256xbf16>,
    } else {
    }
    return
  }
  func.func @transform_0(%arg0: i32, %arg1: i32, %arg2: i32) -> (i32, i32) {
    %c0_i32 = arith.constant 0 : i32
    return %arg0, %arg2 : i32, i32
  }
  func.func @transform_1(%arg0: i32, %arg1: i32, %arg2: i32) -> (i32, i32) {
    %c0_i32 = arith.constant 0 : i32
    return %arg2, %arg1 : i32, i32
  }
  func.func @transform_2(%arg0: i32, %arg1: i32, %arg2: i32) -> (i32, i32) {
    %c0_i32 = arith.constant 0 : i32
    %c0_i32_0 = arith.constant 0 : i32
    return %c0_i32, %arg1 : i32, i32
  }
  func.func @transform_3(%arg0: i32, %arg1: i32, %arg2: i32) -> (i32, i32) {
    %c0_i32 = arith.constant 0 : i32
    return %arg0, %arg1 : i32, i32
  }
}

module attributes {stable_mosaic.version = 11 : i64} {
  func.func @_mm_bias_res_kernel(%arg0: i32, %arg1: i32, %arg2: i32, %arg3: memref<8x512xbf16, #tpu.memory_space<vmem>>, %arg4: memref<512x256xbf16, #tpu.memory_space<vmem>>, %arg5: memref<1x256xf32, #tpu.memory_space<vmem>>, %arg6: memref<8x256xbf16, #tpu.memory_space<vmem>>, %arg7: memref<8x256xbf16, #tpu.memory_space<vmem>>, %arg8: memref<8x256xf32, #tpu.memory_space<vmem>>) attributes {dimension_semantics = [#tpu.dimension_semantics<parallel>, #tpu.dimension_semantics<parallel>, #tpu.dimension_semantics<arbitrary>], iteration_bounds = array<i64: 1, 8, 1>, scalar_prefetch = 0 : i64, scratch_operands = 1 : i64, tpu.core_type = #tpu.core_type<tc>, window_params = [{transform_indices = @transform_0, window_bounds = array<i64: 8, 512>}, {transform_indices = @transform_1, window_bounds = array<i64: 512, 256>}, {transform_indices = @transform_2, window_bounds = array<i64: 1, 256>}, {transform_indices = @transform_3, window_bounds = array<i64: 8, 256>}, {transform_indices = @transform_4, window_bounds = array<i64: 8, 256>}]} {
    %c0_i32 = arith.constant 0 : i32
    %0 = arith.cmpi eq, %arg2, %c0_i32 : i32
    %1 = arith.extui %0 : i1 to i32
    %c0_i32_0 = arith.constant 0 : i32
    %2 = arith.cmpi ne, %1, %c0_i32_0 : i32
    scf.if %2 {
      %cst_10 = arith.constant 0.000000e+00 : f32
      %12 = vector.broadcast %cst_10 : f32 to vector<8x256xf32>
      %c0_11 = arith.constant 0 : index
      %c0_12 = arith.constant 0 : index
      %13 = vector.load %arg8[%c0_11, %c0_12] : memref<8x256xf32, #tpu.memory_space<vmem>>, vector<8x256xf32>
      tpu.vector_store %arg8[%c0_11, %c0_12], %12 {strides = array<i32>} : memref<8x256xf32, #tpu.memory_space<vmem>>, vector<8x256xf32>,
    } else {
    }
    %c0 = arith.constant 0 : index
    %c0_1 = arith.constant 0 : index
    %3 = vector.load %arg8[%c0, %c0_1] : memref<8x256xf32, #tpu.memory_space<vmem>>, vector<8x256xf32>
    %c0_2 = arith.constant 0 : index
    %c0_3 = arith.constant 0 : index
    %4 = vector.load %arg3[%c0_2, %c0_3] : memref<8x512xbf16, #tpu.memory_space<vmem>>, vector<8x512xbf16>
    %c0_4 = arith.constant 0 : index
    %c0_5 = arith.constant 0 : index
    %5 = vector.load %arg4[%c0_4, %c0_5] : memref<512x256xbf16, #tpu.memory_space<vmem>>, vector<512x256xbf16>
    %cst = arith.constant dense<0.000000e+00> : vector<8x256xf32>
    %6 = tpu.matmul %4, %5, %cst {dimension_numbers = #tpu.dot_dimension_numbers<[1], [0], [0], [1], [0, 0, 1, 1], [], []>} : vector<8x512xbf16>, vector<512x256xbf16>, vector<8x256xf32> -> vector<8x256xf32>
    %7 = arith.addf %3, %6 : vector<8x256xf32>
    %c0_6 = arith.constant 0 : index
    %c0_7 = arith.constant 0 : index
    %8 = vector.load %arg8[%c0_6, %c0_7] : memref<8x256xf32, #tpu.memory_space<vmem>>, vector<8x256xf32>
    tpu.vector_store %arg8[%c0_6, %c0_7], %7 {strides = array<i32>} : memref<8x256xf32, #tpu.memory_space<vmem>>, vector<8x256xf32>,
    %c0_i32_8 = arith.constant 0 : i32
    %9 = arith.cmpi eq, %arg2, %c0_i32_8 : i32
    %10 = arith.extui %9 : i1 to i32
    %c0_i32_9 = arith.constant 0 : i32
    %11 = arith.cmpi ne, %10, %c0_i32_9 : i32
    scf.if %11 {
      %c0_10 = arith.constant 0 : index
      %c0_11 = arith.constant 0 : index
      %12 = vector.load %arg8[%c0_10, %c0_11] : memref<8x256xf32, #tpu.memory_space<vmem>>, vector<8x256xf32>
      %c0_12 = arith.constant 0 : index
      %c0_13 = arith.constant 0 : index
      %13 = vector.load %arg5[%c0_12, %c0_13] : memref<1x256xf32, #tpu.memory_space<vmem>>, vector<1x256xf32>
      %14 = vector.broadcast %13 : vector<1x256xf32> to vector<8x256xf32>
      %15 = arith.addf %12, %14 : vector<8x256xf32>
      %c0_14 = arith.constant 0 : index
      %c0_15 = arith.constant 0 : index
      %16 = vector.load %arg6[%c0_14, %c0_15] : memref<8x256xbf16, #tpu.memory_space<vmem>>, vector<8x256xbf16>
      %17 = arith.extf %16 : vector<8x256xbf16> to vector<8x256xf32>
      %18 = arith.addf %15, %17 : vector<8x256xf32>
      %cst_16 = arith.constant 0.000000e+00 : f32
      %19 = vector.broadcast %cst_16 : f32 to vector<8x256xf32>
      %20 = arith.maximumf %18, %19 : vector<8x256xf32>
      %21 = arith.truncf %20 : vector<8x256xf32> to vector<8x256xbf16>
      %c0_17 = arith.constant 0 : index
      %c0_18 = arith.constant 0 : index
      %22 = vector.load %arg7[%c0_17, %c0_18] : memref<8x256xbf16, #tpu.memory_space<vmem>>, vector<8x256xbf16>
      tpu.vector_store %arg7[%c0_17, %c0_18], %21 {strides = array<i32>} : memref<8x256xbf16, #tpu.memory_space<vmem>>, vector<8x256xbf16>,
    } else {
    }
    return
  }
  func.func @transform_0(%arg0: i32, %arg1: i32, %arg2: i32) -> (i32, i32) {
    %c0_i32 = arith.constant 0 : i32
    return %arg0, %arg2 : i32, i32
  }
  func.func @transform_1(%arg0: i32, %arg1: i32, %arg2: i32) -> (i32, i32) {
    %c0_i32 = arith.constant 0 : i32
    return %arg2, %arg1 : i32, i32
  }
  func.func @transform_2(%arg0: i32, %arg1: i32, %arg2: i32) -> (i32, i32) {
    %c0_i32 = arith.constant 0 : i32
    %c0_i32_0 = arith.constant 0 : i32
    return %c0_i32, %arg1 : i32, i32
  }
  func.func @transform_3(%arg0: i32, %arg1: i32, %arg2: i32) -> (i32, i32) {
    %c0_i32 = arith.constant 0 : i32
    return %arg0, %arg1 : i32, i32
  }
  func.func @transform_4(%arg0: i32, %arg1: i32, %arg2: i32) -> (i32, i32) {
    %c0_i32 = arith.constant 0 : i32
    return %arg0, %arg1 : i32, i32
  }
}

module attributes {stable_mosaic.version = 11 : i64} {
  func.func @_gap_kernel(%arg0: memref<2x1x2048xbf16, #tpu.memory_space<vmem>>, %arg1: memref<2x2048xf32, #tpu.memory_space<vmem>>) attributes {dimension_semantics = [], scalar_prefetch = 0 : i64, scratch_operands = 0 : i64, tpu.core_type = #tpu.core_type<tc>} {
    %c0 = arith.constant 0 : index
    %c0_0 = arith.constant 0 : index
    %c0_1 = arith.constant 0 : index
    %0 = vector.load %arg0[%c0, %c0_0, %c0_1] : memref<2x1x2048xbf16, #tpu.memory_space<vmem>>, vector<2x1x2048xbf16>
    %1 = arith.extf %0 : vector<2x1x2048xbf16> to vector<2x1x2048xf32>
    %cst = arith.constant dense<0.000000e+00> : vector<2x2048xf32>
    %2 = vector.multi_reduction <add>, %1, %cst [1] : vector<2x1x2048xf32> to vector<2x2048xf32>
    %cst_2 = arith.constant 1.000000e+00 : f32
    %3 = vector.broadcast %cst_2 : f32 to vector<2x2048xf32>
    %4 = arith.divf %2, %3 : vector<2x2048xf32>
    %c0_3 = arith.constant 0 : index
    %c0_4 = arith.constant 0 : index
    %5 = vector.load %arg1[%c0_3, %c0_4] : memref<2x2048xf32, #tpu.memory_space<vmem>>, vector<2x2048xf32>
    tpu.vector_store %arg1[%c0_3, %c0_4], %4 {strides = array<i32>} : memref<2x2048xf32, #tpu.memory_space<vmem>>, vector<2x2048xf32>,
    return
  }
}

module attributes {stable_mosaic.version = 11 : i64} {
  func.func @_mm_bias_kernel(%arg0: i32, %arg1: i32, %arg2: i32, %arg3: memref<8x512xbf16, #tpu.memory_space<vmem>>, %arg4: memref<512x128xbf16, #tpu.memory_space<vmem>>, %arg5: memref<1x128xf32, #tpu.memory_space<vmem>>, %arg6: memref<8x128xf32, #tpu.memory_space<vmem>>, %arg7: memref<8x128xf32, #tpu.memory_space<vmem>>) attributes {dimension_semantics = [#tpu.dimension_semantics<parallel>, #tpu.dimension_semantics<parallel>, #tpu.dimension_semantics<arbitrary>], iteration_bounds = array<i64: 1, 1, 4>, scalar_prefetch = 0 : i64, scratch_operands = 1 : i64, tpu.core_type = #tpu.core_type<tc>, window_params = [{transform_indices = @transform_0, window_bounds = array<i64: 8, 512>}, {transform_indices = @transform_1, window_bounds = array<i64: 512, 128>}, {transform_indices = @transform_2, window_bounds = array<i64: 1, 128>}, {transform_indices = @transform_3, window_bounds = array<i64: 8, 128>}]} {
    %c0_i32 = arith.constant 0 : i32
    %0 = arith.cmpi eq, %arg2, %c0_i32 : i32
    %1 = arith.extui %0 : i1 to i32
    %c0_i32_0 = arith.constant 0 : i32
    %2 = arith.cmpi ne, %1, %c0_i32_0 : i32
    scf.if %2 {
      %cst_9 = arith.constant 0.000000e+00 : f32
      %12 = vector.broadcast %cst_9 : f32 to vector<8x128xf32>
      %c0_10 = arith.constant 0 : index
      %c0_11 = arith.constant 0 : index
      %13 = vector.load %arg7[%c0_10, %c0_11] : memref<8x128xf32, #tpu.memory_space<vmem>>, vector<8x128xf32>
      tpu.vector_store %arg7[%c0_10, %c0_11], %12 {strides = array<i32>} : memref<8x128xf32, #tpu.memory_space<vmem>>, vector<8x128xf32>,
    } else {
    }
    %c0 = arith.constant 0 : index
    %c0_1 = arith.constant 0 : index
    %3 = vector.load %arg7[%c0, %c0_1] : memref<8x128xf32, #tpu.memory_space<vmem>>, vector<8x128xf32>
    %c0_2 = arith.constant 0 : index
    %c0_3 = arith.constant 0 : index
    %4 = vector.load %arg3[%c0_2, %c0_3] : memref<8x512xbf16, #tpu.memory_space<vmem>>, vector<8x512xbf16>
    %c0_4 = arith.constant 0 : index
    %c0_5 = arith.constant 0 : index
    %5 = vector.load %arg4[%c0_4, %c0_5] : memref<512x128xbf16, #tpu.memory_space<vmem>>, vector<512x128xbf16>
    %cst = arith.constant dense<0.000000e+00> : vector<8x128xf32>
    %6 = tpu.matmul %4, %5, %cst {dimension_numbers = #tpu.dot_dimension_numbers<[1], [0], [0], [1], [0, 0, 1, 1], [], []>} : vector<8x512xbf16>, vector<512x128xbf16>, vector<8x128xf32> -> vector<8x128xf32>
    %7 = arith.addf %3, %6 : vector<8x128xf32>
    %c0_6 = arith.constant 0 : index
    %c0_7 = arith.constant 0 : index
    %8 = vector.load %arg7[%c0_6, %c0_7] : memref<8x128xf32, #tpu.memory_space<vmem>>, vector<8x128xf32>
    tpu.vector_store %arg7[%c0_6, %c0_7], %7 {strides = array<i32>} : memref<8x128xf32, #tpu.memory_space<vmem>>, vector<8x128xf32>,
    %c3_i32 = arith.constant 3 : i32
    %9 = arith.cmpi eq, %arg2, %c3_i32 : i32
    %10 = arith.extui %9 : i1 to i32
    %c0_i32_8 = arith.constant 0 : i32
    %11 = arith.cmpi ne, %10, %c0_i32_8 : i32
    scf.if %11 {
      %c0_9 = arith.constant 0 : index
      %c0_10 = arith.constant 0 : index
      %12 = vector.load %arg7[%c0_9, %c0_10] : memref<8x128xf32, #tpu.memory_space<vmem>>, vector<8x128xf32>
      %c0_11 = arith.constant 0 : index
      %c0_12 = arith.constant 0 : index
      %13 = vector.load %arg5[%c0_11, %c0_12] : memref<1x128xf32, #tpu.memory_space<vmem>>, vector<1x128xf32>
      %14 = vector.broadcast %13 : vector<1x128xf32> to vector<8x128xf32>
      %15 = arith.addf %12, %14 : vector<8x128xf32>
      %c0_13 = arith.constant 0 : index
      %c0_14 = arith.constant 0 : index
      %16 = vector.load %arg6[%c0_13, %c0_14] : memref<8x128xf32, #tpu.memory_space<vmem>>, vector<8x128xf32>
      tpu.vector_store %arg6[%c0_13, %c0_14], %15 {strides = array<i32>} : memref<8x128xf32, #tpu.memory_space<vmem>>, vector<8x128xf32>,
    } else {
    }
    return
  }
  func.func @transform_0(%arg0: i32, %arg1: i32, %arg2: i32) -> (i32, i32) {
    %c0_i32 = arith.constant 0 : i32
    return %arg0, %arg2 : i32, i32
  }
  func.func @transform_1(%arg0: i32, %arg1: i32, %arg2: i32) -> (i32, i32) {
    %c0_i32 = arith.constant 0 : i32
    return %arg2, %arg1 : i32, i32
  }
  func.func @transform_2(%arg0: i32, %arg1: i32, %arg2: i32) -> (i32, i32) {
    %c0_i32 = arith.constant 0 : i32
    %c0_i32_0 = arith.constant 0 : i32
    return %c0_i32, %arg1 : i32, i32
  }
  func.func @transform_3(%arg0: i32, %arg1: i32, %arg2: i32) -> (i32, i32) {
    %c0_i32 = arith.constant 0 : i32
    return %arg0, %arg1 : i32, i32
  }
}

</mosaic_0001>

<bundles_post_ra>
// kernel: resnet_forward.20
= control target key start
LH: loop header
LB: loop body
LE: loop exit
PB: predicated region body
PF: predicated region fallthrough
CT: control target
= control target key end

     0   :  { %s721_s1 = inlined_call_operand.vmem [shape: bf16[128,128], index: 1, kind: input, shape index: {}]   ;;  %s722_s0 = inlined_call_operand.vmem [shape: bf16[128,128], index: 0, kind: input, shape index: {}]   ;;  %s723_s2 = inlined_call_operand.vmem [shape: f32[1,128], index: 2, kind: input, shape index: {}]   ;;  %s724_s3 = inlined_call_operand.vmem [shape: bf16[128,128], index: 3, kind: output, shape index: {}]  }
   0x1   :  { %v610_v0 = vld [vmem:[%s721_s1] sm:$0xff]   ;;  %v611_v1 = vld [vmem:[%s721_s1 + $0x8] sm:$0xff]   ;;  %v612_v2 = vld [vmem:[%s721_s1 + $0x10] sm:$0xff]  }
   0x2   :  { %562 = vmatprep.subr.bf16.mxu0 %v610_v0  ;;  %594 = vmatprep.subr.bf16.mxu1 %v610_v0  ;;  %v613_v3 = vld [vmem:[%s721_s1 + $0x18] sm:$0xff]   ;;  %v618_v4 = vld [vmem:[%s722_s0] sm:$0xff]   ;;  %v615_v7 = vld [vmem:[%s721_s1 + $0x28] sm:$0xff]  }
   0x3   :  { %563 = vmatpush3.bf16.msra.mxu0 %v610_v0  ;;  %602 = vmatpush3.bf16.msra.mxu1 %v610_v0  ;;  %v619_v5 = vld [vmem:[%s722_s0 + $0x20] sm:$0xff]   ;;  %v616_v8 = vld [vmem:[%s721_s1 + $0x30] sm:$0xff]   ;;  %v617_v9 = vld [vmem:[%s721_s1 + $0x38] sm:$0xff]  }
   0x4   :  { %564 = vmatprep.subr.bf16.mxu0 %v611_v1  ;;  %595 = vmatprep.subr.bf16.mxu1 %v611_v1  ;;  %v614_v6 = vld [vmem:[%s721_s1 + $0x20] sm:$0xff]   ;;  %v620_v10 = vld [vmem:[%s722_s0 + $0x8] sm:$0xff]   ;;  %v622_v12 = vld [vmem:[%s722_s0 + $0x10] sm:$0xff]  }
   0x5   :  { %578 = vmatprep.mubr.bf16.mxu0 %v618_v4  ;;  %586 = vmatprep.mubr.bf16.mxu1 %v619_v5  ;;  %v621_v11 = vld [vmem:[%s722_s0 + $0x28] sm:$0xff]   ;;  %v623_v13 = vld [vmem:[%s722_s0 + $0x30] sm:$0xff]   ;;  %v624_v14 = vld [vmem:[%s722_s0 + $0x18] sm:$0xff]  }
   0x6   :  { %v625_v15 = vld [vmem:[%s722_s0 + $0x38] sm:$0xff]   ;;  %v466_v16 = vld [vmem:[%s723_s2] ss:$0 sm:$0xff] }
   0x7   :  { %565 = vmatpush3.bf16.msra.mxu0 %v611_v1  ;;  %603 = vmatpush3.bf16.msra.mxu1 %v611_v1 }
   0x8   :  { %566 = vmatprep.subr.bf16.mxu0 %v612_v2  ;;  %596 = vmatprep.subr.bf16.mxu1 %v612_v2 }
   0xb   :  { %567 = vmatpush3.bf16.msra.mxu0 %v612_v2  ;;  %604 = vmatpush3.bf16.msra.mxu1 %v612_v2 }
   0xc   :  { %568 = vmatprep.subr.bf16.mxu0 %v613_v3  ;;  %597 = vmatprep.subr.bf16.mxu1 %v613_v3 }
   0xf   :  { %569 = vmatpush3.bf16.msra.mxu0 %v613_v3  ;;  %605 = vmatpush3.bf16.msra.mxu1 %v613_v3 }
  0x10   :  { %570 = vmatprep.subr.bf16.mxu0 %v614_v6  ;;  %598 = vmatprep.subr.bf16.mxu1 %v614_v6 }
  0x13   :  { %571 = vmatpush3.bf16.msra.mxu0 %v614_v6  ;;  %606 = vmatpush3.bf16.msra.mxu1 %v614_v6 }
  0x14   :  { %572 = vmatprep.subr.bf16.mxu0 %v615_v7  ;;  %599 = vmatprep.subr.bf16.mxu1 %v615_v7 }
  0x17   :  { %573 = vmatpush3.bf16.msra.mxu0 %v615_v7  ;;  %607 = vmatpush3.bf16.msra.mxu1 %v615_v7 }
  0x18   :  { %574 = vmatprep.subr.bf16.mxu0 %v616_v8  ;;  %600 = vmatprep.subr.bf16.mxu1 %v616_v8 }
  0x1b   :  { %575 = vmatpush3.bf16.msra.mxu0 %v616_v8  ;;  %608 = vmatpush3.bf16.msra.mxu1 %v616_v8 }
  0x1c   :  { %576 = vmatprep.subr.bf16.mxu0 %v617_v9  ;;  %601 = vmatprep.subr.bf16.mxu1 %v617_v9 }
  0x1f   :  { %577 = vmatpush3.bf16.msra.mxu0 %v617_v9  ;;  %609 = vmatpush3.bf16.msra.mxu1 %v617_v9 }
  0x22   :  { %579 = vmatmul.mubr.bf16.vlgmr.msra.gmra.mrb[0].mxu0 %v620_v10  ;;  %587 = vmatmul.mubr.bf16.vlgmr.msra.gmra.mrb[0].mxu1 %v621_v11 }
  0x23   :  { %582 = vmatprep.mubr.bf16.mxu0 %v622_v12  ;;  %590 = vmatprep.mubr.bf16.mxu1 %v623_v13 }
  0x2a   :  { %583 = vmatmul.mubr.bf16.gmra.mrb[4].mxu0 %v624_v14  ;;  %591 = vmatmul.mubr.bf16.gmra.mrb[4].mxu1 %v625_v15 }
  0xf5   :  { %v580_v17 = vpop.f32.mrb[0].mxu0  ;;  %v588_v18 = vpop.f32.mrb[0].mxu1 }
  0xf6   :  { %v336_v19 = vadd.f32 %v580_v17, %v466_v16  ;;  %v344_v20 = vadd.f32 %v588_v18, %v466_v16  ;;  %v213_v21 = vpop.f32.mrb[1].mxu0  ;;  %v245_v22 = vpop.f32.mrb[1].mxu1 }
  0xf7   :  { %v334_v23 = vadd.f32 %v466_v16, %v213_v21  ;;  %v342_v24 = vadd.f32 %v466_v16, %v245_v22  ;;  %v581_v25 = vpop.f32.mrb[2].mxu0  ;;  %v589_v26 = vpop.f32.mrb[2].mxu1 }
  0xf8   :  { %v337_v27 = vadd.f32 %v581_v25, %v466_v16  ;;  %v345_v28 = vadd.f32 %v589_v26, %v466_v16  ;;  %v216_v29 = vpop.f32.mrb[3].mxu0  ;;  %v248_v30 = vpop.f32.mrb[3].mxu1  ;;  %v352_v33 = vmax.f32 %v336_v19, 0.0  ;;  %v360_v34 = vmax.f32 %v344_v20, 0.0 }
  0xf9   :  { %v335_v31 = vadd.f32 %v466_v16, %v216_v29  ;;  %v343_v32 = vadd.f32 %v466_v16, %v248_v30  ;;  %v350_v37 = vmax.f32 %v334_v23, 0.0  ;;  %v358_v38 = vmax.f32 %v342_v24, 0.0 }
  0xfa   :  { %v353_v35 = vmax.f32 %v337_v27, 0.0  ;;  %v361_v36 = vmax.f32 %v345_v28, 0.0 }
  0xfb   :  { %v351_v39 = vmax.f32 %v335_v31, 0.0  ;;  %v359_v40 = vmax.f32 %v343_v32, 0.0 }
  0xfc   :  { %v507_v41 = vpack.c.bf16 %v353_v35, %v352_v33  ;;  %v527_v42 = vpack.c.bf16 %v361_v36, %v360_v34 }
  0xfd   :  { %v502_v43 = vpack.c.bf16 %v351_v39, %v350_v37  ;;  %v522_v44 = vpack.c.bf16 %v359_v40, %v358_v38  ;;  %v584_v45 = vpop.f32.mrb[4].mxu0  ;;  %v592_v46 = vpop.f32.mrb[4].mxu1 }
  0xfe   :  { %539 = vst [vmem:[%s724_s3 + $0x8] sm:$0xff] %v507_v41   ;;  %543 = vst [vmem:[%s724_s3 + $0x28] sm:$0xff] %v527_v42   ;;  %v340_v47 = vadd.f32 %v584_v45, %v466_v16  ;;  %v348_v48 = vadd.f32 %v592_v46, %v466_v16  ;;  %v229_v49 = vpop.f32.mrb[5].mxu0  ;;  %v261_v50 = vpop.f32.mrb[5].mxu1 }
  0xff   :  { %503 = vst [vmem:[%s724_s3] sm:$0xff] %v502_v43   ;;  %542 = vst [vmem:[%s724_s3 + $0x20] sm:$0xff] %v522_v44   ;;  %v338_v51 = vadd.f32 %v466_v16, %v229_v49  ;;  %v346_v52 = vadd.f32 %v466_v16, %v261_v50  ;;  %v585_v53 = vpop.f32.mrb[6].mxu0  ;;  %v593_v54 = vpop.f32.mrb[6].mxu1 }
 0x100   :  { %v341_v55 = vadd.f32 %v585_v53, %v466_v16  ;;  %v349_v56 = vadd.f32 %v593_v54, %v466_v16  ;;  %v232_v57 = vpop.f32.mrb[7].mxu0  ;;  %v264_v58 = vpop.f32.mrb[7].mxu1  ;;  %v356_v61 = vmax.f32 %v340_v47, 0.0  ;;  %v364_v62 = vmax.f32 %v348_v48, 0.0 }
 0x101   :  { %v339_v59 = vadd.f32 %v466_v16, %v232_v57  ;;  %v347_v60 = vadd.f32 %v466_v16, %v264_v58  ;;  %v354_v1 = vmax.f32 %v338_v51, 0.0  ;;  %v362_v2 = vmax.f32 %v346_v52, 0.0 }
 0x102   :  { %v357_v63 = vmax.f32 %v341_v55, 0.0  ;;  %v365_v0 = vmax.f32 %v349_v56, 0.0 }
 0x103   :  { %v355_v3 = vmax.f32 %v339_v59, 0.0  ;;  %v363_v4 = vmax.f32 %v347_v60, 0.0 }
 0x104   :  { %v517_v5 = vpack.c.bf16 %v357_v63, %v356_v61  ;;  %v537_v6 = vpack.c.bf16 %v365_v0, %v364_v62 }
 0x105   :  { %v512_v7 = vpack.c.bf16 %v355_v3, %v354_v1  ;;  %v532_v8 = vpack.c.bf16 %v363_v4, %v362_v2 }
 0x106   :  { %541 = vst [vmem:[%s724_s3 + $0x18] sm:$0xff] %v517_v5   ;;  %545 = vst [vmem:[%s724_s3 + $0x38] sm:$0xff] %v537_v6  }
 0x107   :  { %540 = vst [vmem:[%s724_s3 + $0x10] sm:$0xff] %v512_v7   ;;  %544 = vst [vmem:[%s724_s3 + $0x30] sm:$0xff] %v532_v8  }

// kernel: resnet_forward.19
= control target key start
LH: loop header
LB: loop body
LE: loop exit
PB: predicated region body
PF: predicated region fallthrough
CT: control target
= control target key end

     0   :  { %s1744_s12 = smov 0   ;;  %s1746_s13 = smov 0   ;;  %s1918_s0 = inlined_call_operand.vmem [shape: bf16[512,256], index: 0, kind: input, shape index: {}]   ;;  %s1919_s1 = inlined_call_operand.vmem [shape: bf16[256,128], index: 1, kind: input, shape index: {}]   ;;  %s1920_s2 = inlined_call_operand.vmem [shape: f32[1,128], index: 2, kind: input, shape index: {}]   ;;  %s1921_s3 = inlined_call_operand.vmem [shape: bf16[512,128], index: 3, kind: output, shape index: {}]  }
   0x1   :  { %s1748_s14 = smov 0  }
   0x2 LB: > { %s32_s15 = sadd.s32 1, %s1718_s13  ;;  %p1267_p0 = scmp.ge.s32.totalorder %s1722_s14, 1  ;;  %s1722_s14 = sphi %s1748_s14, %s13_s14   ;;  %s1718_s13 = sphi %s1746_s13, %s1923_s13   ;;  %s1714_s12 = sphi %s1744_s12, %s1922_s12  }
   0x3   : > { %p34_p1 = scmp.ge.s32.totalorder %s32_s15, 2  ;;  %p191_p2 = scmp.lt.s32.totalorder %s1722_s14, 3 }
   0x5   : > { %s1925_s15 = smov (%p34_p1, %s32_s15), 0  ;;  %p192_p3 = pnand %p1267_p0, %p191_p2 }
   0x6   : > { %v1636_v0 = vld [vmem:[%s1919_s1 + $0x40] sm:$0xff] (!%p192_p3)   ;;  %s1268_s18 = sshll.u32 (!%p192_p3), %s1714_s12, 5  ;;  %v1638_v2 = vld [vmem:[%s1919_s1 + $0x48] sm:$0xff] (!%p192_p3)   ;;  %v1640_v4 = vld [vmem:[%s1919_s1 + $0x50] sm:$0xff] (!%p192_p3)  }
   0x7   : > { %195 = sbr.rel (%p192_p3) target bundleno = 320 (0x140), region = 32  ;;  %v1637_v1 = vld [vmem:[%s1919_s1] sm:$0xff] (!%p192_p3)   ;;  %1484 = vmatprep.subr.bf16.mxu0 (!%p192_p3), %v1636_v0  ;;  %1596 = vmatprep.subr.bf16.mxu1 (!%p192_p3), %v1636_v0  ;;  %v1639_v3 = vld [vmem:[%s1919_s1 + $0x8] sm:$0xff] (!%p192_p3)   ;;  %p236_p4 = scmp.lt.s32.totalorder (!%p192_p3), %s1268_s18, 63  ;;  %v1641_v5 = vld [vmem:[%s1919_s1 + $0x10] sm:$0xff] (!%p192_p3)  }
   0x8   : > { %1485 = vmatpush3.bf16.msra.mxu0 (!%p192_p3), %v1637_v1  ;;  %1604 = vmatpush3.bf16.msra.mxu1 (!%p192_p3), %v1637_v1  ;;  %v1642_v6 = vld [vmem:[%s1919_s1 + $0x58] sm:$0xff] (!%p192_p3)   ;;  %v1644_v8 = vld [vmem:[%s1919_s1 + $0x60] sm:$0xff] (!%p192_p3)   ;;  %v1646_v10 = vld [vmem:[%s1919_s1 + $0x68] sm:$0xff] (!%p192_p3)  }
   0x9   : > { %1486 = vmatprep.subr.bf16.mxu0 (!%p192_p3), %v1638_v2  ;;  %1597 = vmatprep.subr.bf16.mxu1 (!%p192_p3), %v1638_v2  ;;  %v1643_v7 = vld [vmem:[%s1919_s1 + $0x18] sm:$0xff] (!%p192_p3)   ;;  %v1645_v9 = vld [vmem:[%s1919_s1 + $0x20] sm:$0xff] (!%p192_p3)   ;;  %v1647_v13 = vld [vmem:[%s1919_s1 + $0x28] sm:$0xff] (!%p192_p3)  }
   0xa   : > { %v1648_v14 = vld [vmem:[%s1919_s1 + $0x70] sm:$0xff] (!%p192_p3)   ;;  %v1650_v16 = vld [vmem:[%s1919_s1 + $0x78] sm:$0xff] (!%p192_p3)   ;;  %v1853_v51 = vld [vmem:[%s1920_s2] ss:$0 sm:$0xff] (!%p192_p3) }
   0xb   : > { %v1649_v15 = vld [vmem:[%s1919_s1 + $0x30] sm:$0xff] (!%p192_p3)   ;;  %v1651_v17 = vld [vmem:[%s1919_s1 + $0x38] sm:$0xff] (!%p192_p3)  }
   0xc   : > { %1487 = vmatpush3.bf16.msra.mxu0 (!%p192_p3), %v1639_v3  ;;  %1605 = vmatpush3.bf16.msra.mxu1 (!%p192_p3), %v1639_v3 }
   0xd   : > { %1488 = vmatprep.subr.bf16.mxu0 (!%p192_p3), %v1640_v4  ;;  %1598 = vmatprep.subr.bf16.mxu1 (!%p192_p3), %v1640_v4 }
   0xe   : > { %s1927_s18 = smov (!%p236_p4, %s1268_s18), 63 }
   0xf   : > { %s1356_s6 = sshll.u32 %s1927_s18, 3  ;;  %s1272_s5 = sshll.u32 %s1927_s18, 2 }
  0x10   : > { %1489 = vmatpush3.bf16.msra.mxu0 %v1641_v5  ;;  %1606 = vmatpush3.bf16.msra.mxu1 %v1641_v5  ;;  %s1795_s11 = scalar_lea.vmem %s1918_s0, %s1356_s6  ;;  %s1863_s8 = scalar_lea.vmem %s1921_s3, %s1272_s5 }
  0x11   : > { %1490 = vmatprep.subr.bf16.mxu0 %v1642_v6  ;;  %1599 = vmatprep.subr.bf16.mxu1 %v1642_v6  ;;  %v1654_v11 = vld [vmem:[%s1795_s11 + $0x4] ss:$8 sps:$4 sm:$0xff]   ;;  %v1652_v18 = vld [vmem:[%s1795_s11] ss:$8 sps:$4 sm:$0xff]   ;;  %v1658_v20 = vld [vmem:[%s1795_s11 + $0x14] ss:$8 sps:$4 sm:$0xff]  }
  0x12   : > { %v1657_v12 = vld [vmem:[%s1795_s11 + $0x84] ss:$8 sps:$4 sm:$0xff]   ;;  %688 = vmatprep.mubr.bf16.mxu0 %v1654_v11  ;;  %v1655_v19 = vld [vmem:[%s1795_s11 + $0x80] ss:$8 sps:$4 sm:$0xff]   ;;  %v1660_v21 = vld [vmem:[%s1795_s11 + $0x94] ss:$8 sps:$4 sm:$0xff]  }
  0x13   : > { %752 = vmatprep.mubr.bf16.mxu1 %v1657_v12  ;;  %v1662_v22 = vld [vmem:[%s1795_s11 + $0x10] ss:$8 sps:$4 sm:$0xff]   ;;  %v1664_v24 = vld [vmem:[%s1795_s11 + $0x24] ss:$8 sps:$4 sm:$0xff]   ;;  %v1668_v26 = vld [vmem:[%s1795_s11 + $0x20] ss:$8 sps:$4 sm:$0xff]  }
  0x14   : > { %1491 = vmatpush3.bf16.msra.mxu0 %v1643_v7  ;;  %1607 = vmatpush3.bf16.msra.mxu1 %v1643_v7  ;;  %v1663_v23 = vld [vmem:[%s1795_s11 + $0x90] ss:$8 sps:$4 sm:$0xff]   ;;  %v1666_v25 = vld [vmem:[%s1795_s11 + $0xa4] ss:$8 sps:$4 sm:$0xff]   ;;  %v1669_v27 = vld [vmem:[%s1795_s11 + $0xa0] ss:$8 sps:$4 sm:$0xff]  }
  0x15   : > { %1492 = vmatprep.subr.bf16.mxu0 %v1644_v8  ;;  %1600 = vmatprep.subr.bf16.mxu1 %v1644_v8  ;;  %v1670_v28 = vld [vmem:[%s1795_s11 + $0x34] ss:$8 sps:$4 sm:$0xff]   ;;  %v1674_v30 = vld [vmem:[%s1795_s11 + $0x30] ss:$8 sps:$4 sm:$0xff]   ;;  %v1676_v32 = vld [vmem:[%s1795_s11 + $0x44] ss:$8 sps:$4 sm:$0xff]  }
  0x16   : > { %v1672_v29 = vld [vmem:[%s1795_s11 + $0xb4] ss:$8 sps:$4 sm:$0xff]   ;;  %v1675_v31 = vld [vmem:[%s1795_s11 + $0xb0] ss:$8 sps:$4 sm:$0xff]   ;;  %v1678_v33 = vld [vmem:[%s1795_s11 + $0xc4] ss:$8 sps:$4 sm:$0xff]  }
  0x17   : > { %v1680_v34 = vld [vmem:[%s1795_s11 + $0x40] ss:$8 sps:$4 sm:$0xff]   ;;  %v1682_v36 = vld [vmem:[%s1795_s11 + $0x54] ss:$8 sps:$4 sm:$0xff]   ;;  %v1686_v38 = vld [vmem:[%s1795_s11 + $0x50] ss:$8 sps:$4 sm:$0xff]  }
  0x18   : > { %1493 = vmatpush3.bf16.msra.mxu0 %v1645_v9  ;;  %1608 = vmatpush3.bf16.msra.mxu1 %v1645_v9  ;;  %v1681_v35 = vld [vmem:[%s1795_s11 + $0xc0] ss:$8 sps:$4 sm:$0xff]   ;;  %v1684_v37 = vld [vmem:[%s1795_s11 + $0xd4] ss:$8 sps:$4 sm:$0xff]   ;;  %v1687_v39 = vld [vmem:[%s1795_s11 + $0xd0] ss:$8 sps:$4 sm:$0xff]  }
  0x19   : > { %1494 = vmatprep.subr.bf16.mxu0 %v1646_v10  ;;  %1601 = vmatprep.subr.bf16.mxu1 %v1646_v10  ;;  %v1688_v40 = vld [vmem:[%s1795_s11 + $0x64] ss:$8 sps:$4 sm:$0xff]   ;;  %v1692_v42 = vld [vmem:[%s1795_s11 + $0x60] ss:$8 sps:$4 sm:$0xff]   ;;  %v1694_v44 = vld [vmem:[%s1795_s11 + $0x74] ss:$8 sps:$4 sm:$0xff]  }
  0x1a   : > { %v1690_v41 = vld [vmem:[%s1795_s11 + $0xe4] ss:$8 sps:$4 sm:$0xff]   ;;  %v1693_v43 = vld [vmem:[%s1795_s11 + $0xe0] ss:$8 sps:$4 sm:$0xff]   ;;  %v1696_v45 = vld [vmem:[%s1795_s11 + $0xf4] ss:$8 sps:$4 sm:$0xff]  }
  0x1b   : > { %v1698_v46 = vld [vmem:[%s1795_s11 + $0x70] ss:$8 sps:$4 sm:$0xff]  }
  0x1c   : > { %1495 = vmatpush3.bf16.msra.mxu0 %v1647_v13  ;;  %1609 = vmatpush3.bf16.msra.mxu1 %v1647_v13  ;;  %v1699_v47 = vld [vmem:[%s1795_s11 + $0xf0] ss:$8 sps:$4 sm:$0xff]  }
  0x1d   : > { %1496 = vmatprep.subr.bf16.mxu0 %v1648_v14  ;;  %1602 = vmatprep.subr.bf16.mxu1 %v1648_v14 }
  0x20   : > { %1497 = vmatpush3.bf16.msra.mxu0 %v1649_v15  ;;  %1610 = vmatpush3.bf16.msra.mxu1 %v1649_v15 }
  0x21   : > { %1498 = vmatprep.subr.bf16.mxu0 %v1650_v16  ;;  %1603 = vmatprep.subr.bf16.mxu1 %v1650_v16 }
  0x24   : > { %1499 = vmatpush3.bf16.msra.mxu0 %v1651_v17  ;;  %1611 = vmatpush3.bf16.msra.mxu1 %v1651_v17 }
  0x27   : > { %689 = vmatmul.mubr.bf16.vlgmr.msra.gmra.mrb[0].mxu0 %v1652_v18  ;;  %753 = vmatmul.mubr.bf16.vlgmr.msra.gmra.mrb[0].mxu1 %v1655_v19 }
  0x28   : > { %696 = vmatprep.mubr.bf16.mxu0 %v1658_v20  ;;  %760 = vmatprep.mubr.bf16.mxu1 %v1660_v21 }
  0x2f   : > { %697 = vmatmul.mubr.bf16.gmra.mrb[4].mxu0 %v1662_v22  ;;  %761 = vmatmul.mubr.bf16.gmra.mrb[4].mxu1 %v1663_v23 }
  0x30   : > { %704 = vmatprep.mubr.bf16.mxu0 %v1664_v24  ;;  %768 = vmatprep.mubr.bf16.mxu1 %v1666_v25 }
  0x37   : > { %705 = vmatmul.mubr.bf16.gmra.mrb[8].mxu0 %v1668_v26  ;;  %769 = vmatmul.mubr.bf16.gmra.mrb[8].mxu1 %v1669_v27 }
  0x38   : > { %712 = vmatprep.mubr.bf16.mxu0 %v1670_v28  ;;  %776 = vmatprep.mubr.bf16.mxu1 %v1672_v29 }
  0x3f   : > { %713 = vmatmul.mubr.bf16.gmra.mrb[12].mxu0 %v1674_v30  ;;  %777 = vmatmul.mubr.bf16.gmra.mrb[12].mxu1 %v1675_v31 }
  0x40   : > { %720 = vmatprep.mubr.bf16.mxu0 %v1676_v32  ;;  %784 = vmatprep.mubr.bf16.mxu1 %v1678_v33 }
  0x47   : > { %721 = vmatmul.mubr.bf16.gmra.mrb[16].mxu0 %v1680_v34  ;;  %785 = vmatmul.mubr.bf16.gmra.mrb[16].mxu1 %v1681_v35 }
  0x48   : > { %728 = vmatprep.mubr.bf16.mxu0 %v1682_v36  ;;  %792 = vmatprep.mubr.bf16.mxu1 %v1684_v37 }
  0x4f   : > { %729 = vmatmul.mubr.bf16.gmra.mrb[20].mxu0 %v1686_v38  ;;  %793 = vmatmul.mubr.bf16.gmra.mrb[20].mxu1 %v1687_v39 }
  0x50   : > { %736 = vmatprep.mubr.bf16.mxu0 %v1688_v40  ;;  %800 = vmatprep.mubr.bf16.mxu1 %v1690_v41 }
  0x57   : > { %737 = vmatmul.mubr.bf16.gmra.mrb[24].mxu0 %v1692_v42  ;;  %801 = vmatmul.mubr.bf16.gmra.mrb[24].mxu1 %v1693_v43 }
  0x58   : > { %744 = vmatprep.mubr.bf16.mxu0 %v1694_v44  ;;  %808 = vmatprep.mubr.bf16.mxu1 %v1696_v45 }
  0x5f   : > { %745 = vmatmul.mubr.bf16.gmra.mrb[28].mxu0 %v1698_v46  ;;  %809 = vmatmul.mubr.bf16.gmra.mrb[28].mxu1 %v1699_v47 }
  0xfa   : > { %v1500_v48 = vpop.f32.mrb[0].mxu0  ;;  %v1548_v49 = vpop.f32.mrb[0].mxu1 }
  0xfb   : > { %v1501_v50 = vpop.f32.mrb[1].mxu0  ;;  %v1549_v52 = vpop.f32.mrb[1].mxu1 }
  0xfc   : > { %v1502_v53 = vadd.f32 %v1501_v50, %v1500_v48  ;;  %v1550_v54 = vadd.f32 %v1549_v52, %v1548_v49  ;;  %v1503_v55 = vpop.f32.mrb[2].mxu0  ;;  %v1551_v56 = vpop.f32.mrb[2].mxu1 }
  0xfd   : > { %v1504_v57 = vpop.f32.mrb[3].mxu0  ;;  %v1552_v58 = vpop.f32.mrb[3].mxu1 }
  0xfe   : > { %v923_v59 = vadd.f32 %v1502_v53, %v1853_v51  ;;  %v939_v60 = vadd.f32 %v1550_v54, %v1853_v51  ;;  %v1505_v61 = vadd.f32 %v1504_v57, %v1503_v55  ;;  %v1553_v62 = vadd.f32 %v1552_v58, %v1551_v56 }
 0x100   : > { %v924_v63 = vadd.f32 %v1505_v61, %v1853_v51  ;;  %v940_v0 = vadd.f32 %v1553_v62, %v1853_v51  ;;  %v955_v1 = vmax.f32 %v923_v59, 0.0  ;;  %v971_v2 = vmax.f32 %v939_v60, 0.0 }
 0x102   : > { %v956_v3 = vmax.f32 %v924_v63, 0.0  ;;  %v972_v4 = vmax.f32 %v940_v0, 0.0  ;;  %v1506_v5 = vpop.f32.mrb[4].mxu0  ;;  %v1554_v6 = vpop.f32.mrb[4].mxu1 }
 0x103   : > { %v1507_v7 = vpop.f32.mrb[5].mxu0  ;;  %v1555_v8 = vpop.f32.mrb[5].mxu1 }
 0x104   : > { %v1392_v9 = vpack.c.bf16 %v956_v3, %v955_v1  ;;  %v1432_v10 = vpack.c.bf16 %v972_v4, %v971_v2  ;;  %v1508_v11 = vadd.f32 %v1507_v7, %v1506_v5  ;;  %v1556_v12 = vadd.f32 %v1555_v8, %v1554_v6  ;;  %v1509_v13 = vpop.f32.mrb[6].mxu0  ;;  %v1557_v14 = vpop.f32.mrb[6].mxu1 }
 0x105   : > { %v1510_v15 = vpop.f32.mrb[7].mxu0  ;;  %v1558_v16 = vpop.f32.mrb[7].mxu1 }
 0x106   : > { %1393 = vst [vmem:[%s1863_s8] sm:$0xff] %v1392_v9   ;;  %1476 = vst [vmem:[%s1863_s8 + $0x40] sm:$0xff] %v1432_v10   ;;  %v925_v17 = vadd.f32 %v1508_v11, %v1853_v51  ;;  %v941_v18 = vadd.f32 %v1556_v12, %v1853_v51  ;;  %v1511_v19 = vadd.f32 %v1510_v15, %v1509_v13 }
 0x107   : > { %v1559_v20 = vadd.f32 %v1558_v16, %v1557_v14 }
 0x108   : > { %v926_v21 = vadd.f32 %v1511_v19, %v1853_v51  ;;  %v957_v23 = vmax.f32 %v925_v17, 0.0  ;;  %v973_v24 = vmax.f32 %v941_v18, 0.0 }
 0x109   : > { %v942_v22 = vadd.f32 %v1559_v20, %v1853_v51 }
 0x10a   : > { %v958_v25 = vmax.f32 %v926_v21, 0.0  ;;  %v1512_v27 = vpop.f32.mrb[8].mxu0  ;;  %v1560_v28 = vpop.f32.mrb[8].mxu1 }
 0x10b   : > { %v974_v26 = vmax.f32 %v942_v22, 0.0  ;;  %v1513_v29 = vpop.f32.mrb[9].mxu0  ;;  %v1561_v30 = vpop.f32.mrb[9].mxu1 }
 0x10c   : > { %v1397_v31 = vpack.c.bf16 %v958_v25, %v957_v23  ;;  %v1514_v33 = vadd.f32 %v1513_v29, %v1512_v27  ;;  %v1562_v34 = vadd.f32 %v1561_v30, %v1560_v28  ;;  %v1515_v35 = vpop.f32.mrb[10].mxu0  ;;  %v1563_v36 = vpop.f32.mrb[10].mxu1 }
 0x10d   : > { %v1437_v32 = vpack.c.bf16 %v974_v26, %v973_v24  ;;  %v1516_v37 = vpop.f32.mrb[11].mxu0  ;;  %v1564_v38 = vpop.f32.mrb[11].mxu1 }
 0x10e   : > { %1469 = vst [vmem:[%s1863_s8 + $0x8] sm:$0xff] %v1397_v31   ;;  %v927_v39 = vadd.f32 %v1514_v33, %v1853_v51  ;;  %v943_v40 = vadd.f32 %v1562_v34, %v1853_v51  ;;  %v1517_v41 = vadd.f32 %v1516_v37, %v1515_v35  ;;  %v1565_v42 = vadd.f32 %v1564_v38, %v1563_v36 }
 0x10f   : > { %1477 = vst [vmem:[%s1863_s8 + $0x48] sm:$0xff] %v1437_v32  }
 0x110   : > { %v928_v43 = vadd.f32 %v1517_v41, %v1853_v51  ;;  %v944_v44 = vadd.f32 %v1565_v42, %v1853_v51  ;;  %v959_v45 = vmax.f32 %v927_v39, 0.0  ;;  %v975_v46 = vmax.f32 %v943_v40, 0.0 }
 0x112   : > { %v960_v47 = vmax.f32 %v928_v43, 0.0  ;;  %v976_v48 = vmax.f32 %v944_v44, 0.0  ;;  %v1518_v49 = vpop.f32.mrb[12].mxu0  ;;  %v1566_v50 = vpop.f32.mrb[12].mxu1 }
 0x113   : > { %v1519_v52 = vpop.f32.mrb[13].mxu0  ;;  %v1567_v53 = vpop.f32.mrb[13].mxu1 }
 0x114   : > { %v1402_v54 = vpack.c.bf16 %v960_v47, %v959_v45  ;;  %v1442_v55 = vpack.c.bf16 %v976_v48, %v975_v46  ;;  %v1520_v56 = vadd.f32 %v1519_v52, %v1518_v49  ;;  %v1568_v57 = vadd.f32 %v1567_v53, %v1566_v50  ;;  %v1521_v58 = vpop.f32.mrb[14].mxu0  ;;  %v1569_v59 = vpop.f32.mrb[14].mxu1 }
 0x115   : > { %v1522_v60 = vpop.f32.mrb[15].mxu0  ;;  %v1570_v61 = vpop.f32.mrb[15].mxu1 }
 0x116   : > { %1470 = vst [vmem:[%s1863_s8 + $0x10] sm:$0xff] %v1402_v54   ;;  %1478 = vst [vmem:[%s1863_s8 + $0x50] sm:$0xff] %v1442_v55   ;;  %v929_v62 = vadd.f32 %v1520_v56, %v1853_v51  ;;  %v945_v63 = vadd.f32 %v1568_v57, %v1853_v51  ;;  %v1523_v0 = vadd.f32 %v1522_v60, %v1521_v58 }
 0x117   : > { %v1571_v1 = vadd.f32 %v1570_v61, %v1569_v59 }
 0x118   : > { %v930_v2 = vadd.f32 %v1523_v0, %v1853_v51  ;;  %v961_v4 = vmax.f32 %v929_v62, 0.0  ;;  %v977_v5 = vmax.f32 %v945_v63, 0.0 }
 0x119   : > { %v946_v3 = vadd.f32 %v1571_v1, %v1853_v51 }
 0x11a   : > { %v962_v6 = vmax.f32 %v930_v2, 0.0  ;;  %v1524_v8 = vpop.f32.mrb[16].mxu0  ;;  %v1572_v9 = vpop.f32.mrb[16].mxu1 }
 0x11b   : > { %v978_v7 = vmax.f32 %v946_v3, 0.0  ;;  %v1525_v10 = vpop.f32.mrb[17].mxu0  ;;  %v1573_v11 = vpop.f32.mrb[17].mxu1 }
 0x11c   : > { %v1407_v12 = vpack.c.bf16 %v962_v6, %v961_v4  ;;  %v1526_v14 = vadd.f32 %v1525_v10, %v1524_v8  ;;  %v1574_v15 = vadd.f32 %v1573_v11, %v1572_v9  ;;  %v1527_v16 = vpop.f32.mrb[18].mxu0  ;;  %v1575_v17 = vpop.f32.mrb[18].mxu1 }
 0x11d   : > { %v1447_v13 = vpack.c.bf16 %v978_v7, %v977_v5  ;;  %v1528_v18 = vpop.f32.mrb[19].mxu0  ;;  %v1576_v19 = vpop.f32.mrb[19].mxu1 }
 0x11e   : > { %1471 = vst [vmem:[%s1863_s8 + $0x18] sm:$0xff] %v1407_v12   ;;  %v931_v20 = vadd.f32 %v1526_v14, %v1853_v51  ;;  %v947_v21 = vadd.f32 %v1574_v15, %v1853_v51  ;;  %v1529_v22 = vadd.f32 %v1528_v18, %v1527_v16  ;;  %v1577_v23 = vadd.f32 %v1576_v19, %v1575_v17 }
 0x11f   : > { %1479 = vst [vmem:[%s1863_s8 + $0x58] sm:$0xff] %v1447_v13  }
 0x120   : > { %v932_v24 = vadd.f32 %v1529_v22, %v1853_v51  ;;  %v948_v25 = vadd.f32 %v1577_v23, %v1853_v51  ;;  %v963_v26 = vmax.f32 %v931_v20, 0.0  ;;  %v979_v27 = vmax.f32 %v947_v21, 0.0 }
 0x122   : > { %v964_v28 = vmax.f32 %v932_v24, 0.0  ;;  %v980_v29 = vmax.f32 %v948_v25, 0.0  ;;  %v1530_v30 = vpop.f32.mrb[20].mxu0  ;;  %v1578_v31 = vpop.f32.mrb[20].mxu1 }
 0x123   : > { %v1531_v32 = vpop.f32.mrb[21].mxu0  ;;  %v1579_v33 = vpop.f32.mrb[21].mxu1 }
 0x124   : > { %v1412_v34 = vpack.c.bf16 %v964_v28, %v963_v26  ;;  %v1452_v35 = vpack.c.bf16 %v980_v29, %v979_v27  ;;  %v1532_v36 = vadd.f32 %v1531_v32, %v1530_v30  ;;  %v1580_v37 = vadd.f32 %v1579_v33, %v1578_v31  ;;  %v1533_v38 = vpop.f32.mrb[22].mxu0  ;;  %v1581_v39 = vpop.f32.mrb[22].mxu1 }
 0x125   : > { %v1534_v40 = vpop.f32.mrb[23].mxu0  ;;  %v1582_v41 = vpop.f32.mrb[23].mxu1 }
 0x126   : > { %1472 = vst [vmem:[%s1863_s8 + $0x20] sm:$0xff] %v1412_v34   ;;  %1480 = vst [vmem:[%s1863_s8 + $0x60] sm:$0xff] %v1452_v35   ;;  %v933_v42 = vadd.f32 %v1532_v36, %v1853_v51  ;;  %v949_v43 = vadd.f32 %v1580_v37, %v1853_v51  ;;  %v1535_v44 = vadd.f32 %v1534_v40, %v1533_v38 }
 0x127   : > { %v1583_v45 = vadd.f32 %v1582_v41, %v1581_v39 }
 0x128   : > { %v934_v46 = vadd.f32 %v1535_v44, %v1853_v51  ;;  %v965_v48 = vmax.f32 %v933_v42, 0.0  ;;  %v981_v49 = vmax.f32 %v949_v43, 0.0 }
 0x129   : > { %v950_v47 = vadd.f32 %v1583_v45, %v1853_v51 }
 0x12a   : > { %v966_v50 = vmax.f32 %v934_v46, 0.0  ;;  %v1536_v53 = vpop.f32.mrb[24].mxu0  ;;  %v1584_v54 = vpop.f32.mrb[24].mxu1 }
 0x12b   : > { %v982_v52 = vmax.f32 %v950_v47, 0.0  ;;  %v1537_v55 = vpop.f32.mrb[25].mxu0  ;;  %v1585_v56 = vpop.f32.mrb[25].mxu1 }
 0x12c   : > { %v1417_v57 = vpack.c.bf16 %v966_v50, %v965_v48  ;;  %v1538_v59 = vadd.f32 %v1537_v55, %v1536_v53  ;;  %v1586_v60 = vadd.f32 %v1585_v56, %v1584_v54  ;;  %v1539_v61 = vpop.f32.mrb[26].mxu0  ;;  %v1587_v62 = vpop.f32.mrb[26].mxu1 }
 0x12d   : > { %v1457_v58 = vpack.c.bf16 %v982_v52, %v981_v49  ;;  %v1540_v63 = vpop.f32.mrb[27].mxu0  ;;  %v1588_v0 = vpop.f32.mrb[27].mxu1 }
 0x12e   : > { %1473 = vst [vmem:[%s1863_s8 + $0x28] sm:$0xff] %v1417_v57   ;;  %v935_v1 = vadd.f32 %v1538_v59, %v1853_v51  ;;  %v951_v2 = vadd.f32 %v1586_v60, %v1853_v51  ;;  %v1541_v3 = vadd.f32 %v1540_v63, %v1539_v61  ;;  %v1589_v4 = vadd.f32 %v1588_v0, %v1587_v62 }
 0x12f   : > { %1481 = vst [vmem:[%s1863_s8 + $0x68] sm:$0xff] %v1457_v58  }
 0x130   : > { %v936_v5 = vadd.f32 %v1541_v3, %v1853_v51  ;;  %v952_v6 = vadd.f32 %v1589_v4, %v1853_v51  ;;  %v967_v7 = vmax.f32 %v935_v1, 0.0  ;;  %v983_v8 = vmax.f32 %v951_v2, 0.0 }
 0x132   : > { %v968_v9 = vmax.f32 %v936_v5, 0.0  ;;  %v984_v10 = vmax.f32 %v952_v6, 0.0  ;;  %v1542_v11 = vpop.f32.mrb[28].mxu0  ;;  %v1590_v12 = vpop.f32.mrb[28].mxu1 }
 0x133   : > { %v1543_v13 = vpop.f32.mrb[29].mxu0  ;;  %v1591_v14 = vpop.f32.mrb[29].mxu1 }
 0x134   : > { %v1422_v15 = vpack.c.bf16 %v968_v9, %v967_v7  ;;  %v1462_v16 = vpack.c.bf16 %v984_v10, %v983_v8  ;;  %v1544_v17 = vadd.f32 %v1543_v13, %v1542_v11  ;;  %v1592_v18 = vadd.f32 %v1591_v14, %v1590_v12  ;;  %v1545_v19 = vpop.f32.mrb[30].mxu0  ;;  %v1593_v20 = vpop.f32.mrb[30].mxu1 }
 0x135   : > { %v1546_v21 = vpop.f32.mrb[31].mxu0  ;;  %v1594_v22 = vpop.f32.mrb[31].mxu1 }
 0x136   : > { %1474 = vst [vmem:[%s1863_s8 + $0x30] sm:$0xff] %v1422_v15   ;;  %1482 = vst [vmem:[%s1863_s8 + $0x70] sm:$0xff] %v1462_v16   ;;  %v937_v23 = vadd.f32 %v1544_v17, %v1853_v51  ;;  %v953_v24 = vadd.f32 %v1592_v18, %v1853_v51  ;;  %v1547_v25 = vadd.f32 %v1546_v21, %v1545_v19 }
 0x137   : > { %v1595_v26 = vadd.f32 %v1594_v22, %v1593_v20 }
 0x138   : > { %v938_v27 = vadd.f32 %v1547_v25, %v1853_v51  ;;  %v969_v29 = vmax.f32 %v937_v23, 0.0  ;;  %v985_v30 = vmax.f32 %v953_v24, 0.0 }
 0x139   : > { %v954_v28 = vadd.f32 %v1595_v26, %v1853_v51 }
 0x13a   : > { %v970_v31 = vmax.f32 %v938_v27, 0.0 }
 0x13b   : > { %v986_v32 = vmax.f32 %v954_v28, 0.0 }
 0x13c   : > { %v1427_v33 = vpack.c.bf16 %v970_v31, %v969_v29 }
 0x13d   : > { %v1467_v34 = vpack.c.bf16 %v986_v32, %v985_v30 }
 0x13e   : > { %1475 = vst [vmem:[%s1863_s8 + $0x38] sm:$0xff] %v1427_v33  }
 0x13f   : > { %1483 = vst [vmem:[%s1863_s8 + $0x78] sm:$0xff] %v1467_v34  }
 0x140 PF: > { %s13_s14 = sadd.s32 1, %s1722_s14   ;;  %s1922_s12 = smov %s1718_s13 }
 0x141   : > { %p10_p5 = scmp.ge.s32.totalorder %s13_s14, 4   ;;  %s1923_s13 = smov %s1925_s15 }
 0x143   :  { %12 = sbr.rel (!%p10_p5) target bundleno = 2 (0x2), region = 76 }

// kernel: resnet_forward.21
= control target key start
LH: loop header
LB: loop body
LE: loop exit
PB: predicated region body
PF: predicated region fallthrough
CT: control target
= control target key end

     0   :  { %s1190_s12 = smov 0   ;;  %s1192_s13 = smov 0   ;;  %s1322_s0 = inlined_call_operand.vmem [shape: bf16[128,640], index: 0, kind: input, shape index: {}]   ;;  %s1323_s1 = inlined_call_operand.vmem [shape: bf16[640,128], index: 1, kind: input, shape index: {}]   ;;  %s1324_s2 = inlined_call_operand.vmem [shape: f32[1,128], index: 2, kind: input, shape index: {}]   ;;  %s1325_s3 = inlined_call_operand.vmem [shape: bf16[128,128], index: 3, kind: output, shape index: {}]  }
   0x1   :  { %s1194_s14 = smov 0   ;;  %s1196_s15 = smov 0  }
   0x2   :  { %s1198_s16 = smov 0  }
   0x3 LB: > { %s25_s17 = sadd.s32 1, %s1163_s15  ;;  %p48_p1 = scmp.ne.s32.totalorder %s1155_s13, %s1151_s12  ;;  %s1167_s16 = sphi %s1198_s16, %s13_s16   ;;  %s1163_s15 = sphi %s1196_s15, %s1329_s15   ;;  %s1159_s14 = sphi %s1194_s14, %s1328_s14   ;;  %s1155_s13 = sphi %s1192_s13, %s1327_s13   ;;  %s1151_s12 = sphi %s1190_s12, %s1326_s12  }
   0x4   : > { %p26_p0 = scmp.ge.s32.totalorder %s25_s17, 5  ;;  %p49_p2 = scmp.eq.s32.totalorder %s1167_s16, 0 }
   0x5   : > { %s41_s19 = sadd.s32 1, %s1155_s13  ;;  %p899_p5 = scmp.ge.s32.totalorder %s1167_s16, 5 }
   0x6   : > { %s1331_s17 = smov (%p26_p0, %s25_s17), 0  ;;  %p50_p3 = por %p49_p2, %p48_p1 }
   0x7   : > { %s37_s18 = ssub.s32 %s1163_s15, %s1331_s17  ;;  %162 = sbr.rel (%p899_p5) target bundleno = 28 (0x1c), region = 20 }
   0x8   : > { %p39_p4 = scmp.eq.s32.totalorder %s37_s18, 0 }
   0xa   : > { %s1225_s20 = scalar_select %p39_p4, %s1155_s13, %s41_s19  }
   0xe   : > { %165 = sbr.rel (!%p50_p3) target bundleno = 28 (0x1c), region = 24  ;;  %s167_s21 = sand.u32 (%p50_p3), 1, %s1155_s13  }
   0xf   : > { %s901_s22 = sshll.u32 (%p50_p3), %s1163_s15, 2  ;;  %s900_s23 = sshll.u32 (%p50_p3), %s167_s21, 6 }
  0x10   : > { %s1233_s26 = scalar_lea.vmem (%p50_p3), %s1322_s0, %s901_s22  ;;  %s169_s27 = scalar_lea.vmem (%p50_p3), [#allocation3], %s900_s23 }
  0x11   : > { %v190_v0 = vld [vmem:[%s1233_s26] sm:$0xf] (%p50_p3)  ;;  %v192_v1 = vld [vmem:[%s1233_s26 + $0x14] sm:$0xf] (%p50_p3)  ;;  %v194_v2 = vld [vmem:[%s1233_s26 + $0x28] sm:$0xf] (%p50_p3) }
  0x12   : > { %191 = vst [vmem:[%s169_s27] sm:$0xf] (%p50_p3), %v190_v0  ;;  %193 = vst [vmem:[%s169_s27 + $0x4] sm:$0xf] (%p50_p3), %v192_v1  ;;  %v196_v3 = vld [vmem:[%s1233_s26 + $0x3c] sm:$0xf] (%p50_p3) }
  0x13   : > { %v198_v4 = vld [vmem:[%s1233_s26 + $0x50] sm:$0xf] (%p50_p3)  ;;  %195 = vst [vmem:[%s169_s27 + $0x8] sm:$0xf] (%p50_p3), %v194_v2  ;;  %197 = vst [vmem:[%s169_s27 + $0xc] sm:$0xf] (%p50_p3), %v196_v3 }
  0x14   : > { %199 = vst [vmem:[%s169_s27 + $0x10] sm:$0xf] (%p50_p3), %v198_v4  ;;  %v200_v5 = vld [vmem:[%s1233_s26 + $0x64] sm:$0xf] (%p50_p3)  ;;  %v202_v6 = vld [vmem:[%s1233_s26 + $0x78] sm:$0xf] (%p50_p3) }
  0x15   : > { %v204_v7 = vld [vmem:[%s1233_s26 + $0x8c] sm:$0xf]  ;;  %201 = vst [vmem:[%s169_s27 + $0x14] sm:$0xf] %v200_v5  ;;  %203 = vst [vmem:[%s169_s27 + $0x18] sm:$0xf] %v202_v6 }
  0x16   : > { %205 = vst [vmem:[%s169_s27 + $0x1c] sm:$0xf] %v204_v7  ;;  %v206_v8 = vld [vmem:[%s1233_s26 + $0xa0] sm:$0xf]  ;;  %v208_v9 = vld [vmem:[%s1233_s26 + $0xb4] sm:$0xf] }
  0x17   : > { %v210_v10 = vld [vmem:[%s1233_s26 + $0xc8] sm:$0xf]  ;;  %207 = vst [vmem:[%s169_s27 + $0x20] sm:$0xf] %v206_v8  ;;  %209 = vst [vmem:[%s169_s27 + $0x24] sm:$0xf] %v208_v9 }
  0x18   : > { %211 = vst [vmem:[%s169_s27 + $0x28] sm:$0xf] %v210_v10  ;;  %v212_v11 = vld [vmem:[%s1233_s26 + $0xdc] sm:$0xf]  ;;  %v214_v12 = vld [vmem:[%s1233_s26 + $0xf0] sm:$0xf] }
  0x19   : > { %v216_v13 = vld [vmem:[%s1233_s26 + $0x104] sm:$0xf]  ;;  %213 = vst [vmem:[%s169_s27 + $0x2c] sm:$0xf] %v212_v11  ;;  %215 = vst [vmem:[%s169_s27 + $0x30] sm:$0xf] %v214_v12 }
  0x1a   : > { %217 = vst [vmem:[%s169_s27 + $0x34] sm:$0xf] %v216_v13  ;;  %v218_v14 = vld [vmem:[%s1233_s26 + $0x118] sm:$0xf]  ;;  %v220_v15 = vld [vmem:[%s1233_s26 + $0x12c] sm:$0xf] }
  0x1b   : > { %219 = vst [vmem:[%s169_s27 + $0x38] sm:$0xf] %v218_v14  ;;  %221 = vst [vmem:[%s169_s27 + $0x3c] sm:$0xf] %v220_v15 }
  0x1c PF: > { %p902_p6 = scmp.ge.s32.totalorder %s1167_s16, 1  ;;  %p287_p7 = scmp.lt.s32.totalorder %s1167_s16, 6 }
  0x1e   : > { %p288_p8 = pnand %p902_p6, %p287_p7 }
  0x1f   : > { %s294_s28 = sand.u32 (!%p288_p8), 1, %s1151_s12   ;;  %s904_s29 = sshll.u32 (!%p288_p8), %s1159_s14, 4 }
  0x20   : > { %291 = sbr.rel (%p288_p8) target bundleno = 323 (0x143), region = 69  ;;  %s903_s30 = sshll.u32 (!%p288_p8), %s294_s28, 6 }
  0x21   : > { %p333_p9 = scmp.lt.s32.totalorder (!%p288_p8), %s904_s29, 79  ;;  %s1260_s8 = scalar_lea.vmem (!%p288_p8), [#allocation3], %s903_s30 }
  0x22   : > { %p906_p10 = scmp.ne.s32.totalorder (!%p288_p8), %s1159_s14, 0 }
  0x27   : > { %s1333_s29 = smov (!%p333_p9, %s904_s29), 79  ;;  %357 = sbr.rel (%p906_p10) target bundleno = 49 (0x31), region = 77 }
  0x28   : > { %s905_s4 = sshll.u32 %s1333_s29, 2  ;;  %v1169_v16 = vmov (!%p906_p10), 0.0  }
  0x29   : > { %s1258_s7 = scalar_lea.vmem %s1323_s1, %s905_s4  ;;  %358 = vst [vmem:[#allocation2] sm:$0xff] (!%p906_p10), %v1169_v16  ;;  %359 = vst [vmem:[#allocation2 + $0x8] sm:$0xff] (!%p906_p10), %v1169_v16 }
  0x2a   : > { %360 = vst [vmem:[#allocation2 + $0x10] sm:$0xff] (!%p906_p10), %v1169_v16  ;;  %361 = vst [vmem:[#allocation2 + $0x18] sm:$0xff] (!%p906_p10), %v1169_v16 }
  0x2b   : > { %362 = vst [vmem:[#allocation2 + $0x20] sm:$0xff] (!%p906_p10), %v1169_v16  ;;  %363 = vst [vmem:[#allocation2 + $0x28] sm:$0xff] (!%p906_p10), %v1169_v16 }
  0x2c   : > { %364 = vst [vmem:[#allocation2 + $0x30] sm:$0xff] (!%p906_p10), %v1169_v16  ;;  %365 = vst [vmem:[#allocation2 + $0x38] sm:$0xff] (!%p906_p10), %v1169_v16 }
  0x2d   : > { %366 = vst [vmem:[#allocation2 + $0x40] sm:$0xff] (!%p906_p10), %v1169_v16  ;;  %367 = vst [vmem:[#allocation2 + $0x48] sm:$0xff] (!%p906_p10), %v1169_v16 }
  0x2e   : > { %368 = vst [vmem:[#allocation2 + $0x50] sm:$0xff] %v1169_v16  ;;  %369 = vst [vmem:[#allocation2 + $0x58] sm:$0xff] %v1169_v16 }
  0x2f   : > { %370 = vst [vmem:[#allocation2 + $0x60] sm:$0xff] %v1169_v16  ;;  %371 = vst [vmem:[#allocation2 + $0x68] sm:$0xff] %v1169_v16 }
  0x30   : > { %372 = vst [vmem:[#allocation2 + $0x70] sm:$0xff] %v1169_v16  ;;  %373 = vst [vmem:[#allocation2 + $0x78] sm:$0xff] %v1169_v16 }
  0x31 PF: > { %v1113_v17 = vld [vmem:[%s1258_s7] sm:$0xff]   ;;  %v1114_v18 = vld [vmem:[%s1258_s7 + $0x8] sm:$0xff]   ;;  %v1115_v19 = vld [vmem:[%s1258_s7 + $0x10] sm:$0xff]   ;;  %p923_p11 = scmp.ne.s32.totalorder %s1159_s14, 4 }
  0x32   : > { %1024 = vmatprep.subr.bf16.mxu0 %v1113_v17  ;;  %1056 = vmatprep.subr.bf16.mxu1 %v1113_v17  ;;  %v1116_v20 = vld [vmem:[%s1258_s7 + $0x18] sm:$0xff]   ;;  %v1121_v21 = vld [vmem:[%s1260_s8] sm:$0xff]   ;;  %v1118_v24 = vld [vmem:[%s1258_s7 + $0x28] sm:$0xff]  }
  0x33   : > { %1025 = vmatpush3.bf16.msra.mxu0 %v1113_v17  ;;  %1064 = vmatpush3.bf16.msra.mxu1 %v1113_v17  ;;  %v1122_v22 = vld [vmem:[%s1260_s8 + $0x20] sm:$0xff]   ;;  %v1119_v25 = vld [vmem:[%s1258_s7 + $0x30] sm:$0xff]   ;;  %v1120_v26 = vld [vmem:[%s1258_s7 + $0x38] sm:$0xff]  }
  0x34   : > { %1026 = vmatprep.subr.bf16.mxu0 %v1114_v18  ;;  %1057 = vmatprep.subr.bf16.mxu1 %v1114_v18  ;;  %v1117_v23 = vld [vmem:[%s1258_s7 + $0x20] sm:$0xff]   ;;  %v1123_v27 = vld [vmem:[%s1260_s8 + $0x8] sm:$0xff]   ;;  %v1125_v29 = vld [vmem:[%s1260_s8 + $0x10] sm:$0xff]  }
  0x35   : > { %1040 = vmatprep.mubr.bf16.mxu0 %v1121_v21  ;;  %1048 = vmatprep.mubr.bf16.mxu1 %v1122_v22  ;;  %v1124_v28 = vld [vmem:[%s1260_s8 + $0x28] sm:$0xff]   ;;  %v1126_v30 = vld [vmem:[%s1260_s8 + $0x30] sm:$0xff]   ;;  %v1127_v31 = vld [vmem:[%s1260_s8 + $0x18] sm:$0xff]  }
  0x36   : > { %v1128_v32 = vld [vmem:[%s1260_s8 + $0x38] sm:$0xff]   ;;  %v376_v33 = vld [vmem:[#allocation2 + $0x10] sm:$0xff]  ;;  %v374_v35 = vld [vmem:[#allocation2] sm:$0xff] }
  0x37   : > { %1027 = vmatpush3.bf16.msra.mxu0 %v1114_v18  ;;  %1065 = vmatpush3.bf16.msra.mxu1 %v1114_v18  ;;  %v384_v34 = vld [vmem:[#allocation2 + $0x50] sm:$0xff]  ;;  %v382_v36 = vld [vmem:[#allocation2 + $0x40] sm:$0xff]  ;;  %v377_v39 = vld [vmem:[#allocation2 + $0x18] sm:$0xff] }
  0x38   : > { %1028 = vmatprep.subr.bf16.mxu0 %v1115_v19  ;;  %1058 = vmatprep.subr.bf16.mxu1 %v1115_v19  ;;  %v385_v40 = vld [vmem:[#allocation2 + $0x58] sm:$0xff]  ;;  %v375_v45 = vld [vmem:[#allocation2 + $0x8] sm:$0xff]  ;;  %v380_v57 = vld [vmem:[#allocation2 + $0x30] sm:$0xff] }
  0x39   : > { %v383_v46 = vld [vmem:[#allocation2 + $0x48] sm:$0xff]  ;;  %v388_v58 = vld [vmem:[#allocation2 + $0x70] sm:$0xff]  ;;  %v378_v59 = vld [vmem:[#allocation2 + $0x20] sm:$0xff] }
  0x3a   : > { %v386_v60 = vld [vmem:[#allocation2 + $0x60] sm:$0xff]  ;;  %v381_v63 = vld [vmem:[#allocation2 + $0x38] sm:$0xff]  ;;  %v379_v5 = vld [vmem:[#allocation2 + $0x28] sm:$0xff] }
  0x3b   : > { %1029 = vmatpush3.bf16.msra.mxu0 %v1115_v19  ;;  %1066 = vmatpush3.bf16.msra.mxu1 %v1115_v19  ;;  %v389_v0 = vld [vmem:[#allocation2 + $0x78] sm:$0xff]  ;;  %v387_v6 = vld [vmem:[#allocation2 + $0x68] sm:$0xff]  ;;  %v924_v19 = vld [vmem:[%s1324_s2] ss:$0 sm:$0xff] (!%p923_p11) }
  0x3c   : > { %1030 = vmatprep.subr.bf16.mxu0 %v1116_v20  ;;  %1059 = vmatprep.subr.bf16.mxu1 %v1116_v20 }
  0x3f   : > { %1031 = vmatpush3.bf16.msra.mxu0 %v1116_v20  ;;  %1067 = vmatpush3.bf16.msra.mxu1 %v1116_v20 }
  0x40   : > { %1032 = vmatprep.subr.bf16.mxu0 %v1117_v23  ;;  %1060 = vmatprep.subr.bf16.mxu1 %v1117_v23 }
  0x43   : > { %1033 = vmatpush3.bf16.msra.mxu0 %v1117_v23  ;;  %1068 = vmatpush3.bf16.msra.mxu1 %v1117_v23 }
  0x44   : > { %1034 = vmatprep.subr.bf16.mxu0 %v1118_v24  ;;  %1061 = vmatprep.subr.bf16.mxu1 %v1118_v24 }
  0x47   : > { %1035 = vmatpush3.bf16.msra.mxu0 %v1118_v24  ;;  %1069 = vmatpush3.bf16.msra.mxu1 %v1118_v24 }
  0x48   : > { %1036 = vmatprep.subr.bf16.mxu0 %v1119_v25  ;;  %1062 = vmatprep.subr.bf16.mxu1 %v1119_v25 }
  0x4b   : > { %1037 = vmatpush3.bf16.msra.mxu0 %v1119_v25  ;;  %1070 = vmatpush3.bf16.msra.mxu1 %v1119_v25 }
  0x4c   : > { %1038 = vmatprep.subr.bf16.mxu0 %v1120_v26  ;;  %1063 = vmatprep.subr.bf16.mxu1 %v1120_v26 }
  0x4f   : > { %1039 = vmatpush3.bf16.msra.mxu0 %v1120_v26  ;;  %1071 = vmatpush3.bf16.msra.mxu1 %v1120_v26 }
  0x52   : > { %1041 = vmatmul.mubr.bf16.vlgmr.msra.gmra.mrb[0].mxu0 %v1123_v27  ;;  %1049 = vmatmul.mubr.bf16.vlgmr.msra.gmra.mrb[0].mxu1 %v1124_v28 }
  0x53   : > { %1044 = vmatprep.mubr.bf16.mxu0 %v1125_v29  ;;  %1052 = vmatprep.mubr.bf16.mxu1 %v1126_v30 }
  0x5a   : > { %1045 = vmatmul.mubr.bf16.gmra.mrb[4].mxu0 %v1127_v31  ;;  %1053 = vmatmul.mubr.bf16.gmra.mrb[4].mxu1 %v1128_v32 }
 0x125   : > { %v1042_v37 = vpop.f32.mrb[0].mxu0  ;;  %v1050_v38 = vpop.f32.mrb[0].mxu1 }
 0x126   : > { %v617_v41 = vadd.f32 %v1042_v37, %v376_v33  ;;  %v625_v42 = vadd.f32 %v1050_v38, %v384_v34  ;;  %v552_v43 = vpop.f32.mrb[1].mxu0  ;;  %v584_v44 = vpop.f32.mrb[1].mxu1 }
 0x127   : > { %v615_v47 = vadd.f32 %v552_v43, %v374_v35  ;;  %v623_v48 = vadd.f32 %v584_v44, %v382_v36  ;;  %v1043_v49 = vpop.f32.mrb[2].mxu0  ;;  %v1051_v50 = vpop.f32.mrb[2].mxu1 }
 0x128   : > { %633 = vst [vmem:[#allocation2 + $0x10] sm:$0xff] %v617_v41  ;;  %641 = vst [vmem:[#allocation2 + $0x50] sm:$0xff] %v625_v42  ;;  %v618_v51 = vadd.f32 %v1043_v49, %v377_v39  ;;  %v626_v52 = vadd.f32 %v1051_v50, %v385_v40  ;;  %v555_v53 = vpop.f32.mrb[3].mxu0  ;;  %v587_v54 = vpop.f32.mrb[3].mxu1 }
 0x129   : > { %631 = vst [vmem:[#allocation2] sm:$0xff] %v615_v47  ;;  %639 = vst [vmem:[#allocation2 + $0x40] sm:$0xff] %v623_v48  ;;  %v616_v55 = vadd.f32 %v555_v53, %v375_v45  ;;  %v624_v56 = vadd.f32 %v587_v54, %v383_v46 }
 0x12a   : > { %634 = vst [vmem:[#allocation2 + $0x18] sm:$0xff] %v618_v51  ;;  %642 = vst [vmem:[#allocation2 + $0x58] sm:$0xff] %v626_v52 }
 0x12b   : > { %632 = vst [vmem:[#allocation2 + $0x8] sm:$0xff] %v616_v55  ;;  %640 = vst [vmem:[#allocation2 + $0x48] sm:$0xff] %v624_v56 }
 0x12d   : > { %v1046_v61 = vpop.f32.mrb[4].mxu0  ;;  %v1054_v62 = vpop.f32.mrb[4].mxu1  ;;  %650 = sbr.rel (%p923_p11) target bundleno = 323 (0x143), region = 81 }
 0x12e   : > { %v621_v1 = vadd.f32 %v1046_v61, %v380_v57  ;;  %v629_v2 = vadd.f32 %v1054_v62, %v388_v58  ;;  %v568_v3 = vpop.f32.mrb[5].mxu0  ;;  %v600_v4 = vpop.f32.mrb[5].mxu1 }
 0x12f   : > { %v619_v7 = vadd.f32 %v568_v3, %v378_v59  ;;  %v627_v8 = vadd.f32 %v600_v4, %v386_v60  ;;  %v1047_v9 = vpop.f32.mrb[6].mxu0  ;;  %v1055_v10 = vpop.f32.mrb[6].mxu1  ;;  %v653_v22 = vld [vmem:[#allocation2 + $0x10] sm:$0xff] (!%p923_p11) }
 0x130   : > { %637 = vst [vmem:[#allocation2 + $0x30] sm:$0xff] %v621_v1  ;;  %645 = vst [vmem:[#allocation2 + $0x70] sm:$0xff] %v629_v2  ;;  %v622_v11 = vadd.f32 %v1047_v9, %v381_v63  ;;  %v630_v12 = vadd.f32 %v1055_v10, %v389_v0  ;;  %v571_v13 = vpop.f32.mrb[7].mxu0  ;;  %v603_v14 = vpop.f32.mrb[7].mxu1  ;;  %v651_v17 = vld [vmem:[#allocation2] sm:$0xff] (!%p923_p11)  ;;  %v676_v25 = vadd.f32 (!%p923_p11), %v924_v19, %v653_v22  ;;  %v661_v37 = vld [vmem:[#allocation2 + $0x50] sm:$0xff] (!%p923_p11) }
 0x131   : > { %635 = vst [vmem:[#allocation2 + $0x20] sm:$0xff] %v619_v7  ;;  %643 = vst [vmem:[#allocation2 + $0x60] sm:$0xff] %v627_v8  ;;  %v620_v15 = vadd.f32 %v571_v13, %v379_v5  ;;  %v628_v16 = vadd.f32 %v603_v14, %v387_v6  ;;  %v674_v20 = vadd.f32 (!%p923_p11), %v924_v19, %v651_v17  ;;  %v654_v23 = vld [vmem:[#allocation2 + $0x18] sm:$0xff] (!%p923_p11)  ;;  %v659_v35 = vld [vmem:[#allocation2 + $0x40] sm:$0xff] (!%p923_p11) }
 0x132   : > { %638 = vst [vmem:[#allocation2 + $0x38] sm:$0xff] %v622_v11  ;;  %646 = vst [vmem:[#allocation2 + $0x78] sm:$0xff] %v630_v12  ;;  %v652_v18 = vld [vmem:[#allocation2 + $0x8] sm:$0xff] (!%p923_p11)  ;;  %v677_v26 = vadd.f32 (!%p923_p11), %v924_v19, %v654_v23  ;;  %v692_v38 = vmax.f32 (!%p923_p11), %v676_v25, 0.0  ;;  %v662_v42 = vld [vmem:[#allocation2 + $0x58] sm:$0xff] (!%p923_p11)  ;;  %v682_v47 = vadd.f32 (!%p923_p11), %v924_v19, %v659_v35  ;;  %v684_v52 = vadd.f32 (!%p923_p11), %v924_v19, %v661_v37 }
 0x133   : > { %636 = vst [vmem:[#allocation2 + $0x28] sm:$0xff] %v620_v15  ;;  %644 = vst [vmem:[#allocation2 + $0x68] sm:$0xff] %v628_v16  ;;  %v675_v21 = vadd.f32 (!%p923_p11), %v924_v19, %v652_v18  ;;  %v690_v31 = vmax.f32 (!%p923_p11), %v674_v20, 0.0  ;;  %v660_v36 = vld [vmem:[#allocation2 + $0x48] sm:$0xff] (!%p923_p11)  ;;  %v685_v57 = vadd.f32 (!%p923_p11), %v924_v19, %v662_v42 }
 0x134   : > { %v693_v39 = vmax.f32 %v677_v26, 0.0  ;;  %v683_v51 = vadd.f32 %v924_v19, %v660_v36  ;;  %v698_v56 = vmax.f32 %v682_v47, 0.0  ;;  %v700_v61 = vmax.f32 %v684_v52, 0.0 }
 0x135   : > { %v691_v32 = vmax.f32 %v675_v21, 0.0  ;;  %v701_v63 = vmax.f32 %v685_v57, 0.0 }
 0x136   : > { %v969_v49 = vpack.c.bf16 %v693_v39, %v692_v38  ;;  %v699_v60 = vmax.f32 %v683_v51, 0.0 }
 0x137   : > { %v657_v29 = vld [vmem:[#allocation2 + $0x30] sm:$0xff]  ;;  %v964_v44 = vpack.c.bf16 %v691_v32, %v690_v31  ;;  %v989_v5 = vpack.c.bf16 %v701_v63, %v700_v61 }
 0x138   : > { %v655_v24 = vld [vmem:[#allocation2 + $0x20] sm:$0xff]  ;;  %v680_v34 = vadd.f32 %v924_v19, %v657_v29  ;;  %v665_v53 = vld [vmem:[#allocation2 + $0x70] sm:$0xff]  ;;  %1001 = vst [vmem:[%s1325_s3 + $0x8] sm:$0xff] %v969_v49   ;;  %v984_v3 = vpack.c.bf16 %v699_v60, %v698_v56 }
 0x139   : > { %v678_v28 = vadd.f32 %v924_v19, %v655_v24  ;;  %v658_v30 = vld [vmem:[#allocation2 + $0x38] sm:$0xff]  ;;  %v663_v43 = vld [vmem:[#allocation2 + $0x60] sm:$0xff]  ;;  %965 = vst [vmem:[%s1325_s3] sm:$0xff] %v964_v44   ;;  %v688_v1 = vadd.f32 %v924_v19, %v665_v53  ;;  %1005 = vst [vmem:[%s1325_s3 + $0x28] sm:$0xff] %v989_v5  }
 0x13a   : > { %v656_v27 = vld [vmem:[#allocation2 + $0x28] sm:$0xff]  ;;  %v681_v41 = vadd.f32 %v924_v19, %v658_v30  ;;  %v696_v46 = vmax.f32 %v680_v34, 0.0  ;;  %v666_v54 = vld [vmem:[#allocation2 + $0x78] sm:$0xff]  ;;  %v686_v58 = vadd.f32 %v924_v19, %v663_v43  ;;  %1004 = vst [vmem:[%s1325_s3 + $0x20] sm:$0xff] %v984_v3  }
 0x13b   : > { %v679_v33 = vadd.f32 %v924_v19, %v656_v27  ;;  %v694_v40 = vmax.f32 %v678_v28, 0.0  ;;  %v664_v48 = vld [vmem:[#allocation2 + $0x68] sm:$0xff]  ;;  %v689_v2 = vadd.f32 %v924_v19, %v666_v54  ;;  %v704_v6 = vmax.f32 %v688_v1, 0.0 }
 0x13c   : > { %v697_v50 = vmax.f32 %v681_v41, 0.0  ;;  %v687_v62 = vadd.f32 %v924_v19, %v664_v48  ;;  %v702_v0 = vmax.f32 %v686_v58, 0.0 }
 0x13d   : > { %v695_v45 = vmax.f32 %v679_v33, 0.0  ;;  %v705_v7 = vmax.f32 %v689_v2, 0.0 }
 0x13e   : > { %v979_v59 = vpack.c.bf16 %v697_v50, %v696_v46  ;;  %v703_v4 = vmax.f32 %v687_v62, 0.0 }
 0x13f   : > { %v974_v55 = vpack.c.bf16 %v695_v45, %v694_v40  ;;  %v999_v9 = vpack.c.bf16 %v705_v7, %v704_v6 }
 0x140   : > { %1003 = vst [vmem:[%s1325_s3 + $0x18] sm:$0xff] %v979_v59   ;;  %v994_v8 = vpack.c.bf16 %v703_v4, %v702_v0 }
 0x141   : > { %1002 = vst [vmem:[%s1325_s3 + $0x10] sm:$0xff] %v974_v55   ;;  %1007 = vst [vmem:[%s1325_s3 + $0x38] sm:$0xff] %v999_v9  }
 0x142   : > { %1006 = vst [vmem:[%s1325_s3 + $0x30] sm:$0xff] %v994_v8  }
 0x143 PF: > { %s13_s16 = sadd.s32 1, %s1167_s16   ;;  %s1326_s12 = smov %s1155_s13 }
 0x144   : > { %p10_p12 = scmp.ge.s32.totalorder %s13_s16, 7   ;;  %s1327_s13 = smov %s1225_s20 }
 0x145   : > { %s1328_s14 = smov %s1163_s15  ;;  %s1329_s15 = smov %s1331_s17 }
 0x146   :  { %12 = sbr.rel (!%p10_p12) target bundleno = 3 (0x3), region = 122 }

// kernel: resnet_forward.24
= control target key start
LH: loop header
LB: loop body
LE: loop exit
PB: predicated region body
PF: predicated region fallthrough
CT: control target
= control target key end

     0   :  { %s939_s1 = inlined_call_operand.vmem [shape: bf16[256,128], index: 1, kind: input, shape index: {}]   ;;  %s940_s0 = inlined_call_operand.vmem [shape: bf16[128,256], index: 0, kind: input, shape index: {}]   ;;  %s941_s2 = inlined_call_operand.vmem [shape: f32[1,128], index: 2, kind: input, shape index: {}]   ;;  %s942_s3 = inlined_call_operand.vmem [shape: bf16[128,128], index: 3, kind: output, shape index: {}]  }
   0x1   :  { %v738_v0 = vld [vmem:[%s939_s1 + $0x40] sm:$0xff]   ;;  %v740_v2 = vld [vmem:[%s939_s1 + $0x48] sm:$0xff]   ;;  %v742_v4 = vld [vmem:[%s939_s1 + $0x50] sm:$0xff]  }
   0x2   :  { %v739_v1 = vld [vmem:[%s939_s1] sm:$0xff]   ;;  %658 = vmatprep.subr.bf16.mxu0 %v738_v0  ;;  %722 = vmatprep.subr.bf16.mxu1 %v738_v0  ;;  %v741_v3 = vld [vmem:[%s939_s1 + $0x8] sm:$0xff]   ;;  %v743_v5 = vld [vmem:[%s939_s1 + $0x10] sm:$0xff]  }
   0x3   :  { %659 = vmatpush3.bf16.msra.mxu0 %v739_v1  ;;  %730 = vmatpush3.bf16.msra.mxu1 %v739_v1  ;;  %v744_v6 = vld [vmem:[%s939_s1 + $0x58] sm:$0xff]   ;;  %v746_v8 = vld [vmem:[%s939_s1 + $0x60] sm:$0xff]   ;;  %v748_v10 = vld [vmem:[%s939_s1 + $0x68] sm:$0xff]  }
   0x4   :  { %660 = vmatprep.subr.bf16.mxu0 %v740_v2  ;;  %723 = vmatprep.subr.bf16.mxu1 %v740_v2  ;;  %v745_v7 = vld [vmem:[%s939_s1 + $0x18] sm:$0xff]   ;;  %v747_v9 = vld [vmem:[%s939_s1 + $0x20] sm:$0xff]   ;;  %v749_v13 = vld [vmem:[%s939_s1 + $0x28] sm:$0xff]  }
   0x5   :  { %v756_v11 = vld [vmem:[%s940_s0 + $0x4] ss:$8 sps:$4 sm:$0xff]   ;;  %v750_v14 = vld [vmem:[%s939_s1 + $0x70] sm:$0xff]   ;;  %v752_v16 = vld [vmem:[%s939_s1 + $0x78] sm:$0xff]  }
   0x6   :  { %v759_v12 = vld [vmem:[%s940_s0 + $0x44] ss:$8 sps:$4 sm:$0xff]   ;;  %307 = vmatprep.mubr.bf16.mxu0 %v756_v11  ;;  %v751_v15 = vld [vmem:[%s939_s1 + $0x30] sm:$0xff]   ;;  %v753_v17 = vld [vmem:[%s939_s1 + $0x38] sm:$0xff]  }
   0x7   :  { %661 = vmatpush3.bf16.msra.mxu0 %v741_v3  ;;  %731 = vmatpush3.bf16.msra.mxu1 %v741_v3  ;;  %v754_v18 = vld [vmem:[%s940_s0] ss:$8 sps:$4 sm:$0xff]   ;;  %v760_v20 = vld [vmem:[%s940_s0 + $0x14] ss:$8 sps:$4 sm:$0xff]   ;;  %v764_v22 = vld [vmem:[%s940_s0 + $0x10] ss:$8 sps:$4 sm:$0xff]  }
   0x8   :  { %662 = vmatprep.subr.bf16.mxu0 %v742_v4  ;;  %724 = vmatprep.subr.bf16.mxu1 %v742_v4  ;;  %v757_v19 = vld [vmem:[%s940_s0 + $0x40] ss:$8 sps:$4 sm:$0xff]   ;;  %v762_v21 = vld [vmem:[%s940_s0 + $0x54] ss:$8 sps:$4 sm:$0xff]   ;;  %v765_v23 = vld [vmem:[%s940_s0 + $0x50] ss:$8 sps:$4 sm:$0xff]  }
   0x9   :  { %339 = vmatprep.mubr.bf16.mxu1 %v759_v12  ;;  %v766_v24 = vld [vmem:[%s940_s0 + $0x24] ss:$8 sps:$4 sm:$0xff]   ;;  %v770_v26 = vld [vmem:[%s940_s0 + $0x20] ss:$8 sps:$4 sm:$0xff]   ;;  %v772_v28 = vld [vmem:[%s940_s0 + $0x34] ss:$8 sps:$4 sm:$0xff]  }
   0xa   :  { %v768_v25 = vld [vmem:[%s940_s0 + $0x64] ss:$8 sps:$4 sm:$0xff]   ;;  %v771_v27 = vld [vmem:[%s940_s0 + $0x60] ss:$8 sps:$4 sm:$0xff]   ;;  %v774_v29 = vld [vmem:[%s940_s0 + $0x74] ss:$8 sps:$4 sm:$0xff]  }
   0xb   :  { %663 = vmatpush3.bf16.msra.mxu0 %v743_v5  ;;  %732 = vmatpush3.bf16.msra.mxu1 %v743_v5  ;;  %v776_v30 = vld [vmem:[%s940_s0 + $0x30] ss:$8 sps:$4 sm:$0xff]   ;;  %v897_v35 = vld [vmem:[%s941_s2] ss:$0 sm:$0xff] }
   0xc   :  { %664 = vmatprep.subr.bf16.mxu0 %v744_v6  ;;  %725 = vmatprep.subr.bf16.mxu1 %v744_v6  ;;  %v777_v31 = vld [vmem:[%s940_s0 + $0x70] ss:$8 sps:$4 sm:$0xff]  }
   0xf   :  { %665 = vmatpush3.bf16.msra.mxu0 %v745_v7  ;;  %733 = vmatpush3.bf16.msra.mxu1 %v745_v7 }
  0x10   :  { %666 = vmatprep.subr.bf16.mxu0 %v746_v8  ;;  %726 = vmatprep.subr.bf16.mxu1 %v746_v8 }
  0x13   :  { %667 = vmatpush3.bf16.msra.mxu0 %v747_v9  ;;  %734 = vmatpush3.bf16.msra.mxu1 %v747_v9 }
  0x14   :  { %668 = vmatprep.subr.bf16.mxu0 %v748_v10  ;;  %727 = vmatprep.subr.bf16.mxu1 %v748_v10 }
  0x17   :  { %669 = vmatpush3.bf16.msra.mxu0 %v749_v13  ;;  %735 = vmatpush3.bf16.msra.mxu1 %v749_v13 }
  0x18   :  { %670 = vmatprep.subr.bf16.mxu0 %v750_v14  ;;  %728 = vmatprep.subr.bf16.mxu1 %v750_v14 }
  0x1b   :  { %671 = vmatpush3.bf16.msra.mxu0 %v751_v15  ;;  %736 = vmatpush3.bf16.msra.mxu1 %v751_v15 }
  0x1c   :  { %672 = vmatprep.subr.bf16.mxu0 %v752_v16  ;;  %729 = vmatprep.subr.bf16.mxu1 %v752_v16 }
  0x1f   :  { %673 = vmatpush3.bf16.msra.mxu0 %v753_v17  ;;  %737 = vmatpush3.bf16.msra.mxu1 %v753_v17 }
  0x22   :  { %308 = vmatmul.mubr.bf16.vlgmr.msra.gmra.mrb[0].mxu0 %v754_v18  ;;  %340 = vmatmul.mubr.bf16.vlgmr.msra.gmra.mrb[0].mxu1 %v757_v19 }
  0x23   :  { %315 = vmatprep.mubr.bf16.mxu0 %v760_v20  ;;  %347 = vmatprep.mubr.bf16.mxu1 %v762_v21 }
  0x2a   :  { %316 = vmatmul.mubr.bf16.gmra.mrb[4].mxu0 %v764_v22  ;;  %348 = vmatmul.mubr.bf16.gmra.mrb[4].mxu1 %v765_v23 }
  0x2b   :  { %323 = vmatprep.mubr.bf16.mxu0 %v766_v24  ;;  %355 = vmatprep.mubr.bf16.mxu1 %v768_v25 }
  0x32   :  { %324 = vmatmul.mubr.bf16.gmra.mrb[8].mxu0 %v770_v26  ;;  %356 = vmatmul.mubr.bf16.gmra.mrb[8].mxu1 %v771_v27 }
  0x33   :  { %331 = vmatprep.mubr.bf16.mxu0 %v772_v28  ;;  %363 = vmatprep.mubr.bf16.mxu1 %v774_v29 }
  0x3a   :  { %332 = vmatmul.mubr.bf16.gmra.mrb[12].mxu0 %v776_v30  ;;  %364 = vmatmul.mubr.bf16.gmra.mrb[12].mxu1 %v777_v31 }
  0xf5   :  { %v674_v32 = vpop.f32.mrb[0].mxu0  ;;  %v698_v33 = vpop.f32.mrb[0].mxu1 }
  0xf6   :  { %v675_v34 = vpop.f32.mrb[1].mxu0  ;;  %v699_v36 = vpop.f32.mrb[1].mxu1 }
  0xf7   :  { %v676_v37 = vadd.f32 %v675_v34, %v674_v32  ;;  %v700_v38 = vadd.f32 %v699_v36, %v698_v33  ;;  %v677_v39 = vpop.f32.mrb[2].mxu0  ;;  %v701_v40 = vpop.f32.mrb[2].mxu1 }
  0xf8   :  { %v678_v41 = vpop.f32.mrb[3].mxu0  ;;  %v702_v42 = vpop.f32.mrb[3].mxu1 }
  0xf9   :  { %v430_v43 = vadd.f32 %v676_v37, %v897_v35  ;;  %v438_v44 = vadd.f32 %v700_v38, %v897_v35  ;;  %v679_v45 = vadd.f32 %v678_v41, %v677_v39  ;;  %v703_v46 = vadd.f32 %v702_v42, %v701_v40 }
  0xfb   :  { %v431_v47 = vadd.f32 %v679_v45, %v897_v35  ;;  %v439_v48 = vadd.f32 %v703_v46, %v897_v35  ;;  %v446_v49 = vmax.f32 %v430_v43, 0.0  ;;  %v454_v50 = vmax.f32 %v438_v44, 0.0 }
  0xfd   :  { %v447_v51 = vmax.f32 %v431_v47, 0.0  ;;  %v455_v52 = vmax.f32 %v439_v48, 0.0  ;;  %v680_v53 = vpop.f32.mrb[4].mxu0  ;;  %v704_v54 = vpop.f32.mrb[4].mxu1 }
  0xfe   :  { %v681_v55 = vpop.f32.mrb[5].mxu0  ;;  %v705_v56 = vpop.f32.mrb[5].mxu1 }
  0xff   :  { %v614_v57 = vpack.c.bf16 %v447_v51, %v446_v49  ;;  %v634_v58 = vpack.c.bf16 %v455_v52, %v454_v50  ;;  %v682_v59 = vadd.f32 %v681_v55, %v680_v53  ;;  %v706_v60 = vadd.f32 %v705_v56, %v704_v54  ;;  %v683_v61 = vpop.f32.mrb[6].mxu0  ;;  %v707_v62 = vpop.f32.mrb[6].mxu1 }
 0x100   :  { %v684_v63 = vpop.f32.mrb[7].mxu0  ;;  %v708_v0 = vpop.f32.mrb[7].mxu1 }
 0x101   :  { %615 = vst [vmem:[%s942_s3] sm:$0xff] %v614_v57   ;;  %654 = vst [vmem:[%s942_s3 + $0x20] sm:$0xff] %v634_v58   ;;  %v432_v1 = vadd.f32 %v682_v59, %v897_v35  ;;  %v440_v2 = vadd.f32 %v706_v60, %v897_v35  ;;  %v685_v3 = vadd.f32 %v684_v63, %v683_v61 }
 0x102   :  { %v709_v4 = vadd.f32 %v708_v0, %v707_v62 }
 0x103   :  { %v433_v5 = vadd.f32 %v685_v3, %v897_v35  ;;  %v448_v7 = vmax.f32 %v432_v1, 0.0  ;;  %v456_v8 = vmax.f32 %v440_v2, 0.0 }
 0x104   :  { %v441_v6 = vadd.f32 %v709_v4, %v897_v35 }
 0x105   :  { %v449_v9 = vmax.f32 %v433_v5, 0.0  ;;  %v686_v11 = vpop.f32.mrb[8].mxu0  ;;  %v710_v12 = vpop.f32.mrb[8].mxu1 }
 0x106   :  { %v457_v10 = vmax.f32 %v441_v6, 0.0  ;;  %v687_v13 = vpop.f32.mrb[9].mxu0  ;;  %v711_v14 = vpop.f32.mrb[9].mxu1 }
 0x107   :  { %v619_v15 = vpack.c.bf16 %v449_v9, %v448_v7  ;;  %v688_v17 = vadd.f32 %v687_v13, %v686_v11  ;;  %v712_v18 = vadd.f32 %v711_v14, %v710_v12  ;;  %v689_v19 = vpop.f32.mrb[10].mxu0  ;;  %v713_v20 = vpop.f32.mrb[10].mxu1 }
 0x108   :  { %v639_v16 = vpack.c.bf16 %v457_v10, %v456_v8  ;;  %v690_v21 = vpop.f32.mrb[11].mxu0  ;;  %v714_v22 = vpop.f32.mrb[11].mxu1 }
 0x109   :  { %651 = vst [vmem:[%s942_s3 + $0x8] sm:$0xff] %v619_v15   ;;  %v434_v23 = vadd.f32 %v688_v17, %v897_v35  ;;  %v442_v24 = vadd.f32 %v712_v18, %v897_v35  ;;  %v691_v25 = vadd.f32 %v690_v21, %v689_v19  ;;  %v715_v26 = vadd.f32 %v714_v22, %v713_v20 }
 0x10a   :  { %655 = vst [vmem:[%s942_s3 + $0x28] sm:$0xff] %v639_v16  }
 0x10b   :  { %v435_v27 = vadd.f32 %v691_v25, %v897_v35  ;;  %v443_v28 = vadd.f32 %v715_v26, %v897_v35  ;;  %v450_v29 = vmax.f32 %v434_v23, 0.0  ;;  %v458_v30 = vmax.f32 %v442_v24, 0.0 }
 0x10d   :  { %v451_v31 = vmax.f32 %v435_v27, 0.0  ;;  %v459_v32 = vmax.f32 %v443_v28, 0.0  ;;  %v692_v33 = vpop.f32.mrb[12].mxu0  ;;  %v716_v34 = vpop.f32.mrb[12].mxu1 }
 0x10e   :  { %v693_v36 = vpop.f32.mrb[13].mxu0  ;;  %v717_v37 = vpop.f32.mrb[13].mxu1 }
 0x10f   :  { %v624_v38 = vpack.c.bf16 %v451_v31, %v450_v29  ;;  %v644_v39 = vpack.c.bf16 %v459_v32, %v458_v30  ;;  %v694_v40 = vadd.f32 %v693_v36, %v692_v33  ;;  %v718_v41 = vadd.f32 %v717_v37, %v716_v34  ;;  %v695_v42 = vpop.f32.mrb[14].mxu0  ;;  %v719_v43 = vpop.f32.mrb[14].mxu1 }
 0x110   :  { %v696_v44 = vpop.f32.mrb[15].mxu0  ;;  %v720_v45 = vpop.f32.mrb[15].mxu1 }
 0x111   :  { %652 = vst [vmem:[%s942_s3 + $0x10] sm:$0xff] %v624_v38   ;;  %656 = vst [vmem:[%s942_s3 + $0x30] sm:$0xff] %v644_v39   ;;  %v436_v46 = vadd.f32 %v694_v40, %v897_v35  ;;  %v444_v47 = vadd.f32 %v718_v41, %v897_v35  ;;  %v697_v48 = vadd.f32 %v696_v44, %v695_v42 }
 0x112   :  { %v721_v49 = vadd.f32 %v720_v45, %v719_v43 }
 0x113   :  { %v437_v50 = vadd.f32 %v697_v48, %v897_v35  ;;  %v452_v52 = vmax.f32 %v436_v46, 0.0  ;;  %v460_v53 = vmax.f32 %v444_v47, 0.0 }
 0x114   :  { %v445_v51 = vadd.f32 %v721_v49, %v897_v35 }
 0x115   :  { %v453_v54 = vmax.f32 %v437_v50, 0.0 }
 0x116   :  { %v461_v55 = vmax.f32 %v445_v51, 0.0 }
 0x117   :  { %v629_v56 = vpack.c.bf16 %v453_v54, %v452_v52 }
 0x118   :  { %v649_v57 = vpack.c.bf16 %v461_v55, %v460_v53 }
 0x119   :  { %653 = vst [vmem:[%s942_s3 + $0x18] sm:$0xff] %v629_v56  }
 0x11a   :  { %657 = vst [vmem:[%s942_s3 + $0x38] sm:$0xff] %v649_v57  }

// kernel: resnet_forward.22
= control target key start
LH: loop header
LB: loop body
LE: loop exit
PB: predicated region body
PF: predicated region fallthrough
CT: control target
= control target key end

     0   :  { %v720_v1 = vmov 0   ;;  %v457_v25 = vlaneseq  ;;  %s908_s1 = inlined_call_operand.vmem [shape: bf16[128,256], index: 1, kind: input, shape index: {}]   ;;  %s909_s0 = inlined_call_operand.vmem [shape: bf16[128,128], index: 0, kind: input, shape index: {}]   ;;  %s910_s2 = inlined_call_operand.vmem [shape: f32[1,256], index: 2, kind: input, shape index: {}]   ;;  %s911_s3 = inlined_call_operand.vmem [shape: bf16[128,256], index: 3, kind: output, shape index: {}]  }
   0x1   :  { %v688_v0 = vld [vmem:[%s908_s1 + $0x4] ss:$8 sps:$4 sm:$0xff]   ;;  %275 = vmatprep.mubr.bf16.mxu0 %v720_v1  ;;  %315 = vmatprep.mubr.bf16.mxu1 %v720_v1  ;;  %v690_v2 = vld [vmem:[%s908_s1] ss:$8 sps:$4 sm:$0xff]   ;;  %v691_v3 = vld [vmem:[%s908_s1 + $0x14] ss:$8 sps:$4 sm:$0xff]  }
   0x2   :  { %243 = vmatprep.subr.bf16.mxu0 %v688_v0  ;;  %671 = vmatprep.subr.bf16.mxu1 %v688_v0  ;;  %v693_v4 = vld [vmem:[%s908_s1 + $0x10] ss:$8 sps:$4 sm:$0xff]   ;;  %v694_v5 = vld [vmem:[%s908_s1 + $0x24] ss:$8 sps:$4 sm:$0xff]   ;;  %v696_v6 = vld [vmem:[%s908_s1 + $0x20] ss:$8 sps:$4 sm:$0xff]  }
   0x3   :  { %244 = vmatpush1.bf16.msra.mxu0 %v690_v2  ;;  %679 = vmatpush1.bf16.msra.mxu1 %v690_v2  ;;  %v697_v7 = vld [vmem:[%s908_s1 + $0x34] ss:$8 sps:$4 sm:$0xff]   ;;  %v699_v8 = vld [vmem:[%s908_s1 + $0x30] ss:$8 sps:$4 sm:$0xff]   ;;  %v700_v9 = vld [vmem:[%s908_s1 + $0x44] ss:$8 sps:$4 sm:$0xff]  }
   0x4   :  { %245 = vmatprep.subr.bf16.mxu0 %v691_v3  ;;  %672 = vmatprep.subr.bf16.mxu1 %v691_v3  ;;  %v702_v10 = vld [vmem:[%s908_s1 + $0x40] ss:$8 sps:$4 sm:$0xff]   ;;  %v703_v11 = vld [vmem:[%s908_s1 + $0x54] ss:$8 sps:$4 sm:$0xff]   ;;  %v705_v12 = vld [vmem:[%s908_s1 + $0x50] ss:$8 sps:$4 sm:$0xff]  }
   0x5   :  { %v706_v13 = vld [vmem:[%s908_s1 + $0x64] ss:$8 sps:$4 sm:$0xff]   ;;  %v708_v14 = vld [vmem:[%s908_s1 + $0x60] ss:$8 sps:$4 sm:$0xff]   ;;  %v709_v15 = vld [vmem:[%s908_s1 + $0x74] ss:$8 sps:$4 sm:$0xff]  }
   0x6   :  { %v711_v16 = vld [vmem:[%s908_s1 + $0x70] ss:$8 sps:$4 sm:$0xff]   ;;  %v712_v17 = vld [vmem:[%s909_s0] sm:$0xff]   ;;  %v714_v19 = vld [vmem:[%s909_s0 + $0x8] sm:$0xff]   ;;  %v458_v26 = vshrl.u32 %v457_v25, 7 }
   0x7   :  { %246 = vmatpush1.bf16.msra.mxu0 %v693_v4  ;;  %680 = vmatpush1.bf16.msra.mxu1 %v693_v4  ;;  %v713_v18 = vld [vmem:[%s909_s0 + $0x20] sm:$0xff]   ;;  %v715_v20 = vld [vmem:[%s909_s0 + $0x28] sm:$0xff]   ;;  %v716_v21 = vld [vmem:[%s909_s0 + $0x10] sm:$0xff]  }
   0x8   :  { %247 = vmatprep.subr.bf16.mxu0 %v694_v5  ;;  %673 = vmatprep.subr.bf16.mxu1 %v694_v5  ;;  %v717_v22 = vld [vmem:[%s909_s0 + $0x30] sm:$0xff]   ;;  %v718_v23 = vld [vmem:[%s909_s0 + $0x18] sm:$0xff]   ;;  %v459_v27 = vsub.s32 0, %v458_v26  ;;  %v455_v28 = vld [vmem:[%s910_s2] sm:$0x3]  ;;  %v463_v29 = vsub.s32 1, %v458_v26 }
   0x9   :  { %v719_v24 = vld [vmem:[%s909_s0 + $0x38] sm:$0xff]  }
   0xa   :  { %v824_v30 = vrot.slane %v455_v28, %v459_v27  ;;  %v826_v31 = vrot.slane %v455_v28, %v463_v29 }
   0xb   :  { %248 = vmatpush1.bf16.msra.mxu0 %v696_v6  ;;  %681 = vmatpush1.bf16.msra.mxu1 %v696_v6 }
   0xc   :  { %249 = vmatprep.subr.bf16.mxu0 %v697_v7  ;;  %674 = vmatprep.subr.bf16.mxu1 %v697_v7 }
   0xf   :  { %250 = vmatpush1.bf16.msra.mxu0 %v699_v8  ;;  %682 = vmatpush1.bf16.msra.mxu1 %v699_v8 }
  0x10   :  { %251 = vmatprep.subr.bf16.mxu0 %v700_v9  ;;  %675 = vmatprep.subr.bf16.mxu1 %v700_v9 }
  0x13   :  { %252 = vmatpush1.bf16.msra.mxu0 %v702_v10  ;;  %683 = vmatpush1.bf16.msra.mxu1 %v702_v10 }
  0x14   :  { %253 = vmatprep.subr.bf16.mxu0 %v703_v11  ;;  %676 = vmatprep.subr.bf16.mxu1 %v703_v11 }
  0x17   :  { %254 = vmatpush1.bf16.msra.mxu0 %v705_v12  ;;  %684 = vmatpush1.bf16.msra.mxu1 %v705_v12 }
  0x18   :  { %255 = vmatprep.subr.bf16.mxu0 %v706_v13  ;;  %677 = vmatprep.subr.bf16.mxu1 %v706_v13 }
  0x1b   :  { %256 = vmatpush1.bf16.msra.mxu0 %v708_v14  ;;  %685 = vmatpush1.bf16.msra.mxu1 %v708_v14 }
  0x1c   :  { %257 = vmatprep.subr.bf16.mxu0 %v709_v15  ;;  %678 = vmatprep.subr.bf16.mxu1 %v709_v15 }
  0x1f   :  { %258 = vmatpush1.bf16.msra.mxu0 %v711_v16  ;;  %686 = vmatpush1.bf16.msra.mxu1 %v711_v16 }
  0x22   :  { %276 = vmatmul.mubr.bf16.vlgmr.msra.gmra.mrb[0].mxu0 %v712_v17  ;;  %316 = vmatmul.mubr.bf16.vlgmr.msra.gmra.mrb[0].mxu1 %v713_v18 }
  0x23   :  { %285 = vmatprep.mubr.bf16.mxu0 %v720_v1  ;;  %325 = vmatprep.mubr.bf16.mxu1 %v720_v1 }
  0x2a   :  { %286 = vmatmul.mubr.bf16.gmra.mrb[4].mxu0 %v714_v19  ;;  %326 = vmatmul.mubr.bf16.gmra.mrb[4].mxu1 %v715_v20 }
  0x2b   :  { %295 = vmatprep.mubr.bf16.mxu0 %v720_v1  ;;  %335 = vmatprep.mubr.bf16.mxu1 %v720_v1 }
  0x32   :  { %296 = vmatmul.mubr.bf16.gmra.mrb[8].mxu0 %v716_v21  ;;  %336 = vmatmul.mubr.bf16.gmra.mrb[8].mxu1 %v717_v22 }
  0x33   :  { %305 = vmatprep.mubr.bf16.mxu0 %v720_v1  ;;  %345 = vmatprep.mubr.bf16.mxu1 %v720_v1 }
  0x3a   :  { %306 = vmatmul.mubr.bf16.gmra.mrb[12].mxu0 %v718_v23  ;;  %346 = vmatmul.mubr.bf16.gmra.mrb[12].mxu1 %v719_v24 }
  0xf5   :  { %v277_v32 = vpop.f32.mrb[0].mxu0  ;;  %v317_v33 = vpop.f32.mrb[0].mxu1 }
  0xf6   :  { %v467_v34 = vadd.f32 %v824_v30, %v277_v32  ;;  %v483_v35 = vadd.f32 %v824_v30, %v317_v33  ;;  %v279_v36 = vpop.f32.mrb[1].mxu0  ;;  %v319_v37 = vpop.f32.mrb[1].mxu1 }
  0xf7   :  { %v468_v38 = vadd.f32 %v826_v31, %v279_v36  ;;  %v484_v39 = vadd.f32 %v826_v31, %v319_v37  ;;  %v281_v40 = vpop.f32.mrb[2].mxu0  ;;  %v321_v41 = vpop.f32.mrb[2].mxu1 }
  0xf8   :  { %v469_v42 = vadd.f32 %v824_v30, %v281_v40  ;;  %v485_v43 = vadd.f32 %v824_v30, %v321_v41  ;;  %v283_v44 = vpop.f32.mrb[3].mxu0  ;;  %v323_v45 = vpop.f32.mrb[3].mxu1 }
  0xf9   :  { %v655_v46 = vpack.c.bf16 %v468_v38, %v467_v34  ;;  %v663_v47 = vpack.c.bf16 %v484_v39, %v483_v35  ;;  %v470_v48 = vadd.f32 %v826_v31, %v283_v44  ;;  %v486_v49 = vadd.f32 %v826_v31, %v323_v45 }
  0xfb   :  { %595 = vst [vmem:[%s911_s3] sm:$0xff] %v655_v46  ;;  %603 = vst [vmem:[%s911_s3 + $0x40] sm:$0xff] %v663_v47  ;;  %v656_v50 = vpack.c.bf16 %v470_v48, %v469_v42  ;;  %v664_v51 = vpack.c.bf16 %v486_v49, %v485_v43 }
  0xfd   :  { %596 = vst [vmem:[%s911_s3 + $0x8] sm:$0xff] %v656_v50  ;;  %604 = vst [vmem:[%s911_s3 + $0x48] sm:$0xff] %v664_v51  ;;  %v287_v52 = vpop.f32.mrb[4].mxu0  ;;  %v327_v53 = vpop.f32.mrb[4].mxu1 }
  0xfe   :  { %v471_v54 = vadd.f32 %v824_v30, %v287_v52  ;;  %v487_v55 = vadd.f32 %v824_v30, %v327_v53  ;;  %v289_v56 = vpop.f32.mrb[5].mxu0  ;;  %v329_v57 = vpop.f32.mrb[5].mxu1 }
  0xff   :  { %v472_v58 = vadd.f32 %v826_v31, %v289_v56  ;;  %v488_v59 = vadd.f32 %v826_v31, %v329_v57  ;;  %v291_v60 = vpop.f32.mrb[6].mxu0  ;;  %v331_v61 = vpop.f32.mrb[6].mxu1 }
 0x100   :  { %v473_v62 = vadd.f32 %v824_v30, %v291_v60  ;;  %v489_v63 = vadd.f32 %v824_v30, %v331_v61  ;;  %v293_v0 = vpop.f32.mrb[7].mxu0  ;;  %v333_v1 = vpop.f32.mrb[7].mxu1 }
 0x101   :  { %v657_v2 = vpack.c.bf16 %v472_v58, %v471_v54  ;;  %v665_v3 = vpack.c.bf16 %v488_v59, %v487_v55  ;;  %v474_v4 = vadd.f32 %v826_v31, %v293_v0  ;;  %v490_v5 = vadd.f32 %v826_v31, %v333_v1 }
 0x103   :  { %597 = vst [vmem:[%s911_s3 + $0x10] sm:$0xff] %v657_v2  ;;  %605 = vst [vmem:[%s911_s3 + $0x50] sm:$0xff] %v665_v3  ;;  %v658_v6 = vpack.c.bf16 %v474_v4, %v473_v62  ;;  %v666_v7 = vpack.c.bf16 %v490_v5, %v489_v63 }
 0x105   :  { %598 = vst [vmem:[%s911_s3 + $0x18] sm:$0xff] %v658_v6  ;;  %606 = vst [vmem:[%s911_s3 + $0x58] sm:$0xff] %v666_v7  ;;  %v297_v8 = vpop.f32.mrb[8].mxu0  ;;  %v337_v9 = vpop.f32.mrb[8].mxu1 }
 0x106   :  { %v475_v10 = vadd.f32 %v824_v30, %v297_v8  ;;  %v491_v11 = vadd.f32 %v824_v30, %v337_v9  ;;  %v299_v12 = vpop.f32.mrb[9].mxu0  ;;  %v339_v13 = vpop.f32.mrb[9].mxu1 }
 0x107   :  { %v476_v14 = vadd.f32 %v826_v31, %v299_v12  ;;  %v492_v15 = vadd.f32 %v826_v31, %v339_v13  ;;  %v301_v16 = vpop.f32.mrb[10].mxu0  ;;  %v341_v17 = vpop.f32.mrb[10].mxu1 }
 0x108   :  { %v477_v18 = vadd.f32 %v824_v30, %v301_v16  ;;  %v493_v19 = vadd.f32 %v824_v30, %v341_v17  ;;  %v303_v20 = vpop.f32.mrb[11].mxu0  ;;  %v343_v21 = vpop.f32.mrb[11].mxu1 }
 0x109   :  { %v659_v22 = vpack.c.bf16 %v476_v14, %v475_v10  ;;  %v667_v23 = vpack.c.bf16 %v492_v15, %v491_v11  ;;  %v478_v24 = vadd.f32 %v826_v31, %v303_v20  ;;  %v494_v25 = vadd.f32 %v826_v31, %v343_v21 }
 0x10b   :  { %599 = vst [vmem:[%s911_s3 + $0x20] sm:$0xff] %v659_v22  ;;  %607 = vst [vmem:[%s911_s3 + $0x60] sm:$0xff] %v667_v23  ;;  %v660_v26 = vpack.c.bf16 %v478_v24, %v477_v18  ;;  %v668_v27 = vpack.c.bf16 %v494_v25, %v493_v19 }
 0x10d   :  { %600 = vst [vmem:[%s911_s3 + $0x28] sm:$0xff] %v660_v26  ;;  %608 = vst [vmem:[%s911_s3 + $0x68] sm:$0xff] %v668_v27  ;;  %v307_v28 = vpop.f32.mrb[12].mxu0  ;;  %v347_v29 = vpop.f32.mrb[12].mxu1 }
 0x10e   :  { %v479_v32 = vadd.f32 %v824_v30, %v307_v28  ;;  %v495_v33 = vadd.f32 %v824_v30, %v347_v29  ;;  %v309_v34 = vpop.f32.mrb[13].mxu0  ;;  %v349_v35 = vpop.f32.mrb[13].mxu1 }
 0x10f   :  { %v480_v36 = vadd.f32 %v826_v31, %v309_v34  ;;  %v496_v37 = vadd.f32 %v826_v31, %v349_v35  ;;  %v311_v38 = vpop.f32.mrb[14].mxu0  ;;  %v351_v39 = vpop.f32.mrb[14].mxu1 }
 0x110   :  { %v481_v40 = vadd.f32 %v824_v30, %v311_v38  ;;  %v497_v41 = vadd.f32 %v824_v30, %v351_v39  ;;  %v313_v42 = vpop.f32.mrb[15].mxu0  ;;  %v353_v43 = vpop.f32.mrb[15].mxu1 }
 0x111   :  { %v661_v44 = vpack.c.bf16 %v480_v36, %v479_v32  ;;  %v669_v45 = vpack.c.bf16 %v496_v37, %v495_v33  ;;  %v482_v46 = vadd.f32 %v826_v31, %v313_v42  ;;  %v498_v47 = vadd.f32 %v826_v31, %v353_v43 }
 0x113   :  { %601 = vst [vmem:[%s911_s3 + $0x30] sm:$0xff] %v661_v44  ;;  %609 = vst [vmem:[%s911_s3 + $0x70] sm:$0xff] %v669_v45  ;;  %v662_v48 = vpack.c.bf16 %v482_v46, %v481_v40  ;;  %v670_v49 = vpack.c.bf16 %v498_v47, %v497_v41 }
 0x115   :  { %602 = vst [vmem:[%s911_s3 + $0x38] sm:$0xff] %v662_v48  ;;  %610 = vst [vmem:[%s911_s3 + $0x78] sm:$0xff] %v670_v49 }

// kernel: resnet_forward.23
= control target key start
LH: loop header
LB: loop body
LE: loop exit
PB: predicated region body
PF: predicated region fallthrough
CT: control target
= control target key end

     0   :  { %v835_v1 = vmov 0   ;;  %v460_v25 = vlaneseq  ;;  %s1156_s1 = inlined_call_operand.vmem [shape: bf16[128,256], index: 1, kind: input, shape index: {}]   ;;  %s1157_s0 = inlined_call_operand.vmem [shape: bf16[128,128], index: 0, kind: input, shape index: {}]   ;;  %s1158_s2 = inlined_call_operand.vmem [shape: f32[1,256], index: 2, kind: input, shape index: {}]   ;;  %s1159_s3 = inlined_call_operand.vmem [shape: bf16[128,256], index: 3, kind: input, shape index: {}, may-alias: {3,4}]   ;;  %s1160_s4 = inlined_call_operand.vmem [shape: bf16[128,256], index: 4, kind: output, shape index: {}, may-alias: {3,4}]  }
   0x1   :  { %v803_v0 = vld [vmem:[%s1156_s1 + $0x4] ss:$8 sps:$4 sm:$0xff]   ;;  %278 = vmatprep.mubr.bf16.mxu0 %v835_v1  ;;  %318 = vmatprep.mubr.bf16.mxu1 %v835_v1  ;;  %v805_v2 = vld [vmem:[%s1156_s1] ss:$8 sps:$4 sm:$0xff]   ;;  %v806_v3 = vld [vmem:[%s1156_s1 + $0x14] ss:$8 sps:$4 sm:$0xff]  }
   0x2   :  { %246 = vmatprep.subr.bf16.mxu0 %v803_v0  ;;  %786 = vmatprep.subr.bf16.mxu1 %v803_v0  ;;  %v808_v4 = vld [vmem:[%s1156_s1 + $0x10] ss:$8 sps:$4 sm:$0xff]   ;;  %v809_v5 = vld [vmem:[%s1156_s1 + $0x24] ss:$8 sps:$4 sm:$0xff]   ;;  %v811_v6 = vld [vmem:[%s1156_s1 + $0x20] ss:$8 sps:$4 sm:$0xff]  }
   0x3   :  { %247 = vmatpush1.bf16.msra.mxu0 %v805_v2  ;;  %794 = vmatpush1.bf16.msra.mxu1 %v805_v2  ;;  %v812_v7 = vld [vmem:[%s1156_s1 + $0x34] ss:$8 sps:$4 sm:$0xff]   ;;  %v814_v8 = vld [vmem:[%s1156_s1 + $0x30] ss:$8 sps:$4 sm:$0xff]   ;;  %v815_v9 = vld [vmem:[%s1156_s1 + $0x44] ss:$8 sps:$4 sm:$0xff]  }
   0x4   :  { %248 = vmatprep.subr.bf16.mxu0 %v806_v3  ;;  %787 = vmatprep.subr.bf16.mxu1 %v806_v3  ;;  %v817_v10 = vld [vmem:[%s1156_s1 + $0x40] ss:$8 sps:$4 sm:$0xff]   ;;  %v818_v11 = vld [vmem:[%s1156_s1 + $0x54] ss:$8 sps:$4 sm:$0xff]   ;;  %v820_v12 = vld [vmem:[%s1156_s1 + $0x50] ss:$8 sps:$4 sm:$0xff]  }
   0x5   :  { %v821_v13 = vld [vmem:[%s1156_s1 + $0x64] ss:$8 sps:$4 sm:$0xff]   ;;  %v823_v14 = vld [vmem:[%s1156_s1 + $0x60] ss:$8 sps:$4 sm:$0xff]   ;;  %v824_v15 = vld [vmem:[%s1156_s1 + $0x74] ss:$8 sps:$4 sm:$0xff]  }
   0x6   :  { %v826_v16 = vld [vmem:[%s1156_s1 + $0x70] ss:$8 sps:$4 sm:$0xff]   ;;  %v827_v17 = vld [vmem:[%s1157_s0] sm:$0xff]   ;;  %v829_v19 = vld [vmem:[%s1157_s0 + $0x8] sm:$0xff]   ;;  %v461_v26 = vshrl.u32 %v460_v25, 7 }
   0x7   :  { %249 = vmatpush1.bf16.msra.mxu0 %v808_v4  ;;  %795 = vmatpush1.bf16.msra.mxu1 %v808_v4  ;;  %v828_v18 = vld [vmem:[%s1157_s0 + $0x20] sm:$0xff]   ;;  %v830_v20 = vld [vmem:[%s1157_s0 + $0x28] sm:$0xff]   ;;  %v831_v21 = vld [vmem:[%s1157_s0 + $0x10] sm:$0xff]  }
   0x8   :  { %250 = vmatprep.subr.bf16.mxu0 %v809_v5  ;;  %788 = vmatprep.subr.bf16.mxu1 %v809_v5  ;;  %v832_v22 = vld [vmem:[%s1157_s0 + $0x30] sm:$0xff]   ;;  %v833_v23 = vld [vmem:[%s1157_s0 + $0x18] sm:$0xff]   ;;  %v462_v27 = vsub.s32 0, %v461_v26  ;;  %v466_v28 = vsub.s32 1, %v461_v26  ;;  %v458_v29 = vld [vmem:[%s1158_s2] sm:$0x3] }
   0x9   :  { %v834_v24 = vld [vmem:[%s1157_s0 + $0x38] sm:$0xff]   ;;  %v502_v30 = vld [vmem:[%s1159_s3] sm:$0xff]  ;;  %v503_v32 = vld [vmem:[%s1159_s3 + $0x8] sm:$0xff] }
   0xa   :  { %v510_v31 = vld [vmem:[%s1159_s3 + $0x40] sm:$0xff]  ;;  %v511_v33 = vld [vmem:[%s1159_s3 + $0x48] sm:$0xff]  ;;  %v956_v34 = vrot.slane %v458_v29, %v462_v27  ;;  %v958_v35 = vrot.slane %v458_v29, %v466_v28  ;;  %v963_v36 = vld [vmem:[%s1159_s3 + $0x10] sm:$0xff]  ;;  %v518_v38 = vunpack.c.l.bf16 %v502_v30  ;;  %v519_v40 = vunpack.c.h.bf16 %v502_v30 }
   0xb   :  { %251 = vmatpush1.bf16.msra.mxu0 %v811_v6  ;;  %796 = vmatpush1.bf16.msra.mxu1 %v811_v6  ;;  %v968_v37 = vld [vmem:[%s1159_s3 + $0x50] sm:$0xff]  ;;  %v534_v39 = vunpack.c.l.bf16 %v510_v31  ;;  %v535_v41 = vunpack.c.h.bf16 %v510_v31  ;;  %v973_v42 = vld [vmem:[%s1159_s3 + $0x18] sm:$0xff]  ;;  %v520_v44 = vunpack.c.l.bf16 %v503_v32  ;;  %v536_v45 = vunpack.c.l.bf16 %v511_v33  ;;  %v983_v48 = vld [vmem:[%s1159_s3 + $0x20] sm:$0xff] }
   0xc   :  { %252 = vmatprep.subr.bf16.mxu0 %v812_v7  ;;  %789 = vmatprep.subr.bf16.mxu1 %v812_v7  ;;  %v978_v43 = vld [vmem:[%s1159_s3 + $0x58] sm:$0xff]  ;;  %v521_v46 = vunpack.c.h.bf16 %v503_v32  ;;  %v537_v47 = vunpack.c.h.bf16 %v511_v33  ;;  %v988_v49 = vld [vmem:[%s1159_s3 + $0x60] sm:$0xff]  ;;  %v522_v50 = vunpack.c.l.bf16 %v963_v36  ;;  %v538_v51 = vunpack.c.l.bf16 %v968_v37 }
   0xd   :  { %v523_v52 = vunpack.c.h.bf16 %v963_v36  ;;  %v539_v53 = vunpack.c.h.bf16 %v968_v37  ;;  %v524_v56 = vunpack.c.l.bf16 %v973_v42  ;;  %v540_v57 = vunpack.c.l.bf16 %v978_v43 }
   0xe   :  { %v525_v58 = vunpack.c.h.bf16 %v973_v42  ;;  %v541_v59 = vunpack.c.h.bf16 %v978_v43  ;;  %v526_v0 = vunpack.c.l.bf16 %v983_v48  ;;  %v527_v6 = vunpack.c.h.bf16 %v983_v48 }
   0xf   :  { %253 = vmatpush1.bf16.msra.mxu0 %v814_v8  ;;  %797 = vmatpush1.bf16.msra.mxu1 %v814_v8  ;;  %v543_v7 = vunpack.c.h.bf16 %v988_v49 }
  0x10   :  { %254 = vmatprep.subr.bf16.mxu0 %v815_v9  ;;  %790 = vmatprep.subr.bf16.mxu1 %v815_v9 }
  0x13   :  { %255 = vmatpush1.bf16.msra.mxu0 %v817_v10  ;;  %798 = vmatpush1.bf16.msra.mxu1 %v817_v10 }
  0x14   :  { %256 = vmatprep.subr.bf16.mxu0 %v818_v11  ;;  %791 = vmatprep.subr.bf16.mxu1 %v818_v11 }
  0x17   :  { %257 = vmatpush1.bf16.msra.mxu0 %v820_v12  ;;  %799 = vmatpush1.bf16.msra.mxu1 %v820_v12 }
  0x18   :  { %258 = vmatprep.subr.bf16.mxu0 %v821_v13  ;;  %792 = vmatprep.subr.bf16.mxu1 %v821_v13 }
  0x1b   :  { %259 = vmatpush1.bf16.msra.mxu0 %v823_v14  ;;  %800 = vmatpush1.bf16.msra.mxu1 %v823_v14 }
  0x1c   :  { %260 = vmatprep.subr.bf16.mxu0 %v824_v15  ;;  %793 = vmatprep.subr.bf16.mxu1 %v824_v15 }
  0x1f   :  { %261 = vmatpush1.bf16.msra.mxu0 %v826_v16  ;;  %801 = vmatpush1.bf16.msra.mxu1 %v826_v16 }
  0x22   :  { %279 = vmatmul.mubr.bf16.vlgmr.msra.gmra.mrb[0].mxu0 %v827_v17  ;;  %319 = vmatmul.mubr.bf16.vlgmr.msra.gmra.mrb[0].mxu1 %v828_v18  ;;  %v1013_v18 = vld [vmem:[%s1159_s3 + $0x28] sm:$0xff] }
  0x23   :  { %288 = vmatprep.mubr.bf16.mxu0 %v835_v1  ;;  %328 = vmatprep.mubr.bf16.mxu1 %v835_v1  ;;  %v528_v30 = vunpack.c.l.bf16 %v1013_v18 }
  0x2a   :  { %289 = vmatmul.mubr.bf16.gmra.mrb[4].mxu0 %v829_v19  ;;  %329 = vmatmul.mubr.bf16.gmra.mrb[4].mxu1 %v830_v20  ;;  %v1018_v19 = vld [vmem:[%s1159_s3 + $0x68] sm:$0xff] }
  0x2b   :  { %298 = vmatprep.mubr.bf16.mxu0 %v835_v1  ;;  %338 = vmatprep.mubr.bf16.mxu1 %v835_v1  ;;  %v544_v31 = vunpack.c.l.bf16 %v1018_v19 }
  0x32   :  { %299 = vmatmul.mubr.bf16.gmra.mrb[8].mxu0 %v831_v21  ;;  %339 = vmatmul.mubr.bf16.gmra.mrb[8].mxu1 %v832_v22 }
  0x33   :  { %308 = vmatprep.mubr.bf16.mxu0 %v835_v1  ;;  %348 = vmatprep.mubr.bf16.mxu1 %v835_v1  ;;  %v542_v1 = vunpack.c.l.bf16 %v988_v49 }
  0x3a   :  { %309 = vmatmul.mubr.bf16.gmra.mrb[12].mxu0 %v833_v23  ;;  %349 = vmatmul.mubr.bf16.gmra.mrb[12].mxu1 %v834_v24 }
  0xf5   :  { %v280_v54 = vpop.f32.mrb[0].mxu0  ;;  %v320_v55 = vpop.f32.mrb[0].mxu1 }
  0xf6   :  { %v470_v60 = vadd.f32 %v956_v34, %v280_v54  ;;  %v486_v61 = vadd.f32 %v956_v34, %v320_v55  ;;  %v282_v62 = vpop.f32.mrb[1].mxu0  ;;  %v322_v63 = vpop.f32.mrb[1].mxu1 }
  0xf7   :  { %v471_v2 = vadd.f32 %v958_v35, %v282_v62  ;;  %v487_v3 = vadd.f32 %v958_v35, %v322_v63  ;;  %v284_v4 = vpop.f32.mrb[2].mxu0  ;;  %v324_v5 = vpop.f32.mrb[2].mxu1 }
  0xf8   :  { %v550_v8 = vadd.f32 %v518_v38, %v470_v60  ;;  %v566_v9 = vadd.f32 %v534_v39, %v486_v61  ;;  %v472_v10 = vadd.f32 %v956_v34, %v284_v4  ;;  %v488_v11 = vadd.f32 %v956_v34, %v324_v5  ;;  %v286_v12 = vpop.f32.mrb[3].mxu0  ;;  %v326_v13 = vpop.f32.mrb[3].mxu1 }
  0xf9   :  { %v551_v14 = vadd.f32 %v519_v40, %v471_v2  ;;  %v567_v15 = vadd.f32 %v535_v41, %v487_v3  ;;  %v473_v16 = vadd.f32 %v958_v35, %v286_v12  ;;  %v489_v17 = vadd.f32 %v958_v35, %v326_v13 }
  0xfa   :  { %v582_v20 = vmax.f32 %v550_v8, 0.0  ;;  %v598_v21 = vmax.f32 %v566_v9, 0.0  ;;  %v552_v22 = vadd.f32 %v520_v44, %v472_v10  ;;  %v568_v23 = vadd.f32 %v536_v45, %v488_v11 }
  0xfb   :  { %v583_v24 = vmax.f32 %v551_v14, 0.0  ;;  %v599_v25 = vmax.f32 %v567_v15, 0.0  ;;  %v553_v26 = vadd.f32 %v521_v46, %v473_v16  ;;  %v569_v27 = vadd.f32 %v537_v47, %v489_v17 }
  0xfc   :  { %v584_v28 = vmax.f32 %v552_v22, 0.0  ;;  %v600_v29 = vmax.f32 %v568_v23, 0.0  ;;  %v529_v46 = vunpack.c.h.bf16 %v1013_v18  ;;  %v545_v47 = vunpack.c.h.bf16 %v1018_v19 }
  0xfd   :  { %v770_v32 = vpack.c.bf16 %v583_v24, %v582_v20  ;;  %v778_v33 = vpack.c.bf16 %v599_v25, %v598_v21  ;;  %v585_v38 = vmax.f32 %v553_v26, 0.0  ;;  %v601_v39 = vmax.f32 %v569_v27, 0.0  ;;  %v290_v40 = vpop.f32.mrb[4].mxu0  ;;  %v330_v41 = vpop.f32.mrb[4].mxu1 }
  0xfe   :  { %v474_v54 = vadd.f32 %v956_v34, %v290_v40  ;;  %v490_v44 = vadd.f32 %v956_v34, %v330_v41  ;;  %v292_v45 = vpop.f32.mrb[5].mxu0  ;;  %v332_v55 = vpop.f32.mrb[5].mxu1 }
  0xff   :  { %710 = vst [vmem:[%s1160_s4] sm:$0xff] %v770_v32  ;;  %718 = vst [vmem:[%s1160_s4 + $0x40] sm:$0xff] %v778_v33  ;;  %v771_v60 = vpack.c.bf16 %v585_v38, %v584_v28  ;;  %v779_v61 = vpack.c.bf16 %v601_v39, %v600_v29  ;;  %v475_v62 = vadd.f32 %v958_v35, %v292_v45  ;;  %v294_v2 = vpop.f32.mrb[6].mxu0  ;;  %v334_v3 = vpop.f32.mrb[6].mxu1 }
 0x100   :  { %v491_v63 = vadd.f32 %v958_v35, %v332_v55  ;;  %v554_v4 = vadd.f32 %v522_v50, %v474_v54  ;;  %v570_v5 = vadd.f32 %v538_v51, %v490_v44  ;;  %v476_v8 = vadd.f32 %v956_v34, %v294_v2  ;;  %v296_v10 = vpop.f32.mrb[7].mxu0  ;;  %v336_v11 = vpop.f32.mrb[7].mxu1 }
 0x101   :  { %v492_v9 = vadd.f32 %v956_v34, %v334_v3  ;;  %711 = vst [vmem:[%s1160_s4 + $0x8] sm:$0xff] %v771_v60  ;;  %719 = vst [vmem:[%s1160_s4 + $0x48] sm:$0xff] %v779_v61  ;;  %v555_v50 = vadd.f32 %v523_v52, %v475_v62  ;;  %v477_v12 = vadd.f32 %v958_v35, %v296_v10 }
 0x102   :  { %v571_v51 = vadd.f32 %v539_v53, %v491_v63  ;;  %v493_v13 = vadd.f32 %v958_v35, %v336_v11  ;;  %v586_v16 = vmax.f32 %v554_v4, 0.0  ;;  %v602_v36 = vmax.f32 %v570_v5, 0.0 }
 0x103   :  { %v556_v37 = vadd.f32 %v524_v56, %v476_v8  ;;  %v572_v52 = vadd.f32 %v540_v57, %v492_v9  ;;  %v587_v53 = vmax.f32 %v555_v50, 0.0  ;;  %v557_v20 = vadd.f32 %v525_v58, %v477_v12 }
 0x104   :  { %v603_v17 = vmax.f32 %v571_v51, 0.0  ;;  %v573_v21 = vadd.f32 %v541_v59, %v493_v13 }
 0x105   :  { %v588_v22 = vmax.f32 %v556_v37, 0.0  ;;  %v604_v23 = vmax.f32 %v572_v52, 0.0  ;;  %v772_v26 = vpack.c.bf16 %v587_v53, %v586_v16  ;;  %v589_v56 = vmax.f32 %v557_v20, 0.0  ;;  %v300_v29 = vpop.f32.mrb[8].mxu0  ;;  %v340_v57 = vpop.f32.mrb[8].mxu1 }
 0x106   :  { %v780_v27 = vpack.c.bf16 %v603_v17, %v602_v36  ;;  %v605_v28 = vmax.f32 %v573_v21, 0.0  ;;  %v478_v32 = vadd.f32 %v956_v34, %v300_v29  ;;  %v494_v42 = vadd.f32 %v956_v34, %v340_v57  ;;  %v302_v58 = vpop.f32.mrb[9].mxu0  ;;  %v342_v33 = vpop.f32.mrb[9].mxu1 }
 0x107   :  { %v773_v38 = vpack.c.bf16 %v589_v56, %v588_v22  ;;  %v479_v40 = vadd.f32 %v958_v35, %v302_v58  ;;  %v495_v41 = vadd.f32 %v958_v35, %v342_v33  ;;  %v304_v54 = vpop.f32.mrb[10].mxu0  ;;  %v344_v44 = vpop.f32.mrb[10].mxu1 }
 0x108   :  { %v1055_v14 = vld [vmem:[%s1159_s3 + $0x30] sm:$0xff]  ;;  %v781_v39 = vpack.c.bf16 %v605_v28, %v604_v23  ;;  %v558_v45 = vadd.f32 %v526_v0, %v478_v32  ;;  %v574_v55 = vadd.f32 %v542_v1, %v494_v42  ;;  %v480_v60 = vadd.f32 %v956_v34, %v304_v54  ;;  %v306_v62 = vpop.f32.mrb[11].mxu0  ;;  %v346_v63 = vpop.f32.mrb[11].mxu1 }
 0x109   :  { %v1060_v15 = vld [vmem:[%s1159_s3 + $0x70] sm:$0xff]  ;;  %v530_v24 = vunpack.c.l.bf16 %v1055_v14  ;;  %v531_v43 = vunpack.c.h.bf16 %v1055_v14  ;;  %v496_v61 = vadd.f32 %v956_v34, %v344_v44  ;;  %v559_v0 = vadd.f32 %v527_v6, %v479_v40 }
 0x10a   :  { %v546_v25 = vunpack.c.l.bf16 %v1060_v15  ;;  %v547_v59 = vunpack.c.h.bf16 %v1060_v15  ;;  %712 = vst [vmem:[%s1160_s4 + $0x10] sm:$0xff] %v772_v26  ;;  %720 = vst [vmem:[%s1160_s4 + $0x50] sm:$0xff] %v780_v27  ;;  %v575_v1 = vadd.f32 %v543_v7, %v495_v41  ;;  %v481_v2 = vadd.f32 %v958_v35, %v306_v62 }
 0x10b   :  { %713 = vst [vmem:[%s1160_s4 + $0x18] sm:$0xff] %v773_v38  ;;  %721 = vst [vmem:[%s1160_s4 + $0x58] sm:$0xff] %v781_v39  ;;  %v497_v3 = vadd.f32 %v958_v35, %v346_v63  ;;  %v590_v8 = vmax.f32 %v558_v45, 0.0  ;;  %v606_v9 = vmax.f32 %v574_v55, 0.0  ;;  %v560_v48 = vadd.f32 %v528_v30, %v480_v60 }
 0x10c   :  { %v576_v49 = vadd.f32 %v544_v31, %v496_v61  ;;  %v591_v6 = vmax.f32 %v559_v0, 0.0  ;;  %v607_v7 = vmax.f32 %v575_v1, 0.0  ;;  %v561_v10 = vadd.f32 %v529_v46, %v481_v2 }
 0x10d   :  { %v577_v11 = vadd.f32 %v545_v47, %v497_v3  ;;  %v592_v50 = vmax.f32 %v560_v48, 0.0  ;;  %v310_v30 = vpop.f32.mrb[12].mxu0  ;;  %v350_v53 = vpop.f32.mrb[12].mxu1 }
 0x10e   :  { %v608_v51 = vmax.f32 %v576_v49, 0.0  ;;  %v774_v16 = vpack.c.bf16 %v591_v6, %v590_v8  ;;  %v782_v36 = vpack.c.bf16 %v607_v7, %v606_v9  ;;  %v593_v37 = vmax.f32 %v561_v10, 0.0  ;;  %v312_v20 = vpop.f32.mrb[13].mxu0  ;;  %v352_v18 = vpop.f32.mrb[13].mxu1 }
 0x10f   :  { %v609_v52 = vmax.f32 %v577_v11, 0.0  ;;  %v482_v31 = vadd.f32 %v956_v34, %v310_v30  ;;  %v498_v17 = vadd.f32 %v956_v34, %v350_v53  ;;  %v483_v22 = vadd.f32 %v958_v35, %v312_v20  ;;  %v314_v26 = vpop.f32.mrb[14].mxu0  ;;  %v354_v27 = vpop.f32.mrb[14].mxu1 }
 0x110   :  { %v775_v19 = vpack.c.bf16 %v593_v37, %v592_v50  ;;  %v499_v23 = vadd.f32 %v958_v35, %v352_v18  ;;  %v484_v29 = vadd.f32 %v956_v34, %v314_v26  ;;  %v500_v57 = vadd.f32 %v956_v34, %v354_v27  ;;  %v316_v32 = vpop.f32.mrb[15].mxu0  ;;  %v356_v42 = vpop.f32.mrb[15].mxu1 }
 0x111   :  { %v783_v47 = vpack.c.bf16 %v609_v52, %v608_v51  ;;  %v562_v56 = vadd.f32 %v530_v24, %v482_v31  ;;  %v578_v28 = vadd.f32 %v546_v25, %v498_v17  ;;  %v563_v24 = vadd.f32 %v531_v43, %v483_v22 }
 0x112   :  { %v509_v4 = vld [vmem:[%s1159_s3 + $0x38] sm:$0xff]  ;;  %v579_v25 = vadd.f32 %v547_v59, %v499_v23  ;;  %v485_v58 = vadd.f32 %v958_v35, %v316_v32  ;;  %v501_v34 = vadd.f32 %v958_v35, %v356_v42 }
 0x113   :  { %v517_v5 = vld [vmem:[%s1159_s3 + $0x78] sm:$0xff]  ;;  %v532_v12 = vunpack.c.l.bf16 %v509_v4  ;;  %v533_v46 = vunpack.c.h.bf16 %v509_v4  ;;  %v594_v33 = vmax.f32 %v562_v56, 0.0  ;;  %v610_v38 = vmax.f32 %v578_v28, 0.0 }
 0x114   :  { %v548_v13 = vunpack.c.l.bf16 %v517_v5  ;;  %v549_v21 = vunpack.c.h.bf16 %v517_v5  ;;  %714 = vst [vmem:[%s1160_s4 + $0x20] sm:$0xff] %v774_v16  ;;  %722 = vst [vmem:[%s1160_s4 + $0x60] sm:$0xff] %v782_v36  ;;  %v595_v41 = vmax.f32 %v563_v24, 0.0  ;;  %v611_v54 = vmax.f32 %v579_v25, 0.0 }
 0x115   :  { %715 = vst [vmem:[%s1160_s4 + $0x28] sm:$0xff] %v775_v19  ;;  %723 = vst [vmem:[%s1160_s4 + $0x68] sm:$0xff] %v783_v47  ;;  %v564_v39 = vadd.f32 %v532_v12, %v484_v29  ;;  %v565_v44 = vadd.f32 %v533_v46, %v485_v58 }
 0x116   :  { %v580_v40 = vadd.f32 %v548_v13, %v500_v57  ;;  %v581_v45 = vadd.f32 %v549_v21, %v501_v34  ;;  %v776_v61 = vpack.c.bf16 %v595_v41, %v594_v33  ;;  %v784_v14 = vpack.c.bf16 %v611_v54, %v610_v38 }
 0x117   :  { %v596_v55 = vmax.f32 %v564_v39, 0.0  ;;  %v597_v43 = vmax.f32 %v565_v44, 0.0 }
 0x118   :  { %v612_v60 = vmax.f32 %v580_v40, 0.0  ;;  %v613_v62 = vmax.f32 %v581_v45, 0.0  ;;  %716 = vst [vmem:[%s1160_s4 + $0x30] sm:$0xff] %v776_v61  ;;  %724 = vst [vmem:[%s1160_s4 + $0x70] sm:$0xff] %v784_v14 }
 0x119   :  { %v777_v35 = vpack.c.bf16 %v597_v43, %v596_v55 }
 0x11a   :  { %v785_v15 = vpack.c.bf16 %v613_v62, %v612_v60 }
 0x11b   :  { %717 = vst [vmem:[%s1160_s4 + $0x38] sm:$0xff] %v777_v35 }
 0x11c   :  { %725 = vst [vmem:[%s1160_s4 + $0x78] sm:$0xff] %v785_v15 }

// kernel: resnet_forward.25
= control target key start
LH: loop header
LB: loop body
LE: loop exit
PB: predicated region body
PF: predicated region fallthrough
CT: control target
= control target key end

     0   :  { %s1071_s12 = smov 0   ;;  %s1073_s13 = smov 0   ;;  %s1181_s0 = inlined_call_operand.vmem [shape: bf16[32,1152], index: 0, kind: input, shape index: {}]   ;;  %s1182_s1 = inlined_call_operand.vmem [shape: bf16[1152,128], index: 1, kind: input, shape index: {}]   ;;  %s1183_s2 = inlined_call_operand.vmem [shape: f32[1,128], index: 2, kind: input, shape index: {}]   ;;  %s1184_s3 = inlined_call_operand.vmem [shape: bf16[32,128], index: 3, kind: output, shape index: {}]  }
   0x1   :  { %s1075_s14 = smov 0   ;;  %s1077_s15 = smov 0  }
   0x2   :  { %s1079_s16 = smov 0  }
   0x3 LB: > { %s25_s17 = sadd.s32 1, %s1044_s15  ;;  %p48_p1 = scmp.ne.s32.totalorder %s1036_s13, %s1032_s12  ;;  %s1048_s16 = sphi %s1079_s16, %s13_s16   ;;  %s1044_s15 = sphi %s1077_s15, %s1188_s15   ;;  %s1040_s14 = sphi %s1075_s14, %s1187_s14   ;;  %s1036_s13 = sphi %s1073_s13, %s1186_s13   ;;  %s1032_s12 = sphi %s1071_s12, %s1185_s12  }
   0x4   : > { %p26_p0 = scmp.ge.s32.totalorder %s25_s17, 3  ;;  %p49_p2 = scmp.eq.s32.totalorder %s1048_s16, 0 }
   0x5   : > { %s41_s19 = sadd.s32 1, %s1036_s13  ;;  %p808_p5 = scmp.ge.s32.totalorder %s1048_s16, 3 }
   0x6   : > { %s1190_s17 = smov (%p26_p0, %s25_s17), 0  ;;  %p50_p3 = por %p49_p2, %p48_p1 }
   0x7   : > { %s37_s18 = ssub.s32 %s1044_s15, %s1190_s17  ;;  %162 = sbr.rel (%p808_p5) target bundleno = 23 (0x17), region = 20 }
   0x8   : > { %p39_p4 = scmp.eq.s32.totalorder %s37_s18, 0 }
   0xa   : > { %s1106_s20 = scalar_select %p39_p4, %s1036_s13, %s41_s19  }
   0xe   : > { %165 = sbr.rel (!%p50_p3) target bundleno = 23 (0x17), region = 24  ;;  %s167_s21 = sand.u32 (%p50_p3), 1, %s1036_s13  }
   0xf   : > { %s861_s22 = smul.u32 (%p50_p3), 12, %s1044_s15 }
  0x10   : > { %s935_s23 = smul.u32 (%p50_p3), 48, %s167_s21 }
  0x11   : > { %s175_s26 = scalar_lea.vmem (%p50_p3), %s1181_s0, %s861_s22 }
  0x12   : > { %v190_v0 = vld [vmem:[%s175_s26] sm:$0xff] (%p50_p3)  ;;  %v194_v2 = vld [vmem:[%s175_s26 + $0x48] sm:$0xff] (%p50_p3)  ;;  %s169_s27 = scalar_lea.vmem (%p50_p3), [#allocation3], %s935_s23  ;;  %v814_v6 = vld [vmem:[%s175_s26 + $0x50] sm:$0xf] (%p50_p3) }
  0x13   : > { %v192_v1 = vld [vmem:[%s175_s26 + $0x24] sm:$0xff] (%p50_p3)  ;;  %191 = vst [vmem:[%s169_s27] sm:$0xff] (%p50_p3), %v190_v0  ;;  %195 = vst [vmem:[%s169_s27 + $0x18] sm:$0xff] (%p50_p3), %v194_v2  ;;  %v196_v3 = vld [vmem:[%s175_s26 + $0x6c] sm:$0xff] (%p50_p3) }
  0x14   : > { %193 = vst [vmem:[%s169_s27 + $0xc] sm:$0xff] (%p50_p3), %v192_v1  ;;  %v810_v4 = vld [vmem:[%s175_s26 + $0x8] sm:$0xf] (%p50_p3)  ;;  %v812_v5 = vld [vmem:[%s175_s26 + $0x2c] sm:$0xf] (%p50_p3)  ;;  %197 = vst [vmem:[%s169_s27 + $0x24] sm:$0xff] (%p50_p3), %v196_v3 }
  0x15   : > { %811 = vst [vmem:[%s169_s27 + $0x8] sm:$0xf] %v810_v4  ;;  %813 = vst [vmem:[%s169_s27 + $0x14] sm:$0xf] %v812_v5  ;;  %v816_v7 = vld [vmem:[%s175_s26 + $0x74] sm:$0xf] }
  0x16   : > { %815 = vst [vmem:[%s169_s27 + $0x20] sm:$0xf] %v814_v6  ;;  %817 = vst [vmem:[%s169_s27 + $0x2c] sm:$0xf] %v816_v7 }
  0x17 PF: > { %p818_p6 = scmp.ge.s32.totalorder %s1048_s16, 1  ;;  %p229_p7 = scmp.lt.s32.totalorder %s1048_s16, 4 }
  0x19   : > { %p230_p8 = pnand %p818_p6, %p229_p7 }
  0x1a   : > { %s236_s28 = sand.u32 (!%p230_p8), 1, %s1032_s12   ;;  %s275_s29 = smul.u32 (!%p230_p8), 48, %s1040_s14 }
  0x1b   : > { %233 = sbr.rel (%p230_p8) target bundleno = 318 (0x13e), region = 54  ;;  %p820_p10 = scmp.ne.s32.totalorder (!%p230_p8), %s1040_s14, 0 }
  0x1c   : > { %s936_s30 = smul.u32 (!%p230_p8), 48, %s236_s28  ;;  %p276_p9 = scmp.lt.s32.totalorder (!%p230_p8), %s275_s29, 143 }
  0x1e   : > { %s1123_s8 = scalar_lea.vmem (!%p230_p8), [#allocation3], %s936_s30 }
  0x22   : > { %s1192_s29 = smov (!%p276_p9, %s275_s29), 143  ;;  %300 = sbr.rel (%p820_p10) target bundleno = 41 (0x29), region = 62 }
  0x23   : > { %s819_s4 = sshll.u32 %s1192_s29, 2  ;;  %v1050_v8 = vmov (!%p820_p10), 0.0  }
  0x24   : > { %s1121_s7 = scalar_lea.vmem %s1182_s1, %s819_s4  ;;  %301 = vst [vmem:[#allocation2] sm:$0xff] (!%p820_p10), %v1050_v8  ;;  %302 = vst [vmem:[#allocation2 + $0x8] sm:$0xff] (!%p820_p10), %v1050_v8 }
  0x25   : > { %303 = vst [vmem:[#allocation2 + $0x10] sm:$0xff] (!%p820_p10), %v1050_v8  ;;  %304 = vst [vmem:[#allocation2 + $0x18] sm:$0xff] (!%p820_p10), %v1050_v8 }
  0x29 PF: > { %v978_v9 = vld [vmem:[%s1121_s7 + $0x40] sm:$0xff]   ;;  %v981_v12 = vld [vmem:[%s1121_s7 + $0x48] sm:$0xff]   ;;  %v984_v15 = vld [vmem:[%s1121_s7 + $0x50] sm:$0xff]   ;;  %p851_p11 = scmp.ne.s32.totalorder %s1040_s14, 2 }
  0x2a   : > { %v979_v10 = vld [vmem:[%s1121_s7] sm:$0xff]   ;;  %877 = vmatprep.subr.bf16.mxu0 %v978_v9  ;;  %v982_v13 = vld [vmem:[%s1121_s7 + $0x8] sm:$0xff]   ;;  %v985_v16 = vld [vmem:[%s1121_s7 + $0x10] sm:$0xff]  }
  0x2b   : > { %v980_v11 = vld [vmem:[%s1121_s7 + $0x80] sm:$0xff]   ;;  %878 = vmatpush3.bf16.msra.mxu0 %v979_v10  ;;  %v983_v14 = vld [vmem:[%s1121_s7 + $0x88] sm:$0xff]   ;;  %v986_v17 = vld [vmem:[%s1121_s7 + $0x90] sm:$0xff]  }
  0x2c   : > { %915 = vmatprep.subr.bf16.mxu1 %v980_v11  ;;  %879 = vmatprep.subr.bf16.mxu0 %v981_v12  ;;  %v987_v18 = vld [vmem:[%s1121_s7 + $0x58] sm:$0xff]   ;;  %v990_v21 = vld [vmem:[%s1121_s7 + $0x60] sm:$0xff]   ;;  %v993_v24 = vld [vmem:[%s1121_s7 + $0x68] sm:$0xff]  }
  0x2d   : > { %916 = vmatpush3.bf16.msra.mxu1 %v980_v11  ;;  %v988_v19 = vld [vmem:[%s1121_s7 + $0x18] sm:$0xff]   ;;  %v992_v22 = vld [vmem:[%s1121_s7 + $0xa0] sm:$0xff]   ;;  %v995_v25 = vld [vmem:[%s1121_s7 + $0xa8] sm:$0xff]  }
  0x2e   : > { %917 = vmatprep.subr.bf16.mxu1 %v983_v14  ;;  %v989_v20 = vld [vmem:[%s1121_s7 + $0x98] sm:$0xff]   ;;  %v991_v23 = vld [vmem:[%s1121_s7 + $0x20] sm:$0xff]   ;;  %v994_v26 = vld [vmem:[%s1121_s7 + $0x28] sm:$0xff]  }
  0x2f   : > { %880 = vmatpush3.bf16.msra.mxu0 %v982_v13  ;;  %v996_v27 = vld [vmem:[%s1121_s7 + $0x70] sm:$0xff]   ;;  %v999_v30 = vld [vmem:[%s1121_s7 + $0x78] sm:$0xff]   ;;  %v305_v45 = vld [vmem:[#allocation2] sm:$0xff] }
  0x30   : > { %881 = vmatprep.subr.bf16.mxu0 %v984_v15  ;;  %v997_v28 = vld [vmem:[%s1121_s7 + $0x30] sm:$0xff]   ;;  %v1001_v31 = vld [vmem:[%s1121_s7 + $0xb8] sm:$0xff]   ;;  %v306_v50 = vld [vmem:[#allocation2 + $0x8] sm:$0xff] }
  0x31   : > { %918 = vmatpush3.bf16.msra.mxu1 %v983_v14  ;;  %v998_v29 = vld [vmem:[%s1121_s7 + $0xb0] sm:$0xff]   ;;  %v1000_v34 = vld [vmem:[%s1121_s7 + $0x38] sm:$0xff]   ;;  %v852_v5 = vld [vmem:[%s1183_s2] ss:$0 sm:$0xff] (!%p851_p11) }
  0x32   : > { %919 = vmatprep.subr.bf16.mxu1 %v986_v17  ;;  %v1004_v32 = vld [vmem:[%s1123_s8 + $0x4] ss:$12 sps:$4 sm:$0xff]   ;;  %v1005_v33 = vld [vmem:[%s1123_s8 + $0x8] ss:$12 sps:$4 sm:$0xff]   ;;  %v1002_v35 = vld [vmem:[%s1123_s8] ss:$12 sps:$4 sm:$0xff]  }
  0x33   : > { %882 = vmatpush3.bf16.msra.mxu0 %v985_v16  ;;  %573 = vmatprep.mubr.bf16.mxu0 %v1004_v32  ;;  %v1007_v36 = vld [vmem:[%s1123_s8 + $0x1c] ss:$12 sps:$4 sm:$0xff]   ;;  %v1006_v37 = vld [vmem:[%s1123_s8 + $0x20] ss:$12 sps:$4 sm:$0xff]   ;;  %v1009_v38 = vld [vmem:[%s1123_s8 + $0x18] ss:$12 sps:$4 sm:$0xff]  }
  0x34   : > { %883 = vmatprep.subr.bf16.mxu0 %v987_v18  ;;  %931 = vmatprep.mubr.bf16.mxu1 %v1005_v33  ;;  %v307_v59 = vld [vmem:[#allocation2 + $0x10] sm:$0xff]  ;;  %v308_v63 = vld [vmem:[#allocation2 + $0x18] sm:$0xff] }
  0x35   : > { %920 = vmatpush3.bf16.msra.mxu1 %v986_v17 }
  0x36   : > { %921 = vmatprep.subr.bf16.mxu1 %v989_v20 }
  0x37   : > { %884 = vmatpush3.bf16.msra.mxu0 %v988_v19 }
  0x38   : > { %885 = vmatprep.subr.bf16.mxu0 %v990_v21 }
  0x39   : > { %922 = vmatpush3.bf16.msra.mxu1 %v989_v20 }
  0x3a   : > { %923 = vmatprep.subr.bf16.mxu1 %v992_v22 }
  0x3b   : > { %886 = vmatpush3.bf16.msra.mxu0 %v991_v23 }
  0x3c   : > { %887 = vmatprep.subr.bf16.mxu0 %v993_v24 }
  0x3d   : > { %924 = vmatpush3.bf16.msra.mxu1 %v992_v22 }
  0x3e   : > { %925 = vmatprep.subr.bf16.mxu1 %v995_v25 }
  0x3f   : > { %888 = vmatpush3.bf16.msra.mxu0 %v994_v26 }
  0x40   : > { %889 = vmatprep.subr.bf16.mxu0 %v996_v27 }
  0x41   : > { %926 = vmatpush3.bf16.msra.mxu1 %v995_v25 }
  0x42   : > { %927 = vmatprep.subr.bf16.mxu1 %v998_v29 }
  0x43   : > { %890 = vmatpush3.bf16.msra.mxu0 %v997_v28 }
  0x44   : > { %891 = vmatprep.subr.bf16.mxu0 %v999_v30 }
  0x45   : > { %928 = vmatpush3.bf16.msra.mxu1 %v998_v29 }
  0x46   : > { %929 = vmatprep.subr.bf16.mxu1 %v1001_v31 }
  0x47   : > { %892 = vmatpush3.bf16.msra.mxu0 %v1000_v34 }
  0x49   : > { %930 = vmatpush3.bf16.msra.mxu1 %v1001_v31 }
  0x4a   : > { %574 = vmatmul.mubr.bf16.vlgmr.msra.gmra.mrb[0].mxu0 %v1002_v35 }
  0x4b   : > { %581 = vmatprep.mubr.bf16.mxu0 %v1007_v36 }
  0x4c   : > { %932 = vmatmul.mubr.bf16.vlgmr.msra.gmra.mrb[0].mxu1 %v1006_v37 }
  0x52   : > { %582 = vmatmul.mubr.bf16.gmra.mrb[4].mxu0 %v1009_v38 }
 0x11d   : > { %v893_v39 = vpop.f32.mrb[0].mxu0 }
 0x11e   : > { %v894_v40 = vpop.f32.mrb[1].mxu0 }
 0x11f   : > { %v895_v41 = vadd.f32 %v894_v40, %v893_v39  ;;  %v896_v42 = vpop.f32.mrb[2].mxu0  ;;  %v933_v43 = vpop.f32.mrb[0].mxu1 }
 0x120   : > { %v897_v44 = vpop.f32.mrb[3].mxu0  ;;  %v624_v46 = vpop.f32.mrb[1].mxu1 }
 0x121   : > { %v898_v47 = vadd.f32 %v897_v44, %v896_v42  ;;  %v625_v48 = vadd.f32 %v895_v41, %v624_v46  ;;  %v934_v49 = vpop.f32.mrb[2].mxu1 }
 0x122   : > { %v627_v51 = vpop.f32.mrb[3].mxu1 }
 0x123   : > { %v639_v52 = vadd.f32 %v625_v48, %v305_v45  ;;  %v628_v53 = vadd.f32 %v898_v47, %v627_v51 }
 0x125   : > { %643 = vst [vmem:[#allocation2] sm:$0xff] %v639_v52  ;;  %v640_v54 = vadd.f32 %v628_v53, %v306_v50  ;;  %v899_v55 = vpop.f32.mrb[4].mxu0 }
 0x126   : > { %v900_v56 = vpop.f32.mrb[5].mxu0 }
 0x127   : > { %644 = vst [vmem:[#allocation2 + $0x8] sm:$0xff] %v640_v54  ;;  %v901_v57 = vadd.f32 %v900_v56, %v899_v55  ;;  %v902_v58 = vpop.f32.mrb[6].mxu0 }
 0x128   : > { %v903_v60 = vpop.f32.mrb[7].mxu0 }
 0x129   : > { %v633_v61 = vadd.f32 %v933_v43, %v901_v57  ;;  %v904_v62 = vadd.f32 %v903_v60, %v902_v58  ;;  %650 = sbr.rel (%p851_p11) target bundleno = 318 (0x13e), region = 66 }
 0x12b   : > { %v641_v0 = vadd.f32 %v633_v61, %v307_v59  ;;  %v636_v1 = vadd.f32 %v934_v49, %v904_v62 }
 0x12c   : > { %v651_v3 = vld [vmem:[#allocation2] sm:$0xff] (!%p851_p11) }
 0x12d   : > { %645 = vst [vmem:[#allocation2 + $0x10] sm:$0xff] %v641_v0  ;;  %v642_v2 = vadd.f32 %v636_v1, %v308_v63  ;;  %v662_v6 = vadd.f32 (!%p851_p11), %v852_v5, %v651_v3 }
 0x12e   : > { %v652_v4 = vld [vmem:[#allocation2 + $0x8] sm:$0xff] (!%p851_p11) }
 0x12f   : > { %646 = vst [vmem:[#allocation2 + $0x18] sm:$0xff] %v642_v2  ;;  %v663_v7 = vadd.f32 (!%p851_p11), %v852_v5, %v652_v4  ;;  %v666_v12 = vmax.f32 (!%p851_p11), %v662_v6, 0.0 }
 0x131   : > { %v667_v13 = vmax.f32 %v663_v7, 0.0 }
 0x133   : > { %v869_v16 = vpack.c.bf16 %v667_v13, %v666_v12 }
 0x134   : > { %v653_v8 = vld [vmem:[#allocation2 + $0x10] sm:$0xff] }
 0x135   : > { %v664_v10 = vadd.f32 %v852_v5, %v653_v8  ;;  %870 = vst [vmem:[%s1184_s3] sm:$0xff] %v869_v16  }
 0x136   : > { %v654_v9 = vld [vmem:[#allocation2 + $0x18] sm:$0xff] }
 0x137   : > { %v665_v11 = vadd.f32 %v852_v5, %v654_v9  ;;  %v668_v14 = vmax.f32 %v664_v10, 0.0 }
 0x139   : > { %v669_v15 = vmax.f32 %v665_v11, 0.0 }
 0x13b   : > { %v874_v17 = vpack.c.bf16 %v669_v15, %v668_v14 }
 0x13d   : > { %876 = vst [vmem:[%s1184_s3 + $0x8] sm:$0xff] %v874_v17  }
 0x13e PF: > { %s13_s16 = sadd.s32 1, %s1048_s16   ;;  %s1185_s12 = smov %s1036_s13 }
 0x13f   : > { %p10_p12 = scmp.ge.s32.totalorder %s13_s16, 5   ;;  %s1186_s13 = smov %s1106_s20 }
 0x140   : > { %s1187_s14 = smov %s1044_s15  ;;  %s1188_s15 = smov %s1190_s17 }
 0x141   :  { %12 = sbr.rel (!%p10_p12) target bundleno = 3 (0x3), region = 113 }

// kernel: resnet_forward.26
= control target key start
LH: loop header
LB: loop body
LE: loop exit
PB: predicated region body
PF: predicated region fallthrough
CT: control target
= control target key end

     0   :  { %s1188_s12 = smov 0   ;;  %s1190_s13 = smov 0   ;;  %s1382_s0 = inlined_call_operand.vmem [shape: bf16[32,256], index: 0, kind: input, shape index: {}]   ;;  %s1383_s1 = inlined_call_operand.vmem [shape: bf16[256,512], index: 1, kind: input, shape index: {}]   ;;  %s1384_s2 = inlined_call_operand.vmem [shape: f32[1,512], index: 2, kind: input, shape index: {}]   ;;  %s1385_s3 = inlined_call_operand.vmem [shape: bf16[32,512], index: 3, kind: output, shape index: {}]  }
   0x1   :  { %s1192_s14 = smov 0   ;;  %s1194_s15 = smov 0  }
   0x2   :  { %s1196_s16 = smov 0  }
   0x3 LB: > { %s28_s17 = sadd.s32 1, %s1162_s15  ;;  %s939_s18 = sadd.s32 4294967295, %s1166_s16   ;;  %s1166_s16 = sphi %s1196_s16, %s13_s16   ;;  %s1162_s15 = sphi %s1194_s15, %s1390_s15   ;;  %s1158_s14 = sphi %s1192_s14, %s1389_s14   ;;  %s1154_s13 = sphi %s1190_s13, %s1388_s13   ;;  %s1150_s12 = sphi %s1188_s12, %s1387_s12  }
   0x4   : > { %p30_p0 = scmp.ge.s32.totalorder %s28_s17, 2  ;;  %p76_p1 = scmp.ne.s32.totalorder %s1154_s13, %s1150_s12 }
   0x5   : > { %p77_p2 = scmp.eq.s32.totalorder %s1166_s16, 0  ;;  %p134_p4 = scmp.eq.s32.totalorder %s939_s18, 1 }
   0x6   : > { %s1392_s17 = smov (%p30_p0, %s28_s17), 0  ;;  %s69_s20 = sadd.s32 1, %s1154_s13 }
   0x7   : > { %p78_p3 = por %p77_p2, %p76_p1  ;;  %s65_s19 = ssub.s32 %s1162_s15, %s1392_s17 }
   0x8   : > { %p67_p5 = scmp.eq.s32.totalorder %s65_s19, 0  ;;  %p1223_p6 = por %p134_p4, %p76_p1 }
   0x9   : > { %p943_p7 = scmp.ge.s32.totalorder %s1166_s16, 2 }
   0xa   : > { %s1228_s22 = scalar_select %p67_p5, %s1154_s13, %s69_s20  }
   0xb   : > { %171 = sbr.rel (%p943_p7) target bundleno = 38 (0x26), region = 20 }
  0x12   : > { %174 = sbr.rel (!%p78_p3) target bundleno = 38 (0x26), region = 24  ;;  %s176_s23 = sand.u32 (%p78_p3), 1, %s1154_s13  }
  0x13   : > { %s996_s24 = sshll.u32 (%p78_p3), %s1162_s15, 3  ;;  %s944_s25 = sshll.u32 (%p78_p3), %s176_s23, 8 }
  0x14   : > { %s1236_s28 = scalar_lea.vmem (%p78_p3), %s1383_s1, %s996_s24  ;;  %s1241_s29 = scalar_lea.vmem (%p78_p3), [#allocation3], %s944_s25 }
  0x15   : > { %v274_v0 = vld [vmem:[%s1236_s28] sm:$0xff] (%p78_p3)  ;;  %v276_v1 = vld [vmem:[%s1236_s28 + $0x10] sm:$0xff] (%p78_p3) }
  0x16   : > { %v278_v2 = vld [vmem:[%s1236_s28 + $0x20] sm:$0xff] (%p78_p3)  ;;  %275 = vst [vmem:[%s1241_s29] sm:$0xff] (%p78_p3), %v274_v0  ;;  %277 = vst [vmem:[%s1241_s29 + $0x8] sm:$0xff] (%p78_p3), %v276_v1  ;;  %v280_v3 = vld [vmem:[%s1236_s28 + $0x30] sm:$0xff] (%p78_p3) }
  0x17   : > { %279 = vst [vmem:[%s1241_s29 + $0x10] sm:$0xff] (%p78_p3), %v278_v2  ;;  %v282_v4 = vld [vmem:[%s1236_s28 + $0x40] sm:$0xff] (%p78_p3)  ;;  %v284_v5 = vld [vmem:[%s1236_s28 + $0x50] sm:$0xff] (%p78_p3)  ;;  %281 = vst [vmem:[%s1241_s29 + $0x18] sm:$0xff] (%p78_p3), %v280_v3 }
  0x18   : > { %283 = vst [vmem:[%s1241_s29 + $0x20] sm:$0xff] (%p78_p3), %v282_v4  ;;  %285 = vst [vmem:[%s1241_s29 + $0x28] sm:$0xff] (%p78_p3), %v284_v5  ;;  %v286_v6 = vld [vmem:[%s1236_s28 + $0x60] sm:$0xff] (%p78_p3)  ;;  %v288_v7 = vld [vmem:[%s1236_s28 + $0x70] sm:$0xff] (%p78_p3) }
  0x19   : > { %v290_v8 = vld [vmem:[%s1236_s28 + $0x80] sm:$0xff]  ;;  %287 = vst [vmem:[%s1241_s29 + $0x30] sm:$0xff] %v286_v6  ;;  %289 = vst [vmem:[%s1241_s29 + $0x38] sm:$0xff] %v288_v7  ;;  %v292_v9 = vld [vmem:[%s1236_s28 + $0x90] sm:$0xff] }
  0x1a   : > { %291 = vst [vmem:[%s1241_s29 + $0x40] sm:$0xff] %v290_v8  ;;  %v294_v10 = vld [vmem:[%s1236_s28 + $0xa0] sm:$0xff]  ;;  %v296_v11 = vld [vmem:[%s1236_s28 + $0xb0] sm:$0xff]  ;;  %293 = vst [vmem:[%s1241_s29 + $0x48] sm:$0xff] %v292_v9 }
  0x1b   : > { %295 = vst [vmem:[%s1241_s29 + $0x50] sm:$0xff] %v294_v10  ;;  %297 = vst [vmem:[%s1241_s29 + $0x58] sm:$0xff] %v296_v11  ;;  %v298_v12 = vld [vmem:[%s1236_s28 + $0xc0] sm:$0xff]  ;;  %v300_v13 = vld [vmem:[%s1236_s28 + $0xd0] sm:$0xff] }
  0x1c   : > { %v302_v14 = vld [vmem:[%s1236_s28 + $0xe0] sm:$0xff]  ;;  %299 = vst [vmem:[%s1241_s29 + $0x60] sm:$0xff] %v298_v12  ;;  %301 = vst [vmem:[%s1241_s29 + $0x68] sm:$0xff] %v300_v13  ;;  %v304_v15 = vld [vmem:[%s1236_s28 + $0xf0] sm:$0xff] }
  0x1d   : > { %303 = vst [vmem:[%s1241_s29 + $0x70] sm:$0xff] %v302_v14  ;;  %v306_v16 = vld [vmem:[%s1236_s28 + $0x100] sm:$0xff]  ;;  %v308_v17 = vld [vmem:[%s1236_s28 + $0x110] sm:$0xff]  ;;  %305 = vst [vmem:[%s1241_s29 + $0x78] sm:$0xff] %v304_v15 }
  0x1e   : > { %307 = vst [vmem:[%s1241_s29 + $0x80] sm:$0xff] %v306_v16  ;;  %309 = vst [vmem:[%s1241_s29 + $0x88] sm:$0xff] %v308_v17  ;;  %v310_v18 = vld [vmem:[%s1236_s28 + $0x120] sm:$0xff]  ;;  %v312_v19 = vld [vmem:[%s1236_s28 + $0x130] sm:$0xff] }
  0x1f   : > { %v314_v20 = vld [vmem:[%s1236_s28 + $0x140] sm:$0xff]  ;;  %311 = vst [vmem:[%s1241_s29 + $0x90] sm:$0xff] %v310_v18  ;;  %313 = vst [vmem:[%s1241_s29 + $0x98] sm:$0xff] %v312_v19  ;;  %v316_v21 = vld [vmem:[%s1236_s28 + $0x150] sm:$0xff] }
  0x20   : > { %315 = vst [vmem:[%s1241_s29 + $0xa0] sm:$0xff] %v314_v20  ;;  %v318_v22 = vld [vmem:[%s1236_s28 + $0x160] sm:$0xff]  ;;  %v320_v23 = vld [vmem:[%s1236_s28 + $0x170] sm:$0xff]  ;;  %317 = vst [vmem:[%s1241_s29 + $0xa8] sm:$0xff] %v316_v21 }
  0x21   : > { %319 = vst [vmem:[%s1241_s29 + $0xb0] sm:$0xff] %v318_v22  ;;  %321 = vst [vmem:[%s1241_s29 + $0xb8] sm:$0xff] %v320_v23  ;;  %v322_v24 = vld [vmem:[%s1236_s28 + $0x180] sm:$0xff]  ;;  %v324_v25 = vld [vmem:[%s1236_s28 + $0x190] sm:$0xff] }
  0x22   : > { %v326_v26 = vld [vmem:[%s1236_s28 + $0x1a0] sm:$0xff]  ;;  %323 = vst [vmem:[%s1241_s29 + $0xc0] sm:$0xff] %v322_v24  ;;  %325 = vst [vmem:[%s1241_s29 + $0xc8] sm:$0xff] %v324_v25  ;;  %v328_v27 = vld [vmem:[%s1236_s28 + $0x1b0] sm:$0xff] }
  0x23   : > { %327 = vst [vmem:[%s1241_s29 + $0xd0] sm:$0xff] %v326_v26  ;;  %v330_v28 = vld [vmem:[%s1236_s28 + $0x1c0] sm:$0xff]  ;;  %v332_v29 = vld [vmem:[%s1236_s28 + $0x1d0] sm:$0xff]  ;;  %329 = vst [vmem:[%s1241_s29 + $0xd8] sm:$0xff] %v328_v27 }
  0x24   : > { %331 = vst [vmem:[%s1241_s29 + $0xe0] sm:$0xff] %v330_v28  ;;  %333 = vst [vmem:[%s1241_s29 + $0xe8] sm:$0xff] %v332_v29  ;;  %v334_v30 = vld [vmem:[%s1236_s28 + $0x1e0] sm:$0xff]  ;;  %v336_v31 = vld [vmem:[%s1236_s28 + $0x1f0] sm:$0xff] }
  0x25   : > { %335 = vst [vmem:[%s1241_s29 + $0xf0] sm:$0xff] %v334_v30  ;;  %337 = vst [vmem:[%s1241_s29 + $0xf8] sm:$0xff] %v336_v31 }
  0x26 PF: > { %p947_p8 = scmp.ge.s32.totalorder %s1166_s16, 1  ;;  %p350_p9 = scmp.lt.s32.totalorder %s1166_s16, 3 }
  0x28   : > { %p351_p10 = pnand %p947_p8, %p350_p9 }
  0x29   : > { %s357_s30 = sand.u32 (!%p351_p10), 1, %s1150_s12   ;;  %v1124_v32 = vld [vmem:[%s1382_s0 + $0x4] ss:$8 sps:$4 sm:$0xff] (!%p351_p10)   ;;  %v1127_v33 = vld [vmem:[%s1382_s0 + $0x14] ss:$8 sps:$4 sm:$0xff] (!%p351_p10)   ;;  %s950_s20 = sshll.u32 (!%p351_p10), %s1158_s14, 1  ;;  %v732_v4 = vlaneseq (!%p351_p10) }
  0x2a   : > { %354 = sbr.rel (%p351_p10) target bundleno = 337 (0x151), region = 66  ;;  %s948_s4 = sshll.u32 (!%p351_p10), %s357_s30, 8  ;;  %682 = vmatprep.mubr.bf16.mxu0 (!%p351_p10), %v1124_v32  ;;  %692 = vmatprep.mubr.bf16.mxu1 (!%p351_p10), %v1127_v33  ;;  %v1122_v2 = vld [vmem:[%s1382_s0] ss:$8 sps:$4 sm:$0xff] (!%p351_p10)   ;;  %v1125_v3 = vld [vmem:[%s1382_s0 + $0x10] ss:$8 sps:$4 sm:$0xff] (!%p351_p10)  }
  0x2b   : > { %s1315_s9 = scalar_lea.vmem (!%p351_p10), [#allocation3], %s948_s4  ;;  %p408_p11 = scmp.lt.s32.totalorder (!%p351_p10), %s950_s20, 3  ;;  %v733_v5 = vshrl.u32 (!%p351_p10), %v732_v4, 7 }
  0x2c   : > { %v1074_v34 = vld [vmem:[%s1315_s9 + $0x4] ss:$8 sps:$4 sm:$0xff] (!%p351_p10)   ;;  %v1076_v35 = vld [vmem:[%s1315_s9] ss:$8 sps:$4 sm:$0xff] (!%p351_p10)   ;;  %v1077_v36 = vld [vmem:[%s1315_s9 + $0x14] ss:$8 sps:$4 sm:$0xff] (!%p351_p10)  }
  0x2d   : > { %650 = vmatprep.subr.bf16.mxu0 (!%p351_p10), %v1074_v34  ;;  %1002 = vmatprep.subr.bf16.mxu1 (!%p351_p10), %v1074_v34  ;;  %v1079_v37 = vld [vmem:[%s1315_s9 + $0x10] ss:$8 sps:$4 sm:$0xff] (!%p351_p10)   ;;  %v1080_v38 = vld [vmem:[%s1315_s9 + $0x24] ss:$8 sps:$4 sm:$0xff] (!%p351_p10)   ;;  %v1082_v39 = vld [vmem:[%s1315_s9 + $0x20] ss:$8 sps:$4 sm:$0xff] (!%p351_p10)  }
  0x2e   : > { %651 = vmatpush1.bf16.msra.mxu0 (!%p351_p10), %v1076_v35  ;;  %1018 = vmatpush1.bf16.msra.mxu1 (!%p351_p10), %v1076_v35  ;;  %v1083_v40 = vld [vmem:[%s1315_s9 + $0x34] ss:$8 sps:$4 sm:$0xff] (!%p351_p10)   ;;  %v1085_v41 = vld [vmem:[%s1315_s9 + $0x30] ss:$8 sps:$4 sm:$0xff] (!%p351_p10)   ;;  %v1086_v42 = vld [vmem:[%s1315_s9 + $0x44] ss:$8 sps:$4 sm:$0xff] (!%p351_p10)  }
  0x2f   : > { %652 = vmatprep.subr.bf16.mxu0 (!%p351_p10), %v1077_v36  ;;  %1003 = vmatprep.subr.bf16.mxu1 (!%p351_p10), %v1077_v36  ;;  %v1088_v43 = vld [vmem:[%s1315_s9 + $0x40] ss:$8 sps:$4 sm:$0xff] (!%p351_p10)   ;;  %v1089_v44 = vld [vmem:[%s1315_s9 + $0x54] ss:$8 sps:$4 sm:$0xff] (!%p351_p10)   ;;  %v1091_v45 = vld [vmem:[%s1315_s9 + $0x50] ss:$8 sps:$4 sm:$0xff] (!%p351_p10)  }
  0x30   : > { %v1092_v46 = vld [vmem:[%s1315_s9 + $0x64] ss:$8 sps:$4 sm:$0xff] (!%p351_p10)   ;;  %v1094_v47 = vld [vmem:[%s1315_s9 + $0x60] ss:$8 sps:$4 sm:$0xff] (!%p351_p10)   ;;  %v1095_v48 = vld [vmem:[%s1315_s9 + $0x74] ss:$8 sps:$4 sm:$0xff] (!%p351_p10)  }
  0x31   : > { %v1097_v49 = vld [vmem:[%s1315_s9 + $0x70] ss:$8 sps:$4 sm:$0xff]   ;;  %v1098_v50 = vld [vmem:[%s1315_s9 + $0x84] ss:$8 sps:$4 sm:$0xff]   ;;  %v1100_v51 = vld [vmem:[%s1315_s9 + $0x80] ss:$8 sps:$4 sm:$0xff]  }
  0x32   : > { %653 = vmatpush1.bf16.msra.mxu0 %v1079_v37  ;;  %1019 = vmatpush1.bf16.msra.mxu1 %v1079_v37  ;;  %v1101_v52 = vld [vmem:[%s1315_s9 + $0x94] ss:$8 sps:$4 sm:$0xff]   ;;  %v1103_v53 = vld [vmem:[%s1315_s9 + $0x90] ss:$8 sps:$4 sm:$0xff]   ;;  %v1104_v54 = vld [vmem:[%s1315_s9 + $0xa4] ss:$8 sps:$4 sm:$0xff]  }
  0x33   : > { %654 = vmatprep.subr.bf16.mxu0 %v1080_v38  ;;  %1004 = vmatprep.subr.bf16.mxu1 %v1080_v38  ;;  %v1106_v55 = vld [vmem:[%s1315_s9 + $0xa0] ss:$8 sps:$4 sm:$0xff]   ;;  %v1107_v56 = vld [vmem:[%s1315_s9 + $0xb4] ss:$8 sps:$4 sm:$0xff]   ;;  %v1109_v57 = vld [vmem:[%s1315_s9 + $0xb0] ss:$8 sps:$4 sm:$0xff]  }
  0x34   : > { %v1110_v58 = vld [vmem:[%s1315_s9 + $0xc4] ss:$8 sps:$4 sm:$0xff]   ;;  %v1112_v59 = vld [vmem:[%s1315_s9 + $0xc0] ss:$8 sps:$4 sm:$0xff]   ;;  %v1113_v60 = vld [vmem:[%s1315_s9 + $0xd4] ss:$8 sps:$4 sm:$0xff]  }
  0x35   : > { %v1115_v61 = vld [vmem:[%s1315_s9 + $0xd0] ss:$8 sps:$4 sm:$0xff]   ;;  %v1116_v62 = vld [vmem:[%s1315_s9 + $0xe4] ss:$8 sps:$4 sm:$0xff]   ;;  %v1118_v63 = vld [vmem:[%s1315_s9 + $0xe0] ss:$8 sps:$4 sm:$0xff]  }
  0x36   : > { %655 = vmatpush1.bf16.msra.mxu0 %v1082_v39  ;;  %1020 = vmatpush1.bf16.msra.mxu1 %v1082_v39  ;;  %v1119_v0 = vld [vmem:[%s1315_s9 + $0xf4] ss:$8 sps:$4 sm:$0xff]   ;;  %v1121_v1 = vld [vmem:[%s1315_s9 + $0xf0] ss:$8 sps:$4 sm:$0xff]   ;;  %s1394_s20 = smov (!%p408_p11, %s950_s20), 3  ;;  %v734_v6 = vsub.s32 0, %v733_v5 }
  0x37   : > { %656 = vmatprep.subr.bf16.mxu0 %v1083_v40  ;;  %1005 = vmatprep.subr.bf16.mxu1 %v1083_v40  ;;  %s410_s25 = scalar_lea.vmem %s1384_s2, %s1394_s20  ;;  %v738_v8 = vsub.s32 1, %v733_v5  ;;  %s949_s26 = sshll.u32 %s357_s30, 5 }
  0x38   : > { %v730_v7 = vld [vmem:[%s410_s25] sm:$0x3]  ;;  %s392_s27 = scalar_lea.vmem [#allocation4], %s949_s26  ;;  %s1001_s12 = sshll.u32 (%p1223_p6), %s1158_s14, 3 }
  0x39   : > { %v735_v9 = vrot.slane %v730_v7, %v734_v6  ;;  %v739_v10 = vrot.slane %v730_v7, %v738_v8  ;;  %s790_s30 = scalar_lea.vmem (%p1223_p6), %s1385_s3, %s1001_s12 }
  0x3a   : > { %657 = vmatpush1.bf16.msra.mxu0 %v1085_v41  ;;  %1021 = vmatpush1.bf16.msra.mxu1 %v1085_v41 }
  0x3b   : > { %658 = vmatprep.subr.bf16.mxu0 %v1086_v42  ;;  %1006 = vmatprep.subr.bf16.mxu1 %v1086_v42 }
  0x3e   : > { %659 = vmatpush1.bf16.msra.mxu0 %v1088_v43  ;;  %1022 = vmatpush1.bf16.msra.mxu1 %v1088_v43 }
  0x3f   : > { %660 = vmatprep.subr.bf16.mxu0 %v1089_v44  ;;  %1007 = vmatprep.subr.bf16.mxu1 %v1089_v44 }
  0x42   : > { %661 = vmatpush1.bf16.msra.mxu0 %v1091_v45  ;;  %1023 = vmatpush1.bf16.msra.mxu1 %v1091_v45 }
  0x43   : > { %662 = vmatprep.subr.bf16.mxu0 %v1092_v46  ;;  %1008 = vmatprep.subr.bf16.mxu1 %v1092_v46 }
  0x46   : > { %663 = vmatpush1.bf16.msra.mxu0 %v1094_v47  ;;  %1024 = vmatpush1.bf16.msra.mxu1 %v1094_v47 }
  0x47   : > { %664 = vmatprep.subr.bf16.mxu0 %v1095_v48  ;;  %1009 = vmatprep.subr.bf16.mxu1 %v1095_v48 }
  0x4a   : > { %665 = vmatpush1.bf16.msra.mxu0 %v1097_v49  ;;  %1025 = vmatpush1.bf16.msra.mxu1 %v1097_v49 }
  0x4b   : > { %666 = vmatprep.subr.bf16.mxu0 %v1098_v50  ;;  %1010 = vmatprep.subr.bf16.mxu1 %v1098_v50 }
  0x4e   : > { %667 = vmatpush1.bf16.msra.mxu0 %v1100_v51  ;;  %1026 = vmatpush1.bf16.msra.mxu1 %v1100_v51 }
  0x4f   : > { %668 = vmatprep.subr.bf16.mxu0 %v1101_v52  ;;  %1011 = vmatprep.subr.bf16.mxu1 %v1101_v52 }
  0x52   : > { %669 = vmatpush1.bf16.msra.mxu0 %v1103_v53  ;;  %1027 = vmatpush1.bf16.msra.mxu1 %v1103_v53 }
  0x53   : > { %670 = vmatprep.subr.bf16.mxu0 %v1104_v54  ;;  %1012 = vmatprep.subr.bf16.mxu1 %v1104_v54 }
  0x56   : > { %671 = vmatpush1.bf16.msra.mxu0 %v1106_v55  ;;  %1028 = vmatpush1.bf16.msra.mxu1 %v1106_v55 }
  0x57   : > { %672 = vmatprep.subr.bf16.mxu0 %v1107_v56  ;;  %1013 = vmatprep.subr.bf16.mxu1 %v1107_v56 }
  0x5a   : > { %673 = vmatpush1.bf16.msra.mxu0 %v1109_v57  ;;  %1029 = vmatpush1.bf16.msra.mxu1 %v1109_v57 }
  0x5b   : > { %674 = vmatprep.subr.bf16.mxu0 %v1110_v58  ;;  %1014 = vmatprep.subr.bf16.mxu1 %v1110_v58 }
  0x5e   : > { %675 = vmatpush1.bf16.msra.mxu0 %v1112_v59  ;;  %1030 = vmatpush1.bf16.msra.mxu1 %v1112_v59 }
  0x5f   : > { %676 = vmatprep.subr.bf16.mxu0 %v1113_v60  ;;  %1015 = vmatprep.subr.bf16.mxu1 %v1113_v60 }
  0x62   : > { %677 = vmatpush1.bf16.msra.mxu0 %v1115_v61  ;;  %1031 = vmatpush1.bf16.msra.mxu1 %v1115_v61 }
  0x63   : > { %678 = vmatprep.subr.bf16.mxu0 %v1116_v62  ;;  %1016 = vmatprep.subr.bf16.mxu1 %v1116_v62 }
  0x66   : > { %679 = vmatpush1.bf16.msra.mxu0 %v1118_v63  ;;  %1032 = vmatpush1.bf16.msra.mxu1 %v1118_v63 }
  0x67   : > { %680 = vmatprep.subr.bf16.mxu0 %v1119_v0  ;;  %1017 = vmatprep.subr.bf16.mxu1 %v1119_v0 }
  0x6a   : > { %681 = vmatpush1.bf16.msra.mxu0 %v1121_v1  ;;  %1033 = vmatpush1.bf16.msra.mxu1 %v1121_v1 }
  0x6d   : > { %683 = vmatmul.mubr.bf16.vlgmr.msra.gmra.mrb[0].mxu0 %v1122_v2  ;;  %693 = vmatmul.mubr.bf16.vlgmr.msra.gmra.mrb[0].mxu1 %v1125_v3 }
 0x140   : > { %v684_v11 = vpop.f32.mrb[0].mxu0  ;;  %v694_v12 = vpop.f32.mrb[0].mxu1 }
 0x141   : > { %v742_v13 = vadd.f32 %v735_v9, %v684_v11  ;;  %v746_v14 = vadd.f32 %v735_v9, %v694_v12  ;;  %v686_v15 = vpop.f32.mrb[1].mxu0  ;;  %v696_v16 = vpop.f32.mrb[1].mxu1 }
 0x142   : > { %v743_v17 = vadd.f32 %v739_v10, %v686_v15  ;;  %v747_v18 = vadd.f32 %v739_v10, %v696_v16  ;;  %v688_v19 = vpop.f32.mrb[2].mxu0  ;;  %v698_v20 = vpop.f32.mrb[2].mxu1  ;;  %784 = sbr.rel (!%p1223_p6) target bundleno = 337 (0x151), region = 82 }
 0x143   : > { %v744_v21 = vadd.f32 %v735_v9, %v688_v19  ;;  %v748_v22 = vadd.f32 %v735_v9, %v698_v20  ;;  %v690_v23 = vpop.f32.mrb[3].mxu0  ;;  %v700_v24 = vpop.f32.mrb[3].mxu1 }
 0x144   : > { %v997_v25 = vpack.c.bf16 %v743_v17, %v742_v13  ;;  %v999_v26 = vpack.c.bf16 %v747_v18, %v746_v14  ;;  %v745_v27 = vadd.f32 %v739_v10, %v690_v23  ;;  %v749_v28 = vadd.f32 %v739_v10, %v700_v24 }
 0x146   : > { %774 = vst [vmem:[%s392_s27] sm:$0xff] %v997_v25  ;;  %776 = vst [vmem:[%s392_s27 + $0x10] sm:$0xff] %v999_v26  ;;  %v998_v29 = vpack.c.bf16 %v745_v27, %v744_v21  ;;  %v1000_v30 = vpack.c.bf16 %v749_v28, %v748_v22 }
 0x148   : > { %775 = vst [vmem:[%s392_s27 + $0x8] sm:$0xff] %v998_v29  ;;  %777 = vst [vmem:[%s392_s27 + $0x18] sm:$0xff] %v1000_v30 }
 0x14d   : > { %v824_v31 = vld [vmem:[%s392_s27] sm:$0xff]  ;;  %v828_v33 = vld [vmem:[%s392_s27 + $0x10] sm:$0xff] }
 0x14e   : > { %825 = vst [vmem:[%s790_s30] sm:$0xff] %v824_v31  ;;  %829 = vst [vmem:[%s790_s30 + $0x20] sm:$0xff] %v828_v33 }
 0x14f   : > { %v826_v32 = vld [vmem:[%s392_s27 + $0x8] sm:$0xff]  ;;  %v830_v34 = vld [vmem:[%s392_s27 + $0x18] sm:$0xff] }
 0x150   : > { %827 = vst [vmem:[%s790_s30 + $0x10] sm:$0xff] %v826_v32  ;;  %831 = vst [vmem:[%s790_s30 + $0x30] sm:$0xff] %v830_v34 }
 0x151 PF: > { %s13_s16 = sadd.s32 1, %s1166_s16   ;;  %s1387_s12 = smov %s1154_s13 }
 0x152   : > { %p10_p12 = scmp.ge.s32.totalorder %s13_s16, 4   ;;  %s1388_s13 = smov %s1228_s22 }
 0x153   : > { %s1389_s14 = smov %s1162_s15  ;;  %s1390_s15 = smov %s1392_s17 }
 0x154   :  { %12 = sbr.rel (!%p10_p12) target bundleno = 3 (0x3), region = 157 }

// kernel: resnet_forward.27
= control target key start
LH: loop header
LB: loop body
LE: loop exit
PB: predicated region body
PF: predicated region fallthrough
CT: control target
= control target key end

     0   :  { %s1110_s15 = smov 0   ;;  %s1112_s16 = smov 0   ;;  %s1249_s0 = inlined_call_operand.vmem [shape: bf16[32,128], index: 0, kind: input, shape index: {}]   ;;  %s1250_s1 = inlined_call_operand.vmem [shape: bf16[128,512], index: 1, kind: input, shape index: {}]   ;;  %s1251_s2 = inlined_call_operand.vmem [shape: f32[1,512], index: 2, kind: input, shape index: {}]   ;;  %s1252_s3 = inlined_call_operand.vmem [shape: bf16[32,512], index: 3, kind: input, shape index: {}, may-alias: {3,4}]   ;;  %s1253_s4 = inlined_call_operand.vmem [shape: bf16[32,512], index: 4, kind: output, shape index: {}, may-alias: {3,4}]  }
   0x1   :  { %s1114_s17 = smov 0   ;;  %s1116_s18 = smov 0  }
   0x2   :  { %s1118_s19 = smov 0  }
   0x3 LB: > { %s29_s20 = sadd.s32 1, %s1078_s18  ;;  %s911_s21 = sadd.s32 4294967295, %s1082_s19   ;;  %s1082_s19 = sphi %s1118_s19, %s14_s19   ;;  %s1078_s18 = sphi %s1116_s18, %s1259_s18   ;;  %s1074_s17 = sphi %s1114_s17, %s1258_s17   ;;  %s1070_s16 = sphi %s1112_s16, %s1257_s16   ;;  %s1066_s15 = sphi %s1110_s15, %s1256_s15  }
   0x4   : > { %p31_p0 = scmp.ge.s32.totalorder %s29_s20, 2  ;;  %p77_p1 = scmp.ne.s32.totalorder %s1070_s16, %s1066_s15 }
   0x5   : > { %p78_p2 = scmp.eq.s32.totalorder %s1082_s19, 0  ;;  %p163_p4 = scmp.eq.s32.totalorder %s911_s21, 1 }
   0x6   : > { %s1261_s20 = smov (%p31_p0, %s29_s20), 0  ;;  %s70_s24 = sadd.s32 1, %s1070_s16 }
   0x7   : > { %p1142_p3 = por %p78_p2, %p77_p1  ;;  %s66_s23 = ssub.s32 %s1078_s18, %s1261_s20 }
   0x8   : > { %p68_p5 = scmp.eq.s32.totalorder %s66_s23, 0  ;;  %p1149_p6 = por %p163_p4, %p77_p1 }
   0x9   : > { %p915_p7 = scmp.ge.s32.totalorder %s1082_s19, 2 }
   0xa   : > { %s1154_s26 = scalar_select %p68_p5, %s1070_s16, %s70_s24  }
   0xb   : > { %197 = sbr.rel (%p915_p7) target bundleno = 37 (0x25), region = 20 }
  0x12   : > { %200 = sbr.rel (!%p1142_p3) target bundleno = 30 (0x1e), region = 24  ;;  %s202_s27 = sand.u32 (%p1142_p3), 1, %s1070_s16  }
  0x13   : > { %s954_s28 = sshll.u32 (%p1142_p3), %s1078_s18, 3  ;;  %s916_s29 = sshll.u32 (%p1142_p3), %s202_s27, 7 }
  0x14   : > { %s1164_s6 = scalar_lea.vmem (%p1142_p3), %s1250_s1, %s954_s28  ;;  %s204_s7 = scalar_lea.vmem (%p1142_p3), [#allocation3], %s916_s29 }
  0x15   : > { %v268_v0 = vld [vmem:[%s1164_s6] sm:$0xff] (%p1142_p3)  ;;  %v270_v1 = vld [vmem:[%s1164_s6 + $0x10] sm:$0xff] (%p1142_p3) }
  0x16   : > { %v272_v2 = vld [vmem:[%s1164_s6 + $0x20] sm:$0xff] (%p1142_p3)  ;;  %269 = vst [vmem:[%s204_s7] sm:$0xff] (%p1142_p3), %v268_v0  ;;  %271 = vst [vmem:[%s204_s7 + $0x8] sm:$0xff] (%p1142_p3), %v270_v1  ;;  %v274_v3 = vld [vmem:[%s1164_s6 + $0x30] sm:$0xff] (%p1142_p3) }
  0x17   : > { %273 = vst [vmem:[%s204_s7 + $0x10] sm:$0xff] (%p1142_p3), %v272_v2  ;;  %v276_v4 = vld [vmem:[%s1164_s6 + $0x40] sm:$0xff] (%p1142_p3)  ;;  %v278_v5 = vld [vmem:[%s1164_s6 + $0x50] sm:$0xff] (%p1142_p3)  ;;  %275 = vst [vmem:[%s204_s7 + $0x18] sm:$0xff] (%p1142_p3), %v274_v3 }
  0x18   : > { %277 = vst [vmem:[%s204_s7 + $0x20] sm:$0xff] (%p1142_p3), %v276_v4  ;;  %279 = vst [vmem:[%s204_s7 + $0x28] sm:$0xff] (%p1142_p3), %v278_v5  ;;  %v280_v6 = vld [vmem:[%s1164_s6 + $0x60] sm:$0xff] (%p1142_p3)  ;;  %v282_v7 = vld [vmem:[%s1164_s6 + $0x70] sm:$0xff] (%p1142_p3) }
  0x19   : > { %v284_v8 = vld [vmem:[%s1164_s6 + $0x80] sm:$0xff]  ;;  %281 = vst [vmem:[%s204_s7 + $0x30] sm:$0xff] %v280_v6  ;;  %283 = vst [vmem:[%s204_s7 + $0x38] sm:$0xff] %v282_v7  ;;  %v286_v9 = vld [vmem:[%s1164_s6 + $0x90] sm:$0xff] }
  0x1a   : > { %285 = vst [vmem:[%s204_s7 + $0x40] sm:$0xff] %v284_v8  ;;  %v288_v10 = vld [vmem:[%s1164_s6 + $0xa0] sm:$0xff]  ;;  %v290_v11 = vld [vmem:[%s1164_s6 + $0xb0] sm:$0xff]  ;;  %287 = vst [vmem:[%s204_s7 + $0x48] sm:$0xff] %v286_v9 }
  0x1b   : > { %289 = vst [vmem:[%s204_s7 + $0x50] sm:$0xff] %v288_v10  ;;  %291 = vst [vmem:[%s204_s7 + $0x58] sm:$0xff] %v290_v11  ;;  %v292_v12 = vld [vmem:[%s1164_s6 + $0xc0] sm:$0xff]  ;;  %v294_v13 = vld [vmem:[%s1164_s6 + $0xd0] sm:$0xff] }
  0x1c   : > { %v296_v14 = vld [vmem:[%s1164_s6 + $0xe0] sm:$0xff]  ;;  %293 = vst [vmem:[%s204_s7 + $0x60] sm:$0xff] %v292_v12  ;;  %295 = vst [vmem:[%s204_s7 + $0x68] sm:$0xff] %v294_v13  ;;  %v298_v15 = vld [vmem:[%s1164_s6 + $0xf0] sm:$0xff] }
  0x1d   : > { %297 = vst [vmem:[%s204_s7 + $0x70] sm:$0xff] %v296_v14  ;;  %299 = vst [vmem:[%s204_s7 + $0x78] sm:$0xff] %v298_v15 }
  0x1e PF: > { %313 = sbr.rel (!%p1142_p3) target bundleno = 37 (0x25), region = 66  ;;  %s315_s8 = sand.u32 (%p1142_p3), 1, %s1070_s16  }
  0x1f   : > { %s955_s9 = sshll.u32 (%p1142_p3), %s1078_s18, 3  ;;  %s919_s10 = sshll.u32 (%p1142_p3), %s315_s8, 5 }
  0x20   : > { %s323_s13 = scalar_lea.vmem (%p1142_p3), %s1252_s3, %s955_s9  ;;  %s317_s14 = scalar_lea.vmem (%p1142_p3), [#allocation4], %s919_s10 }
  0x21   : > { %v357_v16 = vld [vmem:[%s323_s13] sm:$0xff] (%p1142_p3)  ;;  %v359_v17 = vld [vmem:[%s323_s13 + $0x10] sm:$0xff] (%p1142_p3) }
  0x22   : > { %v361_v18 = vld [vmem:[%s323_s13 + $0x20] sm:$0xff] (%p1142_p3)  ;;  %358 = vst [vmem:[%s317_s14] sm:$0xff] (%p1142_p3), %v357_v16  ;;  %360 = vst [vmem:[%s317_s14 + $0x8] sm:$0xff] (%p1142_p3), %v359_v17  ;;  %v363_v19 = vld [vmem:[%s323_s13 + $0x30] sm:$0xff] (%p1142_p3) }
  0x23   : > { %362 = vst [vmem:[%s317_s14 + $0x10] sm:$0xff] (%p1142_p3), %v361_v18  ;;  %364 = vst [vmem:[%s317_s14 + $0x18] sm:$0xff] (%p1142_p3), %v363_v19 }
  0x25 PF: > { %p922_p8 = scmp.ge.s32.totalorder %s1082_s19, 1  ;;  %p369_p9 = scmp.lt.s32.totalorder %s1082_s19, 3 }
  0x27   : > { %p370_p10 = pnand %p922_p8, %p369_p9 }
  0x28   : > { %s376_s21 = sand.u32 (!%p370_p10), 1, %s1066_s15   ;;  %v1084_v20 = vmov (!%p370_p10), 0   ;;  %v1042_v37 = vld [vmem:[%s1249_s0] sm:$0xff] (!%p370_p10)   ;;  %v1043_v38 = vld [vmem:[%s1249_s0 + $0x8] sm:$0xff] (!%p370_p10)   ;;  %s926_s30 = sshll.u32 (!%p370_p10), %s1074_s17, 1  ;;  %v658_v39 = vlaneseq (!%p370_p10) }
  0x29   : > { %373 = sbr.rel (%p370_p10) target bundleno = 308 (0x134), region = 104  ;;  %s923_s22 = sshll.u32 (!%p370_p10), %s376_s21, 7  ;;  %608 = vmatprep.mubr.bf16.mxu0 (!%p370_p10), %v1084_v20  ;;  %618 = vmatprep.mubr.bf16.mxu1 (!%p370_p10), %v1084_v20 }
  0x2a   : > { %s1194_s23 = scalar_lea.vmem (!%p370_p10), [#allocation3], %s923_s22  ;;  %p435_p11 = scmp.lt.s32.totalorder (!%p370_p10), %s926_s30, 3  ;;  %v659_v40 = vshrl.u32 (!%p370_p10), %v658_v39, 7 }
  0x2b   : > { %v1018_v21 = vld [vmem:[%s1194_s23 + $0x4] ss:$8 sps:$4 sm:$0xff] (!%p370_p10)   ;;  %v1020_v22 = vld [vmem:[%s1194_s23] ss:$8 sps:$4 sm:$0xff] (!%p370_p10)   ;;  %v1021_v23 = vld [vmem:[%s1194_s23 + $0x14] ss:$8 sps:$4 sm:$0xff] (!%p370_p10)  }
  0x2c   : > { %576 = vmatprep.subr.bf16.mxu0 (!%p370_p10), %v1018_v21  ;;  %961 = vmatprep.subr.bf16.mxu1 (!%p370_p10), %v1018_v21  ;;  %v1023_v24 = vld [vmem:[%s1194_s23 + $0x10] ss:$8 sps:$4 sm:$0xff] (!%p370_p10)   ;;  %v1024_v25 = vld [vmem:[%s1194_s23 + $0x24] ss:$8 sps:$4 sm:$0xff] (!%p370_p10)   ;;  %v1026_v26 = vld [vmem:[%s1194_s23 + $0x20] ss:$8 sps:$4 sm:$0xff] (!%p370_p10)  }
  0x2d   : > { %577 = vmatpush1.bf16.msra.mxu0 (!%p370_p10), %v1020_v22  ;;  %969 = vmatpush1.bf16.msra.mxu1 (!%p370_p10), %v1020_v22  ;;  %v1027_v27 = vld [vmem:[%s1194_s23 + $0x34] ss:$8 sps:$4 sm:$0xff] (!%p370_p10)   ;;  %v1029_v28 = vld [vmem:[%s1194_s23 + $0x30] ss:$8 sps:$4 sm:$0xff] (!%p370_p10)   ;;  %v1030_v29 = vld [vmem:[%s1194_s23 + $0x44] ss:$8 sps:$4 sm:$0xff] (!%p370_p10)  }
  0x2e   : > { %578 = vmatprep.subr.bf16.mxu0 (!%p370_p10), %v1021_v23  ;;  %962 = vmatprep.subr.bf16.mxu1 (!%p370_p10), %v1021_v23  ;;  %v1032_v30 = vld [vmem:[%s1194_s23 + $0x40] ss:$8 sps:$4 sm:$0xff] (!%p370_p10)   ;;  %v1033_v31 = vld [vmem:[%s1194_s23 + $0x54] ss:$8 sps:$4 sm:$0xff] (!%p370_p10)   ;;  %v1035_v32 = vld [vmem:[%s1194_s23 + $0x50] ss:$8 sps:$4 sm:$0xff] (!%p370_p10)  }
  0x2f   : > { %v1036_v33 = vld [vmem:[%s1194_s23 + $0x64] ss:$8 sps:$4 sm:$0xff] (!%p370_p10)   ;;  %v1038_v34 = vld [vmem:[%s1194_s23 + $0x60] ss:$8 sps:$4 sm:$0xff] (!%p370_p10)   ;;  %v1039_v35 = vld [vmem:[%s1194_s23 + $0x74] ss:$8 sps:$4 sm:$0xff] (!%p370_p10)  }
  0x30   : > { %v1041_v36 = vld [vmem:[%s1194_s23 + $0x70] ss:$8 sps:$4 sm:$0xff]   ;;  %s1263_s30 = smov (!%p435_p11, %s926_s30), 3  ;;  %s1221_s5 = sshll.u32 %s376_s21, 5  ;;  %v660_v41 = vsub.s32 0, %v659_v40  ;;  %v664_v43 = vsub.s32 1, %v659_v40 }
  0x31   : > { %579 = vmatpush1.bf16.msra.mxu0 %v1023_v24  ;;  %970 = vmatpush1.bf16.msra.mxu1 %v1023_v24  ;;  %s437_s8 = scalar_lea.vmem %s1251_s2, %s1263_s30  ;;  %s385_s9 = scalar_lea.vmem [#allocation4], %s1221_s5 }
  0x32   : > { %580 = vmatprep.subr.bf16.mxu0 %v1024_v25  ;;  %963 = vmatprep.subr.bf16.mxu1 %v1024_v25  ;;  %v656_v42 = vld [vmem:[%s437_s8] sm:$0x3]  ;;  %v678_v45 = vld [vmem:[%s385_s9 + $0x10] sm:$0xff]  ;;  %v677_v48 = vld [vmem:[%s385_s9 + $0x8] sm:$0xff]  ;;  %s422_s15 = scalar_lea.vmem [#allocation5], %s1221_s5  ;;  %s960_s10 = sshll.u32 (%p1149_p6), %s1074_s17, 3 }
  0x33   : > { %v676_v44 = vld [vmem:[%s385_s9] sm:$0xff]  ;;  %v661_v46 = vrot.slane %v656_v42, %v660_v41  ;;  %v665_v47 = vrot.slane %v656_v42, %v664_v43  ;;  %v679_v49 = vld [vmem:[%s385_s9 + $0x18] sm:$0xff]  ;;  %v684_v51 = vunpack.c.l.bf16 %v678_v45  ;;  %v685_v55 = vunpack.c.h.bf16 %v678_v45  ;;  %s744_s13 = scalar_lea.vmem (%p1149_p6), %s1253_s4, %s960_s10 }
  0x34   : > { %v680_v50 = vunpack.c.l.bf16 %v676_v44  ;;  %v681_v54 = vunpack.c.h.bf16 %v676_v44  ;;  %v682_v60 = vunpack.c.l.bf16 %v677_v48  ;;  %v686_v61 = vunpack.c.l.bf16 %v679_v49 }
  0x35   : > { %581 = vmatpush1.bf16.msra.mxu0 %v1026_v26  ;;  %971 = vmatpush1.bf16.msra.mxu1 %v1026_v26  ;;  %v683_v2 = vunpack.c.h.bf16 %v677_v48  ;;  %v687_v3 = vunpack.c.h.bf16 %v679_v49 }
  0x36   : > { %582 = vmatprep.subr.bf16.mxu0 %v1027_v27  ;;  %964 = vmatprep.subr.bf16.mxu1 %v1027_v27 }
  0x39   : > { %583 = vmatpush1.bf16.msra.mxu0 %v1029_v28  ;;  %972 = vmatpush1.bf16.msra.mxu1 %v1029_v28 }
  0x3a   : > { %584 = vmatprep.subr.bf16.mxu0 %v1030_v29  ;;  %965 = vmatprep.subr.bf16.mxu1 %v1030_v29 }
  0x3d   : > { %585 = vmatpush1.bf16.msra.mxu0 %v1032_v30  ;;  %973 = vmatpush1.bf16.msra.mxu1 %v1032_v30 }
  0x3e   : > { %586 = vmatprep.subr.bf16.mxu0 %v1033_v31  ;;  %966 = vmatprep.subr.bf16.mxu1 %v1033_v31 }
  0x41   : > { %587 = vmatpush1.bf16.msra.mxu0 %v1035_v32  ;;  %974 = vmatpush1.bf16.msra.mxu1 %v1035_v32 }
  0x42   : > { %588 = vmatprep.subr.bf16.mxu0 %v1036_v33  ;;  %967 = vmatprep.subr.bf16.mxu1 %v1036_v33 }
  0x45   : > { %589 = vmatpush1.bf16.msra.mxu0 %v1038_v34  ;;  %975 = vmatpush1.bf16.msra.mxu1 %v1038_v34 }
  0x46   : > { %590 = vmatprep.subr.bf16.mxu0 %v1039_v35  ;;  %968 = vmatprep.subr.bf16.mxu1 %v1039_v35 }
  0x49   : > { %591 = vmatpush1.bf16.msra.mxu0 %v1041_v36  ;;  %976 = vmatpush1.bf16.msra.mxu1 %v1041_v36 }
  0x4c   : > { %609 = vmatmul.mubr.bf16.vlgmr.msra.gmra.mrb[0].mxu0 %v1042_v37  ;;  %619 = vmatmul.mubr.bf16.vlgmr.msra.gmra.mrb[0].mxu1 %v1043_v38 }
 0x11f   : > { %v610_v52 = vpop.f32.mrb[0].mxu0  ;;  %v620_v53 = vpop.f32.mrb[0].mxu1 }
 0x120   : > { %v668_v56 = vadd.f32 %v661_v46, %v610_v52  ;;  %v672_v57 = vadd.f32 %v661_v46, %v620_v53  ;;  %v612_v58 = vpop.f32.mrb[1].mxu0  ;;  %v622_v59 = vpop.f32.mrb[1].mxu1 }
 0x121   : > { %v669_v62 = vadd.f32 %v665_v47, %v612_v58  ;;  %v673_v63 = vadd.f32 %v665_v47, %v622_v59  ;;  %v614_v0 = vpop.f32.mrb[2].mxu0  ;;  %v624_v1 = vpop.f32.mrb[2].mxu1 }
 0x122   : > { %v688_v4 = vadd.f32 %v680_v50, %v668_v56  ;;  %v692_v5 = vadd.f32 %v684_v51, %v672_v57  ;;  %v670_v6 = vadd.f32 %v661_v46, %v614_v0  ;;  %v674_v7 = vadd.f32 %v661_v46, %v624_v1  ;;  %v616_v8 = vpop.f32.mrb[3].mxu0  ;;  %v626_v9 = vpop.f32.mrb[3].mxu1 }
 0x123   : > { %v689_v10 = vadd.f32 %v681_v54, %v669_v62  ;;  %v693_v11 = vadd.f32 %v685_v55, %v673_v63  ;;  %v671_v12 = vadd.f32 %v665_v47, %v616_v8  ;;  %v675_v13 = vadd.f32 %v665_v47, %v626_v9 }
 0x124   : > { %v696_v14 = vmax.f32 %v688_v4, 0.0  ;;  %v700_v15 = vmax.f32 %v692_v5, 0.0  ;;  %v690_v16 = vadd.f32 %v682_v60, %v670_v6  ;;  %v694_v17 = vadd.f32 %v686_v61, %v674_v7 }
 0x125   : > { %v697_v18 = vmax.f32 %v689_v10, 0.0  ;;  %v701_v19 = vmax.f32 %v693_v11, 0.0  ;;  %v691_v20 = vadd.f32 %v683_v2, %v671_v12  ;;  %v695_v21 = vadd.f32 %v687_v3, %v675_v13  ;;  %738 = sbr.rel (!%p1149_p6) target bundleno = 308 (0x134), region = 124 }
 0x126   : > { %v698_v22 = vmax.f32 %v690_v16, 0.0  ;;  %v702_v23 = vmax.f32 %v694_v17, 0.0 }
 0x127   : > { %v956_v24 = vpack.c.bf16 %v697_v18, %v696_v14  ;;  %v958_v25 = vpack.c.bf16 %v701_v19, %v700_v15  ;;  %v699_v26 = vmax.f32 %v691_v20, 0.0  ;;  %v703_v27 = vmax.f32 %v695_v21, 0.0 }
 0x129   : > { %728 = vst [vmem:[%s422_s15] sm:$0xff] %v956_v24  ;;  %730 = vst [vmem:[%s422_s15 + $0x10] sm:$0xff] %v958_v25  ;;  %v957_v28 = vpack.c.bf16 %v699_v26, %v698_v22  ;;  %v959_v29 = vpack.c.bf16 %v703_v27, %v702_v23 }
 0x12b   : > { %729 = vst [vmem:[%s422_s15 + $0x8] sm:$0xff] %v957_v28  ;;  %731 = vst [vmem:[%s422_s15 + $0x18] sm:$0xff] %v959_v29 }
 0x130   : > { %v778_v30 = vld [vmem:[%s422_s15] sm:$0xff]  ;;  %v782_v32 = vld [vmem:[%s422_s15 + $0x10] sm:$0xff] }
 0x131   : > { %779 = vst [vmem:[%s744_s13] sm:$0xff] %v778_v30  ;;  %783 = vst [vmem:[%s744_s13 + $0x20] sm:$0xff] %v782_v32 }
 0x132   : > { %v780_v31 = vld [vmem:[%s422_s15 + $0x8] sm:$0xff]  ;;  %v784_v33 = vld [vmem:[%s422_s15 + $0x18] sm:$0xff] }
 0x133   : > { %781 = vst [vmem:[%s744_s13 + $0x10] sm:$0xff] %v780_v31  ;;  %785 = vst [vmem:[%s744_s13 + $0x30] sm:$0xff] %v784_v33 }
 0x134 PF: > { %s14_s19 = sadd.s32 1, %s1082_s19   ;;  %s1256_s15 = smov %s1070_s16 }
 0x135   : > { %p11_p12 = scmp.ge.s32.totalorder %s14_s19, 4   ;;  %s1257_s16 = smov %s1154_s26 }
 0x136   : > { %s1258_s17 = smov %s1078_s18  ;;  %s1259_s18 = smov %s1261_s20 }
 0x137   :  { %13 = sbr.rel (!%p11_p12) target bundleno = 3 (0x3), region = 207 }

// kernel: resnet_forward.28
= control target key start
LH: loop header
LB: loop body
LE: loop exit
PB: predicated region body
PF: predicated region fallthrough
CT: control target
= control target key end

     0   :  { %s1106_s1 = inlined_call_operand.vmem [shape: bf16[512,256], index: 1, kind: input, shape index: {}]   ;;  %s1107_s0 = inlined_call_operand.vmem [shape: bf16[32,512], index: 0, kind: input, shape index: {}]   ;;  %s1108_s2 = inlined_call_operand.vmem [shape: f32[1,256], index: 2, kind: input, shape index: {}]   ;;  %s1109_s3 = inlined_call_operand.vmem [shape: bf16[32,256], index: 3, kind: output, shape index: {}]  }
   0x1   :  { %v747_v0 = vld [vmem:[%s1106_s1 + $0x4] ss:$8 sps:$4 sm:$0xff]   ;;  %v751_v2 = vld [vmem:[%s1106_s1] ss:$8 sps:$4 sm:$0xff]   ;;  %v753_v4 = vld [vmem:[%s1106_s1 + $0x14] ss:$8 sps:$4 sm:$0xff]  }
   0x2   :  { %v749_v1 = vld [vmem:[%s1106_s1 + $0x104] ss:$8 sps:$4 sm:$0xff]   ;;  %466 = vmatprep.subr.bf16.mxu1 %v747_v0  ;;  %v752_v3 = vld [vmem:[%s1106_s1 + $0x100] ss:$8 sps:$4 sm:$0xff]   ;;  %v755_v5 = vld [vmem:[%s1106_s1 + $0x114] ss:$8 sps:$4 sm:$0xff]  }
   0x3   :  { %519 = vmatprep.subr.bf16.mxu0 %v749_v1  ;;  %467 = vmatpush1.bf16.msra.mxu1 %v751_v2  ;;  %v757_v6 = vld [vmem:[%s1106_s1 + $0x10] ss:$8 sps:$4 sm:$0xff]   ;;  %v759_v8 = vld [vmem:[%s1106_s1 + $0x24] ss:$8 sps:$4 sm:$0xff]   ;;  %v763_v10 = vld [vmem:[%s1106_s1 + $0x20] ss:$8 sps:$4 sm:$0xff]  }
   0x4   :  { %520 = vmatpush1.bf16.msra.mxu0 %v752_v3  ;;  %468 = vmatprep.subr.bf16.mxu1 %v753_v4  ;;  %v758_v7 = vld [vmem:[%s1106_s1 + $0x110] ss:$8 sps:$4 sm:$0xff]   ;;  %v761_v9 = vld [vmem:[%s1106_s1 + $0x124] ss:$8 sps:$4 sm:$0xff]   ;;  %v764_v11 = vld [vmem:[%s1106_s1 + $0x120] ss:$8 sps:$4 sm:$0xff]  }
   0x5   :  { %521 = vmatprep.subr.bf16.mxu0 %v755_v5  ;;  %v765_v12 = vld [vmem:[%s1106_s1 + $0x34] ss:$8 sps:$4 sm:$0xff]   ;;  %v769_v14 = vld [vmem:[%s1106_s1 + $0x30] ss:$8 sps:$4 sm:$0xff]   ;;  %v771_v16 = vld [vmem:[%s1106_s1 + $0x44] ss:$8 sps:$4 sm:$0xff]  }
   0x6   :  { %v767_v13 = vld [vmem:[%s1106_s1 + $0x134] ss:$8 sps:$4 sm:$0xff]   ;;  %v770_v15 = vld [vmem:[%s1106_s1 + $0x130] ss:$8 sps:$4 sm:$0xff]   ;;  %v773_v17 = vld [vmem:[%s1106_s1 + $0x144] ss:$8 sps:$4 sm:$0xff]  }
   0x7   :  { %469 = vmatpush1.bf16.msra.mxu1 %v757_v6  ;;  %v775_v18 = vld [vmem:[%s1106_s1 + $0x40] ss:$8 sps:$4 sm:$0xff]   ;;  %v777_v20 = vld [vmem:[%s1106_s1 + $0x54] ss:$8 sps:$4 sm:$0xff]   ;;  %v781_v22 = vld [vmem:[%s1106_s1 + $0x50] ss:$8 sps:$4 sm:$0xff]  }
   0x8   :  { %522 = vmatpush1.bf16.msra.mxu0 %v758_v7  ;;  %470 = vmatprep.subr.bf16.mxu1 %v759_v8  ;;  %v776_v19 = vld [vmem:[%s1106_s1 + $0x140] ss:$8 sps:$4 sm:$0xff]   ;;  %v779_v21 = vld [vmem:[%s1106_s1 + $0x154] ss:$8 sps:$4 sm:$0xff]   ;;  %v782_v23 = vld [vmem:[%s1106_s1 + $0x150] ss:$8 sps:$4 sm:$0xff]   ;;  %v601_v8 = vlaneseq }
   0x9   :  { %523 = vmatprep.subr.bf16.mxu0 %v761_v9  ;;  %v783_v24 = vld [vmem:[%s1106_s1 + $0x64] ss:$8 sps:$4 sm:$0xff]   ;;  %v787_v26 = vld [vmem:[%s1106_s1 + $0x60] ss:$8 sps:$4 sm:$0xff]   ;;  %v789_v28 = vld [vmem:[%s1106_s1 + $0x74] ss:$8 sps:$4 sm:$0xff]  }
   0xa   :  { %v785_v25 = vld [vmem:[%s1106_s1 + $0x164] ss:$8 sps:$4 sm:$0xff]   ;;  %v788_v27 = vld [vmem:[%s1106_s1 + $0x160] ss:$8 sps:$4 sm:$0xff]   ;;  %v791_v29 = vld [vmem:[%s1106_s1 + $0x174] ss:$8 sps:$4 sm:$0xff]  }
   0xb   :  { %471 = vmatpush1.bf16.msra.mxu1 %v763_v10  ;;  %v793_v30 = vld [vmem:[%s1106_s1 + $0x70] ss:$8 sps:$4 sm:$0xff]   ;;  %v795_v32 = vld [vmem:[%s1106_s1 + $0x84] ss:$8 sps:$4 sm:$0xff]   ;;  %v799_v34 = vld [vmem:[%s1106_s1 + $0x80] ss:$8 sps:$4 sm:$0xff]  }
   0xc   :  { %524 = vmatpush1.bf16.msra.mxu0 %v764_v11  ;;  %472 = vmatprep.subr.bf16.mxu1 %v765_v12  ;;  %v794_v31 = vld [vmem:[%s1106_s1 + $0x170] ss:$8 sps:$4 sm:$0xff]   ;;  %v797_v33 = vld [vmem:[%s1106_s1 + $0x184] ss:$8 sps:$4 sm:$0xff]   ;;  %v800_v35 = vld [vmem:[%s1106_s1 + $0x180] ss:$8 sps:$4 sm:$0xff]  }
   0xd   :  { %525 = vmatprep.subr.bf16.mxu0 %v767_v13  ;;  %v801_v36 = vld [vmem:[%s1106_s1 + $0x94] ss:$8 sps:$4 sm:$0xff]   ;;  %v805_v38 = vld [vmem:[%s1106_s1 + $0x90] ss:$8 sps:$4 sm:$0xff]   ;;  %v807_v40 = vld [vmem:[%s1106_s1 + $0xa4] ss:$8 sps:$4 sm:$0xff]  }
   0xe   :  { %v803_v37 = vld [vmem:[%s1106_s1 + $0x194] ss:$8 sps:$4 sm:$0xff]   ;;  %v806_v39 = vld [vmem:[%s1106_s1 + $0x190] ss:$8 sps:$4 sm:$0xff]   ;;  %v809_v41 = vld [vmem:[%s1106_s1 + $0x1a4] ss:$8 sps:$4 sm:$0xff]  }
   0xf   :  { %473 = vmatpush1.bf16.msra.mxu1 %v769_v14  ;;  %v811_v42 = vld [vmem:[%s1106_s1 + $0xa0] ss:$8 sps:$4 sm:$0xff]   ;;  %v813_v44 = vld [vmem:[%s1106_s1 + $0xb4] ss:$8 sps:$4 sm:$0xff]   ;;  %v817_v46 = vld [vmem:[%s1106_s1 + $0xb0] ss:$8 sps:$4 sm:$0xff]  }
  0x10   :  { %526 = vmatpush1.bf16.msra.mxu0 %v770_v15  ;;  %474 = vmatprep.subr.bf16.mxu1 %v771_v16  ;;  %v812_v43 = vld [vmem:[%s1106_s1 + $0x1a0] ss:$8 sps:$4 sm:$0xff]   ;;  %v815_v45 = vld [vmem:[%s1106_s1 + $0x1b4] ss:$8 sps:$4 sm:$0xff]   ;;  %v818_v47 = vld [vmem:[%s1106_s1 + $0x1b0] ss:$8 sps:$4 sm:$0xff]  }
  0x11   :  { %527 = vmatprep.subr.bf16.mxu0 %v773_v17  ;;  %v819_v48 = vld [vmem:[%s1106_s1 + $0xc4] ss:$8 sps:$4 sm:$0xff]   ;;  %v823_v52 = vld [vmem:[%s1106_s1 + $0xc0] ss:$8 sps:$4 sm:$0xff]   ;;  %v825_v54 = vld [vmem:[%s1106_s1 + $0xd4] ss:$8 sps:$4 sm:$0xff]  }
  0x12   :  { %v845_v49 = vld [vmem:[%s1107_s0 + $0x4] ss:$16 sps:$4 sm:$0xff]   ;;  %v848_v51 = vld [vmem:[%s1107_s0 + $0xc] ss:$16 sps:$4 sm:$0xff]   ;;  %v824_v53 = vld [vmem:[%s1106_s1 + $0x1c0] ss:$8 sps:$4 sm:$0xff]  }
  0x13   :  { %475 = vmatpush1.bf16.msra.mxu1 %v775_v18  ;;  %v821_v50 = vld [vmem:[%s1106_s1 + $0x1c4] ss:$8 sps:$4 sm:$0xff]   ;;  %498 = vmatprep.mubr.bf16.mxu1 %v845_v49  ;;  %v827_v55 = vld [vmem:[%s1106_s1 + $0x1d4] ss:$8 sps:$4 sm:$0xff]   ;;  %v829_v56 = vld [vmem:[%s1106_s1 + $0xd0] ss:$8 sps:$4 sm:$0xff]  }
  0x14   :  { %528 = vmatpush1.bf16.msra.mxu0 %v776_v19  ;;  %476 = vmatprep.subr.bf16.mxu1 %v777_v20  ;;  %v830_v57 = vld [vmem:[%s1106_s1 + $0x1d0] ss:$8 sps:$4 sm:$0xff]   ;;  %v831_v58 = vld [vmem:[%s1106_s1 + $0xe4] ss:$8 sps:$4 sm:$0xff]   ;;  %v835_v60 = vld [vmem:[%s1106_s1 + $0xe0] ss:$8 sps:$4 sm:$0xff]  }
  0x15   :  { %529 = vmatprep.subr.bf16.mxu0 %v779_v21  ;;  %551 = vmatprep.mubr.bf16.mxu0 %v848_v51  ;;  %v833_v59 = vld [vmem:[%s1106_s1 + $0x1e4] ss:$8 sps:$4 sm:$0xff]   ;;  %v836_v61 = vld [vmem:[%s1106_s1 + $0x1e0] ss:$8 sps:$4 sm:$0xff]   ;;  %v837_v62 = vld [vmem:[%s1106_s1 + $0xf4] ss:$8 sps:$4 sm:$0xff]  }
  0x16   :  { %v839_v63 = vld [vmem:[%s1106_s1 + $0x1f4] ss:$8 sps:$4 sm:$0xff]   ;;  %v841_v0 = vld [vmem:[%s1106_s1 + $0xf0] ss:$8 sps:$4 sm:$0xff]   ;;  %v602_v9 = vshrl.u32 %v601_v8, 7 }
  0x17   :  { %477 = vmatpush1.bf16.msra.mxu1 %v781_v22  ;;  %v842_v1 = vld [vmem:[%s1106_s1 + $0x1f0] ss:$8 sps:$4 sm:$0xff]   ;;  %v849_v4 = vld [vmem:[%s1107_s0 + $0x24] ss:$16 sps:$4 sm:$0xff]   ;;  %v851_v5 = vld [vmem:[%s1107_s0 + $0x2c] ss:$16 sps:$4 sm:$0xff]  }
  0x18   :  { %530 = vmatpush1.bf16.msra.mxu0 %v782_v23  ;;  %478 = vmatprep.subr.bf16.mxu1 %v783_v24  ;;  %v843_v2 = vld [vmem:[%s1107_s0] ss:$16 sps:$4 sm:$0xff]   ;;  %v846_v3 = vld [vmem:[%s1107_s0 + $0x8] ss:$16 sps:$4 sm:$0xff]   ;;  %v603_v10 = vsub.s32 0, %v602_v9  ;;  %v607_v12 = vsub.s32 1, %v602_v9 }
  0x19   :  { %531 = vmatprep.subr.bf16.mxu0 %v785_v25  ;;  %v853_v6 = vld [vmem:[%s1107_s0 + $0x20] ss:$16 sps:$4 sm:$0xff]   ;;  %v854_v7 = vld [vmem:[%s1107_s0 + $0x28] ss:$16 sps:$4 sm:$0xff]  }
  0x1a   :  { %v599_v11 = vld [vmem:[%s1108_s2] sm:$0x3] }
  0x1b   :  { %479 = vmatpush1.bf16.msra.mxu1 %v787_v26  ;;  %v604_v13 = vrot.slane %v599_v11, %v603_v10  ;;  %v608_v16 = vrot.slane %v599_v11, %v607_v12 }
  0x1c   :  { %532 = vmatpush1.bf16.msra.mxu0 %v788_v27  ;;  %480 = vmatprep.subr.bf16.mxu1 %v789_v28 }
  0x1d   :  { %533 = vmatprep.subr.bf16.mxu0 %v791_v29 }
  0x1f   :  { %481 = vmatpush1.bf16.msra.mxu1 %v793_v30 }
  0x20   :  { %534 = vmatpush1.bf16.msra.mxu0 %v794_v31  ;;  %482 = vmatprep.subr.bf16.mxu1 %v795_v32 }
  0x21   :  { %535 = vmatprep.subr.bf16.mxu0 %v797_v33 }
  0x23   :  { %483 = vmatpush1.bf16.msra.mxu1 %v799_v34 }
  0x24   :  { %536 = vmatpush1.bf16.msra.mxu0 %v800_v35  ;;  %484 = vmatprep.subr.bf16.mxu1 %v801_v36 }
  0x25   :  { %537 = vmatprep.subr.bf16.mxu0 %v803_v37 }
  0x27   :  { %485 = vmatpush1.bf16.msra.mxu1 %v805_v38 }
  0x28   :  { %538 = vmatpush1.bf16.msra.mxu0 %v806_v39  ;;  %486 = vmatprep.subr.bf16.mxu1 %v807_v40 }
  0x29   :  { %539 = vmatprep.subr.bf16.mxu0 %v809_v41 }
  0x2b   :  { %487 = vmatpush1.bf16.msra.mxu1 %v811_v42 }
  0x2c   :  { %540 = vmatpush1.bf16.msra.mxu0 %v812_v43  ;;  %488 = vmatprep.subr.bf16.mxu1 %v813_v44 }
  0x2d   :  { %541 = vmatprep.subr.bf16.mxu0 %v815_v45 }
  0x2f   :  { %489 = vmatpush1.bf16.msra.mxu1 %v817_v46 }
  0x30   :  { %542 = vmatpush1.bf16.msra.mxu0 %v818_v47  ;;  %490 = vmatprep.subr.bf16.mxu1 %v819_v48 }
  0x31   :  { %543 = vmatprep.subr.bf16.mxu0 %v821_v50 }
  0x33   :  { %491 = vmatpush1.bf16.msra.mxu1 %v823_v52 }
  0x34   :  { %544 = vmatpush1.bf16.msra.mxu0 %v824_v53  ;;  %492 = vmatprep.subr.bf16.mxu1 %v825_v54 }
  0x35   :  { %545 = vmatprep.subr.bf16.mxu0 %v827_v55 }
  0x37   :  { %493 = vmatpush1.bf16.msra.mxu1 %v829_v56 }
  0x38   :  { %546 = vmatpush1.bf16.msra.mxu0 %v830_v57  ;;  %494 = vmatprep.subr.bf16.mxu1 %v831_v58 }
  0x39   :  { %547 = vmatprep.subr.bf16.mxu0 %v833_v59 }
  0x3b   :  { %495 = vmatpush1.bf16.msra.mxu1 %v835_v60 }
  0x3c   :  { %548 = vmatpush1.bf16.msra.mxu0 %v836_v61  ;;  %496 = vmatprep.subr.bf16.mxu1 %v837_v62 }
  0x3d   :  { %549 = vmatprep.subr.bf16.mxu0 %v839_v63 }
  0x3f   :  { %497 = vmatpush1.bf16.msra.mxu1 %v841_v0 }
  0x40   :  { %550 = vmatpush1.bf16.msra.mxu0 %v842_v1 }
  0x42   :  { %499 = vmatmul.mubr.bf16.vlgmr.msra.gmra.mrb[0].mxu1 %v843_v2 }
  0x43   :  { %552 = vmatmul.mubr.bf16.vlgmr.msra.gmra.mrb[0].mxu0 %v846_v3  ;;  %508 = vmatprep.mubr.bf16.mxu1 %v849_v4 }
  0x44   :  { %561 = vmatprep.mubr.bf16.mxu0 %v851_v5 }
  0x4a   :  { %509 = vmatmul.mubr.bf16.gmra.mrb[4].mxu1 %v853_v6 }
  0x4b   :  { %562 = vmatmul.mubr.bf16.gmra.mrb[4].mxu0 %v854_v7 }
 0x115   :  { %v500_v14 = vpop.f32.mrb[0].mxu1 }
 0x116   :  { %v553_v15 = vpop.f32.mrb[0].mxu0  ;;  %v502_v18 = vpop.f32.mrb[1].mxu1 }
 0x117   :  { %v554_v17 = vadd.f32 %v553_v15, %v500_v14  ;;  %v555_v19 = vpop.f32.mrb[1].mxu0  ;;  %v504_v21 = vpop.f32.mrb[2].mxu1 }
 0x118   :  { %v556_v20 = vadd.f32 %v555_v19, %v502_v18  ;;  %v557_v22 = vpop.f32.mrb[2].mxu0  ;;  %v506_v25 = vpop.f32.mrb[3].mxu1 }
 0x119   :  { %v611_v23 = vadd.f32 %v604_v13, %v554_v17  ;;  %v558_v24 = vadd.f32 %v557_v22, %v504_v21  ;;  %v559_v26 = vpop.f32.mrb[3].mxu0 }
 0x11a   :  { %v612_v27 = vadd.f32 %v608_v16, %v556_v20  ;;  %v560_v28 = vadd.f32 %v559_v26, %v506_v25 }
 0x11b   :  { %v619_v29 = vmax.f32 %v611_v23, 0.0  ;;  %v613_v30 = vadd.f32 %v604_v13, %v558_v24 }
 0x11c   :  { %v620_v31 = vmax.f32 %v612_v27, 0.0  ;;  %v614_v32 = vadd.f32 %v608_v16, %v560_v28 }
 0x11d   :  { %v621_v33 = vmax.f32 %v613_v30, 0.0  ;;  %v510_v36 = vpop.f32.mrb[4].mxu1 }
 0x11e   :  { %v735_v34 = vpack.c.bf16 %v620_v31, %v619_v29  ;;  %v622_v35 = vmax.f32 %v614_v32, 0.0  ;;  %v563_v37 = vpop.f32.mrb[4].mxu0  ;;  %v512_v39 = vpop.f32.mrb[5].mxu1 }
 0x11f   :  { %v564_v38 = vadd.f32 %v563_v37, %v510_v36  ;;  %v565_v40 = vpop.f32.mrb[5].mxu0  ;;  %v514_v43 = vpop.f32.mrb[6].mxu1 }
 0x120   :  { %651 = vst [vmem:[%s1109_s3] sm:$0xff] %v735_v34  ;;  %v736_v41 = vpack.c.bf16 %v622_v35, %v621_v33  ;;  %v566_v42 = vadd.f32 %v565_v40, %v512_v39  ;;  %v567_v44 = vpop.f32.mrb[6].mxu0  ;;  %v516_v47 = vpop.f32.mrb[7].mxu1 }
 0x121   :  { %v615_v45 = vadd.f32 %v604_v13, %v564_v38  ;;  %v568_v46 = vadd.f32 %v567_v44, %v514_v43  ;;  %v569_v48 = vpop.f32.mrb[7].mxu0 }
 0x122   :  { %652 = vst [vmem:[%s1109_s3 + $0x8] sm:$0xff] %v736_v41  ;;  %v616_v49 = vadd.f32 %v608_v16, %v566_v42  ;;  %v570_v50 = vadd.f32 %v569_v48, %v516_v47 }
 0x123   :  { %v623_v51 = vmax.f32 %v615_v45, 0.0  ;;  %v617_v52 = vadd.f32 %v604_v13, %v568_v46 }
 0x124   :  { %v624_v53 = vmax.f32 %v616_v49, 0.0  ;;  %v618_v54 = vadd.f32 %v608_v16, %v570_v50 }
 0x125   :  { %v625_v55 = vmax.f32 %v617_v52, 0.0 }
 0x126   :  { %v737_v56 = vpack.c.bf16 %v624_v53, %v623_v51  ;;  %v626_v57 = vmax.f32 %v618_v54, 0.0 }
 0x128   :  { %653 = vst [vmem:[%s1109_s3 + $0x10] sm:$0xff] %v737_v56  ;;  %v738_v58 = vpack.c.bf16 %v626_v57, %v625_v55 }
 0x12a   :  { %654 = vst [vmem:[%s1109_s3 + $0x18] sm:$0xff] %v738_v58 }

// kernel: resnet_forward.29
= control target key start
LH: loop header
LB: loop body
LE: loop exit
PB: predicated region body
PF: predicated region fallthrough
CT: control target
= control target key end

     0   :  { %s1036_s12 = smov 0   ;;  %s1038_s13 = smov 0   ;;  %s1135_s0 = inlined_call_operand.vmem [shape: bf16[8,2304], index: 0, kind: input, shape index: {}]   ;;  %s1136_s1 = inlined_call_operand.vmem [shape: bf16[2304,256], index: 1, kind: input, shape index: {}]   ;;  %s1137_s2 = inlined_call_operand.vmem [shape: f32[1,256], index: 2, kind: input, shape index: {}]   ;;  %s1138_s3 = inlined_call_operand.vmem [shape: bf16[8,256], index: 3, kind: output, shape index: {}]  }
   0x1   :  { %s1040_s14 = smov 0  }
   0x2 LB: > { %s25_s15 = sadd.s32 1, %s1008_s13  ;;  %p825_p0 = scmp.ge.s32.totalorder %s1012_s14, 1  ;;  %s1012_s14 = sphi %s1040_s14, %s13_s14   ;;  %s1008_s13 = sphi %s1038_s13, %s1140_s13   ;;  %s1004_s12 = sphi %s1036_s12, %s1139_s12  }
   0x3   : > { %p26_p1 = scmp.ge.s32.totalorder %s25_s15, 6  ;;  %p194_p2 = scmp.lt.s32.totalorder %s1012_s14, 7 }
   0x5   : > { %s1142_s15 = smov (%p26_p1, %s25_s15), 0  ;;  %p195_p3 = pnand %p825_p0, %p194_p2 }
   0x6   : > { %s240_s16 = smul.u32 (!%p195_p3), 3, %s1004_s12  ;;  %p829_p6 = scmp.ne.s32.totalorder (!%p195_p3), %s1004_s12, 0 }
   0x7   : > { %198 = sbr.rel (%p195_p3) target bundleno = 321 (0x141), region = 32 }
   0x8   : > { %s250_s17 = smul.u32 (!%p195_p3), 48, %s1004_s12  ;;  %p243_p4 = scmp.lt.s32.totalorder (!%p195_p3), %s240_s16, 17 }
   0xa   : > { %p252_p5 = scmp.lt.s32.totalorder (!%p195_p3), %s250_s17, 287 }
   0xe   : > { %s1144_s16 = smov (!%p243_p4, %s240_s16), 17  ;;  %s1146_s17 = smov (!%p252_p5, %s250_s17), 287 }
   0xf   : > { %s826_s18 = sshll.u32 %s1144_s16, 2  ;;  %s887_s22 = sshll.u32 %s1146_s17, 3  ;;  %v1014_v0 = vmov (!%p829_p6), 0.0  }
  0x10   : > { %s1061_s21 = scalar_lea.vmem %s1135_s0, %s826_s18  ;;  %s1066_s25 = scalar_lea.vmem %s1136_s1, %s887_s22  ;;  %282 = vst [vmem:[#allocation2] sm:$0xff] (!%p829_p6), %v1014_v0  ;;  %283 = vst [vmem:[#allocation2 + $0x8] sm:$0xff] (!%p829_p6), %v1014_v0 }
  0x11   : > { %281 = sbr.rel (%p829_p6) target bundleno = 24 (0x18), region = 36 }
  0x18 PF: > { %v915_v1 = vld [vmem:[%s1066_s25 + $0x4] ss:$8 sps:$4 sm:$0xff]   ;;  %v917_v2 = vld [vmem:[%s1066_s25] ss:$8 sps:$4 sm:$0xff]   ;;  %v1015_v3 = vmov 0   ;;  %p881_p7 = scmp.ne.s32.totalorder %s1004_s12, 5 }
  0x19   : > { %660 = vmatprep.mubr.bf16.mxu1 %v1015_v3  ;;  %587 = vmatprep.subr.bf16.mxu0 %v915_v1  ;;  %v918_v4 = vld [vmem:[%s1066_s25 + $0x14] ss:$8 sps:$4 sm:$0xff]   ;;  %v920_v5 = vld [vmem:[%s1066_s25 + $0x10] ss:$8 sps:$4 sm:$0xff]   ;;  %v921_v6 = vld [vmem:[%s1066_s25 + $0x24] ss:$8 sps:$4 sm:$0xff]  }
  0x1a   : > { %588 = vmatpush1.bf16.msra.mxu0 %v917_v2  ;;  %v923_v7 = vld [vmem:[%s1066_s25 + $0x20] ss:$8 sps:$4 sm:$0xff]   ;;  %v924_v8 = vld [vmem:[%s1066_s25 + $0x34] ss:$8 sps:$4 sm:$0xff]   ;;  %v926_v9 = vld [vmem:[%s1066_s25 + $0x30] ss:$8 sps:$4 sm:$0xff]  }
  0x1b   : > { %589 = vmatprep.subr.bf16.mxu0 %v918_v4  ;;  %v939_v10 = vld [vmem:[%s1066_s25 + $0x104] ss:$8 sps:$4 sm:$0xff]   ;;  %v941_v11 = vld [vmem:[%s1066_s25 + $0x100] ss:$8 sps:$4 sm:$0xff]   ;;  %v945_v13 = vld [vmem:[%s1066_s25 + $0x114] ss:$8 sps:$4 sm:$0xff]   ;;  %v681_v4 = vlaneseq (!%p881_p7) }
  0x1c   : > { %v927_v12 = vld [vmem:[%s1066_s25 + $0x44] ss:$8 sps:$4 sm:$0xff]   ;;  %628 = vmatprep.subr.bf16.mxu1 %v939_v10  ;;  %v947_v14 = vld [vmem:[%s1066_s25 + $0x110] ss:$8 sps:$4 sm:$0xff]   ;;  %v929_v15 = vld [vmem:[%s1066_s25 + $0x40] ss:$8 sps:$4 sm:$0xff]  }
  0x1d   : > { %629 = vmatpush1.bf16.msra.mxu1 %v941_v11  ;;  %v930_v16 = vld [vmem:[%s1066_s25 + $0x54] ss:$8 sps:$4 sm:$0xff]   ;;  %v951_v17 = vld [vmem:[%s1066_s25 + $0x124] ss:$8 sps:$4 sm:$0xff]   ;;  %v953_v18 = vld [vmem:[%s1066_s25 + $0x120] ss:$8 sps:$4 sm:$0xff]  }
  0x1e   : > { %590 = vmatpush1.bf16.msra.mxu0 %v920_v5  ;;  %630 = vmatprep.subr.bf16.mxu1 %v945_v13  ;;  %v932_v19 = vld [vmem:[%s1066_s25 + $0x50] ss:$8 sps:$4 sm:$0xff]   ;;  %v957_v20 = vld [vmem:[%s1066_s25 + $0x134] ss:$8 sps:$4 sm:$0xff]   ;;  %v933_v21 = vld [vmem:[%s1066_s25 + $0x64] ss:$8 sps:$4 sm:$0xff]  }
  0x1f   : > { %591 = vmatprep.subr.bf16.mxu0 %v921_v6  ;;  %v959_v22 = vld [vmem:[%s1066_s25 + $0x130] ss:$8 sps:$4 sm:$0xff]   ;;  %v935_v23 = vld [vmem:[%s1066_s25 + $0x60] ss:$8 sps:$4 sm:$0xff]   ;;  %v963_v24 = vld [vmem:[%s1066_s25 + $0x144] ss:$8 sps:$4 sm:$0xff]  }
  0x20   : > { %v936_v25 = vld [vmem:[%s1066_s25 + $0x74] ss:$8 sps:$4 sm:$0xff]   ;;  %v965_v26 = vld [vmem:[%s1066_s25 + $0x140] ss:$8 sps:$4 sm:$0xff]   ;;  %v938_v27 = vld [vmem:[%s1066_s25 + $0x70] ss:$8 sps:$4 sm:$0xff]  }
  0x21   : > { %631 = vmatpush1.bf16.msra.mxu1 %v947_v14  ;;  %v969_v28 = vld [vmem:[%s1066_s25 + $0x154] ss:$8 sps:$4 sm:$0xff]   ;;  %v942_v29 = vld [vmem:[%s1066_s25 + $0x84] ss:$8 sps:$4 sm:$0xff]   ;;  %v971_v30 = vld [vmem:[%s1066_s25 + $0x150] ss:$8 sps:$4 sm:$0xff]  }
  0x22   : > { %592 = vmatpush1.bf16.msra.mxu0 %v923_v7  ;;  %632 = vmatprep.subr.bf16.mxu1 %v951_v17  ;;  %v944_v31 = vld [vmem:[%s1066_s25 + $0x80] ss:$8 sps:$4 sm:$0xff]   ;;  %v975_v32 = vld [vmem:[%s1066_s25 + $0x164] ss:$8 sps:$4 sm:$0xff]   ;;  %v948_v33 = vld [vmem:[%s1066_s25 + $0x94] ss:$8 sps:$4 sm:$0xff]  }
  0x23   : > { %593 = vmatprep.subr.bf16.mxu0 %v924_v8  ;;  %v286_v34 = vld [vmem:[%s1061_s21] sm:$0xff]  ;;  %v950_v37 = vld [vmem:[%s1066_s25 + $0x90] ss:$8 sps:$4 sm:$0xff]   ;;  %v981_v38 = vld [vmem:[%s1066_s25 + $0x174] ss:$8 sps:$4 sm:$0xff]   ;;  %v682_v5 = vshrl.u32 (!%p881_p7), %v681_v4, 7 }
  0x24   : > { %v831_v35 = vcombine.high %v286_v34, %v286_v34  ;;  %v977_v36 = vld [vmem:[%s1066_s25 + $0x160] ss:$8 sps:$4 sm:$0xff]   ;;  %v954_v39 = vld [vmem:[%s1066_s25 + $0xa4] ss:$8 sps:$4 sm:$0xff]   ;;  %v983_v40 = vld [vmem:[%s1066_s25 + $0x170] ss:$8 sps:$4 sm:$0xff]   ;;  %v830_v53 = vcombine.low %v286_v34, %v286_v34 }
  0x25   : > { %633 = vmatpush1.bf16.msra.mxu1 %v953_v18  ;;  %v956_v41 = vld [vmem:[%s1066_s25 + $0xa0] ss:$8 sps:$4 sm:$0xff]   ;;  %v960_v42 = vld [vmem:[%s1066_s25 + $0xb4] ss:$8 sps:$4 sm:$0xff]   ;;  %v962_v44 = vld [vmem:[%s1066_s25 + $0xb0] ss:$8 sps:$4 sm:$0xff]  }
  0x26   : > { %594 = vmatpush1.bf16.msra.mxu0 %v926_v9  ;;  %634 = vmatprep.subr.bf16.mxu1 %v957_v20  ;;  %v987_v43 = vld [vmem:[%s1061_s21 + $0x8] ss:$0 sps:$4 sm:$0xff]   ;;  %v966_v45 = vld [vmem:[%s1066_s25 + $0xc4] ss:$8 sps:$4 sm:$0xff]   ;;  %v972_v47 = vld [vmem:[%s1066_s25 + $0xd4] ss:$8 sps:$4 sm:$0xff]  }
  0x27   : > { %595 = vmatprep.subr.bf16.mxu0 %v927_v12  ;;  %619 = vmatprep.mubr.bf16.mxu0 %v831_v35  ;;  %v968_v46 = vld [vmem:[%s1066_s25 + $0xc0] ss:$8 sps:$4 sm:$0xff]   ;;  %v974_v48 = vld [vmem:[%s1066_s25 + $0xd0] ss:$8 sps:$4 sm:$0xff]   ;;  %v978_v49 = vld [vmem:[%s1066_s25 + $0xe4] ss:$8 sps:$4 sm:$0xff]  }
  0x28   : > { %v980_v50 = vld [vmem:[%s1066_s25 + $0xe0] ss:$8 sps:$4 sm:$0xff]   ;;  %v984_v51 = vld [vmem:[%s1066_s25 + $0xf4] ss:$8 sps:$4 sm:$0xff]   ;;  %v986_v52 = vld [vmem:[%s1066_s25 + $0xf0] ss:$8 sps:$4 sm:$0xff]  }
  0x29   : > { %635 = vmatpush1.bf16.msra.mxu1 %v959_v22  ;;  %v284_v58 = vld [vmem:[#allocation2] sm:$0xff]  ;;  %v285_v61 = vld [vmem:[#allocation2 + $0x8] sm:$0xff]  ;;  %v683_v7 = vsub.s32 (!%p881_p7), 0, %v682_v5  ;;  %v687_v8 = vsub.s32 (!%p881_p7), 1, %v682_v5 }
  0x2a   : > { %596 = vmatpush1.bf16.msra.mxu0 %v929_v15  ;;  %636 = vmatprep.subr.bf16.mxu1 %v963_v24  ;;  %v679_v6 = vld [vmem:[%s1137_s2] sm:$0x3] (!%p881_p7) }
  0x2b   : > { %597 = vmatprep.subr.bf16.mxu0 %v930_v16  ;;  %v684_v11 = vrot.slane (!%p881_p7), %v679_v6, %v683_v7  ;;  %v688_v12 = vrot.slane (!%p881_p7), %v679_v6, %v687_v8 }
  0x2d   : > { %637 = vmatpush1.bf16.msra.mxu1 %v965_v26 }
  0x2e   : > { %598 = vmatpush1.bf16.msra.mxu0 %v932_v19  ;;  %638 = vmatprep.subr.bf16.mxu1 %v969_v28 }
  0x2f   : > { %599 = vmatprep.subr.bf16.mxu0 %v933_v21 }
  0x31   : > { %639 = vmatpush1.bf16.msra.mxu1 %v971_v30 }
  0x32   : > { %600 = vmatpush1.bf16.msra.mxu0 %v935_v23  ;;  %640 = vmatprep.subr.bf16.mxu1 %v975_v32 }
  0x33   : > { %601 = vmatprep.subr.bf16.mxu0 %v936_v25 }
  0x35   : > { %641 = vmatpush1.bf16.msra.mxu1 %v977_v36 }
  0x36   : > { %602 = vmatpush1.bf16.msra.mxu0 %v938_v27  ;;  %642 = vmatprep.subr.bf16.mxu1 %v981_v38 }
  0x37   : > { %603 = vmatprep.subr.bf16.mxu0 %v942_v29 }
  0x39   : > { %643 = vmatpush1.bf16.msra.mxu1 %v983_v40 }
  0x3a   : > { %604 = vmatpush1.bf16.msra.mxu0 %v944_v31 }
  0x3b   : > { %605 = vmatprep.subr.bf16.mxu0 %v948_v33 }
  0x3c   : > { %661 = vmatmul.mubr.bf16.vlgmr.msra.gmra.mrb[0].mxu1 %v987_v43 }
  0x3e   : > { %606 = vmatpush1.bf16.msra.mxu0 %v950_v37 }
  0x3f   : > { %607 = vmatprep.subr.bf16.mxu0 %v954_v39 }
  0x42   : > { %608 = vmatpush1.bf16.msra.mxu0 %v956_v41 }
  0x43   : > { %609 = vmatprep.subr.bf16.mxu0 %v960_v42 }
  0x46   : > { %610 = vmatpush1.bf16.msra.mxu0 %v962_v44 }
  0x47   : > { %611 = vmatprep.subr.bf16.mxu0 %v966_v45 }
  0x4a   : > { %612 = vmatpush1.bf16.msra.mxu0 %v968_v46 }
  0x4b   : > { %613 = vmatprep.subr.bf16.mxu0 %v972_v47 }
  0x4e   : > { %614 = vmatpush1.bf16.msra.mxu0 %v974_v48 }
  0x4f   : > { %615 = vmatprep.subr.bf16.mxu0 %v978_v49 }
  0x52   : > { %616 = vmatpush1.bf16.msra.mxu0 %v980_v50 }
  0x53   : > { %617 = vmatprep.subr.bf16.mxu0 %v984_v51 }
  0x56   : > { %618 = vmatpush1.bf16.msra.mxu0 %v986_v52 }
  0x59   : > { %620 = vmatmul.mubr.bf16.vlgmr.msra.gmra.mrb[0].mxu0 %v830_v53 }
 0x10f   : > { %v662_v54 = vpop.f32.mrb[0].mxu1 }
 0x110   : > { %v664_v55 = vpop.f32.mrb[1].mxu1 }
 0x111   : > { %v666_v56 = vpop.f32.mrb[2].mxu1 }
 0x112   : > { %v667_v57 = vpop.f32.mrb[3].mxu1 }
 0x12c   : > { %v621_v59 = vpop.f32.mrb[0].mxu0  ;;  %676 = sbr.rel (%p881_p7) target bundleno = 321 (0x141), region = 40 }
 0x12d   : > { %v663_v60 = vadd.f32 %v662_v54, %v621_v59  ;;  %v623_v62 = vpop.f32.mrb[1].mxu0 }
 0x12e   : > { %v665_v63 = vadd.f32 %v664_v55, %v623_v62  ;;  %v625_v0 = vpop.f32.mrb[2].mxu0 }
 0x12f   : > { %v669_v1 = vadd.f32 %v663_v60, %v284_v58  ;;  %v626_v2 = vpop.f32.mrb[3].mxu0 }
 0x130   : > { %v670_v3 = vadd.f32 %v665_v63, %v285_v61 }
 0x131   : > { %671 = vst [vmem:[#allocation2] sm:$0xff] %v669_v1 }
 0x132   : > { %672 = vst [vmem:[#allocation2 + $0x8] sm:$0xff] %v670_v3 }
 0x138   : > { %v677_v9 = vld [vmem:[#allocation2] sm:$0xff] }
 0x139   : > { %v678_v10 = vld [vmem:[#allocation2 + $0x8] sm:$0xff]  ;;  %v691_v13 = vadd.f32 %v684_v11, %v677_v9 }
 0x13a   : > { %v692_v14 = vadd.f32 %v688_v12, %v678_v10 }
 0x13b   : > { %v693_v15 = vmax.f32 %v691_v13, 0.0 }
 0x13c   : > { %v694_v16 = vmax.f32 %v692_v14, 0.0 }
 0x13e   : > { %v888_v17 = vpack.c.bf16 %v694_v16, %v693_v15 }
 0x140   : > { %703 = vst [vmem:[%s1138_s3] sm:$0xff] %v888_v17 }
 0x141 PF: > { %s13_s14 = sadd.s32 1, %s1012_s14   ;;  %s1139_s12 = smov %s1008_s13 }
 0x142   : > { %p10_p8 = scmp.ge.s32.totalorder %s13_s14, 8   ;;  %s1140_s13 = smov %s1142_s15 }
 0x144   :  { %12 = sbr.rel (!%p10_p8) target bundleno = 2 (0x2), region = 76 }

// kernel: resnet_forward.30
= control target key start
LH: loop header
LB: loop body
LE: loop exit
PB: predicated region body
PF: predicated region fallthrough
CT: control target
= control target key end

     0   :  { %s1481_s12 = smov 0   ;;  %s1483_s13 = smov 0   ;;  %s1765_s0 = inlined_call_operand.vmem [shape: bf16[8,512], index: 0, kind: input, shape index: {}]   ;;  %s1766_s1 = inlined_call_operand.vmem [shape: bf16[512,1024], index: 1, kind: input, shape index: {}]   ;;  %s1767_s2 = inlined_call_operand.vmem [shape: f32[1,1024], index: 2, kind: input, shape index: {}]   ;;  %s1768_s3 = inlined_call_operand.vmem [shape: bf16[8,1024], index: 3, kind: output, shape index: {}]  }
   0x1   :  { %s1485_s14 = smov 0   ;;  %s1487_s15 = smov 0  }
   0x2   :  { %s1489_s16 = smov 0  }
   0x3 LB: > { %s28_s17 = sadd.s32 1, %s1455_s15  ;;  %p76_p1 = scmp.ne.s32.totalorder %s1447_s13, %s1443_s12  ;;  %s1459_s16 = sphi %s1489_s16, %s13_s16   ;;  %s1455_s15 = sphi %s1487_s15, %s1772_s15   ;;  %s1451_s14 = sphi %s1485_s14, %s1771_s14   ;;  %s1447_s13 = sphi %s1483_s13, %s1770_s13   ;;  %s1443_s12 = sphi %s1481_s12, %s1769_s12  }
   0x4   : > { %p30_p0 = scmp.ge.s32.totalorder %s28_s17, 4  ;;  %p77_p2 = scmp.eq.s32.totalorder %s1459_s16, 0 }
   0x5   : > { %s69_s19 = sadd.s32 1, %s1447_s13  ;;  %p1199_p5 = scmp.ge.s32.totalorder %s1459_s16, 4 }
   0x6   : > { %s1774_s17 = smov (%p30_p0, %s28_s17), 0  ;;  %p78_p3 = por %p77_p2, %p76_p1 }
   0x7   : > { %s65_s18 = ssub.s32 %s1455_s15, %s1774_s17  ;;  %169 = sbr.rel (%p1199_p5) target bundleno = 82 (0x52), region = 20 }
   0x8   : > { %p67_p4 = scmp.eq.s32.totalorder %s65_s18, 0 }
   0xa   : > { %s1516_s20 = scalar_select %p67_p4, %s1447_s13, %s69_s19  }
   0xe   : > { %172 = sbr.rel (!%p78_p3) target bundleno = 82 (0x52), region = 24  ;;  %s174_s21 = sand.u32 (%p78_p3), 1, %s1447_s13  }
   0xf   : > { %s1279_s22 = sshll.u32 (%p78_p3), %s1455_s15, 3  ;;  %s1200_s23 = sshll.u32 (%p78_p3), %s174_s21, 9 }
  0x10   : > { %s1524_s26 = scalar_lea.vmem (%p78_p3), %s1766_s1, %s1279_s22  ;;  %s1529_s27 = scalar_lea.vmem (%p78_p3), [#allocation3], %s1200_s23 }
  0x11   : > { %v336_v0 = vld [vmem:[%s1524_s26] sm:$0xff] (%p78_p3) }
  0x12   : > { %v338_v1 = vld [vmem:[%s1524_s26 + $0x20] sm:$0xff] (%p78_p3)  ;;  %337 = vst [vmem:[%s1529_s27] sm:$0xff] (%p78_p3), %v336_v0 }
  0x13   : > { %v340_v2 = vld [vmem:[%s1524_s26 + $0x40] sm:$0xff] (%p78_p3)  ;;  %339 = vst [vmem:[%s1529_s27 + $0x8] sm:$0xff] (%p78_p3), %v338_v1 }
  0x14   : > { %341 = vst [vmem:[%s1529_s27 + $0x10] sm:$0xff] (%p78_p3), %v340_v2  ;;  %v342_v3 = vld [vmem:[%s1524_s26 + $0x60] sm:$0xff] (%p78_p3) }
  0x15   : > { %v344_v4 = vld [vmem:[%s1524_s26 + $0x80] sm:$0xff]  ;;  %343 = vst [vmem:[%s1529_s27 + $0x18] sm:$0xff] %v342_v3 }
  0x16   : > { %v346_v5 = vld [vmem:[%s1524_s26 + $0xa0] sm:$0xff]  ;;  %345 = vst [vmem:[%s1529_s27 + $0x20] sm:$0xff] %v344_v4 }
  0x17   : > { %347 = vst [vmem:[%s1529_s27 + $0x28] sm:$0xff] %v346_v5  ;;  %v348_v6 = vld [vmem:[%s1524_s26 + $0xc0] sm:$0xff] }
  0x18   : > { %v350_v7 = vld [vmem:[%s1524_s26 + $0xe0] sm:$0xff]  ;;  %349 = vst [vmem:[%s1529_s27 + $0x30] sm:$0xff] %v348_v6 }
  0x19   : > { %v352_v8 = vld [vmem:[%s1524_s26 + $0x100] sm:$0xff]  ;;  %351 = vst [vmem:[%s1529_s27 + $0x38] sm:$0xff] %v350_v7 }
  0x1a   : > { %353 = vst [vmem:[%s1529_s27 + $0x40] sm:$0xff] %v352_v8  ;;  %v354_v9 = vld [vmem:[%s1524_s26 + $0x120] sm:$0xff] }
  0x1b   : > { %v356_v10 = vld [vmem:[%s1524_s26 + $0x140] sm:$0xff]  ;;  %355 = vst [vmem:[%s1529_s27 + $0x48] sm:$0xff] %v354_v9 }
  0x1c   : > { %v358_v11 = vld [vmem:[%s1524_s26 + $0x160] sm:$0xff]  ;;  %357 = vst [vmem:[%s1529_s27 + $0x50] sm:$0xff] %v356_v10 }
  0x1d   : > { %359 = vst [vmem:[%s1529_s27 + $0x58] sm:$0xff] %v358_v11  ;;  %v360_v12 = vld [vmem:[%s1524_s26 + $0x180] sm:$0xff] }
  0x1e   : > { %v362_v13 = vld [vmem:[%s1524_s26 + $0x1a0] sm:$0xff]  ;;  %361 = vst [vmem:[%s1529_s27 + $0x60] sm:$0xff] %v360_v12 }
  0x1f   : > { %v364_v14 = vld [vmem:[%s1524_s26 + $0x1c0] sm:$0xff]  ;;  %363 = vst [vmem:[%s1529_s27 + $0x68] sm:$0xff] %v362_v13 }
  0x20   : > { %365 = vst [vmem:[%s1529_s27 + $0x70] sm:$0xff] %v364_v14  ;;  %v366_v15 = vld [vmem:[%s1524_s26 + $0x1e0] sm:$0xff] }
  0x21   : > { %v368_v16 = vld [vmem:[%s1524_s26 + $0x200] sm:$0xff]  ;;  %367 = vst [vmem:[%s1529_s27 + $0x78] sm:$0xff] %v366_v15 }
  0x22   : > { %v370_v17 = vld [vmem:[%s1524_s26 + $0x220] sm:$0xff]  ;;  %369 = vst [vmem:[%s1529_s27 + $0x80] sm:$0xff] %v368_v16 }
  0x23   : > { %371 = vst [vmem:[%s1529_s27 + $0x88] sm:$0xff] %v370_v17  ;;  %v372_v18 = vld [vmem:[%s1524_s26 + $0x240] sm:$0xff] }
  0x24   : > { %v374_v19 = vld [vmem:[%s1524_s26 + $0x260] sm:$0xff]  ;;  %373 = vst [vmem:[%s1529_s27 + $0x90] sm:$0xff] %v372_v18 }
  0x25   : > { %v376_v20 = vld [vmem:[%s1524_s26 + $0x280] sm:$0xff]  ;;  %375 = vst [vmem:[%s1529_s27 + $0x98] sm:$0xff] %v374_v19 }
  0x26   : > { %377 = vst [vmem:[%s1529_s27 + $0xa0] sm:$0xff] %v376_v20  ;;  %v378_v21 = vld [vmem:[%s1524_s26 + $0x2a0] sm:$0xff] }
  0x27   : > { %v380_v22 = vld [vmem:[%s1524_s26 + $0x2c0] sm:$0xff]  ;;  %379 = vst [vmem:[%s1529_s27 + $0xa8] sm:$0xff] %v378_v21 }
  0x28   : > { %v382_v23 = vld [vmem:[%s1524_s26 + $0x2e0] sm:$0xff]  ;;  %381 = vst [vmem:[%s1529_s27 + $0xb0] sm:$0xff] %v380_v22 }
  0x29   : > { %383 = vst [vmem:[%s1529_s27 + $0xb8] sm:$0xff] %v382_v23  ;;  %v384_v24 = vld [vmem:[%s1524_s26 + $0x300] sm:$0xff] }
  0x2a   : > { %v386_v25 = vld [vmem:[%s1524_s26 + $0x320] sm:$0xff]  ;;  %385 = vst [vmem:[%s1529_s27 + $0xc0] sm:$0xff] %v384_v24 }
  0x2b   : > { %v388_v26 = vld [vmem:[%s1524_s26 + $0x340] sm:$0xff]  ;;  %387 = vst [vmem:[%s1529_s27 + $0xc8] sm:$0xff] %v386_v25 }
  0x2c   : > { %389 = vst [vmem:[%s1529_s27 + $0xd0] sm:$0xff] %v388_v26  ;;  %v390_v27 = vld [vmem:[%s1524_s26 + $0x360] sm:$0xff] }
  0x2d   : > { %v392_v28 = vld [vmem:[%s1524_s26 + $0x380] sm:$0xff]  ;;  %391 = vst [vmem:[%s1529_s27 + $0xd8] sm:$0xff] %v390_v27 }
  0x2e   : > { %v394_v29 = vld [vmem:[%s1524_s26 + $0x3a0] sm:$0xff]  ;;  %393 = vst [vmem:[%s1529_s27 + $0xe0] sm:$0xff] %v392_v28 }
  0x2f   : > { %395 = vst [vmem:[%s1529_s27 + $0xe8] sm:$0xff] %v394_v29  ;;  %v396_v30 = vld [vmem:[%s1524_s26 + $0x3c0] sm:$0xff] }
  0x30   : > { %v398_v31 = vld [vmem:[%s1524_s26 + $0x3e0] sm:$0xff]  ;;  %397 = vst [vmem:[%s1529_s27 + $0xf0] sm:$0xff] %v396_v30 }
  0x31   : > { %v400_v32 = vld [vmem:[%s1524_s26 + $0x400] sm:$0xff]  ;;  %399 = vst [vmem:[%s1529_s27 + $0xf8] sm:$0xff] %v398_v31 }
  0x32   : > { %401 = vst [vmem:[%s1529_s27 + $0x100] sm:$0xff] %v400_v32  ;;  %v402_v33 = vld [vmem:[%s1524_s26 + $0x420] sm:$0xff] }
  0x33   : > { %v404_v34 = vld [vmem:[%s1524_s26 + $0x440] sm:$0xff]  ;;  %403 = vst [vmem:[%s1529_s27 + $0x108] sm:$0xff] %v402_v33 }
  0x34   : > { %v406_v35 = vld [vmem:[%s1524_s26 + $0x460] sm:$0xff]  ;;  %405 = vst [vmem:[%s1529_s27 + $0x110] sm:$0xff] %v404_v34 }
  0x35   : > { %407 = vst [vmem:[%s1529_s27 + $0x118] sm:$0xff] %v406_v35  ;;  %v408_v36 = vld [vmem:[%s1524_s26 + $0x480] sm:$0xff] }
  0x36   : > { %v410_v37 = vld [vmem:[%s1524_s26 + $0x4a0] sm:$0xff]  ;;  %409 = vst [vmem:[%s1529_s27 + $0x120] sm:$0xff] %v408_v36 }
  0x37   : > { %v412_v38 = vld [vmem:[%s1524_s26 + $0x4c0] sm:$0xff]  ;;  %411 = vst [vmem:[%s1529_s27 + $0x128] sm:$0xff] %v410_v37 }
  0x38   : > { %413 = vst [vmem:[%s1529_s27 + $0x130] sm:$0xff] %v412_v38  ;;  %v414_v39 = vld [vmem:[%s1524_s26 + $0x4e0] sm:$0xff] }
  0x39   : > { %v416_v40 = vld [vmem:[%s1524_s26 + $0x500] sm:$0xff]  ;;  %415 = vst [vmem:[%s1529_s27 + $0x138] sm:$0xff] %v414_v39 }
  0x3a   : > { %v418_v41 = vld [vmem:[%s1524_s26 + $0x520] sm:$0xff]  ;;  %417 = vst [vmem:[%s1529_s27 + $0x140] sm:$0xff] %v416_v40 }
  0x3b   : > { %419 = vst [vmem:[%s1529_s27 + $0x148] sm:$0xff] %v418_v41  ;;  %v420_v42 = vld [vmem:[%s1524_s26 + $0x540] sm:$0xff] }
  0x3c   : > { %v422_v43 = vld [vmem:[%s1524_s26 + $0x560] sm:$0xff]  ;;  %421 = vst [vmem:[%s1529_s27 + $0x150] sm:$0xff] %v420_v42 }
  0x3d   : > { %v424_v44 = vld [vmem:[%s1524_s26 + $0x580] sm:$0xff]  ;;  %423 = vst [vmem:[%s1529_s27 + $0x158] sm:$0xff] %v422_v43 }
  0x3e   : > { %425 = vst [vmem:[%s1529_s27 + $0x160] sm:$0xff] %v424_v44  ;;  %v426_v45 = vld [vmem:[%s1524_s26 + $0x5a0] sm:$0xff] }
  0x3f   : > { %v428_v46 = vld [vmem:[%s1524_s26 + $0x5c0] sm:$0xff]  ;;  %427 = vst [vmem:[%s1529_s27 + $0x168] sm:$0xff] %v426_v45 }
  0x40   : > { %v430_v47 = vld [vmem:[%s1524_s26 + $0x5e0] sm:$0xff]  ;;  %429 = vst [vmem:[%s1529_s27 + $0x170] sm:$0xff] %v428_v46 }
  0x41   : > { %431 = vst [vmem:[%s1529_s27 + $0x178] sm:$0xff] %v430_v47  ;;  %v432_v48 = vld [vmem:[%s1524_s26 + $0x600] sm:$0xff] }
  0x42   : > { %v434_v49 = vld [vmem:[%s1524_s26 + $0x620] sm:$0xff]  ;;  %433 = vst [vmem:[%s1529_s27 + $0x180] sm:$0xff] %v432_v48 }
  0x43   : > { %v436_v50 = vld [vmem:[%s1524_s26 + $0x640] sm:$0xff]  ;;  %435 = vst [vmem:[%s1529_s27 + $0x188] sm:$0xff] %v434_v49 }
  0x44   : > { %437 = vst [vmem:[%s1529_s27 + $0x190] sm:$0xff] %v436_v50  ;;  %v438_v51 = vld [vmem:[%s1524_s26 + $0x660] sm:$0xff] }
  0x45   : > { %v440_v52 = vld [vmem:[%s1524_s26 + $0x680] sm:$0xff]  ;;  %439 = vst [vmem:[%s1529_s27 + $0x198] sm:$0xff] %v438_v51 }
  0x46   : > { %v442_v53 = vld [vmem:[%s1524_s26 + $0x6a0] sm:$0xff]  ;;  %441 = vst [vmem:[%s1529_s27 + $0x1a0] sm:$0xff] %v440_v52 }
  0x47   : > { %443 = vst [vmem:[%s1529_s27 + $0x1a8] sm:$0xff] %v442_v53  ;;  %v444_v54 = vld [vmem:[%s1524_s26 + $0x6c0] sm:$0xff] }
  0x48   : > { %v446_v55 = vld [vmem:[%s1524_s26 + $0x6e0] sm:$0xff]  ;;  %445 = vst [vmem:[%s1529_s27 + $0x1b0] sm:$0xff] %v444_v54 }
  0x49   : > { %v448_v56 = vld [vmem:[%s1524_s26 + $0x700] sm:$0xff]  ;;  %447 = vst [vmem:[%s1529_s27 + $0x1b8] sm:$0xff] %v446_v55 }
  0x4a   : > { %449 = vst [vmem:[%s1529_s27 + $0x1c0] sm:$0xff] %v448_v56  ;;  %v450_v57 = vld [vmem:[%s1524_s26 + $0x720] sm:$0xff] }
  0x4b   : > { %v452_v58 = vld [vmem:[%s1524_s26 + $0x740] sm:$0xff]  ;;  %451 = vst [vmem:[%s1529_s27 + $0x1c8] sm:$0xff] %v450_v57 }
  0x4c   : > { %v454_v59 = vld [vmem:[%s1524_s26 + $0x760] sm:$0xff]  ;;  %453 = vst [vmem:[%s1529_s27 + $0x1d0] sm:$0xff] %v452_v58 }
  0x4d   : > { %455 = vst [vmem:[%s1529_s27 + $0x1d8] sm:$0xff] %v454_v59  ;;  %v456_v60 = vld [vmem:[%s1524_s26 + $0x780] sm:$0xff] }
  0x4e   : > { %v458_v61 = vld [vmem:[%s1524_s26 + $0x7a0] sm:$0xff]  ;;  %457 = vst [vmem:[%s1529_s27 + $0x1e0] sm:$0xff] %v456_v60 }
  0x4f   : > { %v460_v62 = vld [vmem:[%s1524_s26 + $0x7c0] sm:$0xff]  ;;  %459 = vst [vmem:[%s1529_s27 + $0x1e8] sm:$0xff] %v458_v61 }
  0x50   : > { %461 = vst [vmem:[%s1529_s27 + $0x1f0] sm:$0xff] %v460_v62  ;;  %v462_v63 = vld [vmem:[%s1524_s26 + $0x7e0] sm:$0xff] }
  0x51   : > { %463 = vst [vmem:[%s1529_s27 + $0x1f8] sm:$0xff] %v462_v63 }
  0x52 PF: > { %p1203_p6 = scmp.ge.s32.totalorder %s1459_s16, 1  ;;  %p476_p7 = scmp.lt.s32.totalorder %s1459_s16, 5 }
  0x54   : > { %p477_p8 = pnand %p1203_p6, %p476_p7 }
  0x55   : > { %s483_s28 = sand.u32 (!%p477_p8), 1, %s1443_s12   ;;  %v1662_v0 = vld [vmem:[%s1765_s0] sm:$0xff] (!%p477_p8)  ;;  %v1667_v1 = vld [vmem:[%s1765_s0 + $0x8] sm:$0xff] (!%p477_p8)  ;;  %s1205_s8 = sshll.u32 (!%p477_p8), %s1451_s14, 1 }
  0x56   : > { %480 = sbr.rel (%p477_p8) target bundleno = 374 (0x176), region = 66  ;;  %s1204_s6 = sshll.u32 (!%p477_p8), %s483_s28, 9  ;;  %v1209_v2 = vcombine.high (!%p477_p8), %v1662_v0, %v1662_v0  ;;  %v1211_v3 = vcombine.high (!%p477_p8), %v1667_v1, %v1667_v1 }
  0x57   : > { %s1673_s7 = scalar_lea.vmem (!%p477_p8), [#allocation3], %s1204_s6  ;;  %p536_p9 = scmp.lt.s32.totalorder (!%p477_p8), %s1205_s8, 7 }
  0x58   : > { %v1321_v4 = vld [vmem:[%s1673_s7 + $0x4] ss:$8 sps:$4 sm:$0xff] (!%p477_p8)   ;;  %990 = vmatprep.mubr.bf16.mxu0 (!%p477_p8), %v1209_v2  ;;  %1031 = vmatprep.mubr.bf16.mxu1 (!%p477_p8), %v1211_v3  ;;  %v1325_v6 = vld [vmem:[%s1673_s7] ss:$8 sps:$4 sm:$0xff] (!%p477_p8)   ;;  %v1327_v8 = vld [vmem:[%s1673_s7 + $0x14] ss:$8 sps:$4 sm:$0xff] (!%p477_p8)  }
  0x59   : > { %v1323_v5 = vld [vmem:[%s1673_s7 + $0x104] ss:$8 sps:$4 sm:$0xff] (!%p477_p8)   ;;  %958 = vmatprep.subr.bf16.mxu0 (!%p477_p8), %v1321_v4  ;;  %v1326_v7 = vld [vmem:[%s1673_s7 + $0x100] ss:$8 sps:$4 sm:$0xff] (!%p477_p8)   ;;  %v1329_v9 = vld [vmem:[%s1673_s7 + $0x114] ss:$8 sps:$4 sm:$0xff] (!%p477_p8)  }
  0x5a   : > { %999 = vmatprep.subr.bf16.mxu1 (!%p477_p8), %v1323_v5  ;;  %959 = vmatpush1.bf16.msra.mxu0 (!%p477_p8), %v1325_v6  ;;  %v1331_v10 = vld [vmem:[%s1673_s7 + $0x10] ss:$8 sps:$4 sm:$0xff] (!%p477_p8)   ;;  %v1333_v12 = vld [vmem:[%s1673_s7 + $0x24] ss:$8 sps:$4 sm:$0xff] (!%p477_p8)   ;;  %v1337_v14 = vld [vmem:[%s1673_s7 + $0x20] ss:$8 sps:$4 sm:$0xff] (!%p477_p8)   ;;  %v1208_v6 = vcombine.low (!%p477_p8), %v1662_v0, %v1662_v0 }
  0x5b   : > { %1000 = vmatpush1.bf16.msra.mxu1 (!%p477_p8), %v1326_v7  ;;  %960 = vmatprep.subr.bf16.mxu0 (!%p477_p8), %v1327_v8  ;;  %v1332_v11 = vld [vmem:[%s1673_s7 + $0x110] ss:$8 sps:$4 sm:$0xff] (!%p477_p8)   ;;  %v1335_v13 = vld [vmem:[%s1673_s7 + $0x124] ss:$8 sps:$4 sm:$0xff] (!%p477_p8)   ;;  %v1338_v15 = vld [vmem:[%s1673_s7 + $0x120] ss:$8 sps:$4 sm:$0xff] (!%p477_p8)   ;;  %v1210_v7 = vcombine.low (!%p477_p8), %v1667_v1, %v1667_v1  ;;  %v1051_v8 = vlaneseq (!%p477_p8) }
  0x5c   : > { %1001 = vmatprep.subr.bf16.mxu1 (!%p477_p8), %v1329_v9  ;;  %v1339_v16 = vld [vmem:[%s1673_s7 + $0x34] ss:$8 sps:$4 sm:$0xff] (!%p477_p8)   ;;  %v1343_v18 = vld [vmem:[%s1673_s7 + $0x30] ss:$8 sps:$4 sm:$0xff] (!%p477_p8)   ;;  %v1345_v20 = vld [vmem:[%s1673_s7 + $0x44] ss:$8 sps:$4 sm:$0xff] (!%p477_p8)  }
  0x5d   : > { %v1341_v17 = vld [vmem:[%s1673_s7 + $0x134] ss:$8 sps:$4 sm:$0xff]   ;;  %v1344_v19 = vld [vmem:[%s1673_s7 + $0x130] ss:$8 sps:$4 sm:$0xff]   ;;  %v1347_v21 = vld [vmem:[%s1673_s7 + $0x144] ss:$8 sps:$4 sm:$0xff]  }
  0x5e   : > { %961 = vmatpush1.bf16.msra.mxu0 %v1331_v10  ;;  %v1349_v22 = vld [vmem:[%s1673_s7 + $0x40] ss:$8 sps:$4 sm:$0xff]   ;;  %v1351_v24 = vld [vmem:[%s1673_s7 + $0x54] ss:$8 sps:$4 sm:$0xff]   ;;  %v1355_v26 = vld [vmem:[%s1673_s7 + $0x50] ss:$8 sps:$4 sm:$0xff]  }
  0x5f   : > { %1002 = vmatpush1.bf16.msra.mxu1 %v1332_v11  ;;  %962 = vmatprep.subr.bf16.mxu0 %v1333_v12  ;;  %v1350_v23 = vld [vmem:[%s1673_s7 + $0x140] ss:$8 sps:$4 sm:$0xff]   ;;  %v1353_v25 = vld [vmem:[%s1673_s7 + $0x154] ss:$8 sps:$4 sm:$0xff]   ;;  %v1356_v27 = vld [vmem:[%s1673_s7 + $0x150] ss:$8 sps:$4 sm:$0xff]  }
  0x60   : > { %1003 = vmatprep.subr.bf16.mxu1 %v1335_v13  ;;  %v1357_v28 = vld [vmem:[%s1673_s7 + $0x64] ss:$8 sps:$4 sm:$0xff]   ;;  %v1361_v30 = vld [vmem:[%s1673_s7 + $0x60] ss:$8 sps:$4 sm:$0xff]   ;;  %v1363_v32 = vld [vmem:[%s1673_s7 + $0x74] ss:$8 sps:$4 sm:$0xff]  }
  0x61   : > { %v1359_v29 = vld [vmem:[%s1673_s7 + $0x164] ss:$8 sps:$4 sm:$0xff]   ;;  %v1362_v31 = vld [vmem:[%s1673_s7 + $0x160] ss:$8 sps:$4 sm:$0xff]   ;;  %v1365_v33 = vld [vmem:[%s1673_s7 + $0x174] ss:$8 sps:$4 sm:$0xff]  }
  0x62   : > { %963 = vmatpush1.bf16.msra.mxu0 %v1337_v14  ;;  %v1367_v34 = vld [vmem:[%s1673_s7 + $0x70] ss:$8 sps:$4 sm:$0xff]   ;;  %v1369_v36 = vld [vmem:[%s1673_s7 + $0x84] ss:$8 sps:$4 sm:$0xff]   ;;  %v1373_v38 = vld [vmem:[%s1673_s7 + $0x80] ss:$8 sps:$4 sm:$0xff]  }
  0x63   : > { %1004 = vmatpush1.bf16.msra.mxu1 %v1338_v15  ;;  %964 = vmatprep.subr.bf16.mxu0 %v1339_v16  ;;  %v1368_v35 = vld [vmem:[%s1673_s7 + $0x170] ss:$8 sps:$4 sm:$0xff]   ;;  %v1371_v37 = vld [vmem:[%s1673_s7 + $0x184] ss:$8 sps:$4 sm:$0xff]   ;;  %v1374_v39 = vld [vmem:[%s1673_s7 + $0x180] ss:$8 sps:$4 sm:$0xff]  }
  0x64   : > { %1005 = vmatprep.subr.bf16.mxu1 %v1341_v17  ;;  %v1375_v40 = vld [vmem:[%s1673_s7 + $0x94] ss:$8 sps:$4 sm:$0xff]   ;;  %v1379_v42 = vld [vmem:[%s1673_s7 + $0x90] ss:$8 sps:$4 sm:$0xff]   ;;  %v1381_v44 = vld [vmem:[%s1673_s7 + $0xa4] ss:$8 sps:$4 sm:$0xff]  }
  0x65   : > { %v1377_v41 = vld [vmem:[%s1673_s7 + $0x194] ss:$8 sps:$4 sm:$0xff]   ;;  %v1380_v43 = vld [vmem:[%s1673_s7 + $0x190] ss:$8 sps:$4 sm:$0xff]   ;;  %v1383_v45 = vld [vmem:[%s1673_s7 + $0x1a4] ss:$8 sps:$4 sm:$0xff]  }
  0x66   : > { %965 = vmatpush1.bf16.msra.mxu0 %v1343_v18  ;;  %v1385_v46 = vld [vmem:[%s1673_s7 + $0xa0] ss:$8 sps:$4 sm:$0xff]   ;;  %v1387_v48 = vld [vmem:[%s1673_s7 + $0xb4] ss:$8 sps:$4 sm:$0xff]   ;;  %v1391_v50 = vld [vmem:[%s1673_s7 + $0xb0] ss:$8 sps:$4 sm:$0xff]  }
  0x67   : > { %1006 = vmatpush1.bf16.msra.mxu1 %v1344_v19  ;;  %966 = vmatprep.subr.bf16.mxu0 %v1345_v20  ;;  %v1386_v47 = vld [vmem:[%s1673_s7 + $0x1a0] ss:$8 sps:$4 sm:$0xff]   ;;  %v1389_v49 = vld [vmem:[%s1673_s7 + $0x1b4] ss:$8 sps:$4 sm:$0xff]   ;;  %v1392_v51 = vld [vmem:[%s1673_s7 + $0x1b0] ss:$8 sps:$4 sm:$0xff]  }
  0x68   : > { %1007 = vmatprep.subr.bf16.mxu1 %v1347_v21  ;;  %v1393_v52 = vld [vmem:[%s1673_s7 + $0xc4] ss:$8 sps:$4 sm:$0xff]   ;;  %v1397_v54 = vld [vmem:[%s1673_s7 + $0xc0] ss:$8 sps:$4 sm:$0xff]   ;;  %v1399_v56 = vld [vmem:[%s1673_s7 + $0xd4] ss:$8 sps:$4 sm:$0xff]  }
  0x69   : > { %v1395_v53 = vld [vmem:[%s1673_s7 + $0x1c4] ss:$8 sps:$4 sm:$0xff]   ;;  %v1398_v55 = vld [vmem:[%s1673_s7 + $0x1c0] ss:$8 sps:$4 sm:$0xff]   ;;  %v1401_v57 = vld [vmem:[%s1673_s7 + $0x1d4] ss:$8 sps:$4 sm:$0xff]  }
  0x6a   : > { %967 = vmatpush1.bf16.msra.mxu0 %v1349_v22  ;;  %v1403_v58 = vld [vmem:[%s1673_s7 + $0xd0] ss:$8 sps:$4 sm:$0xff]   ;;  %v1405_v60 = vld [vmem:[%s1673_s7 + $0xe4] ss:$8 sps:$4 sm:$0xff]   ;;  %v1409_v62 = vld [vmem:[%s1673_s7 + $0xe0] ss:$8 sps:$4 sm:$0xff]  }
  0x6b   : > { %1008 = vmatpush1.bf16.msra.mxu1 %v1350_v23  ;;  %968 = vmatprep.subr.bf16.mxu0 %v1351_v24  ;;  %v1404_v59 = vld [vmem:[%s1673_s7 + $0x1d0] ss:$8 sps:$4 sm:$0xff]   ;;  %v1407_v61 = vld [vmem:[%s1673_s7 + $0x1e4] ss:$8 sps:$4 sm:$0xff]   ;;  %v1410_v63 = vld [vmem:[%s1673_s7 + $0x1e0] ss:$8 sps:$4 sm:$0xff]  }
  0x6c   : > { %1009 = vmatprep.subr.bf16.mxu1 %v1353_v25  ;;  %v1411_v2 = vld [vmem:[%s1673_s7 + $0xf4] ss:$8 sps:$4 sm:$0xff]   ;;  %v1415_v4 = vld [vmem:[%s1673_s7 + $0xf0] ss:$8 sps:$4 sm:$0xff]   ;;  %s1776_s8 = smov (!%p536_p9, %s1205_s8), 7  ;;  %v1052_v9 = vshrl.u32 %v1051_v8, 7 }
  0x6d   : > { %v1413_v3 = vld [vmem:[%s1673_s7 + $0x1f4] ss:$8 sps:$4 sm:$0xff]   ;;  %v1416_v5 = vld [vmem:[%s1673_s7 + $0x1f0] ss:$8 sps:$4 sm:$0xff]   ;;  %s538_s11 = scalar_lea.vmem %s1767_s2, %s1776_s8  ;;  %s1207_s12 = sshll.u32 %s1776_s8, 2 }
  0x6e   : > { %969 = vmatpush1.bf16.msra.mxu0 %v1355_v26  ;;  %v1053_v10 = vsub.s32 0, %v1052_v9  ;;  %v1049_v11 = vld [vmem:[%s538_s11] sm:$0x3]  ;;  %v1057_v12 = vsub.s32 1, %v1052_v9  ;;  %s548_s19 = scalar_lea.vmem %s1768_s3, %s1207_s12 }
  0x6f   : > { %1010 = vmatpush1.bf16.msra.mxu1 %v1356_v27  ;;  %970 = vmatprep.subr.bf16.mxu0 %v1357_v28 }
  0x70   : > { %1011 = vmatprep.subr.bf16.mxu1 %v1359_v29  ;;  %v1054_v0 = vrot.slane %v1049_v11, %v1053_v10  ;;  %v1058_v1 = vrot.slane %v1049_v11, %v1057_v12 }
  0x72   : > { %971 = vmatpush1.bf16.msra.mxu0 %v1361_v30 }
  0x73   : > { %1012 = vmatpush1.bf16.msra.mxu1 %v1362_v31  ;;  %972 = vmatprep.subr.bf16.mxu0 %v1363_v32 }
  0x74   : > { %1013 = vmatprep.subr.bf16.mxu1 %v1365_v33 }
  0x76   : > { %973 = vmatpush1.bf16.msra.mxu0 %v1367_v34 }
  0x77   : > { %1014 = vmatpush1.bf16.msra.mxu1 %v1368_v35  ;;  %974 = vmatprep.subr.bf16.mxu0 %v1369_v36 }
  0x78   : > { %1015 = vmatprep.subr.bf16.mxu1 %v1371_v37 }
  0x7a   : > { %975 = vmatpush1.bf16.msra.mxu0 %v1373_v38 }
  0x7b   : > { %1016 = vmatpush1.bf16.msra.mxu1 %v1374_v39  ;;  %976 = vmatprep.subr.bf16.mxu0 %v1375_v40 }
  0x7c   : > { %1017 = vmatprep.subr.bf16.mxu1 %v1377_v41 }
  0x7e   : > { %977 = vmatpush1.bf16.msra.mxu0 %v1379_v42 }
  0x7f   : > { %1018 = vmatpush1.bf16.msra.mxu1 %v1380_v43  ;;  %978 = vmatprep.subr.bf16.mxu0 %v1381_v44 }
  0x80   : > { %1019 = vmatprep.subr.bf16.mxu1 %v1383_v45 }
  0x82   : > { %979 = vmatpush1.bf16.msra.mxu0 %v1385_v46 }
  0x83   : > { %1020 = vmatpush1.bf16.msra.mxu1 %v1386_v47  ;;  %980 = vmatprep.subr.bf16.mxu0 %v1387_v48 }
  0x84   : > { %1021 = vmatprep.subr.bf16.mxu1 %v1389_v49 }
  0x86   : > { %981 = vmatpush1.bf16.msra.mxu0 %v1391_v50 }
  0x87   : > { %1022 = vmatpush1.bf16.msra.mxu1 %v1392_v51  ;;  %982 = vmatprep.subr.bf16.mxu0 %v1393_v52 }
  0x88   : > { %1023 = vmatprep.subr.bf16.mxu1 %v1395_v53 }
  0x8a   : > { %983 = vmatpush1.bf16.msra.mxu0 %v1397_v54 }
  0x8b   : > { %1024 = vmatpush1.bf16.msra.mxu1 %v1398_v55  ;;  %984 = vmatprep.subr.bf16.mxu0 %v1399_v56 }
  0x8c   : > { %1025 = vmatprep.subr.bf16.mxu1 %v1401_v57 }
  0x8e   : > { %985 = vmatpush1.bf16.msra.mxu0 %v1403_v58 }
  0x8f   : > { %1026 = vmatpush1.bf16.msra.mxu1 %v1404_v59  ;;  %986 = vmatprep.subr.bf16.mxu0 %v1405_v60 }
  0x90   : > { %1027 = vmatprep.subr.bf16.mxu1 %v1407_v61 }
  0x92   : > { %987 = vmatpush1.bf16.msra.mxu0 %v1409_v62 }
  0x93   : > { %1028 = vmatpush1.bf16.msra.mxu1 %v1410_v63  ;;  %988 = vmatprep.subr.bf16.mxu0 %v1411_v2 }
  0x94   : > { %1029 = vmatprep.subr.bf16.mxu1 %v1413_v3 }
  0x96   : > { %989 = vmatpush1.bf16.msra.mxu0 %v1415_v4 }
  0x97   : > { %1030 = vmatpush1.bf16.msra.mxu1 %v1416_v5 }
  0x99   : > { %991 = vmatmul.mubr.bf16.vlgmr.msra.gmra.mrb[0].mxu0 %v1208_v6 }
  0x9a   : > { %1032 = vmatmul.mubr.bf16.vlgmr.msra.gmra.mrb[0].mxu1 %v1210_v7 }
 0x16c   : > { %v992_v13 = vpop.f32.mrb[0].mxu0 }
 0x16d   : > { %v1033_v14 = vpop.f32.mrb[0].mxu1  ;;  %v994_v16 = vpop.f32.mrb[1].mxu0 }
 0x16e   : > { %v1034_v15 = vadd.f32 %v1033_v14, %v992_v13  ;;  %v1035_v17 = vpop.f32.mrb[1].mxu1  ;;  %v996_v19 = vpop.f32.mrb[2].mxu0 }
 0x16f   : > { %v1036_v18 = vadd.f32 %v1035_v17, %v994_v16  ;;  %v1037_v20 = vpop.f32.mrb[2].mxu1  ;;  %v997_v22 = vpop.f32.mrb[3].mxu0 }
 0x170   : > { %v1061_v21 = vadd.f32 %v1054_v0, %v1034_v15  ;;  %v1038_v23 = vpop.f32.mrb[3].mxu1 }
 0x171   : > { %v1062_v24 = vadd.f32 %v1058_v1, %v1036_v18 }
 0x173   : > { %v1280_v25 = vpack.c.bf16 %v1062_v24, %v1061_v21 }
 0x175   : > { %1071 = vst [vmem:[%s548_s19] sm:$0xff] %v1280_v25 }
 0x176 PF: > { %s13_s16 = sadd.s32 1, %s1459_s16   ;;  %s1769_s12 = smov %s1447_s13 }
 0x177   : > { %p10_p10 = scmp.ge.s32.totalorder %s13_s16, 6   ;;  %s1770_s13 = smov %s1516_s20 }
 0x178   : > { %s1771_s14 = smov %s1455_s15  ;;  %s1772_s15 = smov %s1774_s17 }
 0x179   :  { %12 = sbr.rel (!%p10_p10) target bundleno = 3 (0x3), region = 119 }

// kernel: resnet_forward.31
= control target key start
LH: loop header
LB: loop body
LE: loop exit
PB: predicated region body
PF: predicated region fallthrough
CT: control target
= control target key end

     0   :  { %s1123_s15 = smov 0   ;;  %s1125_s16 = smov 0   ;;  %s1305_s0 = inlined_call_operand.vmem [shape: bf16[8,256], index: 0, kind: input, shape index: {}]   ;;  %s1306_s1 = inlined_call_operand.vmem [shape: bf16[256,1024], index: 1, kind: input, shape index: {}]   ;;  %s1307_s2 = inlined_call_operand.vmem [shape: f32[1,1024], index: 2, kind: input, shape index: {}]   ;;  %s1308_s3 = inlined_call_operand.vmem [shape: bf16[8,1024], index: 3, kind: input, shape index: {}, may-alias: {3,4}]   ;;  %s1309_s4 = inlined_call_operand.vmem [shape: bf16[8,1024], index: 4, kind: output, shape index: {}, may-alias: {3,4}]  }
   0x1   :  { %s1127_s17 = smov 0   ;;  %s1129_s18 = smov 0  }
   0x2   :  { %s1131_s19 = smov 0  }
   0x3 LB: > { %s29_s20 = sadd.s32 1, %s1092_s18  ;;  %p77_p1 = scmp.ne.s32.totalorder %s1084_s16, %s1080_s15  ;;  %s1096_s19 = sphi %s1131_s19, %s14_s19   ;;  %s1092_s18 = sphi %s1129_s18, %s1313_s18   ;;  %s1088_s17 = sphi %s1127_s17, %s1312_s17   ;;  %s1084_s16 = sphi %s1125_s16, %s1311_s16   ;;  %s1080_s15 = sphi %s1123_s15, %s1310_s15  }
   0x4   : > { %p31_p0 = scmp.ge.s32.totalorder %s29_s20, 4  ;;  %p78_p2 = scmp.eq.s32.totalorder %s1096_s19, 0 }
   0x5   : > { %s70_s22 = sadd.s32 1, %s1084_s16  ;;  %p918_p5 = scmp.ge.s32.totalorder %s1096_s19, 4 }
   0x6   : > { %s1315_s20 = smov (%p31_p0, %s29_s20), 0  ;;  %p79_p3 = por %p78_p2, %p77_p1 }
   0x7   : > { %s66_s21 = ssub.s32 %s1092_s18, %s1315_s20  ;;  %198 = sbr.rel (%p918_p5) target bundleno = 50 (0x32), region = 20 }
   0x8   : > { %p68_p4 = scmp.eq.s32.totalorder %s66_s21, 0 }
   0xa   : > { %s1158_s23 = scalar_select %p68_p4, %s1084_s16, %s70_s22  }
   0xe   : > { %201 = sbr.rel (!%p79_p3) target bundleno = 50 (0x32), region = 24  ;;  %s203_s24 = sand.u32 (%p79_p3), 1, %s1084_s16  }
   0xf   : > { %s966_s25 = sshll.u32 (%p79_p3), %s1092_s18, 3  ;;  %s919_s26 = sshll.u32 (%p79_p3), %s203_s24, 8 }
  0x10   : > { %s1166_s29 = scalar_lea.vmem (%p79_p3), %s1306_s1, %s966_s25  ;;  %s1171_s30 = scalar_lea.vmem (%p79_p3), [#allocation3], %s919_s26 }
  0x11   : > { %v301_v0 = vld [vmem:[%s1166_s29] sm:$0xff] (%p79_p3) }
  0x12   : > { %v303_v1 = vld [vmem:[%s1166_s29 + $0x20] sm:$0xff] (%p79_p3)  ;;  %302 = vst [vmem:[%s1171_s30] sm:$0xff] (%p79_p3), %v301_v0 }
  0x13   : > { %v305_v2 = vld [vmem:[%s1166_s29 + $0x40] sm:$0xff] (%p79_p3)  ;;  %304 = vst [vmem:[%s1171_s30 + $0x8] sm:$0xff] (%p79_p3), %v303_v1 }
  0x14   : > { %306 = vst [vmem:[%s1171_s30 + $0x10] sm:$0xff] (%p79_p3), %v305_v2  ;;  %v307_v3 = vld [vmem:[%s1166_s29 + $0x60] sm:$0xff] (%p79_p3) }
  0x15   : > { %v309_v4 = vld [vmem:[%s1166_s29 + $0x80] sm:$0xff]  ;;  %308 = vst [vmem:[%s1171_s30 + $0x18] sm:$0xff] %v307_v3 }
  0x16   : > { %v311_v5 = vld [vmem:[%s1166_s29 + $0xa0] sm:$0xff]  ;;  %310 = vst [vmem:[%s1171_s30 + $0x20] sm:$0xff] %v309_v4 }
  0x17   : > { %312 = vst [vmem:[%s1171_s30 + $0x28] sm:$0xff] %v311_v5  ;;  %v313_v6 = vld [vmem:[%s1166_s29 + $0xc0] sm:$0xff] }
  0x18   : > { %v315_v7 = vld [vmem:[%s1166_s29 + $0xe0] sm:$0xff]  ;;  %314 = vst [vmem:[%s1171_s30 + $0x30] sm:$0xff] %v313_v6 }
  0x19   : > { %v317_v8 = vld [vmem:[%s1166_s29 + $0x100] sm:$0xff]  ;;  %316 = vst [vmem:[%s1171_s30 + $0x38] sm:$0xff] %v315_v7 }
  0x1a   : > { %318 = vst [vmem:[%s1171_s30 + $0x40] sm:$0xff] %v317_v8  ;;  %v319_v9 = vld [vmem:[%s1166_s29 + $0x120] sm:$0xff] }
  0x1b   : > { %v321_v10 = vld [vmem:[%s1166_s29 + $0x140] sm:$0xff]  ;;  %320 = vst [vmem:[%s1171_s30 + $0x48] sm:$0xff] %v319_v9 }
  0x1c   : > { %v323_v11 = vld [vmem:[%s1166_s29 + $0x160] sm:$0xff]  ;;  %322 = vst [vmem:[%s1171_s30 + $0x50] sm:$0xff] %v321_v10 }
  0x1d   : > { %324 = vst [vmem:[%s1171_s30 + $0x58] sm:$0xff] %v323_v11  ;;  %v325_v12 = vld [vmem:[%s1166_s29 + $0x180] sm:$0xff] }
  0x1e   : > { %v327_v13 = vld [vmem:[%s1166_s29 + $0x1a0] sm:$0xff]  ;;  %326 = vst [vmem:[%s1171_s30 + $0x60] sm:$0xff] %v325_v12 }
  0x1f   : > { %v329_v14 = vld [vmem:[%s1166_s29 + $0x1c0] sm:$0xff]  ;;  %328 = vst [vmem:[%s1171_s30 + $0x68] sm:$0xff] %v327_v13 }
  0x20   : > { %330 = vst [vmem:[%s1171_s30 + $0x70] sm:$0xff] %v329_v14  ;;  %v331_v15 = vld [vmem:[%s1166_s29 + $0x1e0] sm:$0xff] }
  0x21   : > { %v333_v16 = vld [vmem:[%s1166_s29 + $0x200] sm:$0xff]  ;;  %332 = vst [vmem:[%s1171_s30 + $0x78] sm:$0xff] %v331_v15 }
  0x22   : > { %v335_v17 = vld [vmem:[%s1166_s29 + $0x220] sm:$0xff]  ;;  %334 = vst [vmem:[%s1171_s30 + $0x80] sm:$0xff] %v333_v16 }
  0x23   : > { %336 = vst [vmem:[%s1171_s30 + $0x88] sm:$0xff] %v335_v17  ;;  %v337_v18 = vld [vmem:[%s1166_s29 + $0x240] sm:$0xff] }
  0x24   : > { %v339_v19 = vld [vmem:[%s1166_s29 + $0x260] sm:$0xff]  ;;  %338 = vst [vmem:[%s1171_s30 + $0x90] sm:$0xff] %v337_v18 }
  0x25   : > { %v341_v20 = vld [vmem:[%s1166_s29 + $0x280] sm:$0xff]  ;;  %340 = vst [vmem:[%s1171_s30 + $0x98] sm:$0xff] %v339_v19 }
  0x26   : > { %342 = vst [vmem:[%s1171_s30 + $0xa0] sm:$0xff] %v341_v20  ;;  %v343_v21 = vld [vmem:[%s1166_s29 + $0x2a0] sm:$0xff] }
  0x27   : > { %v345_v22 = vld [vmem:[%s1166_s29 + $0x2c0] sm:$0xff]  ;;  %344 = vst [vmem:[%s1171_s30 + $0xa8] sm:$0xff] %v343_v21 }
  0x28   : > { %v347_v23 = vld [vmem:[%s1166_s29 + $0x2e0] sm:$0xff]  ;;  %346 = vst [vmem:[%s1171_s30 + $0xb0] sm:$0xff] %v345_v22 }
  0x29   : > { %348 = vst [vmem:[%s1171_s30 + $0xb8] sm:$0xff] %v347_v23  ;;  %v349_v24 = vld [vmem:[%s1166_s29 + $0x300] sm:$0xff] }
  0x2a   : > { %v351_v25 = vld [vmem:[%s1166_s29 + $0x320] sm:$0xff]  ;;  %350 = vst [vmem:[%s1171_s30 + $0xc0] sm:$0xff] %v349_v24 }
  0x2b   : > { %v353_v26 = vld [vmem:[%s1166_s29 + $0x340] sm:$0xff]  ;;  %352 = vst [vmem:[%s1171_s30 + $0xc8] sm:$0xff] %v351_v25 }
  0x2c   : > { %354 = vst [vmem:[%s1171_s30 + $0xd0] sm:$0xff] %v353_v26  ;;  %v355_v27 = vld [vmem:[%s1166_s29 + $0x360] sm:$0xff] }
  0x2d   : > { %v357_v28 = vld [vmem:[%s1166_s29 + $0x380] sm:$0xff]  ;;  %356 = vst [vmem:[%s1171_s30 + $0xd8] sm:$0xff] %v355_v27 }
  0x2e   : > { %v359_v29 = vld [vmem:[%s1166_s29 + $0x3a0] sm:$0xff]  ;;  %358 = vst [vmem:[%s1171_s30 + $0xe0] sm:$0xff] %v357_v28 }
  0x2f   : > { %360 = vst [vmem:[%s1171_s30 + $0xe8] sm:$0xff] %v359_v29  ;;  %v361_v30 = vld [vmem:[%s1166_s29 + $0x3c0] sm:$0xff] }
  0x30   : > { %v363_v31 = vld [vmem:[%s1166_s29 + $0x3e0] sm:$0xff]  ;;  %362 = vst [vmem:[%s1171_s30 + $0xf0] sm:$0xff] %v361_v30 }
  0x31   : > { %364 = vst [vmem:[%s1171_s30 + $0xf8] sm:$0xff] %v363_v31 }
  0x32 PF: > { %p922_p6 = scmp.ge.s32.totalorder %s1096_s19, 1  ;;  %p390_p7 = scmp.lt.s32.totalorder %s1096_s19, 5 }
  0x34   : > { %p391_p8 = pnand %p922_p6, %p390_p7 }
  0x35   : > { %s397_s5 = sand.u32 (!%p391_p8), 1, %s1080_s15   ;;  %v1240_v32 = vld [vmem:[%s1305_s0] sm:$0xff] (!%p391_p8)  ;;  %s924_s10 = sshll.u32 (!%p391_p8), %s1088_s17, 1  ;;  %v745_v3 = vlaneseq (!%p391_p8) }
  0x36   : > { %394 = sbr.rel (%p391_p8) target bundleno = 343 (0x157), region = 70  ;;  %s923_s8 = sshll.u32 (!%p391_p8), %s397_s5, 8  ;;  %v930_v33 = vcombine.high (!%p391_p8), %v1240_v32, %v1240_v32  ;;  %v929_v2 = vcombine.low (!%p391_p8), %v1240_v32, %v1240_v32 }
  0x37   : > { %s1244_s9 = scalar_lea.vmem (!%p391_p8), [#allocation3], %s923_s8  ;;  %p461_p9 = scmp.lt.s32.totalorder (!%p391_p8), %s924_s10, 7  ;;  %v746_v4 = vshrl.u32 (!%p391_p8), %v745_v3, 7 }
  0x38   : > { %v1008_v34 = vld [vmem:[%s1244_s9 + $0x4] ss:$8 sps:$4 sm:$0xff] (!%p391_p8)   ;;  %725 = vmatprep.mubr.bf16.mxu0 (!%p391_p8), %v930_v33  ;;  %v1010_v35 = vld [vmem:[%s1244_s9] ss:$8 sps:$4 sm:$0xff] (!%p391_p8)   ;;  %v1011_v36 = vld [vmem:[%s1244_s9 + $0x14] ss:$8 sps:$4 sm:$0xff] (!%p391_p8)  }
  0x39   : > { %693 = vmatprep.subr.bf16.mxu0 (!%p391_p8), %v1008_v34  ;;  %v1013_v37 = vld [vmem:[%s1244_s9 + $0x10] ss:$8 sps:$4 sm:$0xff] (!%p391_p8)   ;;  %v1014_v38 = vld [vmem:[%s1244_s9 + $0x24] ss:$8 sps:$4 sm:$0xff] (!%p391_p8)   ;;  %v1016_v39 = vld [vmem:[%s1244_s9 + $0x20] ss:$8 sps:$4 sm:$0xff] (!%p391_p8)  }
  0x3a   : > { %694 = vmatpush1.bf16.msra.mxu0 (!%p391_p8), %v1010_v35  ;;  %v1017_v40 = vld [vmem:[%s1244_s9 + $0x34] ss:$8 sps:$4 sm:$0xff] (!%p391_p8)   ;;  %v1019_v41 = vld [vmem:[%s1244_s9 + $0x30] ss:$8 sps:$4 sm:$0xff] (!%p391_p8)   ;;  %v1020_v42 = vld [vmem:[%s1244_s9 + $0x44] ss:$8 sps:$4 sm:$0xff] (!%p391_p8)  }
  0x3b   : > { %695 = vmatprep.subr.bf16.mxu0 (!%p391_p8), %v1011_v36  ;;  %v1022_v43 = vld [vmem:[%s1244_s9 + $0x40] ss:$8 sps:$4 sm:$0xff] (!%p391_p8)   ;;  %v1023_v44 = vld [vmem:[%s1244_s9 + $0x54] ss:$8 sps:$4 sm:$0xff] (!%p391_p8)   ;;  %v1025_v45 = vld [vmem:[%s1244_s9 + $0x50] ss:$8 sps:$4 sm:$0xff] (!%p391_p8)  }
  0x3c   : > { %v1026_v46 = vld [vmem:[%s1244_s9 + $0x64] ss:$8 sps:$4 sm:$0xff] (!%p391_p8)   ;;  %v1028_v47 = vld [vmem:[%s1244_s9 + $0x60] ss:$8 sps:$4 sm:$0xff] (!%p391_p8)   ;;  %v1029_v48 = vld [vmem:[%s1244_s9 + $0x74] ss:$8 sps:$4 sm:$0xff] (!%p391_p8)  }
  0x3d   : > { %v1031_v49 = vld [vmem:[%s1244_s9 + $0x70] ss:$8 sps:$4 sm:$0xff]   ;;  %v1032_v50 = vld [vmem:[%s1244_s9 + $0x84] ss:$8 sps:$4 sm:$0xff]   ;;  %v1034_v51 = vld [vmem:[%s1244_s9 + $0x80] ss:$8 sps:$4 sm:$0xff]  }
  0x3e   : > { %696 = vmatpush1.bf16.msra.mxu0 %v1013_v37  ;;  %v1035_v52 = vld [vmem:[%s1244_s9 + $0x94] ss:$8 sps:$4 sm:$0xff]   ;;  %v1037_v53 = vld [vmem:[%s1244_s9 + $0x90] ss:$8 sps:$4 sm:$0xff]   ;;  %v1038_v54 = vld [vmem:[%s1244_s9 + $0xa4] ss:$8 sps:$4 sm:$0xff]  }
  0x3f   : > { %697 = vmatprep.subr.bf16.mxu0 %v1014_v38  ;;  %v1040_v55 = vld [vmem:[%s1244_s9 + $0xa0] ss:$8 sps:$4 sm:$0xff]   ;;  %v1041_v56 = vld [vmem:[%s1244_s9 + $0xb4] ss:$8 sps:$4 sm:$0xff]   ;;  %v1043_v57 = vld [vmem:[%s1244_s9 + $0xb0] ss:$8 sps:$4 sm:$0xff]  }
  0x40   : > { %v1044_v58 = vld [vmem:[%s1244_s9 + $0xc4] ss:$8 sps:$4 sm:$0xff]   ;;  %v1046_v59 = vld [vmem:[%s1244_s9 + $0xc0] ss:$8 sps:$4 sm:$0xff]   ;;  %v1047_v60 = vld [vmem:[%s1244_s9 + $0xd4] ss:$8 sps:$4 sm:$0xff]  }
  0x41   : > { %v1049_v61 = vld [vmem:[%s1244_s9 + $0xd0] ss:$8 sps:$4 sm:$0xff]   ;;  %v1050_v62 = vld [vmem:[%s1244_s9 + $0xe4] ss:$8 sps:$4 sm:$0xff]   ;;  %v1052_v63 = vld [vmem:[%s1244_s9 + $0xe0] ss:$8 sps:$4 sm:$0xff]  }
  0x42   : > { %698 = vmatpush1.bf16.msra.mxu0 %v1016_v39  ;;  %v1053_v0 = vld [vmem:[%s1244_s9 + $0xf4] ss:$8 sps:$4 sm:$0xff]   ;;  %v1055_v1 = vld [vmem:[%s1244_s9 + $0xf0] ss:$8 sps:$4 sm:$0xff]   ;;  %s1317_s10 = smov (!%p461_p9, %s924_s10), 7  ;;  %v747_v5 = vsub.s32 0, %v746_v4 }
  0x43   : > { %699 = vmatprep.subr.bf16.mxu0 %v1017_v40  ;;  %s926_s11 = sshll.u32 %s1317_s10, 2  ;;  %s463_s14 = scalar_lea.vmem %s1307_s2, %s1317_s10  ;;  %v751_v7 = vsub.s32 1, %v746_v4 }
  0x44   : > { %s473_s22 = scalar_lea.vmem %s1308_s3, %s926_s11  ;;  %v743_v6 = vld [vmem:[%s463_s14] sm:$0x3]  ;;  %s483_s25 = scalar_lea.vmem %s1309_s4, %s926_s11 }
  0x45   : > { %v757_v8 = vld [vmem:[%s473_s22] sm:$0xff]  ;;  %v748_v9 = vrot.slane %v743_v6, %v747_v5  ;;  %v752_v10 = vrot.slane %v743_v6, %v751_v7 }
  0x46   : > { %700 = vmatpush1.bf16.msra.mxu0 %v1019_v41  ;;  %v758_v11 = vunpack.c.l.bf16 %v757_v8  ;;  %v759_v13 = vunpack.c.h.bf16 %v757_v8 }
  0x47   : > { %701 = vmatprep.subr.bf16.mxu0 %v1020_v42 }
  0x4a   : > { %702 = vmatpush1.bf16.msra.mxu0 %v1022_v43 }
  0x4b   : > { %703 = vmatprep.subr.bf16.mxu0 %v1023_v44 }
  0x4e   : > { %704 = vmatpush1.bf16.msra.mxu0 %v1025_v45 }
  0x4f   : > { %705 = vmatprep.subr.bf16.mxu0 %v1026_v46 }
  0x52   : > { %706 = vmatpush1.bf16.msra.mxu0 %v1028_v47 }
  0x53   : > { %707 = vmatprep.subr.bf16.mxu0 %v1029_v48 }
  0x56   : > { %708 = vmatpush1.bf16.msra.mxu0 %v1031_v49 }
  0x57   : > { %709 = vmatprep.subr.bf16.mxu0 %v1032_v50 }
  0x5a   : > { %710 = vmatpush1.bf16.msra.mxu0 %v1034_v51 }
  0x5b   : > { %711 = vmatprep.subr.bf16.mxu0 %v1035_v52 }
  0x5e   : > { %712 = vmatpush1.bf16.msra.mxu0 %v1037_v53 }
  0x5f   : > { %713 = vmatprep.subr.bf16.mxu0 %v1038_v54 }
  0x62   : > { %714 = vmatpush1.bf16.msra.mxu0 %v1040_v55 }
  0x63   : > { %715 = vmatprep.subr.bf16.mxu0 %v1041_v56 }
  0x66   : > { %716 = vmatpush1.bf16.msra.mxu0 %v1043_v57 }
  0x67   : > { %717 = vmatprep.subr.bf16.mxu0 %v1044_v58 }
  0x6a   : > { %718 = vmatpush1.bf16.msra.mxu0 %v1046_v59 }
  0x6b   : > { %719 = vmatprep.subr.bf16.mxu0 %v1047_v60 }
  0x6e   : > { %720 = vmatpush1.bf16.msra.mxu0 %v1049_v61 }
  0x6f   : > { %721 = vmatprep.subr.bf16.mxu0 %v1050_v62 }
  0x72   : > { %722 = vmatpush1.bf16.msra.mxu0 %v1052_v63 }
  0x73   : > { %723 = vmatprep.subr.bf16.mxu0 %v1053_v0 }
  0x76   : > { %724 = vmatpush1.bf16.msra.mxu0 %v1055_v1 }
  0x79   : > { %726 = vmatmul.mubr.bf16.vlgmr.msra.gmra.mrb[0].mxu0 %v929_v2 }
 0x14c   : > { %v727_v12 = vpop.f32.mrb[0].mxu0 }
 0x14d   : > { %v755_v14 = vadd.f32 %v748_v9, %v727_v12  ;;  %v729_v15 = vpop.f32.mrb[1].mxu0 }
 0x14e   : > { %v756_v16 = vadd.f32 %v752_v10, %v729_v15  ;;  %v731_v17 = vpop.f32.mrb[2].mxu0 }
 0x14f   : > { %v760_v18 = vadd.f32 %v758_v11, %v755_v14  ;;  %v732_v19 = vpop.f32.mrb[3].mxu0 }
 0x150   : > { %v761_v20 = vadd.f32 %v759_v13, %v756_v16 }
 0x151   : > { %v762_v21 = vmax.f32 %v760_v18, 0.0 }
 0x152   : > { %v763_v22 = vmax.f32 %v761_v20, 0.0 }
 0x154   : > { %v967_v23 = vpack.c.bf16 %v763_v22, %v762_v21 }
 0x156   : > { %772 = vst [vmem:[%s483_s25] sm:$0xff] %v967_v23 }
 0x157 PF: > { %s14_s19 = sadd.s32 1, %s1096_s19   ;;  %s1310_s15 = smov %s1084_s16 }
 0x158   : > { %p11_p10 = scmp.ge.s32.totalorder %s14_s19, 6   ;;  %s1311_s16 = smov %s1158_s23 }
 0x159   : > { %s1312_s17 = smov %s1092_s18  ;;  %s1313_s18 = smov %s1315_s20 }
 0x15a   :  { %13 = sbr.rel (!%p11_p10) target bundleno = 3 (0x3), region = 126 }

// kernel: resnet_forward.32
= control target key start
LH: loop header
LB: loop body
LE: loop exit
PB: predicated region body
PF: predicated region fallthrough
CT: control target
= control target key end

     0   :  { %s1523_s12 = smov 0   ;;  %s1525_s13 = smov 0   ;;  %s1834_s0 = inlined_call_operand.vmem [shape: bf16[8,1024], index: 0, kind: input, shape index: {}]   ;;  %s1835_s1 = inlined_call_operand.vmem [shape: bf16[1024,512], index: 1, kind: input, shape index: {}]   ;;  %s1836_s2 = inlined_call_operand.vmem [shape: f32[1,512], index: 2, kind: input, shape index: {}]   ;;  %s1837_s3 = inlined_call_operand.vmem [shape: bf16[8,512], index: 3, kind: output, shape index: {}]  }
   0x1   :  { %s1527_s14 = smov 0   ;;  %s1529_s15 = smov 0  }
   0x2   :  { %s1531_s16 = smov 0   ;;  %s1533_s17 = smov 0  }
   0x3   :  { %s1535_s18 = smov 0  }
   0x4 LB: > { %s25_s19 = sadd.s32 1, %s1492_s16  ;;  %s28_s20 = sadd.s32 1, %s1496_s17  ;;  %s1500_s18 = sphi %s1535_s18, %s13_s18   ;;  %s1496_s17 = sphi %s1533_s17, %s1843_s17   ;;  %s1492_s16 = sphi %s1531_s16, %s1842_s16   ;;  %s1488_s15 = sphi %s1529_s15, %s1841_s15   ;;  %s1484_s14 = sphi %s1527_s14, %s1840_s14   ;;  %s1480_s13 = sphi %s1525_s13, %s1839_s13   ;;  %s1476_s12 = sphi %s1523_s12, %s1838_s12  }
   0x5   : > { %p26_p0 = scmp.ge.s32.totalorder %s25_s19, 2  ;;  %p76_p1 = scmp.ne.s32.totalorder %s1480_s13, %s1476_s12 }
   0x6   : > { %p77_p2 = scmp.eq.s32.totalorder %s1500_s18, 0  ;;  %s69_s24 = sadd.s32 1, %s1480_s13 }
   0x7   : > { %s1845_s19 = smov (%p26_p0, %s25_s19), 0  ;;  %s1847_s20 = smov (!%p26_p0, %s28_s20), %s1496_s17 }
   0x8   : > { %p78_p3 = por %p77_p2, %p76_p1  ;;  %p30_p4 = scmp.ge.s32.totalorder %s1847_s20, 2 }
   0x9   : > { %s64_s21 = ssub.s32 %s1492_s16, %s1845_s19  ;;  %p1201_p6 = scmp.ge.s32.totalorder %s1500_s18, 4 }
   0xa   : > { %s1849_s20 = smov (%p30_p4, %s1847_s20), 0 }
   0xb   : > { %s65_s22 = ssub.s32 %s1496_s17, %s1849_s20  ;;  %156 = sbr.rel (%p1201_p6) target bundleno = 57 (0x39), region = 16 }
   0xc   : > { %s66_s23 = sor.u32 %s65_s22, %s64_s21 }
   0xd   : > { %p67_p5 = scmp.eq.s32.totalorder %s66_s23, 0 }
   0xf   : > { %s1574_s25 = scalar_select %p67_p5, %s1480_s13, %s69_s24  }
  0x12   : > { %172 = sbr.rel (!%p78_p3) target bundleno = 57 (0x39), region = 24  ;;  %s174_s26 = sand.u32 (%p78_p3), 1, %s1480_s13  }
  0x13   : > { %s1204_s27 = sshll.u32 (%p78_p3), %s1496_s17, 1  ;;  %s1202_s28 = sshll.u32 (%p78_p3), %s174_s26, 9 }
  0x14   : > { %s1287_s29 = sshll.u32 (%p78_p3), %s1492_s16, 8  ;;  %s1588_s8 = scalar_lea.vmem (%p78_p3), [#allocation3], %s1202_s28 }
  0x15   : > { %s180_s30 = sadd.s32 (%p78_p3), %s1287_s29, %s1204_s27 }
  0x16   : > { %s1206_s4 = sshll.u32 (%p78_p3), %s180_s30, 2 }
  0x17   : > { %s1583_s7 = scalar_lea.vmem (%p78_p3), %s1835_s1, %s1206_s4 }
  0x18   : > { %v336_v0 = vld [vmem:[%s1583_s7] sm:$0xff] (%p78_p3)  ;;  %v338_v1 = vld [vmem:[%s1583_s7 + $0x10] sm:$0xff] (%p78_p3) }
  0x19   : > { %v340_v2 = vld [vmem:[%s1583_s7 + $0x20] sm:$0xff]  ;;  %337 = vst [vmem:[%s1588_s8] sm:$0xff] %v336_v0  ;;  %339 = vst [vmem:[%s1588_s8 + $0x8] sm:$0xff] %v338_v1  ;;  %v342_v3 = vld [vmem:[%s1583_s7 + $0x30] sm:$0xff] }
  0x1a   : > { %341 = vst [vmem:[%s1588_s8 + $0x10] sm:$0xff] %v340_v2  ;;  %v344_v4 = vld [vmem:[%s1583_s7 + $0x40] sm:$0xff]  ;;  %v346_v5 = vld [vmem:[%s1583_s7 + $0x50] sm:$0xff]  ;;  %343 = vst [vmem:[%s1588_s8 + $0x18] sm:$0xff] %v342_v3 }
  0x1b   : > { %345 = vst [vmem:[%s1588_s8 + $0x20] sm:$0xff] %v344_v4  ;;  %347 = vst [vmem:[%s1588_s8 + $0x28] sm:$0xff] %v346_v5  ;;  %v348_v6 = vld [vmem:[%s1583_s7 + $0x60] sm:$0xff]  ;;  %v350_v7 = vld [vmem:[%s1583_s7 + $0x70] sm:$0xff] }
  0x1c   : > { %v352_v8 = vld [vmem:[%s1583_s7 + $0x80] sm:$0xff]  ;;  %349 = vst [vmem:[%s1588_s8 + $0x30] sm:$0xff] %v348_v6  ;;  %351 = vst [vmem:[%s1588_s8 + $0x38] sm:$0xff] %v350_v7  ;;  %v354_v9 = vld [vmem:[%s1583_s7 + $0x90] sm:$0xff] }
  0x1d   : > { %353 = vst [vmem:[%s1588_s8 + $0x40] sm:$0xff] %v352_v8  ;;  %v356_v10 = vld [vmem:[%s1583_s7 + $0xa0] sm:$0xff]  ;;  %v358_v11 = vld [vmem:[%s1583_s7 + $0xb0] sm:$0xff]  ;;  %355 = vst [vmem:[%s1588_s8 + $0x48] sm:$0xff] %v354_v9 }
  0x1e   : > { %357 = vst [vmem:[%s1588_s8 + $0x50] sm:$0xff] %v356_v10  ;;  %359 = vst [vmem:[%s1588_s8 + $0x58] sm:$0xff] %v358_v11  ;;  %v360_v12 = vld [vmem:[%s1583_s7 + $0xc0] sm:$0xff]  ;;  %v362_v13 = vld [vmem:[%s1583_s7 + $0xd0] sm:$0xff] }
  0x1f   : > { %v364_v14 = vld [vmem:[%s1583_s7 + $0xe0] sm:$0xff]  ;;  %361 = vst [vmem:[%s1588_s8 + $0x60] sm:$0xff] %v360_v12  ;;  %363 = vst [vmem:[%s1588_s8 + $0x68] sm:$0xff] %v362_v13  ;;  %v366_v15 = vld [vmem:[%s1583_s7 + $0xf0] sm:$0xff] }
  0x20   : > { %365 = vst [vmem:[%s1588_s8 + $0x70] sm:$0xff] %v364_v14  ;;  %v368_v16 = vld [vmem:[%s1583_s7 + $0x100] sm:$0xff]  ;;  %v370_v17 = vld [vmem:[%s1583_s7 + $0x110] sm:$0xff]  ;;  %367 = vst [vmem:[%s1588_s8 + $0x78] sm:$0xff] %v366_v15 }
  0x21   : > { %369 = vst [vmem:[%s1588_s8 + $0x80] sm:$0xff] %v368_v16  ;;  %371 = vst [vmem:[%s1588_s8 + $0x88] sm:$0xff] %v370_v17  ;;  %v372_v18 = vld [vmem:[%s1583_s7 + $0x120] sm:$0xff]  ;;  %v374_v19 = vld [vmem:[%s1583_s7 + $0x130] sm:$0xff] }
  0x22   : > { %v376_v20 = vld [vmem:[%s1583_s7 + $0x140] sm:$0xff]  ;;  %373 = vst [vmem:[%s1588_s8 + $0x90] sm:$0xff] %v372_v18  ;;  %375 = vst [vmem:[%s1588_s8 + $0x98] sm:$0xff] %v374_v19  ;;  %v378_v21 = vld [vmem:[%s1583_s7 + $0x150] sm:$0xff] }
  0x23   : > { %377 = vst [vmem:[%s1588_s8 + $0xa0] sm:$0xff] %v376_v20  ;;  %v380_v22 = vld [vmem:[%s1583_s7 + $0x160] sm:$0xff]  ;;  %v382_v23 = vld [vmem:[%s1583_s7 + $0x170] sm:$0xff]  ;;  %379 = vst [vmem:[%s1588_s8 + $0xa8] sm:$0xff] %v378_v21 }
  0x24   : > { %381 = vst [vmem:[%s1588_s8 + $0xb0] sm:$0xff] %v380_v22  ;;  %383 = vst [vmem:[%s1588_s8 + $0xb8] sm:$0xff] %v382_v23  ;;  %v384_v24 = vld [vmem:[%s1583_s7 + $0x180] sm:$0xff]  ;;  %v386_v25 = vld [vmem:[%s1583_s7 + $0x190] sm:$0xff] }
  0x25   : > { %v388_v26 = vld [vmem:[%s1583_s7 + $0x1a0] sm:$0xff]  ;;  %385 = vst [vmem:[%s1588_s8 + $0xc0] sm:$0xff] %v384_v24  ;;  %387 = vst [vmem:[%s1588_s8 + $0xc8] sm:$0xff] %v386_v25  ;;  %v390_v27 = vld [vmem:[%s1583_s7 + $0x1b0] sm:$0xff] }
  0x26   : > { %389 = vst [vmem:[%s1588_s8 + $0xd0] sm:$0xff] %v388_v26  ;;  %v392_v28 = vld [vmem:[%s1583_s7 + $0x1c0] sm:$0xff]  ;;  %v394_v29 = vld [vmem:[%s1583_s7 + $0x1d0] sm:$0xff]  ;;  %391 = vst [vmem:[%s1588_s8 + $0xd8] sm:$0xff] %v390_v27 }
  0x27   : > { %393 = vst [vmem:[%s1588_s8 + $0xe0] sm:$0xff] %v392_v28  ;;  %395 = vst [vmem:[%s1588_s8 + $0xe8] sm:$0xff] %v394_v29  ;;  %v396_v30 = vld [vmem:[%s1583_s7 + $0x1e0] sm:$0xff]  ;;  %v398_v31 = vld [vmem:[%s1583_s7 + $0x1f0] sm:$0xff] }
  0x28   : > { %v400_v32 = vld [vmem:[%s1583_s7 + $0x200] sm:$0xff]  ;;  %397 = vst [vmem:[%s1588_s8 + $0xf0] sm:$0xff] %v396_v30  ;;  %399 = vst [vmem:[%s1588_s8 + $0xf8] sm:$0xff] %v398_v31  ;;  %v402_v33 = vld [vmem:[%s1583_s7 + $0x210] sm:$0xff] }
  0x29   : > { %401 = vst [vmem:[%s1588_s8 + $0x100] sm:$0xff] %v400_v32  ;;  %v404_v34 = vld [vmem:[%s1583_s7 + $0x220] sm:$0xff]  ;;  %v406_v35 = vld [vmem:[%s1583_s7 + $0x230] sm:$0xff]  ;;  %403 = vst [vmem:[%s1588_s8 + $0x108] sm:$0xff] %v402_v33 }
  0x2a   : > { %405 = vst [vmem:[%s1588_s8 + $0x110] sm:$0xff] %v404_v34  ;;  %407 = vst [vmem:[%s1588_s8 + $0x118] sm:$0xff] %v406_v35  ;;  %v408_v36 = vld [vmem:[%s1583_s7 + $0x240] sm:$0xff]  ;;  %v410_v37 = vld [vmem:[%s1583_s7 + $0x250] sm:$0xff] }
  0x2b   : > { %v412_v38 = vld [vmem:[%s1583_s7 + $0x260] sm:$0xff]  ;;  %409 = vst [vmem:[%s1588_s8 + $0x120] sm:$0xff] %v408_v36  ;;  %411 = vst [vmem:[%s1588_s8 + $0x128] sm:$0xff] %v410_v37  ;;  %v414_v39 = vld [vmem:[%s1583_s7 + $0x270] sm:$0xff] }
  0x2c   : > { %413 = vst [vmem:[%s1588_s8 + $0x130] sm:$0xff] %v412_v38  ;;  %v416_v40 = vld [vmem:[%s1583_s7 + $0x280] sm:$0xff]  ;;  %v418_v41 = vld [vmem:[%s1583_s7 + $0x290] sm:$0xff]  ;;  %415 = vst [vmem:[%s1588_s8 + $0x138] sm:$0xff] %v414_v39 }
  0x2d   : > { %417 = vst [vmem:[%s1588_s8 + $0x140] sm:$0xff] %v416_v40  ;;  %419 = vst [vmem:[%s1588_s8 + $0x148] sm:$0xff] %v418_v41  ;;  %v420_v42 = vld [vmem:[%s1583_s7 + $0x2a0] sm:$0xff]  ;;  %v422_v43 = vld [vmem:[%s1583_s7 + $0x2b0] sm:$0xff] }
  0x2e   : > { %v424_v44 = vld [vmem:[%s1583_s7 + $0x2c0] sm:$0xff]  ;;  %421 = vst [vmem:[%s1588_s8 + $0x150] sm:$0xff] %v420_v42  ;;  %423 = vst [vmem:[%s1588_s8 + $0x158] sm:$0xff] %v422_v43  ;;  %v426_v45 = vld [vmem:[%s1583_s7 + $0x2d0] sm:$0xff] }
  0x2f   : > { %425 = vst [vmem:[%s1588_s8 + $0x160] sm:$0xff] %v424_v44  ;;  %v428_v46 = vld [vmem:[%s1583_s7 + $0x2e0] sm:$0xff]  ;;  %v430_v47 = vld [vmem:[%s1583_s7 + $0x2f0] sm:$0xff]  ;;  %427 = vst [vmem:[%s1588_s8 + $0x168] sm:$0xff] %v426_v45 }
  0x30   : > { %429 = vst [vmem:[%s1588_s8 + $0x170] sm:$0xff] %v428_v46  ;;  %431 = vst [vmem:[%s1588_s8 + $0x178] sm:$0xff] %v430_v47  ;;  %v432_v48 = vld [vmem:[%s1583_s7 + $0x300] sm:$0xff]  ;;  %v434_v49 = vld [vmem:[%s1583_s7 + $0x310] sm:$0xff] }
  0x31   : > { %v436_v50 = vld [vmem:[%s1583_s7 + $0x320] sm:$0xff]  ;;  %433 = vst [vmem:[%s1588_s8 + $0x180] sm:$0xff] %v432_v48  ;;  %435 = vst [vmem:[%s1588_s8 + $0x188] sm:$0xff] %v434_v49  ;;  %v438_v51 = vld [vmem:[%s1583_s7 + $0x330] sm:$0xff] }
  0x32   : > { %437 = vst [vmem:[%s1588_s8 + $0x190] sm:$0xff] %v436_v50  ;;  %v440_v52 = vld [vmem:[%s1583_s7 + $0x340] sm:$0xff]  ;;  %v442_v53 = vld [vmem:[%s1583_s7 + $0x350] sm:$0xff]  ;;  %439 = vst [vmem:[%s1588_s8 + $0x198] sm:$0xff] %v438_v51 }
  0x33   : > { %441 = vst [vmem:[%s1588_s8 + $0x1a0] sm:$0xff] %v440_v52  ;;  %443 = vst [vmem:[%s1588_s8 + $0x1a8] sm:$0xff] %v442_v53  ;;  %v444_v54 = vld [vmem:[%s1583_s7 + $0x360] sm:$0xff]  ;;  %v446_v55 = vld [vmem:[%s1583_s7 + $0x370] sm:$0xff] }
  0x34   : > { %v448_v56 = vld [vmem:[%s1583_s7 + $0x380] sm:$0xff]  ;;  %445 = vst [vmem:[%s1588_s8 + $0x1b0] sm:$0xff] %v444_v54  ;;  %447 = vst [vmem:[%s1588_s8 + $0x1b8] sm:$0xff] %v446_v55  ;;  %v450_v57 = vld [vmem:[%s1583_s7 + $0x390] sm:$0xff] }
  0x35   : > { %449 = vst [vmem:[%s1588_s8 + $0x1c0] sm:$0xff] %v448_v56  ;;  %v452_v58 = vld [vmem:[%s1583_s7 + $0x3a0] sm:$0xff]  ;;  %v454_v59 = vld [vmem:[%s1583_s7 + $0x3b0] sm:$0xff]  ;;  %451 = vst [vmem:[%s1588_s8 + $0x1c8] sm:$0xff] %v450_v57 }
  0x36   : > { %453 = vst [vmem:[%s1588_s8 + $0x1d0] sm:$0xff] %v452_v58  ;;  %455 = vst [vmem:[%s1588_s8 + $0x1d8] sm:$0xff] %v454_v59  ;;  %v456_v60 = vld [vmem:[%s1583_s7 + $0x3c0] sm:$0xff]  ;;  %v458_v61 = vld [vmem:[%s1583_s7 + $0x3d0] sm:$0xff] }
  0x37   : > { %v460_v62 = vld [vmem:[%s1583_s7 + $0x3e0] sm:$0xff]  ;;  %457 = vst [vmem:[%s1588_s8 + $0x1e0] sm:$0xff] %v456_v60  ;;  %459 = vst [vmem:[%s1588_s8 + $0x1e8] sm:$0xff] %v458_v61  ;;  %v462_v63 = vld [vmem:[%s1583_s7 + $0x3f0] sm:$0xff] }
  0x38   : > { %461 = vst [vmem:[%s1588_s8 + $0x1f0] sm:$0xff] %v460_v62  ;;  %463 = vst [vmem:[%s1588_s8 + $0x1f8] sm:$0xff] %v462_v63 }
  0x39 PF: > { %p1207_p7 = scmp.ge.s32.totalorder %s1500_s18, 1  ;;  %p476_p8 = scmp.lt.s32.totalorder %s1500_s18, 5 }
  0x3b   : > { %p477_p9 = pnand %p1207_p7, %p476_p8 }
  0x3c   : > { %s483_s9 = sand.u32 (!%p477_p9), 1, %s1476_s12   ;;  %s1209_s10 = sshll.u32 (!%p477_p9), %s1484_s14, 2 }
  0x3d   : > { %480 = sbr.rel (%p477_p9) target bundleno = 376 (0x178), region = 66  ;;  %s1208_s11 = sshll.u32 (!%p477_p9), %s483_s9, 9 }
  0x3e   : > { %p526_p10 = scmp.lt.s32.totalorder (!%p477_p9), %s1209_s10, 7  ;;  %s1211_s21 = sshll.u32 (!%p477_p9), %s1488_s15, 1 }
  0x3f   : > { %p536_p11 = scmp.lt.s32.totalorder (!%p477_p9), %s1211_s21, 3  ;;  %s1737_s5 = scalar_lea.vmem (!%p477_p9), [#allocation3], %s1208_s11 }
  0x40   : > { %p1214_p12 = scmp.ne.s32.totalorder (!%p477_p9), %s1484_s14, 0 }
  0x44   : > { %s1851_s10 = smov (!%p526_p10, %s1209_s10), 7  ;;  %s1853_s21 = smov (!%p536_p11, %s1211_s21), 3 }
  0x45   : > { %s1210_s22 = sshll.u32 %s1851_s10, 2  ;;  %s538_s12 = scalar_lea.vmem %s1836_s2, %s1853_s21  ;;  %v1502_v0 = vmov (!%p1214_p12), 0.0  }
  0x46   : > { %s1723_s26 = scalar_lea.vmem %s1834_s0, %s1210_s22  ;;  %s1213_s29 = sshll.u32 %s1853_s21, 2  ;;  %554 = vst [vmem:[#allocation2] sm:$0xff] (!%p1214_p12), %v1502_v0  ;;  %555 = vst [vmem:[#allocation2 + $0x8] sm:$0xff] (!%p1214_p12), %v1502_v0 }
  0x47   : > { %s1735_s15 = scalar_lea.vmem %s1837_s3, %s1213_s29  ;;  %553 = sbr.rel (%p1214_p12) target bundleno = 78 (0x4e), region = 74 }
  0x4e PF: > { %v1346_v1 = vld [vmem:[%s1737_s5 + $0x4] ss:$8 sps:$4 sm:$0xff]   ;;  %v1350_v3 = vld [vmem:[%s1737_s5] ss:$8 sps:$4 sm:$0xff]   ;;  %v1352_v5 = vld [vmem:[%s1737_s5 + $0x14] ss:$8 sps:$4 sm:$0xff]  }
  0x4f   : > { %v1348_v2 = vld [vmem:[%s1737_s5 + $0x104] ss:$8 sps:$4 sm:$0xff]   ;;  %958 = vmatprep.subr.bf16.mxu0 %v1346_v1  ;;  %v1351_v4 = vld [vmem:[%s1737_s5 + $0x100] ss:$8 sps:$4 sm:$0xff]   ;;  %v1354_v6 = vld [vmem:[%s1737_s5 + $0x114] ss:$8 sps:$4 sm:$0xff]  }
  0x50   : > { %999 = vmatprep.subr.bf16.mxu1 %v1348_v2  ;;  %959 = vmatpush1.bf16.msra.mxu0 %v1350_v3  ;;  %v1356_v7 = vld [vmem:[%s1737_s5 + $0x10] ss:$8 sps:$4 sm:$0xff]   ;;  %v1358_v9 = vld [vmem:[%s1737_s5 + $0x24] ss:$8 sps:$4 sm:$0xff]   ;;  %v1362_v11 = vld [vmem:[%s1737_s5 + $0x20] ss:$8 sps:$4 sm:$0xff]  }
  0x51   : > { %1000 = vmatpush1.bf16.msra.mxu1 %v1351_v4  ;;  %960 = vmatprep.subr.bf16.mxu0 %v1352_v5  ;;  %v1357_v8 = vld [vmem:[%s1737_s5 + $0x110] ss:$8 sps:$4 sm:$0xff]   ;;  %v1360_v10 = vld [vmem:[%s1737_s5 + $0x124] ss:$8 sps:$4 sm:$0xff]   ;;  %v1363_v12 = vld [vmem:[%s1737_s5 + $0x120] ss:$8 sps:$4 sm:$0xff]  }
  0x52   : > { %1001 = vmatprep.subr.bf16.mxu1 %v1354_v6  ;;  %v1364_v13 = vld [vmem:[%s1737_s5 + $0x34] ss:$8 sps:$4 sm:$0xff]   ;;  %v1368_v15 = vld [vmem:[%s1737_s5 + $0x30] ss:$8 sps:$4 sm:$0xff]   ;;  %v1370_v17 = vld [vmem:[%s1737_s5 + $0x44] ss:$8 sps:$4 sm:$0xff]  }
  0x53   : > { %v1366_v14 = vld [vmem:[%s1737_s5 + $0x134] ss:$8 sps:$4 sm:$0xff]   ;;  %v1369_v16 = vld [vmem:[%s1737_s5 + $0x130] ss:$8 sps:$4 sm:$0xff]   ;;  %v1372_v18 = vld [vmem:[%s1737_s5 + $0x144] ss:$8 sps:$4 sm:$0xff]  }
  0x54   : > { %961 = vmatpush1.bf16.msra.mxu0 %v1356_v7  ;;  %v1374_v19 = vld [vmem:[%s1737_s5 + $0x40] ss:$8 sps:$4 sm:$0xff]   ;;  %v1376_v21 = vld [vmem:[%s1737_s5 + $0x54] ss:$8 sps:$4 sm:$0xff]   ;;  %v1380_v23 = vld [vmem:[%s1737_s5 + $0x50] ss:$8 sps:$4 sm:$0xff]  }
  0x55   : > { %1002 = vmatpush1.bf16.msra.mxu1 %v1357_v8  ;;  %962 = vmatprep.subr.bf16.mxu0 %v1358_v9  ;;  %v1375_v20 = vld [vmem:[%s1737_s5 + $0x140] ss:$8 sps:$4 sm:$0xff]   ;;  %v1378_v22 = vld [vmem:[%s1737_s5 + $0x154] ss:$8 sps:$4 sm:$0xff]   ;;  %v1381_v24 = vld [vmem:[%s1737_s5 + $0x150] ss:$8 sps:$4 sm:$0xff]  }
  0x56   : > { %1003 = vmatprep.subr.bf16.mxu1 %v1360_v10  ;;  %v1382_v25 = vld [vmem:[%s1737_s5 + $0x64] ss:$8 sps:$4 sm:$0xff]   ;;  %v1386_v27 = vld [vmem:[%s1737_s5 + $0x60] ss:$8 sps:$4 sm:$0xff]   ;;  %v1388_v29 = vld [vmem:[%s1737_s5 + $0x74] ss:$8 sps:$4 sm:$0xff]  }
  0x57   : > { %v1384_v26 = vld [vmem:[%s1737_s5 + $0x164] ss:$8 sps:$4 sm:$0xff]   ;;  %v1387_v28 = vld [vmem:[%s1737_s5 + $0x160] ss:$8 sps:$4 sm:$0xff]   ;;  %v1390_v30 = vld [vmem:[%s1737_s5 + $0x174] ss:$8 sps:$4 sm:$0xff]  }
  0x58   : > { %963 = vmatpush1.bf16.msra.mxu0 %v1362_v11  ;;  %v1392_v31 = vld [vmem:[%s1737_s5 + $0x70] ss:$8 sps:$4 sm:$0xff]   ;;  %v1394_v33 = vld [vmem:[%s1737_s5 + $0x84] ss:$8 sps:$4 sm:$0xff]   ;;  %v1398_v35 = vld [vmem:[%s1737_s5 + $0x80] ss:$8 sps:$4 sm:$0xff]  }
  0x59   : > { %1004 = vmatpush1.bf16.msra.mxu1 %v1363_v12  ;;  %964 = vmatprep.subr.bf16.mxu0 %v1364_v13  ;;  %v1393_v32 = vld [vmem:[%s1737_s5 + $0x170] ss:$8 sps:$4 sm:$0xff]   ;;  %v1396_v34 = vld [vmem:[%s1737_s5 + $0x184] ss:$8 sps:$4 sm:$0xff]   ;;  %v1399_v36 = vld [vmem:[%s1737_s5 + $0x180] ss:$8 sps:$4 sm:$0xff]  }
  0x5a   : > { %1005 = vmatprep.subr.bf16.mxu1 %v1366_v14  ;;  %v1400_v37 = vld [vmem:[%s1737_s5 + $0x94] ss:$8 sps:$4 sm:$0xff]   ;;  %v1404_v39 = vld [vmem:[%s1737_s5 + $0x90] ss:$8 sps:$4 sm:$0xff]   ;;  %v1406_v41 = vld [vmem:[%s1737_s5 + $0xa4] ss:$8 sps:$4 sm:$0xff]  }
  0x5b   : > { %v1402_v38 = vld [vmem:[%s1737_s5 + $0x194] ss:$8 sps:$4 sm:$0xff]   ;;  %v1405_v40 = vld [vmem:[%s1737_s5 + $0x190] ss:$8 sps:$4 sm:$0xff]   ;;  %v1408_v42 = vld [vmem:[%s1737_s5 + $0x1a4] ss:$8 sps:$4 sm:$0xff]  }
  0x5c   : > { %965 = vmatpush1.bf16.msra.mxu0 %v1368_v15  ;;  %v1410_v43 = vld [vmem:[%s1737_s5 + $0xa0] ss:$8 sps:$4 sm:$0xff]   ;;  %v1412_v45 = vld [vmem:[%s1737_s5 + $0xb4] ss:$8 sps:$4 sm:$0xff]   ;;  %v1416_v50 = vld [vmem:[%s1737_s5 + $0xb0] ss:$8 sps:$4 sm:$0xff]  }
  0x5d   : > { %1006 = vmatpush1.bf16.msra.mxu1 %v1369_v16  ;;  %966 = vmatprep.subr.bf16.mxu0 %v1370_v17  ;;  %v1411_v44 = vld [vmem:[%s1737_s5 + $0x1a0] ss:$8 sps:$4 sm:$0xff]   ;;  %v1414_v46 = vld [vmem:[%s1737_s5 + $0x1b4] ss:$8 sps:$4 sm:$0xff]   ;;  %v1417_v51 = vld [vmem:[%s1737_s5 + $0x1b0] ss:$8 sps:$4 sm:$0xff]  }
  0x5e   : > { %1007 = vmatprep.subr.bf16.mxu1 %v1372_v18  ;;  %v558_v47 = vld [vmem:[%s1723_s26] sm:$0xff]  ;;  %v559_v49 = vld [vmem:[%s1723_s26 + $0x8] sm:$0xff]  ;;  %v1418_v53 = vld [vmem:[%s1737_s5 + $0xc4] ss:$8 sps:$4 sm:$0xff]   ;;  %p1283_p13 = scmp.ne.s32.totalorder %s1484_s14, 1 }
  0x5f   : > { %v1216_v48 = vcombine.high %v558_v47, %v558_v47  ;;  %v1218_v52 = vcombine.high %v559_v49, %v559_v49  ;;  %v1420_v54 = vld [vmem:[%s1737_s5 + $0x1c4] ss:$8 sps:$4 sm:$0xff]   ;;  %v1422_v55 = vld [vmem:[%s1737_s5 + $0xc0] ss:$8 sps:$4 sm:$0xff]   ;;  %v1424_v57 = vld [vmem:[%s1737_s5 + $0xd4] ss:$8 sps:$4 sm:$0xff]   ;;  %v1215_v5 = vcombine.low %v558_v47, %v558_v47  ;;  %v1217_v6 = vcombine.low %v559_v49, %v559_v49 }
  0x60   : > { %967 = vmatpush1.bf16.msra.mxu0 %v1374_v19  ;;  %v1423_v56 = vld [vmem:[%s1737_s5 + $0x1c0] ss:$8 sps:$4 sm:$0xff]   ;;  %v1426_v58 = vld [vmem:[%s1737_s5 + $0x1d4] ss:$8 sps:$4 sm:$0xff]   ;;  %v1428_v59 = vld [vmem:[%s1737_s5 + $0xd0] ss:$8 sps:$4 sm:$0xff]  }
  0x61   : > { %1008 = vmatpush1.bf16.msra.mxu1 %v1375_v20  ;;  %968 = vmatprep.subr.bf16.mxu0 %v1376_v21  ;;  %v1429_v60 = vld [vmem:[%s1737_s5 + $0x1d0] ss:$8 sps:$4 sm:$0xff]   ;;  %v1430_v61 = vld [vmem:[%s1737_s5 + $0xe4] ss:$8 sps:$4 sm:$0xff]   ;;  %v1434_v63 = vld [vmem:[%s1737_s5 + $0xe0] ss:$8 sps:$4 sm:$0xff]   ;;  %v1052_v21 = vlaneseq (!%p1283_p13) }
  0x62   : > { %1009 = vmatprep.subr.bf16.mxu1 %v1378_v22  ;;  %990 = vmatprep.mubr.bf16.mxu0 %v1216_v48  ;;  %v1432_v62 = vld [vmem:[%s1737_s5 + $0x1e4] ss:$8 sps:$4 sm:$0xff]   ;;  %v1435_v0 = vld [vmem:[%s1737_s5 + $0x1e0] ss:$8 sps:$4 sm:$0xff]   ;;  %v1436_v1 = vld [vmem:[%s1737_s5 + $0xf4] ss:$8 sps:$4 sm:$0xff]  }
  0x63   : > { %1031 = vmatprep.mubr.bf16.mxu1 %v1218_v52  ;;  %v1438_v2 = vld [vmem:[%s1737_s5 + $0x1f4] ss:$8 sps:$4 sm:$0xff]   ;;  %v1440_v3 = vld [vmem:[%s1737_s5 + $0xf0] ss:$8 sps:$4 sm:$0xff]   ;;  %v1053_v22 = vshrl.u32 (!%p1283_p13), %v1052_v21, 7 }
  0x64   : > { %969 = vmatpush1.bf16.msra.mxu0 %v1380_v23  ;;  %v1441_v4 = vld [vmem:[%s1737_s5 + $0x1f0] ss:$8 sps:$4 sm:$0xff]  }
  0x65   : > { %1010 = vmatpush1.bf16.msra.mxu1 %v1381_v24  ;;  %970 = vmatprep.subr.bf16.mxu0 %v1382_v25  ;;  %v556_v8 = vld [vmem:[#allocation2] sm:$0xff]  ;;  %v557_v12 = vld [vmem:[#allocation2 + $0x8] sm:$0xff]  ;;  %v1054_v24 = vsub.s32 (!%p1283_p13), 0, %v1053_v22  ;;  %v1058_v25 = vsub.s32 (!%p1283_p13), 1, %v1053_v22 }
  0x66   : > { %1011 = vmatprep.subr.bf16.mxu1 %v1384_v26  ;;  %v1050_v23 = vld [vmem:[%s538_s12] sm:$0x3] (!%p1283_p13) }
  0x68   : > { %971 = vmatpush1.bf16.msra.mxu0 %v1386_v27 }
  0x69   : > { %1012 = vmatpush1.bf16.msra.mxu1 %v1387_v28  ;;  %972 = vmatprep.subr.bf16.mxu0 %v1388_v29  ;;  %v1055_v28 = vrot.slane (!%p1283_p13), %v1050_v23, %v1054_v24  ;;  %v1059_v29 = vrot.slane (!%p1283_p13), %v1050_v23, %v1058_v25 }
  0x6a   : > { %1013 = vmatprep.subr.bf16.mxu1 %v1390_v30 }
  0x6c   : > { %973 = vmatpush1.bf16.msra.mxu0 %v1392_v31 }
  0x6d   : > { %1014 = vmatpush1.bf16.msra.mxu1 %v1393_v32  ;;  %974 = vmatprep.subr.bf16.mxu0 %v1394_v33 }
  0x6e   : > { %1015 = vmatprep.subr.bf16.mxu1 %v1396_v34 }
  0x70   : > { %975 = vmatpush1.bf16.msra.mxu0 %v1398_v35 }
  0x71   : > { %1016 = vmatpush1.bf16.msra.mxu1 %v1399_v36  ;;  %976 = vmatprep.subr.bf16.mxu0 %v1400_v37 }
  0x72   : > { %1017 = vmatprep.subr.bf16.mxu1 %v1402_v38 }
  0x74   : > { %977 = vmatpush1.bf16.msra.mxu0 %v1404_v39 }
  0x75   : > { %1018 = vmatpush1.bf16.msra.mxu1 %v1405_v40  ;;  %978 = vmatprep.subr.bf16.mxu0 %v1406_v41 }
  0x76   : > { %1019 = vmatprep.subr.bf16.mxu1 %v1408_v42 }
  0x78   : > { %979 = vmatpush1.bf16.msra.mxu0 %v1410_v43 }
  0x79   : > { %1020 = vmatpush1.bf16.msra.mxu1 %v1411_v44  ;;  %980 = vmatprep.subr.bf16.mxu0 %v1412_v45 }
  0x7a   : > { %1021 = vmatprep.subr.bf16.mxu1 %v1414_v46 }
  0x7c   : > { %981 = vmatpush1.bf16.msra.mxu0 %v1416_v50 }
  0x7d   : > { %1022 = vmatpush1.bf16.msra.mxu1 %v1417_v51  ;;  %982 = vmatprep.subr.bf16.mxu0 %v1418_v53 }
  0x7e   : > { %1023 = vmatprep.subr.bf16.mxu1 %v1420_v54 }
  0x80   : > { %983 = vmatpush1.bf16.msra.mxu0 %v1422_v55 }
  0x81   : > { %1024 = vmatpush1.bf16.msra.mxu1 %v1423_v56  ;;  %984 = vmatprep.subr.bf16.mxu0 %v1424_v57 }
  0x82   : > { %1025 = vmatprep.subr.bf16.mxu1 %v1426_v58 }
  0x84   : > { %985 = vmatpush1.bf16.msra.mxu0 %v1428_v59 }
  0x85   : > { %1026 = vmatpush1.bf16.msra.mxu1 %v1429_v60  ;;  %986 = vmatprep.subr.bf16.mxu0 %v1430_v61 }
  0x86   : > { %1027 = vmatprep.subr.bf16.mxu1 %v1432_v62 }
  0x88   : > { %987 = vmatpush1.bf16.msra.mxu0 %v1434_v63 }
  0x89   : > { %1028 = vmatpush1.bf16.msra.mxu1 %v1435_v0  ;;  %988 = vmatprep.subr.bf16.mxu0 %v1436_v1 }
  0x8a   : > { %1029 = vmatprep.subr.bf16.mxu1 %v1438_v2 }
  0x8c   : > { %989 = vmatpush1.bf16.msra.mxu0 %v1440_v3 }
  0x8d   : > { %1030 = vmatpush1.bf16.msra.mxu1 %v1441_v4 }
  0x8f   : > { %991 = vmatmul.mubr.bf16.vlgmr.msra.gmra.mrb[0].mxu0 %v1215_v5 }
  0x90   : > { %1032 = vmatmul.mubr.bf16.vlgmr.msra.gmra.mrb[0].mxu1 %v1217_v6 }
 0x162   : > { %v992_v7 = vpop.f32.mrb[0].mxu0 }
 0x163   : > { %v1033_v9 = vpop.f32.mrb[0].mxu1  ;;  %v994_v11 = vpop.f32.mrb[1].mxu0  ;;  %1047 = sbr.rel (%p1283_p13) target bundleno = 376 (0x178), region = 78 }
 0x164   : > { %v1034_v10 = vadd.f32 %v1033_v9, %v992_v7  ;;  %v1035_v13 = vpop.f32.mrb[1].mxu1  ;;  %v996_v15 = vpop.f32.mrb[2].mxu0 }
 0x165   : > { %v1036_v14 = vadd.f32 %v1035_v13, %v994_v11  ;;  %v1037_v16 = vpop.f32.mrb[2].mxu1  ;;  %v997_v18 = vpop.f32.mrb[3].mxu0 }
 0x166   : > { %v1040_v17 = vadd.f32 %v1034_v10, %v556_v8  ;;  %v1038_v19 = vpop.f32.mrb[3].mxu1 }
 0x167   : > { %v1041_v20 = vadd.f32 %v1036_v14, %v557_v12 }
 0x168   : > { %1042 = vst [vmem:[#allocation2] sm:$0xff] %v1040_v17 }
 0x169   : > { %1043 = vst [vmem:[#allocation2 + $0x8] sm:$0xff] %v1041_v20 }
 0x16f   : > { %v1048_v26 = vld [vmem:[#allocation2] sm:$0xff] }
 0x170   : > { %v1049_v27 = vld [vmem:[#allocation2 + $0x8] sm:$0xff]  ;;  %v1062_v30 = vadd.f32 %v1055_v28, %v1048_v26 }
 0x171   : > { %v1063_v31 = vadd.f32 %v1059_v29, %v1049_v27 }
 0x172   : > { %v1064_v32 = vmax.f32 %v1062_v30, 0.0 }
 0x173   : > { %v1065_v33 = vmax.f32 %v1063_v31, 0.0 }
 0x175   : > { %v1288_v34 = vpack.c.bf16 %v1065_v33, %v1064_v32 }
 0x177   : > { %1074 = vst [vmem:[%s1735_s15] sm:$0xff] %v1288_v34 }
 0x178 PF: > { %s13_s18 = sadd.s32 1, %s1500_s18   ;;  %s1838_s12 = smov %s1480_s13 }
 0x179   : > { %p10_p0 = scmp.ge.s32.totalorder %s13_s18, 6   ;;  %s1839_s13 = smov %s1574_s25 }
 0x17a   : > { %s1840_s14 = smov %s1492_s16  ;;  %s1841_s15 = smov %s1496_s17 }
 0x17b   : > { %s1842_s16 = smov %s1845_s19  ;;  %s1843_s17 = smov %s1849_s20 }
 0x17c   :  { %12 = sbr.rel (!%p10_p0) target bundleno = 4 (0x4), region = 119 }

// kernel: resnet_forward.33
= control target key start
LH: loop header
LB: loop body
LE: loop exit
PB: predicated region body
PF: predicated region fallthrough
CT: control target
= control target key end

     0   :  { %s1523_s12 = smov 0   ;;  %s1525_s13 = smov 0   ;;  %s1834_s0 = inlined_call_operand.vmem [shape: bf16[8,4608], index: 0, kind: input, shape index: {}]   ;;  %s1835_s1 = inlined_call_operand.vmem [shape: bf16[4608,512], index: 1, kind: input, shape index: {}]   ;;  %s1836_s2 = inlined_call_operand.vmem [shape: f32[1,512], index: 2, kind: input, shape index: {}]   ;;  %s1837_s3 = inlined_call_operand.vmem [shape: bf16[8,512], index: 3, kind: output, shape index: {}]  }
   0x1   :  { %s1527_s14 = smov 0   ;;  %s1529_s15 = smov 0  }
   0x2   :  { %s1531_s16 = smov 0   ;;  %s1533_s17 = smov 0  }
   0x3   :  { %s1535_s18 = smov 0  }
   0x4 LB: > { %s25_s19 = sadd.s32 1, %s1492_s16  ;;  %s28_s20 = sadd.s32 1, %s1496_s17  ;;  %s1500_s18 = sphi %s1535_s18, %s13_s18   ;;  %s1496_s17 = sphi %s1533_s17, %s1843_s17   ;;  %s1492_s16 = sphi %s1531_s16, %s1842_s16   ;;  %s1488_s15 = sphi %s1529_s15, %s1841_s15   ;;  %s1484_s14 = sphi %s1527_s14, %s1840_s14   ;;  %s1480_s13 = sphi %s1525_s13, %s1839_s13   ;;  %s1476_s12 = sphi %s1523_s12, %s1838_s12  }
   0x5   : > { %p26_p0 = scmp.ge.s32.totalorder %s25_s19, 9  ;;  %p76_p1 = scmp.ne.s32.totalorder %s1480_s13, %s1476_s12 }
   0x6   : > { %p77_p2 = scmp.eq.s32.totalorder %s1500_s18, 0  ;;  %s69_s24 = sadd.s32 1, %s1480_s13 }
   0x7   : > { %s1845_s19 = smov (%p26_p0, %s25_s19), 0  ;;  %s1847_s20 = smov (!%p26_p0, %s28_s20), %s1496_s17 }
   0x8   : > { %p78_p3 = por %p77_p2, %p76_p1  ;;  %p30_p4 = scmp.ge.s32.totalorder %s1847_s20, 2 }
   0x9   : > { %s64_s21 = ssub.s32 %s1492_s16, %s1845_s19  ;;  %p1201_p6 = scmp.ge.s32.totalorder %s1500_s18, 18 }
   0xa   : > { %s1849_s20 = smov (%p30_p4, %s1847_s20), 0 }
   0xb   : > { %s65_s22 = ssub.s32 %s1496_s17, %s1849_s20  ;;  %156 = sbr.rel (%p1201_p6) target bundleno = 57 (0x39), region = 16 }
   0xc   : > { %s66_s23 = sor.u32 %s65_s22, %s64_s21 }
   0xd   : > { %p67_p5 = scmp.eq.s32.totalorder %s66_s23, 0 }
   0xf   : > { %s1574_s25 = scalar_select %p67_p5, %s1480_s13, %s69_s24  }
  0x12   : > { %172 = sbr.rel (!%p78_p3) target bundleno = 57 (0x39), region = 24  ;;  %s174_s26 = sand.u32 (%p78_p3), 1, %s1480_s13  }
  0x13   : > { %s1204_s27 = sshll.u32 (%p78_p3), %s1496_s17, 1  ;;  %s1202_s28 = sshll.u32 (%p78_p3), %s174_s26, 9 }
  0x14   : > { %s1287_s29 = sshll.u32 (%p78_p3), %s1492_s16, 8  ;;  %s1588_s8 = scalar_lea.vmem (%p78_p3), [#allocation3], %s1202_s28 }
  0x15   : > { %s180_s30 = sadd.s32 (%p78_p3), %s1287_s29, %s1204_s27 }
  0x16   : > { %s1206_s4 = sshll.u32 (%p78_p3), %s180_s30, 2 }
  0x17   : > { %s1583_s7 = scalar_lea.vmem (%p78_p3), %s1835_s1, %s1206_s4 }
  0x18   : > { %v336_v0 = vld [vmem:[%s1583_s7] sm:$0xff] (%p78_p3)  ;;  %v338_v1 = vld [vmem:[%s1583_s7 + $0x10] sm:$0xff] (%p78_p3) }
  0x19   : > { %v340_v2 = vld [vmem:[%s1583_s7 + $0x20] sm:$0xff]  ;;  %337 = vst [vmem:[%s1588_s8] sm:$0xff] %v336_v0  ;;  %339 = vst [vmem:[%s1588_s8 + $0x8] sm:$0xff] %v338_v1  ;;  %v342_v3 = vld [vmem:[%s1583_s7 + $0x30] sm:$0xff] }
  0x1a   : > { %341 = vst [vmem:[%s1588_s8 + $0x10] sm:$0xff] %v340_v2  ;;  %v344_v4 = vld [vmem:[%s1583_s7 + $0x40] sm:$0xff]  ;;  %v346_v5 = vld [vmem:[%s1583_s7 + $0x50] sm:$0xff]  ;;  %343 = vst [vmem:[%s1588_s8 + $0x18] sm:$0xff] %v342_v3 }
  0x1b   : > { %345 = vst [vmem:[%s1588_s8 + $0x20] sm:$0xff] %v344_v4  ;;  %347 = vst [vmem:[%s1588_s8 + $0x28] sm:$0xff] %v346_v5  ;;  %v348_v6 = vld [vmem:[%s1583_s7 + $0x60] sm:$0xff]  ;;  %v350_v7 = vld [vmem:[%s1583_s7 + $0x70] sm:$0xff] }
  0x1c   : > { %v352_v8 = vld [vmem:[%s1583_s7 + $0x80] sm:$0xff]  ;;  %349 = vst [vmem:[%s1588_s8 + $0x30] sm:$0xff] %v348_v6  ;;  %351 = vst [vmem:[%s1588_s8 + $0x38] sm:$0xff] %v350_v7  ;;  %v354_v9 = vld [vmem:[%s1583_s7 + $0x90] sm:$0xff] }
  0x1d   : > { %353 = vst [vmem:[%s1588_s8 + $0x40] sm:$0xff] %v352_v8  ;;  %v356_v10 = vld [vmem:[%s1583_s7 + $0xa0] sm:$0xff]  ;;  %v358_v11 = vld [vmem:[%s1583_s7 + $0xb0] sm:$0xff]  ;;  %355 = vst [vmem:[%s1588_s8 + $0x48] sm:$0xff] %v354_v9 }
  0x1e   : > { %357 = vst [vmem:[%s1588_s8 + $0x50] sm:$0xff] %v356_v10  ;;  %359 = vst [vmem:[%s1588_s8 + $0x58] sm:$0xff] %v358_v11  ;;  %v360_v12 = vld [vmem:[%s1583_s7 + $0xc0] sm:$0xff]  ;;  %v362_v13 = vld [vmem:[%s1583_s7 + $0xd0] sm:$0xff] }
  0x1f   : > { %v364_v14 = vld [vmem:[%s1583_s7 + $0xe0] sm:$0xff]  ;;  %361 = vst [vmem:[%s1588_s8 + $0x60] sm:$0xff] %v360_v12  ;;  %363 = vst [vmem:[%s1588_s8 + $0x68] sm:$0xff] %v362_v13  ;;  %v366_v15 = vld [vmem:[%s1583_s7 + $0xf0] sm:$0xff] }
  0x20   : > { %365 = vst [vmem:[%s1588_s8 + $0x70] sm:$0xff] %v364_v14  ;;  %v368_v16 = vld [vmem:[%s1583_s7 + $0x100] sm:$0xff]  ;;  %v370_v17 = vld [vmem:[%s1583_s7 + $0x110] sm:$0xff]  ;;  %367 = vst [vmem:[%s1588_s8 + $0x78] sm:$0xff] %v366_v15 }
  0x21   : > { %369 = vst [vmem:[%s1588_s8 + $0x80] sm:$0xff] %v368_v16  ;;  %371 = vst [vmem:[%s1588_s8 + $0x88] sm:$0xff] %v370_v17  ;;  %v372_v18 = vld [vmem:[%s1583_s7 + $0x120] sm:$0xff]  ;;  %v374_v19 = vld [vmem:[%s1583_s7 + $0x130] sm:$0xff] }
  0x22   : > { %v376_v20 = vld [vmem:[%s1583_s7 + $0x140] sm:$0xff]  ;;  %373 = vst [vmem:[%s1588_s8 + $0x90] sm:$0xff] %v372_v18  ;;  %375 = vst [vmem:[%s1588_s8 + $0x98] sm:$0xff] %v374_v19  ;;  %v378_v21 = vld [vmem:[%s1583_s7 + $0x150] sm:$0xff] }
  0x23   : > { %377 = vst [vmem:[%s1588_s8 + $0xa0] sm:$0xff] %v376_v20  ;;  %v380_v22 = vld [vmem:[%s1583_s7 + $0x160] sm:$0xff]  ;;  %v382_v23 = vld [vmem:[%s1583_s7 + $0x170] sm:$0xff]  ;;  %379 = vst [vmem:[%s1588_s8 + $0xa8] sm:$0xff] %v378_v21 }
  0x24   : > { %381 = vst [vmem:[%s1588_s8 + $0xb0] sm:$0xff] %v380_v22  ;;  %383 = vst [vmem:[%s1588_s8 + $0xb8] sm:$0xff] %v382_v23  ;;  %v384_v24 = vld [vmem:[%s1583_s7 + $0x180] sm:$0xff]  ;;  %v386_v25 = vld [vmem:[%s1583_s7 + $0x190] sm:$0xff] }
  0x25   : > { %v388_v26 = vld [vmem:[%s1583_s7 + $0x1a0] sm:$0xff]  ;;  %385 = vst [vmem:[%s1588_s8 + $0xc0] sm:$0xff] %v384_v24  ;;  %387 = vst [vmem:[%s1588_s8 + $0xc8] sm:$0xff] %v386_v25  ;;  %v390_v27 = vld [vmem:[%s1583_s7 + $0x1b0] sm:$0xff] }
  0x26   : > { %389 = vst [vmem:[%s1588_s8 + $0xd0] sm:$0xff] %v388_v26  ;;  %v392_v28 = vld [vmem:[%s1583_s7 + $0x1c0] sm:$0xff]  ;;  %v394_v29 = vld [vmem:[%s1583_s7 + $0x1d0] sm:$0xff]  ;;  %391 = vst [vmem:[%s1588_s8 + $0xd8] sm:$0xff] %v390_v27 }
  0x27   : > { %393 = vst [vmem:[%s1588_s8 + $0xe0] sm:$0xff] %v392_v28  ;;  %395 = vst [vmem:[%s1588_s8 + $0xe8] sm:$0xff] %v394_v29  ;;  %v396_v30 = vld [vmem:[%s1583_s7 + $0x1e0] sm:$0xff]  ;;  %v398_v31 = vld [vmem:[%s1583_s7 + $0x1f0] sm:$0xff] }
  0x28   : > { %v400_v32 = vld [vmem:[%s1583_s7 + $0x200] sm:$0xff]  ;;  %397 = vst [vmem:[%s1588_s8 + $0xf0] sm:$0xff] %v396_v30  ;;  %399 = vst [vmem:[%s1588_s8 + $0xf8] sm:$0xff] %v398_v31  ;;  %v402_v33 = vld [vmem:[%s1583_s7 + $0x210] sm:$0xff] }
  0x29   : > { %401 = vst [vmem:[%s1588_s8 + $0x100] sm:$0xff] %v400_v32  ;;  %v404_v34 = vld [vmem:[%s1583_s7 + $0x220] sm:$0xff]  ;;  %v406_v35 = vld [vmem:[%s1583_s7 + $0x230] sm:$0xff]  ;;  %403 = vst [vmem:[%s1588_s8 + $0x108] sm:$0xff] %v402_v33 }
  0x2a   : > { %405 = vst [vmem:[%s1588_s8 + $0x110] sm:$0xff] %v404_v34  ;;  %407 = vst [vmem:[%s1588_s8 + $0x118] sm:$0xff] %v406_v35  ;;  %v408_v36 = vld [vmem:[%s1583_s7 + $0x240] sm:$0xff]  ;;  %v410_v37 = vld [vmem:[%s1583_s7 + $0x250] sm:$0xff] }
  0x2b   : > { %v412_v38 = vld [vmem:[%s1583_s7 + $0x260] sm:$0xff]  ;;  %409 = vst [vmem:[%s1588_s8 + $0x120] sm:$0xff] %v408_v36  ;;  %411 = vst [vmem:[%s1588_s8 + $0x128] sm:$0xff] %v410_v37  ;;  %v414_v39 = vld [vmem:[%s1583_s7 + $0x270] sm:$0xff] }
  0x2c   : > { %413 = vst [vmem:[%s1588_s8 + $0x130] sm:$0xff] %v412_v38  ;;  %v416_v40 = vld [vmem:[%s1583_s7 + $0x280] sm:$0xff]  ;;  %v418_v41 = vld [vmem:[%s1583_s7 + $0x290] sm:$0xff]  ;;  %415 = vst [vmem:[%s1588_s8 + $0x138] sm:$0xff] %v414_v39 }
  0x2d   : > { %417 = vst [vmem:[%s1588_s8 + $0x140] sm:$0xff] %v416_v40  ;;  %419 = vst [vmem:[%s1588_s8 + $0x148] sm:$0xff] %v418_v41  ;;  %v420_v42 = vld [vmem:[%s1583_s7 + $0x2a0] sm:$0xff]  ;;  %v422_v43 = vld [vmem:[%s1583_s7 + $0x2b0] sm:$0xff] }
  0x2e   : > { %v424_v44 = vld [vmem:[%s1583_s7 + $0x2c0] sm:$0xff]  ;;  %421 = vst [vmem:[%s1588_s8 + $0x150] sm:$0xff] %v420_v42  ;;  %423 = vst [vmem:[%s1588_s8 + $0x158] sm:$0xff] %v422_v43  ;;  %v426_v45 = vld [vmem:[%s1583_s7 + $0x2d0] sm:$0xff] }
  0x2f   : > { %425 = vst [vmem:[%s1588_s8 + $0x160] sm:$0xff] %v424_v44  ;;  %v428_v46 = vld [vmem:[%s1583_s7 + $0x2e0] sm:$0xff]  ;;  %v430_v47 = vld [vmem:[%s1583_s7 + $0x2f0] sm:$0xff]  ;;  %427 = vst [vmem:[%s1588_s8 + $0x168] sm:$0xff] %v426_v45 }
  0x30   : > { %429 = vst [vmem:[%s1588_s8 + $0x170] sm:$0xff] %v428_v46  ;;  %431 = vst [vmem:[%s1588_s8 + $0x178] sm:$0xff] %v430_v47  ;;  %v432_v48 = vld [vmem:[%s1583_s7 + $0x300] sm:$0xff]  ;;  %v434_v49 = vld [vmem:[%s1583_s7 + $0x310] sm:$0xff] }
  0x31   : > { %v436_v50 = vld [vmem:[%s1583_s7 + $0x320] sm:$0xff]  ;;  %433 = vst [vmem:[%s1588_s8 + $0x180] sm:$0xff] %v432_v48  ;;  %435 = vst [vmem:[%s1588_s8 + $0x188] sm:$0xff] %v434_v49  ;;  %v438_v51 = vld [vmem:[%s1583_s7 + $0x330] sm:$0xff] }
  0x32   : > { %437 = vst [vmem:[%s1588_s8 + $0x190] sm:$0xff] %v436_v50  ;;  %v440_v52 = vld [vmem:[%s1583_s7 + $0x340] sm:$0xff]  ;;  %v442_v53 = vld [vmem:[%s1583_s7 + $0x350] sm:$0xff]  ;;  %439 = vst [vmem:[%s1588_s8 + $0x198] sm:$0xff] %v438_v51 }
  0x33   : > { %441 = vst [vmem:[%s1588_s8 + $0x1a0] sm:$0xff] %v440_v52  ;;  %443 = vst [vmem:[%s1588_s8 + $0x1a8] sm:$0xff] %v442_v53  ;;  %v444_v54 = vld [vmem:[%s1583_s7 + $0x360] sm:$0xff]  ;;  %v446_v55 = vld [vmem:[%s1583_s7 + $0x370] sm:$0xff] }
  0x34   : > { %v448_v56 = vld [vmem:[%s1583_s7 + $0x380] sm:$0xff]  ;;  %445 = vst [vmem:[%s1588_s8 + $0x1b0] sm:$0xff] %v444_v54  ;;  %447 = vst [vmem:[%s1588_s8 + $0x1b8] sm:$0xff] %v446_v55  ;;  %v450_v57 = vld [vmem:[%s1583_s7 + $0x390] sm:$0xff] }
  0x35   : > { %449 = vst [vmem:[%s1588_s8 + $0x1c0] sm:$0xff] %v448_v56  ;;  %v452_v58 = vld [vmem:[%s1583_s7 + $0x3a0] sm:$0xff]  ;;  %v454_v59 = vld [vmem:[%s1583_s7 + $0x3b0] sm:$0xff]  ;;  %451 = vst [vmem:[%s1588_s8 + $0x1c8] sm:$0xff] %v450_v57 }
  0x36   : > { %453 = vst [vmem:[%s1588_s8 + $0x1d0] sm:$0xff] %v452_v58  ;;  %455 = vst [vmem:[%s1588_s8 + $0x1d8] sm:$0xff] %v454_v59  ;;  %v456_v60 = vld [vmem:[%s1583_s7 + $0x3c0] sm:$0xff]  ;;  %v458_v61 = vld [vmem:[%s1583_s7 + $0x3d0] sm:$0xff] }
  0x37   : > { %v460_v62 = vld [vmem:[%s1583_s7 + $0x3e0] sm:$0xff]  ;;  %457 = vst [vmem:[%s1588_s8 + $0x1e0] sm:$0xff] %v456_v60  ;;  %459 = vst [vmem:[%s1588_s8 + $0x1e8] sm:$0xff] %v458_v61  ;;  %v462_v63 = vld [vmem:[%s1583_s7 + $0x3f0] sm:$0xff] }
  0x38   : > { %461 = vst [vmem:[%s1588_s8 + $0x1f0] sm:$0xff] %v460_v62  ;;  %463 = vst [vmem:[%s1588_s8 + $0x1f8] sm:$0xff] %v462_v63 }
  0x39 PF: > { %p1207_p7 = scmp.ge.s32.totalorder %s1500_s18, 1  ;;  %p476_p8 = scmp.lt.s32.totalorder %s1500_s18, 19 }
  0x3b   : > { %p477_p9 = pnand %p1207_p7, %p476_p8 }
  0x3c   : > { %s483_s9 = sand.u32 (!%p477_p9), 1, %s1476_s12   ;;  %s1209_s10 = sshll.u32 (!%p477_p9), %s1484_s14, 2 }
  0x3d   : > { %480 = sbr.rel (%p477_p9) target bundleno = 376 (0x178), region = 66  ;;  %s1208_s11 = sshll.u32 (!%p477_p9), %s483_s9, 9 }
  0x3e   : > { %p526_p10 = scmp.lt.s32.totalorder (!%p477_p9), %s1209_s10, 35  ;;  %s1211_s21 = sshll.u32 (!%p477_p9), %s1488_s15, 1 }
  0x3f   : > { %p536_p11 = scmp.lt.s32.totalorder (!%p477_p9), %s1211_s21, 3  ;;  %s1737_s5 = scalar_lea.vmem (!%p477_p9), [#allocation3], %s1208_s11 }
  0x40   : > { %p1214_p12 = scmp.ne.s32.totalorder (!%p477_p9), %s1484_s14, 0 }
  0x44   : > { %s1851_s10 = smov (!%p526_p10, %s1209_s10), 35  ;;  %s1853_s21 = smov (!%p536_p11, %s1211_s21), 3 }
  0x45   : > { %s1210_s22 = sshll.u32 %s1851_s10, 2  ;;  %s538_s12 = scalar_lea.vmem %s1836_s2, %s1853_s21  ;;  %v1502_v0 = vmov (!%p1214_p12), 0.0  }
  0x46   : > { %s1723_s26 = scalar_lea.vmem %s1834_s0, %s1210_s22  ;;  %s1213_s29 = sshll.u32 %s1853_s21, 2  ;;  %554 = vst [vmem:[#allocation2] sm:$0xff] (!%p1214_p12), %v1502_v0  ;;  %555 = vst [vmem:[#allocation2 + $0x8] sm:$0xff] (!%p1214_p12), %v1502_v0 }
  0x47   : > { %s1735_s15 = scalar_lea.vmem %s1837_s3, %s1213_s29  ;;  %553 = sbr.rel (%p1214_p12) target bundleno = 78 (0x4e), region = 74 }
  0x4e PF: > { %v1346_v1 = vld [vmem:[%s1737_s5 + $0x4] ss:$8 sps:$4 sm:$0xff]   ;;  %v1350_v3 = vld [vmem:[%s1737_s5] ss:$8 sps:$4 sm:$0xff]   ;;  %v1352_v5 = vld [vmem:[%s1737_s5 + $0x14] ss:$8 sps:$4 sm:$0xff]  }
  0x4f   : > { %v1348_v2 = vld [vmem:[%s1737_s5 + $0x104] ss:$8 sps:$4 sm:$0xff]   ;;  %958 = vmatprep.subr.bf16.mxu0 %v1346_v1  ;;  %v1351_v4 = vld [vmem:[%s1737_s5 + $0x100] ss:$8 sps:$4 sm:$0xff]   ;;  %v1354_v6 = vld [vmem:[%s1737_s5 + $0x114] ss:$8 sps:$4 sm:$0xff]  }
  0x50   : > { %999 = vmatprep.subr.bf16.mxu1 %v1348_v2  ;;  %959 = vmatpush1.bf16.msra.mxu0 %v1350_v3  ;;  %v1356_v7 = vld [vmem:[%s1737_s5 + $0x10] ss:$8 sps:$4 sm:$0xff]   ;;  %v1358_v9 = vld [vmem:[%s1737_s5 + $0x24] ss:$8 sps:$4 sm:$0xff]   ;;  %v1362_v11 = vld [vmem:[%s1737_s5 + $0x20] ss:$8 sps:$4 sm:$0xff]  }
  0x51   : > { %1000 = vmatpush1.bf16.msra.mxu1 %v1351_v4  ;;  %960 = vmatprep.subr.bf16.mxu0 %v1352_v5  ;;  %v1357_v8 = vld [vmem:[%s1737_s5 + $0x110] ss:$8 sps:$4 sm:$0xff]   ;;  %v1360_v10 = vld [vmem:[%s1737_s5 + $0x124] ss:$8 sps:$4 sm:$0xff]   ;;  %v1363_v12 = vld [vmem:[%s1737_s5 + $0x120] ss:$8 sps:$4 sm:$0xff]  }
  0x52   : > { %1001 = vmatprep.subr.bf16.mxu1 %v1354_v6  ;;  %v1364_v13 = vld [vmem:[%s1737_s5 + $0x34] ss:$8 sps:$4 sm:$0xff]   ;;  %v1368_v15 = vld [vmem:[%s1737_s5 + $0x30] ss:$8 sps:$4 sm:$0xff]   ;;  %v1370_v17 = vld [vmem:[%s1737_s5 + $0x44] ss:$8 sps:$4 sm:$0xff]  }
  0x53   : > { %v1366_v14 = vld [vmem:[%s1737_s5 + $0x134] ss:$8 sps:$4 sm:$0xff]   ;;  %v1369_v16 = vld [vmem:[%s1737_s5 + $0x130] ss:$8 sps:$4 sm:$0xff]   ;;  %v1372_v18 = vld [vmem:[%s1737_s5 + $0x144] ss:$8 sps:$4 sm:$0xff]  }
  0x54   : > { %961 = vmatpush1.bf16.msra.mxu0 %v1356_v7  ;;  %v1374_v19 = vld [vmem:[%s1737_s5 + $0x40] ss:$8 sps:$4 sm:$0xff]   ;;  %v1376_v21 = vld [vmem:[%s1737_s5 + $0x54] ss:$8 sps:$4 sm:$0xff]   ;;  %v1380_v23 = vld [vmem:[%s1737_s5 + $0x50] ss:$8 sps:$4 sm:$0xff]  }
  0x55   : > { %1002 = vmatpush1.bf16.msra.mxu1 %v1357_v8  ;;  %962 = vmatprep.subr.bf16.mxu0 %v1358_v9  ;;  %v1375_v20 = vld [vmem:[%s1737_s5 + $0x140] ss:$8 sps:$4 sm:$0xff]   ;;  %v1378_v22 = vld [vmem:[%s1737_s5 + $0x154] ss:$8 sps:$4 sm:$0xff]   ;;  %v1381_v24 = vld [vmem:[%s1737_s5 + $0x150] ss:$8 sps:$4 sm:$0xff]  }
  0x56   : > { %1003 = vmatprep.subr.bf16.mxu1 %v1360_v10  ;;  %v1382_v25 = vld [vmem:[%s1737_s5 + $0x64] ss:$8 sps:$4 sm:$0xff]   ;;  %v1386_v27 = vld [vmem:[%s1737_s5 + $0x60] ss:$8 sps:$4 sm:$0xff]   ;;  %v1388_v29 = vld [vmem:[%s1737_s5 + $0x74] ss:$8 sps:$4 sm:$0xff]  }
  0x57   : > { %v1384_v26 = vld [vmem:[%s1737_s5 + $0x164] ss:$8 sps:$4 sm:$0xff]   ;;  %v1387_v28 = vld [vmem:[%s1737_s5 + $0x160] ss:$8 sps:$4 sm:$0xff]   ;;  %v1390_v30 = vld [vmem:[%s1737_s5 + $0x174] ss:$8 sps:$4 sm:$0xff]  }
  0x58   : > { %963 = vmatpush1.bf16.msra.mxu0 %v1362_v11  ;;  %v1392_v31 = vld [vmem:[%s1737_s5 + $0x70] ss:$8 sps:$4 sm:$0xff]   ;;  %v1394_v33 = vld [vmem:[%s1737_s5 + $0x84] ss:$8 sps:$4 sm:$0xff]   ;;  %v1398_v35 = vld [vmem:[%s1737_s5 + $0x80] ss:$8 sps:$4 sm:$0xff]  }
  0x59   : > { %1004 = vmatpush1.bf16.msra.mxu1 %v1363_v12  ;;  %964 = vmatprep.subr.bf16.mxu0 %v1364_v13  ;;  %v1393_v32 = vld [vmem:[%s1737_s5 + $0x170] ss:$8 sps:$4 sm:$0xff]   ;;  %v1396_v34 = vld [vmem:[%s1737_s5 + $0x184] ss:$8 sps:$4 sm:$0xff]   ;;  %v1399_v36 = vld [vmem:[%s1737_s5 + $0x180] ss:$8 sps:$4 sm:$0xff]  }
  0x5a   : > { %1005 = vmatprep.subr.bf16.mxu1 %v1366_v14  ;;  %v1400_v37 = vld [vmem:[%s1737_s5 + $0x94] ss:$8 sps:$4 sm:$0xff]   ;;  %v1404_v39 = vld [vmem:[%s1737_s5 + $0x90] ss:$8 sps:$4 sm:$0xff]   ;;  %v1406_v41 = vld [vmem:[%s1737_s5 + $0xa4] ss:$8 sps:$4 sm:$0xff]  }
  0x5b   : > { %v1402_v38 = vld [vmem:[%s1737_s5 + $0x194] ss:$8 sps:$4 sm:$0xff]   ;;  %v1405_v40 = vld [vmem:[%s1737_s5 + $0x190] ss:$8 sps:$4 sm:$0xff]   ;;  %v1408_v42 = vld [vmem:[%s1737_s5 + $0x1a4] ss:$8 sps:$4 sm:$0xff]  }
  0x5c   : > { %965 = vmatpush1.bf16.msra.mxu0 %v1368_v15  ;;  %v1410_v43 = vld [vmem:[%s1737_s5 + $0xa0] ss:$8 sps:$4 sm:$0xff]   ;;  %v1412_v45 = vld [vmem:[%s1737_s5 + $0xb4] ss:$8 sps:$4 sm:$0xff]   ;;  %v1416_v50 = vld [vmem:[%s1737_s5 + $0xb0] ss:$8 sps:$4 sm:$0xff]  }
  0x5d   : > { %1006 = vmatpush1.bf16.msra.mxu1 %v1369_v16  ;;  %966 = vmatprep.subr.bf16.mxu0 %v1370_v17  ;;  %v1411_v44 = vld [vmem:[%s1737_s5 + $0x1a0] ss:$8 sps:$4 sm:$0xff]   ;;  %v1414_v46 = vld [vmem:[%s1737_s5 + $0x1b4] ss:$8 sps:$4 sm:$0xff]   ;;  %v1417_v51 = vld [vmem:[%s1737_s5 + $0x1b0] ss:$8 sps:$4 sm:$0xff]  }
  0x5e   : > { %1007 = vmatprep.subr.bf16.mxu1 %v1372_v18  ;;  %v558_v47 = vld [vmem:[%s1723_s26] sm:$0xff]  ;;  %v559_v49 = vld [vmem:[%s1723_s26 + $0x8] sm:$0xff]  ;;  %v1418_v53 = vld [vmem:[%s1737_s5 + $0xc4] ss:$8 sps:$4 sm:$0xff]   ;;  %p1283_p13 = scmp.ne.s32.totalorder %s1484_s14, 8 }
  0x5f   : > { %v1216_v48 = vcombine.high %v558_v47, %v558_v47  ;;  %v1218_v52 = vcombine.high %v559_v49, %v559_v49  ;;  %v1420_v54 = vld [vmem:[%s1737_s5 + $0x1c4] ss:$8 sps:$4 sm:$0xff]   ;;  %v1422_v55 = vld [vmem:[%s1737_s5 + $0xc0] ss:$8 sps:$4 sm:$0xff]   ;;  %v1424_v57 = vld [vmem:[%s1737_s5 + $0xd4] ss:$8 sps:$4 sm:$0xff]   ;;  %v1215_v5 = vcombine.low %v558_v47, %v558_v47  ;;  %v1217_v6 = vcombine.low %v559_v49, %v559_v49 }
  0x60   : > { %967 = vmatpush1.bf16.msra.mxu0 %v1374_v19  ;;  %v1423_v56 = vld [vmem:[%s1737_s5 + $0x1c0] ss:$8 sps:$4 sm:$0xff]   ;;  %v1426_v58 = vld [vmem:[%s1737_s5 + $0x1d4] ss:$8 sps:$4 sm:$0xff]   ;;  %v1428_v59 = vld [vmem:[%s1737_s5 + $0xd0] ss:$8 sps:$4 sm:$0xff]  }
  0x61   : > { %1008 = vmatpush1.bf16.msra.mxu1 %v1375_v20  ;;  %968 = vmatprep.subr.bf16.mxu0 %v1376_v21  ;;  %v1429_v60 = vld [vmem:[%s1737_s5 + $0x1d0] ss:$8 sps:$4 sm:$0xff]   ;;  %v1430_v61 = vld [vmem:[%s1737_s5 + $0xe4] ss:$8 sps:$4 sm:$0xff]   ;;  %v1434_v63 = vld [vmem:[%s1737_s5 + $0xe0] ss:$8 sps:$4 sm:$0xff]   ;;  %v1052_v21 = vlaneseq (!%p1283_p13) }
  0x62   : > { %1009 = vmatprep.subr.bf16.mxu1 %v1378_v22  ;;  %990 = vmatprep.mubr.bf16.mxu0 %v1216_v48  ;;  %v1432_v62 = vld [vmem:[%s1737_s5 + $0x1e4] ss:$8 sps:$4 sm:$0xff]   ;;  %v1435_v0 = vld [vmem:[%s1737_s5 + $0x1e0] ss:$8 sps:$4 sm:$0xff]   ;;  %v1436_v1 = vld [vmem:[%s1737_s5 + $0xf4] ss:$8 sps:$4 sm:$0xff]  }
  0x63   : > { %1031 = vmatprep.mubr.bf16.mxu1 %v1218_v52  ;;  %v1438_v2 = vld [vmem:[%s1737_s5 + $0x1f4] ss:$8 sps:$4 sm:$0xff]   ;;  %v1440_v3 = vld [vmem:[%s1737_s5 + $0xf0] ss:$8 sps:$4 sm:$0xff]   ;;  %v1053_v22 = vshrl.u32 (!%p1283_p13), %v1052_v21, 7 }
  0x64   : > { %969 = vmatpush1.bf16.msra.mxu0 %v1380_v23  ;;  %v1441_v4 = vld [vmem:[%s1737_s5 + $0x1f0] ss:$8 sps:$4 sm:$0xff]  }
  0x65   : > { %1010 = vmatpush1.bf16.msra.mxu1 %v1381_v24  ;;  %970 = vmatprep.subr.bf16.mxu0 %v1382_v25  ;;  %v556_v8 = vld [vmem:[#allocation2] sm:$0xff]  ;;  %v557_v12 = vld [vmem:[#allocation2 + $0x8] sm:$0xff]  ;;  %v1054_v24 = vsub.s32 (!%p1283_p13), 0, %v1053_v22  ;;  %v1058_v25 = vsub.s32 (!%p1283_p13), 1, %v1053_v22 }
  0x66   : > { %1011 = vmatprep.subr.bf16.mxu1 %v1384_v26  ;;  %v1050_v23 = vld [vmem:[%s538_s12] sm:$0x3] (!%p1283_p13) }
  0x68   : > { %971 = vmatpush1.bf16.msra.mxu0 %v1386_v27 }
  0x69   : > { %1012 = vmatpush1.bf16.msra.mxu1 %v1387_v28  ;;  %972 = vmatprep.subr.bf16.mxu0 %v1388_v29  ;;  %v1055_v28 = vrot.slane (!%p1283_p13), %v1050_v23, %v1054_v24  ;;  %v1059_v29 = vrot.slane (!%p1283_p13), %v1050_v23, %v1058_v25 }
  0x6a   : > { %1013 = vmatprep.subr.bf16.mxu1 %v1390_v30 }
  0x6c   : > { %973 = vmatpush1.bf16.msra.mxu0 %v1392_v31 }
  0x6d   : > { %1014 = vmatpush1.bf16.msra.mxu1 %v1393_v32  ;;  %974 = vmatprep.subr.bf16.mxu0 %v1394_v33 }
  0x6e   : > { %1015 = vmatprep.subr.bf16.mxu1 %v1396_v34 }
  0x70   : > { %975 = vmatpush1.bf16.msra.mxu0 %v1398_v35 }
  0x71   : > { %1016 = vmatpush1.bf16.msra.mxu1 %v1399_v36  ;;  %976 = vmatprep.subr.bf16.mxu0 %v1400_v37 }
  0x72   : > { %1017 = vmatprep.subr.bf16.mxu1 %v1402_v38 }
  0x74   : > { %977 = vmatpush1.bf16.msra.mxu0 %v1404_v39 }
  0x75   : > { %1018 = vmatpush1.bf16.msra.mxu1 %v1405_v40  ;;  %978 = vmatprep.subr.bf16.mxu0 %v1406_v41 }
  0x76   : > { %1019 = vmatprep.subr.bf16.mxu1 %v1408_v42 }
  0x78   : > { %979 = vmatpush1.bf16.msra.mxu0 %v1410_v43 }
  0x79   : > { %1020 = vmatpush1.bf16.msra.mxu1 %v1411_v44  ;;  %980 = vmatprep.subr.bf16.mxu0 %v1412_v45 }
  0x7a   : > { %1021 = vmatprep.subr.bf16.mxu1 %v1414_v46 }
  0x7c   : > { %981 = vmatpush1.bf16.msra.mxu0 %v1416_v50 }
  0x7d   : > { %1022 = vmatpush1.bf16.msra.mxu1 %v1417_v51  ;;  %982 = vmatprep.subr.bf16.mxu0 %v1418_v53 }
  0x7e   : > { %1023 = vmatprep.subr.bf16.mxu1 %v1420_v54 }
  0x80   : > { %983 = vmatpush1.bf16.msra.mxu0 %v1422_v55 }
  0x81   : > { %1024 = vmatpush1.bf16.msra.mxu1 %v1423_v56  ;;  %984 = vmatprep.subr.bf16.mxu0 %v1424_v57 }
  0x82   : > { %1025 = vmatprep.subr.bf16.mxu1 %v1426_v58 }
  0x84   : > { %985 = vmatpush1.bf16.msra.mxu0 %v1428_v59 }
  0x85   : > { %1026 = vmatpush1.bf16.msra.mxu1 %v1429_v60  ;;  %986 = vmatprep.subr.bf16.mxu0 %v1430_v61 }
  0x86   : > { %1027 = vmatprep.subr.bf16.mxu1 %v1432_v62 }
  0x88   : > { %987 = vmatpush1.bf16.msra.mxu0 %v1434_v63 }
  0x89   : > { %1028 = vmatpush1.bf16.msra.mxu1 %v1435_v0  ;;  %988 = vmatprep.subr.bf16.mxu0 %v1436_v1 }
  0x8a   : > { %1029 = vmatprep.subr.bf16.mxu1 %v1438_v2 }
  0x8c   : > { %989 = vmatpush1.bf16.msra.mxu0 %v1440_v3 }
  0x8d   : > { %1030 = vmatpush1.bf16.msra.mxu1 %v1441_v4 }
  0x8f   : > { %991 = vmatmul.mubr.bf16.vlgmr.msra.gmra.mrb[0].mxu0 %v1215_v5 }
  0x90   : > { %1032 = vmatmul.mubr.bf16.vlgmr.msra.gmra.mrb[0].mxu1 %v1217_v6 }
 0x162   : > { %v992_v7 = vpop.f32.mrb[0].mxu0 }
 0x163   : > { %v1033_v9 = vpop.f32.mrb[0].mxu1  ;;  %v994_v11 = vpop.f32.mrb[1].mxu0  ;;  %1047 = sbr.rel (%p1283_p13) target bundleno = 376 (0x178), region = 78 }
 0x164   : > { %v1034_v10 = vadd.f32 %v1033_v9, %v992_v7  ;;  %v1035_v13 = vpop.f32.mrb[1].mxu1  ;;  %v996_v15 = vpop.f32.mrb[2].mxu0 }
 0x165   : > { %v1036_v14 = vadd.f32 %v1035_v13, %v994_v11  ;;  %v1037_v16 = vpop.f32.mrb[2].mxu1  ;;  %v997_v18 = vpop.f32.mrb[3].mxu0 }
 0x166   : > { %v1040_v17 = vadd.f32 %v1034_v10, %v556_v8  ;;  %v1038_v19 = vpop.f32.mrb[3].mxu1 }
 0x167   : > { %v1041_v20 = vadd.f32 %v1036_v14, %v557_v12 }
 0x168   : > { %1042 = vst [vmem:[#allocation2] sm:$0xff] %v1040_v17 }
 0x169   : > { %1043 = vst [vmem:[#allocation2 + $0x8] sm:$0xff] %v1041_v20 }
 0x16f   : > { %v1048_v26 = vld [vmem:[#allocation2] sm:$0xff] }
 0x170   : > { %v1049_v27 = vld [vmem:[#allocation2 + $0x8] sm:$0xff]  ;;  %v1062_v30 = vadd.f32 %v1055_v28, %v1048_v26 }
 0x171   : > { %v1063_v31 = vadd.f32 %v1059_v29, %v1049_v27 }
 0x172   : > { %v1064_v32 = vmax.f32 %v1062_v30, 0.0 }
 0x173   : > { %v1065_v33 = vmax.f32 %v1063_v31, 0.0 }
 0x175   : > { %v1288_v34 = vpack.c.bf16 %v1065_v33, %v1064_v32 }
 0x177   : > { %1074 = vst [vmem:[%s1735_s15] sm:$0xff] %v1288_v34 }
 0x178 PF: > { %s13_s18 = sadd.s32 1, %s1500_s18   ;;  %s1838_s12 = smov %s1480_s13 }
 0x179   : > { %p10_p0 = scmp.ge.s32.totalorder %s13_s18, 20   ;;  %s1839_s13 = smov %s1574_s25 }
 0x17a   : > { %s1840_s14 = smov %s1492_s16  ;;  %s1841_s15 = smov %s1496_s17 }
 0x17b   : > { %s1842_s16 = smov %s1845_s19  ;;  %s1843_s17 = smov %s1849_s20 }
 0x17c   :  { %12 = sbr.rel (!%p10_p0) target bundleno = 4 (0x4), region = 119 }

// kernel: resnet_forward.34
= control target key start
LH: loop header
LB: loop body
LE: loop exit
PB: predicated region body
PF: predicated region fallthrough
CT: control target
= control target key end

     0   :  { %s1521_s12 = smov 0   ;;  %s1523_s13 = smov 0   ;;  %s1832_s0 = inlined_call_operand.vmem [shape: bf16[8,1024], index: 0, kind: input, shape index: {}]   ;;  %s1833_s1 = inlined_call_operand.vmem [shape: bf16[1024,2048], index: 1, kind: input, shape index: {}]   ;;  %s1834_s2 = inlined_call_operand.vmem [shape: f32[1,2048], index: 2, kind: input, shape index: {}]   ;;  %s1835_s3 = inlined_call_operand.vmem [shape: bf16[8,2048], index: 3, kind: output, shape index: {}]  }
   0x1   :  { %s1525_s14 = smov 0   ;;  %s1527_s15 = smov 0  }
   0x2   :  { %s1529_s16 = smov 0   ;;  %s1531_s17 = smov 0  }
   0x3   :  { %s1533_s18 = smov 0  }
   0x4 LB: > { %s25_s19 = sadd.s32 1, %s1490_s16  ;;  %s28_s20 = sadd.s32 1, %s1494_s17  ;;  %s1498_s18 = sphi %s1533_s18, %s13_s18   ;;  %s1494_s17 = sphi %s1531_s17, %s1841_s17   ;;  %s1490_s16 = sphi %s1529_s16, %s1840_s16   ;;  %s1486_s15 = sphi %s1527_s15, %s1839_s15   ;;  %s1482_s14 = sphi %s1525_s14, %s1838_s14   ;;  %s1478_s13 = sphi %s1523_s13, %s1837_s13   ;;  %s1474_s12 = sphi %s1521_s12, %s1836_s12  }
   0x5   : > { %p26_p0 = scmp.ge.s32.totalorder %s25_s19, 2  ;;  %p76_p1 = scmp.ne.s32.totalorder %s1478_s13, %s1474_s12 }
   0x6   : > { %p77_p2 = scmp.eq.s32.totalorder %s1498_s18, 0  ;;  %s69_s24 = sadd.s32 1, %s1478_s13 }
   0x7   : > { %s1843_s19 = smov (%p26_p0, %s25_s19), 0  ;;  %s1845_s20 = smov (!%p26_p0, %s28_s20), %s1494_s17 }
   0x8   : > { %p78_p3 = por %p77_p2, %p76_p1  ;;  %p30_p4 = scmp.ge.s32.totalorder %s1845_s20, 8 }
   0x9   : > { %s64_s21 = ssub.s32 %s1490_s16, %s1843_s19  ;;  %p1199_p6 = scmp.ge.s32.totalorder %s1498_s18, 16 }
   0xa   : > { %s1847_s20 = smov (%p30_p4, %s1845_s20), 0 }
   0xb   : > { %s65_s22 = ssub.s32 %s1494_s17, %s1847_s20  ;;  %156 = sbr.rel (%p1199_p6) target bundleno = 89 (0x59), region = 16 }
   0xc   : > { %s66_s23 = sor.u32 %s65_s22, %s64_s21 }
   0xd   : > { %p67_p5 = scmp.eq.s32.totalorder %s66_s23, 0 }
   0xf   : > { %s1572_s25 = scalar_select %p67_p5, %s1478_s13, %s69_s24  }
  0x12   : > { %172 = sbr.rel (!%p78_p3) target bundleno = 89 (0x59), region = 24  ;;  %s174_s26 = sand.u32 (%p78_p3), 1, %s1478_s13  }
  0x13   : > { %s1202_s27 = sshll.u32 (%p78_p3), %s1494_s17, 1  ;;  %s1200_s28 = sshll.u32 (%p78_p3), %s174_s26, 9 }
  0x14   : > { %s1285_s29 = sshll.u32 (%p78_p3), %s1490_s16, 10  ;;  %s1586_s8 = scalar_lea.vmem (%p78_p3), [#allocation3], %s1200_s28 }
  0x15   : > { %s180_s30 = sadd.s32 (%p78_p3), %s1285_s29, %s1202_s27 }
  0x16   : > { %s1204_s4 = sshll.u32 (%p78_p3), %s180_s30, 2 }
  0x17   : > { %s1581_s7 = scalar_lea.vmem (%p78_p3), %s1833_s1, %s1204_s4 }
  0x18   : > { %v336_v0 = vld [vmem:[%s1581_s7] sm:$0xff] (%p78_p3) }
  0x19   : > { %v338_v1 = vld [vmem:[%s1581_s7 + $0x40] sm:$0xff]  ;;  %337 = vst [vmem:[%s1586_s8] sm:$0xff] %v336_v0 }
  0x1a   : > { %v340_v2 = vld [vmem:[%s1581_s7 + $0x80] sm:$0xff]  ;;  %339 = vst [vmem:[%s1586_s8 + $0x8] sm:$0xff] %v338_v1 }
  0x1b   : > { %341 = vst [vmem:[%s1586_s8 + $0x10] sm:$0xff] %v340_v2  ;;  %v342_v3 = vld [vmem:[%s1581_s7 + $0xc0] sm:$0xff] }
  0x1c   : > { %v344_v4 = vld [vmem:[%s1581_s7 + $0x100] sm:$0xff]  ;;  %343 = vst [vmem:[%s1586_s8 + $0x18] sm:$0xff] %v342_v3 }
  0x1d   : > { %v346_v5 = vld [vmem:[%s1581_s7 + $0x140] sm:$0xff]  ;;  %345 = vst [vmem:[%s1586_s8 + $0x20] sm:$0xff] %v344_v4 }
  0x1e   : > { %347 = vst [vmem:[%s1586_s8 + $0x28] sm:$0xff] %v346_v5  ;;  %v348_v6 = vld [vmem:[%s1581_s7 + $0x180] sm:$0xff] }
  0x1f   : > { %v350_v7 = vld [vmem:[%s1581_s7 + $0x1c0] sm:$0xff]  ;;  %349 = vst [vmem:[%s1586_s8 + $0x30] sm:$0xff] %v348_v6 }
  0x20   : > { %v352_v8 = vld [vmem:[%s1581_s7 + $0x200] sm:$0xff]  ;;  %351 = vst [vmem:[%s1586_s8 + $0x38] sm:$0xff] %v350_v7 }
  0x21   : > { %353 = vst [vmem:[%s1586_s8 + $0x40] sm:$0xff] %v352_v8  ;;  %v354_v9 = vld [vmem:[%s1581_s7 + $0x240] sm:$0xff] }
  0x22   : > { %v356_v10 = vld [vmem:[%s1581_s7 + $0x280] sm:$0xff]  ;;  %355 = vst [vmem:[%s1586_s8 + $0x48] sm:$0xff] %v354_v9 }
  0x23   : > { %v358_v11 = vld [vmem:[%s1581_s7 + $0x2c0] sm:$0xff]  ;;  %357 = vst [vmem:[%s1586_s8 + $0x50] sm:$0xff] %v356_v10 }
  0x24   : > { %359 = vst [vmem:[%s1586_s8 + $0x58] sm:$0xff] %v358_v11  ;;  %v360_v12 = vld [vmem:[%s1581_s7 + $0x300] sm:$0xff] }
  0x25   : > { %v362_v13 = vld [vmem:[%s1581_s7 + $0x340] sm:$0xff]  ;;  %361 = vst [vmem:[%s1586_s8 + $0x60] sm:$0xff] %v360_v12 }
  0x26   : > { %v364_v14 = vld [vmem:[%s1581_s7 + $0x380] sm:$0xff]  ;;  %363 = vst [vmem:[%s1586_s8 + $0x68] sm:$0xff] %v362_v13 }
  0x27   : > { %365 = vst [vmem:[%s1586_s8 + $0x70] sm:$0xff] %v364_v14  ;;  %v366_v15 = vld [vmem:[%s1581_s7 + $0x3c0] sm:$0xff] }
  0x28   : > { %v368_v16 = vld [vmem:[%s1581_s7 + $0x400] sm:$0xff]  ;;  %367 = vst [vmem:[%s1586_s8 + $0x78] sm:$0xff] %v366_v15 }
  0x29   : > { %v370_v17 = vld [vmem:[%s1581_s7 + $0x440] sm:$0xff]  ;;  %369 = vst [vmem:[%s1586_s8 + $0x80] sm:$0xff] %v368_v16 }
  0x2a   : > { %371 = vst [vmem:[%s1586_s8 + $0x88] sm:$0xff] %v370_v17  ;;  %v372_v18 = vld [vmem:[%s1581_s7 + $0x480] sm:$0xff] }
  0x2b   : > { %v374_v19 = vld [vmem:[%s1581_s7 + $0x4c0] sm:$0xff]  ;;  %373 = vst [vmem:[%s1586_s8 + $0x90] sm:$0xff] %v372_v18 }
  0x2c   : > { %v376_v20 = vld [vmem:[%s1581_s7 + $0x500] sm:$0xff]  ;;  %375 = vst [vmem:[%s1586_s8 + $0x98] sm:$0xff] %v374_v19 }
  0x2d   : > { %377 = vst [vmem:[%s1586_s8 + $0xa0] sm:$0xff] %v376_v20  ;;  %v378_v21 = vld [vmem:[%s1581_s7 + $0x540] sm:$0xff] }
  0x2e   : > { %v380_v22 = vld [vmem:[%s1581_s7 + $0x580] sm:$0xff]  ;;  %379 = vst [vmem:[%s1586_s8 + $0xa8] sm:$0xff] %v378_v21 }
  0x2f   : > { %v382_v23 = vld [vmem:[%s1581_s7 + $0x5c0] sm:$0xff]  ;;  %381 = vst [vmem:[%s1586_s8 + $0xb0] sm:$0xff] %v380_v22 }
  0x30   : > { %383 = vst [vmem:[%s1586_s8 + $0xb8] sm:$0xff] %v382_v23  ;;  %v384_v24 = vld [vmem:[%s1581_s7 + $0x600] sm:$0xff] }
  0x31   : > { %v386_v25 = vld [vmem:[%s1581_s7 + $0x640] sm:$0xff]  ;;  %385 = vst [vmem:[%s1586_s8 + $0xc0] sm:$0xff] %v384_v24 }
  0x32   : > { %v388_v26 = vld [vmem:[%s1581_s7 + $0x680] sm:$0xff]  ;;  %387 = vst [vmem:[%s1586_s8 + $0xc8] sm:$0xff] %v386_v25 }
  0x33   : > { %389 = vst [vmem:[%s1586_s8 + $0xd0] sm:$0xff] %v388_v26  ;;  %v390_v27 = vld [vmem:[%s1581_s7 + $0x6c0] sm:$0xff] }
  0x34   : > { %v392_v28 = vld [vmem:[%s1581_s7 + $0x700] sm:$0xff]  ;;  %391 = vst [vmem:[%s1586_s8 + $0xd8] sm:$0xff] %v390_v27 }
  0x35   : > { %v394_v29 = vld [vmem:[%s1581_s7 + $0x740] sm:$0xff]  ;;  %393 = vst [vmem:[%s1586_s8 + $0xe0] sm:$0xff] %v392_v28 }
  0x36   : > { %395 = vst [vmem:[%s1586_s8 + $0xe8] sm:$0xff] %v394_v29  ;;  %v396_v30 = vld [vmem:[%s1581_s7 + $0x780] sm:$0xff] }
  0x37   : > { %v398_v31 = vld [vmem:[%s1581_s7 + $0x7c0] sm:$0xff]  ;;  %397 = vst [vmem:[%s1586_s8 + $0xf0] sm:$0xff] %v396_v30 }
  0x38   : > { %v400_v32 = vld [vmem:[%s1581_s7 + $0x800] sm:$0xff]  ;;  %399 = vst [vmem:[%s1586_s8 + $0xf8] sm:$0xff] %v398_v31 }
  0x39   : > { %401 = vst [vmem:[%s1586_s8 + $0x100] sm:$0xff] %v400_v32  ;;  %v402_v33 = vld [vmem:[%s1581_s7 + $0x840] sm:$0xff] }
  0x3a   : > { %v404_v34 = vld [vmem:[%s1581_s7 + $0x880] sm:$0xff]  ;;  %403 = vst [vmem:[%s1586_s8 + $0x108] sm:$0xff] %v402_v33 }
  0x3b   : > { %v406_v35 = vld [vmem:[%s1581_s7 + $0x8c0] sm:$0xff]  ;;  %405 = vst [vmem:[%s1586_s8 + $0x110] sm:$0xff] %v404_v34 }
  0x3c   : > { %407 = vst [vmem:[%s1586_s8 + $0x118] sm:$0xff] %v406_v35  ;;  %v408_v36 = vld [vmem:[%s1581_s7 + $0x900] sm:$0xff] }
  0x3d   : > { %v410_v37 = vld [vmem:[%s1581_s7 + $0x940] sm:$0xff]  ;;  %409 = vst [vmem:[%s1586_s8 + $0x120] sm:$0xff] %v408_v36 }
  0x3e   : > { %v412_v38 = vld [vmem:[%s1581_s7 + $0x980] sm:$0xff]  ;;  %411 = vst [vmem:[%s1586_s8 + $0x128] sm:$0xff] %v410_v37 }
  0x3f   : > { %413 = vst [vmem:[%s1586_s8 + $0x130] sm:$0xff] %v412_v38  ;;  %v414_v39 = vld [vmem:[%s1581_s7 + $0x9c0] sm:$0xff] }
  0x40   : > { %v416_v40 = vld [vmem:[%s1581_s7 + $0xa00] sm:$0xff]  ;;  %415 = vst [vmem:[%s1586_s8 + $0x138] sm:$0xff] %v414_v39 }
  0x41   : > { %v418_v41 = vld [vmem:[%s1581_s7 + $0xa40] sm:$0xff]  ;;  %417 = vst [vmem:[%s1586_s8 + $0x140] sm:$0xff] %v416_v40 }
  0x42   : > { %419 = vst [vmem:[%s1586_s8 + $0x148] sm:$0xff] %v418_v41  ;;  %v420_v42 = vld [vmem:[%s1581_s7 + $0xa80] sm:$0xff] }
  0x43   : > { %v422_v43 = vld [vmem:[%s1581_s7 + $0xac0] sm:$0xff]  ;;  %421 = vst [vmem:[%s1586_s8 + $0x150] sm:$0xff] %v420_v42 }
  0x44   : > { %v424_v44 = vld [vmem:[%s1581_s7 + $0xb00] sm:$0xff]  ;;  %423 = vst [vmem:[%s1586_s8 + $0x158] sm:$0xff] %v422_v43 }
  0x45   : > { %425 = vst [vmem:[%s1586_s8 + $0x160] sm:$0xff] %v424_v44  ;;  %v426_v45 = vld [vmem:[%s1581_s7 + $0xb40] sm:$0xff] }
  0x46   : > { %v428_v46 = vld [vmem:[%s1581_s7 + $0xb80] sm:$0xff]  ;;  %427 = vst [vmem:[%s1586_s8 + $0x168] sm:$0xff] %v426_v45 }
  0x47   : > { %v430_v47 = vld [vmem:[%s1581_s7 + $0xbc0] sm:$0xff]  ;;  %429 = vst [vmem:[%s1586_s8 + $0x170] sm:$0xff] %v428_v46 }
  0x48   : > { %431 = vst [vmem:[%s1586_s8 + $0x178] sm:$0xff] %v430_v47  ;;  %v432_v48 = vld [vmem:[%s1581_s7 + $0xc00] sm:$0xff] }
  0x49   : > { %v434_v49 = vld [vmem:[%s1581_s7 + $0xc40] sm:$0xff]  ;;  %433 = vst [vmem:[%s1586_s8 + $0x180] sm:$0xff] %v432_v48 }
  0x4a   : > { %v436_v50 = vld [vmem:[%s1581_s7 + $0xc80] sm:$0xff]  ;;  %435 = vst [vmem:[%s1586_s8 + $0x188] sm:$0xff] %v434_v49 }
  0x4b   : > { %437 = vst [vmem:[%s1586_s8 + $0x190] sm:$0xff] %v436_v50  ;;  %v438_v51 = vld [vmem:[%s1581_s7 + $0xcc0] sm:$0xff] }
  0x4c   : > { %v440_v52 = vld [vmem:[%s1581_s7 + $0xd00] sm:$0xff]  ;;  %439 = vst [vmem:[%s1586_s8 + $0x198] sm:$0xff] %v438_v51 }
  0x4d   : > { %v442_v53 = vld [vmem:[%s1581_s7 + $0xd40] sm:$0xff]  ;;  %441 = vst [vmem:[%s1586_s8 + $0x1a0] sm:$0xff] %v440_v52 }
  0x4e   : > { %443 = vst [vmem:[%s1586_s8 + $0x1a8] sm:$0xff] %v442_v53  ;;  %v444_v54 = vld [vmem:[%s1581_s7 + $0xd80] sm:$0xff] }
  0x4f   : > { %v446_v55 = vld [vmem:[%s1581_s7 + $0xdc0] sm:$0xff]  ;;  %445 = vst [vmem:[%s1586_s8 + $0x1b0] sm:$0xff] %v444_v54 }
  0x50   : > { %v448_v56 = vld [vmem:[%s1581_s7 + $0xe00] sm:$0xff]  ;;  %447 = vst [vmem:[%s1586_s8 + $0x1b8] sm:$0xff] %v446_v55 }
  0x51   : > { %449 = vst [vmem:[%s1586_s8 + $0x1c0] sm:$0xff] %v448_v56  ;;  %v450_v57 = vld [vmem:[%s1581_s7 + $0xe40] sm:$0xff] }
  0x52   : > { %v452_v58 = vld [vmem:[%s1581_s7 + $0xe80] sm:$0xff]  ;;  %451 = vst [vmem:[%s1586_s8 + $0x1c8] sm:$0xff] %v450_v57 }
  0x53   : > { %v454_v59 = vld [vmem:[%s1581_s7 + $0xec0] sm:$0xff]  ;;  %453 = vst [vmem:[%s1586_s8 + $0x1d0] sm:$0xff] %v452_v58 }
  0x54   : > { %455 = vst [vmem:[%s1586_s8 + $0x1d8] sm:$0xff] %v454_v59  ;;  %v456_v60 = vld [vmem:[%s1581_s7 + $0xf00] sm:$0xff] }
  0x55   : > { %v458_v61 = vld [vmem:[%s1581_s7 + $0xf40] sm:$0xff]  ;;  %457 = vst [vmem:[%s1586_s8 + $0x1e0] sm:$0xff] %v456_v60 }
  0x56   : > { %v460_v62 = vld [vmem:[%s1581_s7 + $0xf80] sm:$0xff]  ;;  %459 = vst [vmem:[%s1586_s8 + $0x1e8] sm:$0xff] %v458_v61 }
  0x57   : > { %461 = vst [vmem:[%s1586_s8 + $0x1f0] sm:$0xff] %v460_v62  ;;  %v462_v63 = vld [vmem:[%s1581_s7 + $0xfc0] sm:$0xff] }
  0x58   : > { %463 = vst [vmem:[%s1586_s8 + $0x1f8] sm:$0xff] %v462_v63 }
  0x59 PF: > { %p1205_p7 = scmp.ge.s32.totalorder %s1498_s18, 1  ;;  %p476_p8 = scmp.lt.s32.totalorder %s1498_s18, 17 }
  0x5b   : > { %p477_p9 = pnand %p1205_p7, %p476_p8 }
  0x5c   : > { %s483_s9 = sand.u32 (!%p477_p9), 1, %s1474_s12   ;;  %s1207_s10 = sshll.u32 (!%p477_p9), %s1482_s14, 2 }
  0x5d   : > { %480 = sbr.rel (%p477_p9) target bundleno = 406 (0x196), region = 66  ;;  %s1206_s11 = sshll.u32 (!%p477_p9), %s483_s9, 9 }
  0x5e   : > { %p526_p10 = scmp.lt.s32.totalorder (!%p477_p9), %s1207_s10, 7  ;;  %s1209_s21 = sshll.u32 (!%p477_p9), %s1486_s15, 1 }
  0x5f   : > { %p536_p11 = scmp.lt.s32.totalorder (!%p477_p9), %s1209_s21, 15  ;;  %s1735_s5 = scalar_lea.vmem (!%p477_p9), [#allocation3], %s1206_s11 }
  0x60   : > { %p1212_p12 = scmp.ne.s32.totalorder (!%p477_p9), %s1482_s14, 0 }
  0x64   : > { %s1849_s10 = smov (!%p526_p10, %s1207_s10), 7  ;;  %s1851_s21 = smov (!%p536_p11, %s1209_s21), 15 }
  0x65   : > { %s1208_s22 = sshll.u32 %s1849_s10, 2  ;;  %s538_s12 = scalar_lea.vmem %s1834_s2, %s1851_s21  ;;  %v1500_v0 = vmov (!%p1212_p12), 0.0  }
  0x66   : > { %s1721_s26 = scalar_lea.vmem %s1832_s0, %s1208_s22  ;;  %s1211_s29 = sshll.u32 %s1851_s21, 2  ;;  %554 = vst [vmem:[#allocation2] sm:$0xff] (!%p1212_p12), %v1500_v0  ;;  %555 = vst [vmem:[#allocation2 + $0x8] sm:$0xff] (!%p1212_p12), %v1500_v0 }
  0x67   : > { %s1733_s15 = scalar_lea.vmem %s1835_s3, %s1211_s29  ;;  %553 = sbr.rel (%p1212_p12) target bundleno = 110 (0x6e), region = 74 }
  0x6e PF: > { %v1344_v1 = vld [vmem:[%s1735_s5 + $0x4] ss:$8 sps:$4 sm:$0xff]   ;;  %v1348_v3 = vld [vmem:[%s1735_s5] ss:$8 sps:$4 sm:$0xff]   ;;  %v1350_v5 = vld [vmem:[%s1735_s5 + $0x14] ss:$8 sps:$4 sm:$0xff]  }
  0x6f   : > { %v1346_v2 = vld [vmem:[%s1735_s5 + $0x104] ss:$8 sps:$4 sm:$0xff]   ;;  %958 = vmatprep.subr.bf16.mxu0 %v1344_v1  ;;  %v1349_v4 = vld [vmem:[%s1735_s5 + $0x100] ss:$8 sps:$4 sm:$0xff]   ;;  %v1352_v6 = vld [vmem:[%s1735_s5 + $0x114] ss:$8 sps:$4 sm:$0xff]  }
  0x70   : > { %999 = vmatprep.subr.bf16.mxu1 %v1346_v2  ;;  %959 = vmatpush1.bf16.msra.mxu0 %v1348_v3  ;;  %v1354_v7 = vld [vmem:[%s1735_s5 + $0x10] ss:$8 sps:$4 sm:$0xff]   ;;  %v1356_v9 = vld [vmem:[%s1735_s5 + $0x24] ss:$8 sps:$4 sm:$0xff]   ;;  %v1360_v11 = vld [vmem:[%s1735_s5 + $0x20] ss:$8 sps:$4 sm:$0xff]  }
  0x71   : > { %1000 = vmatpush1.bf16.msra.mxu1 %v1349_v4  ;;  %960 = vmatprep.subr.bf16.mxu0 %v1350_v5  ;;  %v1355_v8 = vld [vmem:[%s1735_s5 + $0x110] ss:$8 sps:$4 sm:$0xff]   ;;  %v1358_v10 = vld [vmem:[%s1735_s5 + $0x124] ss:$8 sps:$4 sm:$0xff]   ;;  %v1361_v12 = vld [vmem:[%s1735_s5 + $0x120] ss:$8 sps:$4 sm:$0xff]  }
  0x72   : > { %1001 = vmatprep.subr.bf16.mxu1 %v1352_v6  ;;  %v1362_v13 = vld [vmem:[%s1735_s5 + $0x34] ss:$8 sps:$4 sm:$0xff]   ;;  %v1366_v15 = vld [vmem:[%s1735_s5 + $0x30] ss:$8 sps:$4 sm:$0xff]   ;;  %v1368_v17 = vld [vmem:[%s1735_s5 + $0x44] ss:$8 sps:$4 sm:$0xff]  }
  0x73   : > { %v1364_v14 = vld [vmem:[%s1735_s5 + $0x134] ss:$8 sps:$4 sm:$0xff]   ;;  %v1367_v16 = vld [vmem:[%s1735_s5 + $0x130] ss:$8 sps:$4 sm:$0xff]   ;;  %v1370_v18 = vld [vmem:[%s1735_s5 + $0x144] ss:$8 sps:$4 sm:$0xff]  }
  0x74   : > { %961 = vmatpush1.bf16.msra.mxu0 %v1354_v7  ;;  %v1372_v19 = vld [vmem:[%s1735_s5 + $0x40] ss:$8 sps:$4 sm:$0xff]   ;;  %v1374_v21 = vld [vmem:[%s1735_s5 + $0x54] ss:$8 sps:$4 sm:$0xff]   ;;  %v1378_v23 = vld [vmem:[%s1735_s5 + $0x50] ss:$8 sps:$4 sm:$0xff]  }
  0x75   : > { %1002 = vmatpush1.bf16.msra.mxu1 %v1355_v8  ;;  %962 = vmatprep.subr.bf16.mxu0 %v1356_v9  ;;  %v1373_v20 = vld [vmem:[%s1735_s5 + $0x140] ss:$8 sps:$4 sm:$0xff]   ;;  %v1376_v22 = vld [vmem:[%s1735_s5 + $0x154] ss:$8 sps:$4 sm:$0xff]   ;;  %v1379_v24 = vld [vmem:[%s1735_s5 + $0x150] ss:$8 sps:$4 sm:$0xff]  }
  0x76   : > { %1003 = vmatprep.subr.bf16.mxu1 %v1358_v10  ;;  %v1380_v25 = vld [vmem:[%s1735_s5 + $0x64] ss:$8 sps:$4 sm:$0xff]   ;;  %v1384_v27 = vld [vmem:[%s1735_s5 + $0x60] ss:$8 sps:$4 sm:$0xff]   ;;  %v1386_v29 = vld [vmem:[%s1735_s5 + $0x74] ss:$8 sps:$4 sm:$0xff]  }
  0x77   : > { %v1382_v26 = vld [vmem:[%s1735_s5 + $0x164] ss:$8 sps:$4 sm:$0xff]   ;;  %v1385_v28 = vld [vmem:[%s1735_s5 + $0x160] ss:$8 sps:$4 sm:$0xff]   ;;  %v1388_v30 = vld [vmem:[%s1735_s5 + $0x174] ss:$8 sps:$4 sm:$0xff]  }
  0x78   : > { %963 = vmatpush1.bf16.msra.mxu0 %v1360_v11  ;;  %v1390_v31 = vld [vmem:[%s1735_s5 + $0x70] ss:$8 sps:$4 sm:$0xff]   ;;  %v1392_v33 = vld [vmem:[%s1735_s5 + $0x84] ss:$8 sps:$4 sm:$0xff]   ;;  %v1396_v35 = vld [vmem:[%s1735_s5 + $0x80] ss:$8 sps:$4 sm:$0xff]  }
  0x79   : > { %1004 = vmatpush1.bf16.msra.mxu1 %v1361_v12  ;;  %964 = vmatprep.subr.bf16.mxu0 %v1362_v13  ;;  %v1391_v32 = vld [vmem:[%s1735_s5 + $0x170] ss:$8 sps:$4 sm:$0xff]   ;;  %v1394_v34 = vld [vmem:[%s1735_s5 + $0x184] ss:$8 sps:$4 sm:$0xff]   ;;  %v1397_v36 = vld [vmem:[%s1735_s5 + $0x180] ss:$8 sps:$4 sm:$0xff]  }
  0x7a   : > { %1005 = vmatprep.subr.bf16.mxu1 %v1364_v14  ;;  %v1398_v37 = vld [vmem:[%s1735_s5 + $0x94] ss:$8 sps:$4 sm:$0xff]   ;;  %v1402_v39 = vld [vmem:[%s1735_s5 + $0x90] ss:$8 sps:$4 sm:$0xff]   ;;  %v1404_v41 = vld [vmem:[%s1735_s5 + $0xa4] ss:$8 sps:$4 sm:$0xff]  }
  0x7b   : > { %v1400_v38 = vld [vmem:[%s1735_s5 + $0x194] ss:$8 sps:$4 sm:$0xff]   ;;  %v1403_v40 = vld [vmem:[%s1735_s5 + $0x190] ss:$8 sps:$4 sm:$0xff]   ;;  %v1406_v42 = vld [vmem:[%s1735_s5 + $0x1a4] ss:$8 sps:$4 sm:$0xff]  }
  0x7c   : > { %965 = vmatpush1.bf16.msra.mxu0 %v1366_v15  ;;  %v1408_v43 = vld [vmem:[%s1735_s5 + $0xa0] ss:$8 sps:$4 sm:$0xff]   ;;  %v1410_v45 = vld [vmem:[%s1735_s5 + $0xb4] ss:$8 sps:$4 sm:$0xff]   ;;  %v1414_v50 = vld [vmem:[%s1735_s5 + $0xb0] ss:$8 sps:$4 sm:$0xff]  }
  0x7d   : > { %1006 = vmatpush1.bf16.msra.mxu1 %v1367_v16  ;;  %966 = vmatprep.subr.bf16.mxu0 %v1368_v17  ;;  %v1409_v44 = vld [vmem:[%s1735_s5 + $0x1a0] ss:$8 sps:$4 sm:$0xff]   ;;  %v1412_v46 = vld [vmem:[%s1735_s5 + $0x1b4] ss:$8 sps:$4 sm:$0xff]   ;;  %v1415_v51 = vld [vmem:[%s1735_s5 + $0x1b0] ss:$8 sps:$4 sm:$0xff]  }
  0x7e   : > { %1007 = vmatprep.subr.bf16.mxu1 %v1370_v18  ;;  %v558_v47 = vld [vmem:[%s1721_s26] sm:$0xff]  ;;  %v559_v49 = vld [vmem:[%s1721_s26 + $0x8] sm:$0xff]  ;;  %v1416_v53 = vld [vmem:[%s1735_s5 + $0xc4] ss:$8 sps:$4 sm:$0xff]   ;;  %p1281_p13 = scmp.ne.s32.totalorder %s1482_s14, 1 }
  0x7f   : > { %v1214_v48 = vcombine.high %v558_v47, %v558_v47  ;;  %v1216_v52 = vcombine.high %v559_v49, %v559_v49  ;;  %v1418_v54 = vld [vmem:[%s1735_s5 + $0x1c4] ss:$8 sps:$4 sm:$0xff]   ;;  %v1420_v55 = vld [vmem:[%s1735_s5 + $0xc0] ss:$8 sps:$4 sm:$0xff]   ;;  %v1422_v57 = vld [vmem:[%s1735_s5 + $0xd4] ss:$8 sps:$4 sm:$0xff]   ;;  %v1213_v5 = vcombine.low %v558_v47, %v558_v47  ;;  %v1215_v6 = vcombine.low %v559_v49, %v559_v49 }
  0x80   : > { %967 = vmatpush1.bf16.msra.mxu0 %v1372_v19  ;;  %v1421_v56 = vld [vmem:[%s1735_s5 + $0x1c0] ss:$8 sps:$4 sm:$0xff]   ;;  %v1424_v58 = vld [vmem:[%s1735_s5 + $0x1d4] ss:$8 sps:$4 sm:$0xff]   ;;  %v1426_v59 = vld [vmem:[%s1735_s5 + $0xd0] ss:$8 sps:$4 sm:$0xff]  }
  0x81   : > { %1008 = vmatpush1.bf16.msra.mxu1 %v1373_v20  ;;  %968 = vmatprep.subr.bf16.mxu0 %v1374_v21  ;;  %v1427_v60 = vld [vmem:[%s1735_s5 + $0x1d0] ss:$8 sps:$4 sm:$0xff]   ;;  %v1428_v61 = vld [vmem:[%s1735_s5 + $0xe4] ss:$8 sps:$4 sm:$0xff]   ;;  %v1432_v63 = vld [vmem:[%s1735_s5 + $0xe0] ss:$8 sps:$4 sm:$0xff]   ;;  %v1052_v21 = vlaneseq (!%p1281_p13) }
  0x82   : > { %1009 = vmatprep.subr.bf16.mxu1 %v1376_v22  ;;  %990 = vmatprep.mubr.bf16.mxu0 %v1214_v48  ;;  %v1430_v62 = vld [vmem:[%s1735_s5 + $0x1e4] ss:$8 sps:$4 sm:$0xff]   ;;  %v1433_v0 = vld [vmem:[%s1735_s5 + $0x1e0] ss:$8 sps:$4 sm:$0xff]   ;;  %v1434_v1 = vld [vmem:[%s1735_s5 + $0xf4] ss:$8 sps:$4 sm:$0xff]  }
  0x83   : > { %1031 = vmatprep.mubr.bf16.mxu1 %v1216_v52  ;;  %v1436_v2 = vld [vmem:[%s1735_s5 + $0x1f4] ss:$8 sps:$4 sm:$0xff]   ;;  %v1438_v3 = vld [vmem:[%s1735_s5 + $0xf0] ss:$8 sps:$4 sm:$0xff]   ;;  %v1053_v22 = vshrl.u32 (!%p1281_p13), %v1052_v21, 7 }
  0x84   : > { %969 = vmatpush1.bf16.msra.mxu0 %v1378_v23  ;;  %v1439_v4 = vld [vmem:[%s1735_s5 + $0x1f0] ss:$8 sps:$4 sm:$0xff]  }
  0x85   : > { %1010 = vmatpush1.bf16.msra.mxu1 %v1379_v24  ;;  %970 = vmatprep.subr.bf16.mxu0 %v1380_v25  ;;  %v556_v8 = vld [vmem:[#allocation2] sm:$0xff]  ;;  %v557_v12 = vld [vmem:[#allocation2 + $0x8] sm:$0xff]  ;;  %v1054_v24 = vsub.s32 (!%p1281_p13), 0, %v1053_v22  ;;  %v1058_v25 = vsub.s32 (!%p1281_p13), 1, %v1053_v22 }
  0x86   : > { %1011 = vmatprep.subr.bf16.mxu1 %v1382_v26  ;;  %v1050_v23 = vld [vmem:[%s538_s12] sm:$0x3] (!%p1281_p13) }
  0x88   : > { %971 = vmatpush1.bf16.msra.mxu0 %v1384_v27 }
  0x89   : > { %1012 = vmatpush1.bf16.msra.mxu1 %v1385_v28  ;;  %972 = vmatprep.subr.bf16.mxu0 %v1386_v29  ;;  %v1055_v28 = vrot.slane (!%p1281_p13), %v1050_v23, %v1054_v24  ;;  %v1059_v29 = vrot.slane (!%p1281_p13), %v1050_v23, %v1058_v25 }
  0x8a   : > { %1013 = vmatprep.subr.bf16.mxu1 %v1388_v30 }
  0x8c   : > { %973 = vmatpush1.bf16.msra.mxu0 %v1390_v31 }
  0x8d   : > { %1014 = vmatpush1.bf16.msra.mxu1 %v1391_v32  ;;  %974 = vmatprep.subr.bf16.mxu0 %v1392_v33 }
  0x8e   : > { %1015 = vmatprep.subr.bf16.mxu1 %v1394_v34 }
  0x90   : > { %975 = vmatpush1.bf16.msra.mxu0 %v1396_v35 }
  0x91   : > { %1016 = vmatpush1.bf16.msra.mxu1 %v1397_v36  ;;  %976 = vmatprep.subr.bf16.mxu0 %v1398_v37 }
  0x92   : > { %1017 = vmatprep.subr.bf16.mxu1 %v1400_v38 }
  0x94   : > { %977 = vmatpush1.bf16.msra.mxu0 %v1402_v39 }
  0x95   : > { %1018 = vmatpush1.bf16.msra.mxu1 %v1403_v40  ;;  %978 = vmatprep.subr.bf16.mxu0 %v1404_v41 }
  0x96   : > { %1019 = vmatprep.subr.bf16.mxu1 %v1406_v42 }
  0x98   : > { %979 = vmatpush1.bf16.msra.mxu0 %v1408_v43 }
  0x99   : > { %1020 = vmatpush1.bf16.msra.mxu1 %v1409_v44  ;;  %980 = vmatprep.subr.bf16.mxu0 %v1410_v45 }
  0x9a   : > { %1021 = vmatprep.subr.bf16.mxu1 %v1412_v46 }
  0x9c   : > { %981 = vmatpush1.bf16.msra.mxu0 %v1414_v50 }
  0x9d   : > { %1022 = vmatpush1.bf16.msra.mxu1 %v1415_v51  ;;  %982 = vmatprep.subr.bf16.mxu0 %v1416_v53 }
  0x9e   : > { %1023 = vmatprep.subr.bf16.mxu1 %v1418_v54 }
  0xa0   : > { %983 = vmatpush1.bf16.msra.mxu0 %v1420_v55 }
  0xa1   : > { %1024 = vmatpush1.bf16.msra.mxu1 %v1421_v56  ;;  %984 = vmatprep.subr.bf16.mxu0 %v1422_v57 }
  0xa2   : > { %1025 = vmatprep.subr.bf16.mxu1 %v1424_v58 }
  0xa4   : > { %985 = vmatpush1.bf16.msra.mxu0 %v1426_v59 }
  0xa5   : > { %1026 = vmatpush1.bf16.msra.mxu1 %v1427_v60  ;;  %986 = vmatprep.subr.bf16.mxu0 %v1428_v61 }
  0xa6   : > { %1027 = vmatprep.subr.bf16.mxu1 %v1430_v62 }
  0xa8   : > { %987 = vmatpush1.bf16.msra.mxu0 %v1432_v63 }
  0xa9   : > { %1028 = vmatpush1.bf16.msra.mxu1 %v1433_v0  ;;  %988 = vmatprep.subr.bf16.mxu0 %v1434_v1 }
  0xaa   : > { %1029 = vmatprep.subr.bf16.mxu1 %v1436_v2 }
  0xac   : > { %989 = vmatpush1.bf16.msra.mxu0 %v1438_v3 }
  0xad   : > { %1030 = vmatpush1.bf16.msra.mxu1 %v1439_v4 }
  0xaf   : > { %991 = vmatmul.mubr.bf16.vlgmr.msra.gmra.mrb[0].mxu0 %v1213_v5 }
  0xb0   : > { %1032 = vmatmul.mubr.bf16.vlgmr.msra.gmra.mrb[0].mxu1 %v1215_v6 }
 0x182   : > { %v992_v7 = vpop.f32.mrb[0].mxu0 }
 0x183   : > { %v1033_v9 = vpop.f32.mrb[0].mxu1  ;;  %v994_v11 = vpop.f32.mrb[1].mxu0  ;;  %1047 = sbr.rel (%p1281_p13) target bundleno = 406 (0x196), region = 78 }
 0x184   : > { %v1034_v10 = vadd.f32 %v1033_v9, %v992_v7  ;;  %v1035_v13 = vpop.f32.mrb[1].mxu1  ;;  %v996_v15 = vpop.f32.mrb[2].mxu0 }
 0x185   : > { %v1036_v14 = vadd.f32 %v1035_v13, %v994_v11  ;;  %v1037_v16 = vpop.f32.mrb[2].mxu1  ;;  %v997_v18 = vpop.f32.mrb[3].mxu0 }
 0x186   : > { %v1040_v17 = vadd.f32 %v1034_v10, %v556_v8  ;;  %v1038_v19 = vpop.f32.mrb[3].mxu1 }
 0x187   : > { %v1041_v20 = vadd.f32 %v1036_v14, %v557_v12 }
 0x188   : > { %1042 = vst [vmem:[#allocation2] sm:$0xff] %v1040_v17 }
 0x189   : > { %1043 = vst [vmem:[#allocation2 + $0x8] sm:$0xff] %v1041_v20 }
 0x18f   : > { %v1048_v26 = vld [vmem:[#allocation2] sm:$0xff] }
 0x190   : > { %v1049_v27 = vld [vmem:[#allocation2 + $0x8] sm:$0xff]  ;;  %v1062_v30 = vadd.f32 %v1055_v28, %v1048_v26 }
 0x191   : > { %v1063_v31 = vadd.f32 %v1059_v29, %v1049_v27 }
 0x193   : > { %v1286_v32 = vpack.c.bf16 %v1063_v31, %v1062_v30 }
 0x195   : > { %1072 = vst [vmem:[%s1733_s15] sm:$0xff] %v1286_v32 }
 0x196 PF: > { %s13_s18 = sadd.s32 1, %s1498_s18   ;;  %s1836_s12 = smov %s1478_s13 }
 0x197   : > { %p10_p0 = scmp.ge.s32.totalorder %s13_s18, 18   ;;  %s1837_s13 = smov %s1572_s25 }
 0x198   : > { %s1838_s14 = smov %s1490_s16  ;;  %s1839_s15 = smov %s1494_s17 }
 0x199   : > { %s1840_s16 = smov %s1843_s19  ;;  %s1841_s17 = smov %s1847_s20 }
 0x19a   :  { %12 = sbr.rel (!%p10_p0) target bundleno = 4 (0x4), region = 119 }

// kernel: resnet_forward.35
= control target key start
LH: loop header
LB: loop body
LE: loop exit
PB: predicated region body
PF: predicated region fallthrough
CT: control target
= control target key end

     0   :  { %s1576_s15 = smov 0   ;;  %s1578_s16 = smov 0   ;;  %s1867_s0 = inlined_call_operand.vmem [shape: bf16[8,512], index: 0, kind: input, shape index: {}]   ;;  %s1868_s1 = inlined_call_operand.vmem [shape: bf16[512,2048], index: 1, kind: input, shape index: {}]   ;;  %s1869_s2 = inlined_call_operand.vmem [shape: f32[1,2048], index: 2, kind: input, shape index: {}]   ;;  %s1870_s3 = inlined_call_operand.vmem [shape: bf16[8,2048], index: 3, kind: input, shape index: {}, may-alias: {3,4}]   ;;  %s1871_s4 = inlined_call_operand.vmem [shape: bf16[8,2048], index: 4, kind: output, shape index: {}, may-alias: {3,4}]  }
   0x1   :  { %s1580_s17 = smov 0   ;;  %s1582_s18 = smov 0  }
   0x2   :  { %s1584_s19 = smov 0  }
   0x3 LB: > { %s29_s20 = sadd.s32 1, %s1545_s18  ;;  %p77_p1 = scmp.ne.s32.totalorder %s1537_s16, %s1533_s15  ;;  %s1549_s19 = sphi %s1584_s19, %s14_s19   ;;  %s1545_s18 = sphi %s1582_s18, %s1875_s18   ;;  %s1541_s17 = sphi %s1580_s17, %s1874_s17   ;;  %s1537_s16 = sphi %s1578_s16, %s1873_s16   ;;  %s1533_s15 = sphi %s1576_s15, %s1872_s15  }
   0x4   : > { %p31_p0 = scmp.ge.s32.totalorder %s29_s20, 8  ;;  %p78_p2 = scmp.eq.s32.totalorder %s1549_s19, 0 }
   0x5   : > { %s70_s22 = sadd.s32 1, %s1537_s16  ;;  %p1287_p5 = scmp.ge.s32.totalorder %s1549_s19, 8 }
   0x6   : > { %s1877_s20 = smov (%p31_p0, %s29_s20), 0  ;;  %p79_p3 = por %p78_p2, %p77_p1 }
   0x7   : > { %s66_s21 = ssub.s32 %s1545_s18, %s1877_s20  ;;  %198 = sbr.rel (%p1287_p5) target bundleno = 82 (0x52), region = 20 }
   0x8   : > { %p68_p4 = scmp.eq.s32.totalorder %s66_s21, 0 }
   0xa   : > { %s1611_s23 = scalar_select %p68_p4, %s1537_s16, %s70_s22  }
   0xe   : > { %201 = sbr.rel (!%p79_p3) target bundleno = 82 (0x52), region = 24  ;;  %s203_s24 = sand.u32 (%p79_p3), 1, %s1537_s16  }
   0xf   : > { %s1369_s25 = sshll.u32 (%p79_p3), %s1545_s18, 3  ;;  %s1288_s26 = sshll.u32 (%p79_p3), %s203_s24, 9 }
  0x10   : > { %s1619_s29 = scalar_lea.vmem (%p79_p3), %s1868_s1, %s1369_s25  ;;  %s1624_s30 = scalar_lea.vmem (%p79_p3), [#allocation3], %s1288_s26 }
  0x11   : > { %v365_v0 = vld [vmem:[%s1619_s29] sm:$0xff] (%p79_p3) }
  0x12   : > { %v367_v1 = vld [vmem:[%s1619_s29 + $0x40] sm:$0xff] (%p79_p3)  ;;  %366 = vst [vmem:[%s1624_s30] sm:$0xff] (%p79_p3), %v365_v0 }
  0x13   : > { %v369_v2 = vld [vmem:[%s1619_s29 + $0x80] sm:$0xff] (%p79_p3)  ;;  %368 = vst [vmem:[%s1624_s30 + $0x8] sm:$0xff] (%p79_p3), %v367_v1 }
  0x14   : > { %370 = vst [vmem:[%s1624_s30 + $0x10] sm:$0xff] (%p79_p3), %v369_v2  ;;  %v371_v3 = vld [vmem:[%s1619_s29 + $0xc0] sm:$0xff] (%p79_p3) }
  0x15   : > { %v373_v4 = vld [vmem:[%s1619_s29 + $0x100] sm:$0xff]  ;;  %372 = vst [vmem:[%s1624_s30 + $0x18] sm:$0xff] %v371_v3 }
  0x16   : > { %v375_v5 = vld [vmem:[%s1619_s29 + $0x140] sm:$0xff]  ;;  %374 = vst [vmem:[%s1624_s30 + $0x20] sm:$0xff] %v373_v4 }
  0x17   : > { %376 = vst [vmem:[%s1624_s30 + $0x28] sm:$0xff] %v375_v5  ;;  %v377_v6 = vld [vmem:[%s1619_s29 + $0x180] sm:$0xff] }
  0x18   : > { %v379_v7 = vld [vmem:[%s1619_s29 + $0x1c0] sm:$0xff]  ;;  %378 = vst [vmem:[%s1624_s30 + $0x30] sm:$0xff] %v377_v6 }
  0x19   : > { %v381_v8 = vld [vmem:[%s1619_s29 + $0x200] sm:$0xff]  ;;  %380 = vst [vmem:[%s1624_s30 + $0x38] sm:$0xff] %v379_v7 }
  0x1a   : > { %382 = vst [vmem:[%s1624_s30 + $0x40] sm:$0xff] %v381_v8  ;;  %v383_v9 = vld [vmem:[%s1619_s29 + $0x240] sm:$0xff] }
  0x1b   : > { %v385_v10 = vld [vmem:[%s1619_s29 + $0x280] sm:$0xff]  ;;  %384 = vst [vmem:[%s1624_s30 + $0x48] sm:$0xff] %v383_v9 }
  0x1c   : > { %v387_v11 = vld [vmem:[%s1619_s29 + $0x2c0] sm:$0xff]  ;;  %386 = vst [vmem:[%s1624_s30 + $0x50] sm:$0xff] %v385_v10 }
  0x1d   : > { %388 = vst [vmem:[%s1624_s30 + $0x58] sm:$0xff] %v387_v11  ;;  %v389_v12 = vld [vmem:[%s1619_s29 + $0x300] sm:$0xff] }
  0x1e   : > { %v391_v13 = vld [vmem:[%s1619_s29 + $0x340] sm:$0xff]  ;;  %390 = vst [vmem:[%s1624_s30 + $0x60] sm:$0xff] %v389_v12 }
  0x1f   : > { %v393_v14 = vld [vmem:[%s1619_s29 + $0x380] sm:$0xff]  ;;  %392 = vst [vmem:[%s1624_s30 + $0x68] sm:$0xff] %v391_v13 }
  0x20   : > { %394 = vst [vmem:[%s1624_s30 + $0x70] sm:$0xff] %v393_v14  ;;  %v395_v15 = vld [vmem:[%s1619_s29 + $0x3c0] sm:$0xff] }
  0x21   : > { %v397_v16 = vld [vmem:[%s1619_s29 + $0x400] sm:$0xff]  ;;  %396 = vst [vmem:[%s1624_s30 + $0x78] sm:$0xff] %v395_v15 }
  0x22   : > { %v399_v17 = vld [vmem:[%s1619_s29 + $0x440] sm:$0xff]  ;;  %398 = vst [vmem:[%s1624_s30 + $0x80] sm:$0xff] %v397_v16 }
  0x23   : > { %400 = vst [vmem:[%s1624_s30 + $0x88] sm:$0xff] %v399_v17  ;;  %v401_v18 = vld [vmem:[%s1619_s29 + $0x480] sm:$0xff] }
  0x24   : > { %v403_v19 = vld [vmem:[%s1619_s29 + $0x4c0] sm:$0xff]  ;;  %402 = vst [vmem:[%s1624_s30 + $0x90] sm:$0xff] %v401_v18 }
  0x25   : > { %v405_v20 = vld [vmem:[%s1619_s29 + $0x500] sm:$0xff]  ;;  %404 = vst [vmem:[%s1624_s30 + $0x98] sm:$0xff] %v403_v19 }
  0x26   : > { %406 = vst [vmem:[%s1624_s30 + $0xa0] sm:$0xff] %v405_v20  ;;  %v407_v21 = vld [vmem:[%s1619_s29 + $0x540] sm:$0xff] }
  0x27   : > { %v409_v22 = vld [vmem:[%s1619_s29 + $0x580] sm:$0xff]  ;;  %408 = vst [vmem:[%s1624_s30 + $0xa8] sm:$0xff] %v407_v21 }
  0x28   : > { %v411_v23 = vld [vmem:[%s1619_s29 + $0x5c0] sm:$0xff]  ;;  %410 = vst [vmem:[%s1624_s30 + $0xb0] sm:$0xff] %v409_v22 }
  0x29   : > { %412 = vst [vmem:[%s1624_s30 + $0xb8] sm:$0xff] %v411_v23  ;;  %v413_v24 = vld [vmem:[%s1619_s29 + $0x600] sm:$0xff] }
  0x2a   : > { %v415_v25 = vld [vmem:[%s1619_s29 + $0x640] sm:$0xff]  ;;  %414 = vst [vmem:[%s1624_s30 + $0xc0] sm:$0xff] %v413_v24 }
  0x2b   : > { %v417_v26 = vld [vmem:[%s1619_s29 + $0x680] sm:$0xff]  ;;  %416 = vst [vmem:[%s1624_s30 + $0xc8] sm:$0xff] %v415_v25 }
  0x2c   : > { %418 = vst [vmem:[%s1624_s30 + $0xd0] sm:$0xff] %v417_v26  ;;  %v419_v27 = vld [vmem:[%s1619_s29 + $0x6c0] sm:$0xff] }
  0x2d   : > { %v421_v28 = vld [vmem:[%s1619_s29 + $0x700] sm:$0xff]  ;;  %420 = vst [vmem:[%s1624_s30 + $0xd8] sm:$0xff] %v419_v27 }
  0x2e   : > { %v423_v29 = vld [vmem:[%s1619_s29 + $0x740] sm:$0xff]  ;;  %422 = vst [vmem:[%s1624_s30 + $0xe0] sm:$0xff] %v421_v28 }
  0x2f   : > { %424 = vst [vmem:[%s1624_s30 + $0xe8] sm:$0xff] %v423_v29  ;;  %v425_v30 = vld [vmem:[%s1619_s29 + $0x780] sm:$0xff] }
  0x30   : > { %v427_v31 = vld [vmem:[%s1619_s29 + $0x7c0] sm:$0xff]  ;;  %426 = vst [vmem:[%s1624_s30 + $0xf0] sm:$0xff] %v425_v30 }
  0x31   : > { %v429_v32 = vld [vmem:[%s1619_s29 + $0x800] sm:$0xff]  ;;  %428 = vst [vmem:[%s1624_s30 + $0xf8] sm:$0xff] %v427_v31 }
  0x32   : > { %430 = vst [vmem:[%s1624_s30 + $0x100] sm:$0xff] %v429_v32  ;;  %v431_v33 = vld [vmem:[%s1619_s29 + $0x840] sm:$0xff] }
  0x33   : > { %v433_v34 = vld [vmem:[%s1619_s29 + $0x880] sm:$0xff]  ;;  %432 = vst [vmem:[%s1624_s30 + $0x108] sm:$0xff] %v431_v33 }
  0x34   : > { %v435_v35 = vld [vmem:[%s1619_s29 + $0x8c0] sm:$0xff]  ;;  %434 = vst [vmem:[%s1624_s30 + $0x110] sm:$0xff] %v433_v34 }
  0x35   : > { %436 = vst [vmem:[%s1624_s30 + $0x118] sm:$0xff] %v435_v35  ;;  %v437_v36 = vld [vmem:[%s1619_s29 + $0x900] sm:$0xff] }
  0x36   : > { %v439_v37 = vld [vmem:[%s1619_s29 + $0x940] sm:$0xff]  ;;  %438 = vst [vmem:[%s1624_s30 + $0x120] sm:$0xff] %v437_v36 }
  0x37   : > { %v441_v38 = vld [vmem:[%s1619_s29 + $0x980] sm:$0xff]  ;;  %440 = vst [vmem:[%s1624_s30 + $0x128] sm:$0xff] %v439_v37 }
  0x38   : > { %442 = vst [vmem:[%s1624_s30 + $0x130] sm:$0xff] %v441_v38  ;;  %v443_v39 = vld [vmem:[%s1619_s29 + $0x9c0] sm:$0xff] }
  0x39   : > { %v445_v40 = vld [vmem:[%s1619_s29 + $0xa00] sm:$0xff]  ;;  %444 = vst [vmem:[%s1624_s30 + $0x138] sm:$0xff] %v443_v39 }
  0x3a   : > { %v447_v41 = vld [vmem:[%s1619_s29 + $0xa40] sm:$0xff]  ;;  %446 = vst [vmem:[%s1624_s30 + $0x140] sm:$0xff] %v445_v40 }
  0x3b   : > { %448 = vst [vmem:[%s1624_s30 + $0x148] sm:$0xff] %v447_v41  ;;  %v449_v42 = vld [vmem:[%s1619_s29 + $0xa80] sm:$0xff] }
  0x3c   : > { %v451_v43 = vld [vmem:[%s1619_s29 + $0xac0] sm:$0xff]  ;;  %450 = vst [vmem:[%s1624_s30 + $0x150] sm:$0xff] %v449_v42 }
  0x3d   : > { %v453_v44 = vld [vmem:[%s1619_s29 + $0xb00] sm:$0xff]  ;;  %452 = vst [vmem:[%s1624_s30 + $0x158] sm:$0xff] %v451_v43 }
  0x3e   : > { %454 = vst [vmem:[%s1624_s30 + $0x160] sm:$0xff] %v453_v44  ;;  %v455_v45 = vld [vmem:[%s1619_s29 + $0xb40] sm:$0xff] }
  0x3f   : > { %v457_v46 = vld [vmem:[%s1619_s29 + $0xb80] sm:$0xff]  ;;  %456 = vst [vmem:[%s1624_s30 + $0x168] sm:$0xff] %v455_v45 }
  0x40   : > { %v459_v47 = vld [vmem:[%s1619_s29 + $0xbc0] sm:$0xff]  ;;  %458 = vst [vmem:[%s1624_s30 + $0x170] sm:$0xff] %v457_v46 }
  0x41   : > { %460 = vst [vmem:[%s1624_s30 + $0x178] sm:$0xff] %v459_v47  ;;  %v461_v48 = vld [vmem:[%s1619_s29 + $0xc00] sm:$0xff] }
  0x42   : > { %v463_v49 = vld [vmem:[%s1619_s29 + $0xc40] sm:$0xff]  ;;  %462 = vst [vmem:[%s1624_s30 + $0x180] sm:$0xff] %v461_v48 }
  0x43   : > { %v465_v50 = vld [vmem:[%s1619_s29 + $0xc80] sm:$0xff]  ;;  %464 = vst [vmem:[%s1624_s30 + $0x188] sm:$0xff] %v463_v49 }
  0x44   : > { %466 = vst [vmem:[%s1624_s30 + $0x190] sm:$0xff] %v465_v50  ;;  %v467_v51 = vld [vmem:[%s1619_s29 + $0xcc0] sm:$0xff] }
  0x45   : > { %v469_v52 = vld [vmem:[%s1619_s29 + $0xd00] sm:$0xff]  ;;  %468 = vst [vmem:[%s1624_s30 + $0x198] sm:$0xff] %v467_v51 }
  0x46   : > { %v471_v53 = vld [vmem:[%s1619_s29 + $0xd40] sm:$0xff]  ;;  %470 = vst [vmem:[%s1624_s30 + $0x1a0] sm:$0xff] %v469_v52 }
  0x47   : > { %472 = vst [vmem:[%s1624_s30 + $0x1a8] sm:$0xff] %v471_v53  ;;  %v473_v54 = vld [vmem:[%s1619_s29 + $0xd80] sm:$0xff] }
  0x48   : > { %v475_v55 = vld [vmem:[%s1619_s29 + $0xdc0] sm:$0xff]  ;;  %474 = vst [vmem:[%s1624_s30 + $0x1b0] sm:$0xff] %v473_v54 }
  0x49   : > { %v477_v56 = vld [vmem:[%s1619_s29 + $0xe00] sm:$0xff]  ;;  %476 = vst [vmem:[%s1624_s30 + $0x1b8] sm:$0xff] %v475_v55 }
  0x4a   : > { %478 = vst [vmem:[%s1624_s30 + $0x1c0] sm:$0xff] %v477_v56  ;;  %v479_v57 = vld [vmem:[%s1619_s29 + $0xe40] sm:$0xff] }
  0x4b   : > { %v481_v58 = vld [vmem:[%s1619_s29 + $0xe80] sm:$0xff]  ;;  %480 = vst [vmem:[%s1624_s30 + $0x1c8] sm:$0xff] %v479_v57 }
  0x4c   : > { %v483_v59 = vld [vmem:[%s1619_s29 + $0xec0] sm:$0xff]  ;;  %482 = vst [vmem:[%s1624_s30 + $0x1d0] sm:$0xff] %v481_v58 }
  0x4d   : > { %484 = vst [vmem:[%s1624_s30 + $0x1d8] sm:$0xff] %v483_v59  ;;  %v485_v60 = vld [vmem:[%s1619_s29 + $0xf00] sm:$0xff] }
  0x4e   : > { %v487_v61 = vld [vmem:[%s1619_s29 + $0xf40] sm:$0xff]  ;;  %486 = vst [vmem:[%s1624_s30 + $0x1e0] sm:$0xff] %v485_v60 }
  0x4f   : > { %v489_v62 = vld [vmem:[%s1619_s29 + $0xf80] sm:$0xff]  ;;  %488 = vst [vmem:[%s1624_s30 + $0x1e8] sm:$0xff] %v487_v61 }
  0x50   : > { %490 = vst [vmem:[%s1624_s30 + $0x1f0] sm:$0xff] %v489_v62  ;;  %v491_v63 = vld [vmem:[%s1619_s29 + $0xfc0] sm:$0xff] }
  0x51   : > { %492 = vst [vmem:[%s1624_s30 + $0x1f8] sm:$0xff] %v491_v63 }
  0x52 PF: > { %p1291_p6 = scmp.ge.s32.totalorder %s1549_s19, 1  ;;  %p518_p7 = scmp.lt.s32.totalorder %s1549_s19, 9 }
  0x54   : > { %p519_p8 = pnand %p1291_p6, %p518_p7 }
  0x55   : > { %s525_s5 = sand.u32 (!%p519_p8), 1, %s1533_s15   ;;  %v1757_v0 = vld [vmem:[%s1867_s0] sm:$0xff] (!%p519_p8)  ;;  %v1762_v1 = vld [vmem:[%s1867_s0 + $0x8] sm:$0xff] (!%p519_p8)  ;;  %s1293_s12 = sshll.u32 (!%p519_p8), %s1541_s17, 1 }
  0x56   : > { %522 = sbr.rel (%p519_p8) target bundleno = 378 (0x17a), region = 70  ;;  %s1292_s10 = sshll.u32 (!%p519_p8), %s525_s5, 9  ;;  %v1299_v2 = vcombine.high (!%p519_p8), %v1757_v0, %v1757_v0  ;;  %v1301_v3 = vcombine.high (!%p519_p8), %v1762_v1, %v1762_v1 }
  0x57   : > { %s1768_s11 = scalar_lea.vmem (!%p519_p8), [#allocation3], %s1292_s10  ;;  %p589_p9 = scmp.lt.s32.totalorder (!%p519_p8), %s1293_s12, 15 }
  0x58   : > { %v1411_v4 = vld [vmem:[%s1768_s11 + $0x4] ss:$8 sps:$4 sm:$0xff] (!%p519_p8)   ;;  %1053 = vmatprep.mubr.bf16.mxu0 (!%p519_p8), %v1299_v2  ;;  %1094 = vmatprep.mubr.bf16.mxu1 (!%p519_p8), %v1301_v3  ;;  %v1415_v6 = vld [vmem:[%s1768_s11] ss:$8 sps:$4 sm:$0xff] (!%p519_p8)   ;;  %v1417_v8 = vld [vmem:[%s1768_s11 + $0x14] ss:$8 sps:$4 sm:$0xff] (!%p519_p8)  }
  0x59   : > { %v1413_v5 = vld [vmem:[%s1768_s11 + $0x104] ss:$8 sps:$4 sm:$0xff] (!%p519_p8)   ;;  %1021 = vmatprep.subr.bf16.mxu0 (!%p519_p8), %v1411_v4  ;;  %v1416_v7 = vld [vmem:[%s1768_s11 + $0x100] ss:$8 sps:$4 sm:$0xff] (!%p519_p8)   ;;  %v1419_v9 = vld [vmem:[%s1768_s11 + $0x114] ss:$8 sps:$4 sm:$0xff] (!%p519_p8)  }
  0x5a   : > { %1062 = vmatprep.subr.bf16.mxu1 (!%p519_p8), %v1413_v5  ;;  %1022 = vmatpush1.bf16.msra.mxu0 (!%p519_p8), %v1415_v6  ;;  %v1421_v10 = vld [vmem:[%s1768_s11 + $0x10] ss:$8 sps:$4 sm:$0xff] (!%p519_p8)   ;;  %v1423_v12 = vld [vmem:[%s1768_s11 + $0x24] ss:$8 sps:$4 sm:$0xff] (!%p519_p8)   ;;  %v1427_v14 = vld [vmem:[%s1768_s11 + $0x20] ss:$8 sps:$4 sm:$0xff] (!%p519_p8)   ;;  %v1298_v6 = vcombine.low (!%p519_p8), %v1757_v0, %v1757_v0 }
  0x5b   : > { %1063 = vmatpush1.bf16.msra.mxu1 (!%p519_p8), %v1416_v7  ;;  %1023 = vmatprep.subr.bf16.mxu0 (!%p519_p8), %v1417_v8  ;;  %v1422_v11 = vld [vmem:[%s1768_s11 + $0x110] ss:$8 sps:$4 sm:$0xff] (!%p519_p8)   ;;  %v1425_v13 = vld [vmem:[%s1768_s11 + $0x124] ss:$8 sps:$4 sm:$0xff] (!%p519_p8)   ;;  %v1428_v15 = vld [vmem:[%s1768_s11 + $0x120] ss:$8 sps:$4 sm:$0xff] (!%p519_p8)   ;;  %v1300_v7 = vcombine.low (!%p519_p8), %v1762_v1, %v1762_v1  ;;  %v1114_v8 = vlaneseq (!%p519_p8) }
  0x5c   : > { %1064 = vmatprep.subr.bf16.mxu1 (!%p519_p8), %v1419_v9  ;;  %v1429_v16 = vld [vmem:[%s1768_s11 + $0x34] ss:$8 sps:$4 sm:$0xff] (!%p519_p8)   ;;  %v1433_v18 = vld [vmem:[%s1768_s11 + $0x30] ss:$8 sps:$4 sm:$0xff] (!%p519_p8)   ;;  %v1435_v20 = vld [vmem:[%s1768_s11 + $0x44] ss:$8 sps:$4 sm:$0xff] (!%p519_p8)  }
  0x5d   : > { %v1431_v17 = vld [vmem:[%s1768_s11 + $0x134] ss:$8 sps:$4 sm:$0xff]   ;;  %v1434_v19 = vld [vmem:[%s1768_s11 + $0x130] ss:$8 sps:$4 sm:$0xff]   ;;  %v1437_v21 = vld [vmem:[%s1768_s11 + $0x144] ss:$8 sps:$4 sm:$0xff]  }
  0x5e   : > { %1024 = vmatpush1.bf16.msra.mxu0 %v1421_v10  ;;  %v1439_v22 = vld [vmem:[%s1768_s11 + $0x40] ss:$8 sps:$4 sm:$0xff]   ;;  %v1441_v24 = vld [vmem:[%s1768_s11 + $0x54] ss:$8 sps:$4 sm:$0xff]   ;;  %v1445_v26 = vld [vmem:[%s1768_s11 + $0x50] ss:$8 sps:$4 sm:$0xff]  }
  0x5f   : > { %1065 = vmatpush1.bf16.msra.mxu1 %v1422_v11  ;;  %1025 = vmatprep.subr.bf16.mxu0 %v1423_v12  ;;  %v1440_v23 = vld [vmem:[%s1768_s11 + $0x140] ss:$8 sps:$4 sm:$0xff]   ;;  %v1443_v25 = vld [vmem:[%s1768_s11 + $0x154] ss:$8 sps:$4 sm:$0xff]   ;;  %v1446_v27 = vld [vmem:[%s1768_s11 + $0x150] ss:$8 sps:$4 sm:$0xff]  }
  0x60   : > { %1066 = vmatprep.subr.bf16.mxu1 %v1425_v13  ;;  %v1447_v28 = vld [vmem:[%s1768_s11 + $0x64] ss:$8 sps:$4 sm:$0xff]   ;;  %v1451_v30 = vld [vmem:[%s1768_s11 + $0x60] ss:$8 sps:$4 sm:$0xff]   ;;  %v1453_v32 = vld [vmem:[%s1768_s11 + $0x74] ss:$8 sps:$4 sm:$0xff]  }
  0x61   : > { %v1449_v29 = vld [vmem:[%s1768_s11 + $0x164] ss:$8 sps:$4 sm:$0xff]   ;;  %v1452_v31 = vld [vmem:[%s1768_s11 + $0x160] ss:$8 sps:$4 sm:$0xff]   ;;  %v1455_v33 = vld [vmem:[%s1768_s11 + $0x174] ss:$8 sps:$4 sm:$0xff]  }
  0x62   : > { %1026 = vmatpush1.bf16.msra.mxu0 %v1427_v14  ;;  %v1457_v34 = vld [vmem:[%s1768_s11 + $0x70] ss:$8 sps:$4 sm:$0xff]   ;;  %v1459_v36 = vld [vmem:[%s1768_s11 + $0x84] ss:$8 sps:$4 sm:$0xff]   ;;  %v1463_v38 = vld [vmem:[%s1768_s11 + $0x80] ss:$8 sps:$4 sm:$0xff]  }
  0x63   : > { %1067 = vmatpush1.bf16.msra.mxu1 %v1428_v15  ;;  %1027 = vmatprep.subr.bf16.mxu0 %v1429_v16  ;;  %v1458_v35 = vld [vmem:[%s1768_s11 + $0x170] ss:$8 sps:$4 sm:$0xff]   ;;  %v1461_v37 = vld [vmem:[%s1768_s11 + $0x184] ss:$8 sps:$4 sm:$0xff]   ;;  %v1464_v39 = vld [vmem:[%s1768_s11 + $0x180] ss:$8 sps:$4 sm:$0xff]  }
  0x64   : > { %1068 = vmatprep.subr.bf16.mxu1 %v1431_v17  ;;  %v1465_v40 = vld [vmem:[%s1768_s11 + $0x94] ss:$8 sps:$4 sm:$0xff]   ;;  %v1469_v42 = vld [vmem:[%s1768_s11 + $0x90] ss:$8 sps:$4 sm:$0xff]   ;;  %v1471_v44 = vld [vmem:[%s1768_s11 + $0xa4] ss:$8 sps:$4 sm:$0xff]  }
  0x65   : > { %v1467_v41 = vld [vmem:[%s1768_s11 + $0x194] ss:$8 sps:$4 sm:$0xff]   ;;  %v1470_v43 = vld [vmem:[%s1768_s11 + $0x190] ss:$8 sps:$4 sm:$0xff]   ;;  %v1473_v45 = vld [vmem:[%s1768_s11 + $0x1a4] ss:$8 sps:$4 sm:$0xff]  }
  0x66   : > { %1028 = vmatpush1.bf16.msra.mxu0 %v1433_v18  ;;  %v1475_v46 = vld [vmem:[%s1768_s11 + $0xa0] ss:$8 sps:$4 sm:$0xff]   ;;  %v1477_v48 = vld [vmem:[%s1768_s11 + $0xb4] ss:$8 sps:$4 sm:$0xff]   ;;  %v1481_v50 = vld [vmem:[%s1768_s11 + $0xb0] ss:$8 sps:$4 sm:$0xff]  }
  0x67   : > { %1069 = vmatpush1.bf16.msra.mxu1 %v1434_v19  ;;  %1029 = vmatprep.subr.bf16.mxu0 %v1435_v20  ;;  %v1476_v47 = vld [vmem:[%s1768_s11 + $0x1a0] ss:$8 sps:$4 sm:$0xff]   ;;  %v1479_v49 = vld [vmem:[%s1768_s11 + $0x1b4] ss:$8 sps:$4 sm:$0xff]   ;;  %v1482_v51 = vld [vmem:[%s1768_s11 + $0x1b0] ss:$8 sps:$4 sm:$0xff]  }
  0x68   : > { %1070 = vmatprep.subr.bf16.mxu1 %v1437_v21  ;;  %v1483_v52 = vld [vmem:[%s1768_s11 + $0xc4] ss:$8 sps:$4 sm:$0xff]   ;;  %v1487_v54 = vld [vmem:[%s1768_s11 + $0xc0] ss:$8 sps:$4 sm:$0xff]   ;;  %v1489_v56 = vld [vmem:[%s1768_s11 + $0xd4] ss:$8 sps:$4 sm:$0xff]  }
  0x69   : > { %v1485_v53 = vld [vmem:[%s1768_s11 + $0x1c4] ss:$8 sps:$4 sm:$0xff]   ;;  %v1488_v55 = vld [vmem:[%s1768_s11 + $0x1c0] ss:$8 sps:$4 sm:$0xff]   ;;  %v1491_v57 = vld [vmem:[%s1768_s11 + $0x1d4] ss:$8 sps:$4 sm:$0xff]  }
  0x6a   : > { %1030 = vmatpush1.bf16.msra.mxu0 %v1439_v22  ;;  %v1493_v58 = vld [vmem:[%s1768_s11 + $0xd0] ss:$8 sps:$4 sm:$0xff]   ;;  %v1495_v60 = vld [vmem:[%s1768_s11 + $0xe4] ss:$8 sps:$4 sm:$0xff]   ;;  %v1499_v62 = vld [vmem:[%s1768_s11 + $0xe0] ss:$8 sps:$4 sm:$0xff]  }
  0x6b   : > { %1071 = vmatpush1.bf16.msra.mxu1 %v1440_v23  ;;  %1031 = vmatprep.subr.bf16.mxu0 %v1441_v24  ;;  %v1494_v59 = vld [vmem:[%s1768_s11 + $0x1d0] ss:$8 sps:$4 sm:$0xff]   ;;  %v1497_v61 = vld [vmem:[%s1768_s11 + $0x1e4] ss:$8 sps:$4 sm:$0xff]   ;;  %v1500_v63 = vld [vmem:[%s1768_s11 + $0x1e0] ss:$8 sps:$4 sm:$0xff]  }
  0x6c   : > { %1072 = vmatprep.subr.bf16.mxu1 %v1443_v25  ;;  %v1501_v2 = vld [vmem:[%s1768_s11 + $0xf4] ss:$8 sps:$4 sm:$0xff]   ;;  %v1505_v4 = vld [vmem:[%s1768_s11 + $0xf0] ss:$8 sps:$4 sm:$0xff]   ;;  %s1879_s12 = smov (!%p589_p9, %s1293_s12), 15  ;;  %v1115_v9 = vshrl.u32 %v1114_v8, 7 }
  0x6d   : > { %v1503_v3 = vld [vmem:[%s1768_s11 + $0x1f4] ss:$8 sps:$4 sm:$0xff]   ;;  %v1506_v5 = vld [vmem:[%s1768_s11 + $0x1f0] ss:$8 sps:$4 sm:$0xff]   ;;  %s1295_s13 = sshll.u32 %s1879_s12, 2  ;;  %s591_s21 = scalar_lea.vmem %s1869_s2, %s1879_s12 }
  0x6e   : > { %1032 = vmatpush1.bf16.msra.mxu0 %v1445_v26  ;;  %s601_s25 = scalar_lea.vmem %s1870_s3, %s1295_s13  ;;  %v1116_v0 = vsub.s32 0, %v1115_v9  ;;  %v1112_v1 = vld [vmem:[%s591_s21] sm:$0x3]  ;;  %v1120_v10 = vsub.s32 1, %v1115_v9  ;;  %s611_s27 = scalar_lea.vmem %s1871_s4, %s1295_s13 }
  0x6f   : > { %1073 = vmatpush1.bf16.msra.mxu1 %v1446_v27  ;;  %1033 = vmatprep.subr.bf16.mxu0 %v1447_v28  ;;  %v1126_v11 = vld [vmem:[%s601_s25] sm:$0xff] }
  0x70   : > { %1074 = vmatprep.subr.bf16.mxu1 %v1449_v29  ;;  %v1117_v12 = vrot.slane %v1112_v1, %v1116_v0  ;;  %v1121_v15 = vrot.slane %v1112_v1, %v1120_v10  ;;  %v1127_v17 = vunpack.c.l.bf16 %v1126_v11  ;;  %v1128_v21 = vunpack.c.h.bf16 %v1126_v11 }
  0x72   : > { %1034 = vmatpush1.bf16.msra.mxu0 %v1451_v30 }
  0x73   : > { %1075 = vmatpush1.bf16.msra.mxu1 %v1452_v31  ;;  %1035 = vmatprep.subr.bf16.mxu0 %v1453_v32 }
  0x74   : > { %1076 = vmatprep.subr.bf16.mxu1 %v1455_v33 }
  0x76   : > { %1036 = vmatpush1.bf16.msra.mxu0 %v1457_v34 }
  0x77   : > { %1077 = vmatpush1.bf16.msra.mxu1 %v1458_v35  ;;  %1037 = vmatprep.subr.bf16.mxu0 %v1459_v36 }
  0x78   : > { %1078 = vmatprep.subr.bf16.mxu1 %v1461_v37 }
  0x7a   : > { %1038 = vmatpush1.bf16.msra.mxu0 %v1463_v38 }
  0x7b   : > { %1079 = vmatpush1.bf16.msra.mxu1 %v1464_v39  ;;  %1039 = vmatprep.subr.bf16.mxu0 %v1465_v40 }
  0x7c   : > { %1080 = vmatprep.subr.bf16.mxu1 %v1467_v41 }
  0x7e   : > { %1040 = vmatpush1.bf16.msra.mxu0 %v1469_v42 }
  0x7f   : > { %1081 = vmatpush1.bf16.msra.mxu1 %v1470_v43  ;;  %1041 = vmatprep.subr.bf16.mxu0 %v1471_v44 }
  0x80   : > { %1082 = vmatprep.subr.bf16.mxu1 %v1473_v45 }
  0x82   : > { %1042 = vmatpush1.bf16.msra.mxu0 %v1475_v46 }
  0x83   : > { %1083 = vmatpush1.bf16.msra.mxu1 %v1476_v47  ;;  %1043 = vmatprep.subr.bf16.mxu0 %v1477_v48 }
  0x84   : > { %1084 = vmatprep.subr.bf16.mxu1 %v1479_v49 }
  0x86   : > { %1044 = vmatpush1.bf16.msra.mxu0 %v1481_v50 }
  0x87   : > { %1085 = vmatpush1.bf16.msra.mxu1 %v1482_v51  ;;  %1045 = vmatprep.subr.bf16.mxu0 %v1483_v52 }
  0x88   : > { %1086 = vmatprep.subr.bf16.mxu1 %v1485_v53 }
  0x8a   : > { %1046 = vmatpush1.bf16.msra.mxu0 %v1487_v54 }
  0x8b   : > { %1087 = vmatpush1.bf16.msra.mxu1 %v1488_v55  ;;  %1047 = vmatprep.subr.bf16.mxu0 %v1489_v56 }
  0x8c   : > { %1088 = vmatprep.subr.bf16.mxu1 %v1491_v57 }
  0x8e   : > { %1048 = vmatpush1.bf16.msra.mxu0 %v1493_v58 }
  0x8f   : > { %1089 = vmatpush1.bf16.msra.mxu1 %v1494_v59  ;;  %1049 = vmatprep.subr.bf16.mxu0 %v1495_v60 }
  0x90   : > { %1090 = vmatprep.subr.bf16.mxu1 %v1497_v61 }
  0x92   : > { %1050 = vmatpush1.bf16.msra.mxu0 %v1499_v62 }
  0x93   : > { %1091 = vmatpush1.bf16.msra.mxu1 %v1500_v63  ;;  %1051 = vmatprep.subr.bf16.mxu0 %v1501_v2 }
  0x94   : > { %1092 = vmatprep.subr.bf16.mxu1 %v1503_v3 }
  0x96   : > { %1052 = vmatpush1.bf16.msra.mxu0 %v1505_v4 }
  0x97   : > { %1093 = vmatpush1.bf16.msra.mxu1 %v1506_v5 }
  0x99   : > { %1054 = vmatmul.mubr.bf16.vlgmr.msra.gmra.mrb[0].mxu0 %v1298_v6 }
  0x9a   : > { %1095 = vmatmul.mubr.bf16.vlgmr.msra.gmra.mrb[0].mxu1 %v1300_v7 }
 0x16c   : > { %v1055_v13 = vpop.f32.mrb[0].mxu0 }
 0x16d   : > { %v1096_v14 = vpop.f32.mrb[0].mxu1  ;;  %v1057_v18 = vpop.f32.mrb[1].mxu0 }
 0x16e   : > { %v1097_v16 = vadd.f32 %v1096_v14, %v1055_v13  ;;  %v1098_v19 = vpop.f32.mrb[1].mxu1  ;;  %v1059_v22 = vpop.f32.mrb[2].mxu0 }
 0x16f   : > { %v1099_v20 = vadd.f32 %v1098_v19, %v1057_v18  ;;  %v1100_v23 = vpop.f32.mrb[2].mxu1  ;;  %v1060_v25 = vpop.f32.mrb[3].mxu0 }
 0x170   : > { %v1124_v24 = vadd.f32 %v1117_v12, %v1097_v16  ;;  %v1101_v26 = vpop.f32.mrb[3].mxu1 }
 0x171   : > { %v1125_v27 = vadd.f32 %v1121_v15, %v1099_v20 }
 0x172   : > { %v1129_v28 = vadd.f32 %v1127_v17, %v1124_v24 }
 0x173   : > { %v1130_v29 = vadd.f32 %v1128_v21, %v1125_v27 }
 0x174   : > { %v1131_v30 = vmax.f32 %v1129_v28, 0.0 }
 0x175   : > { %v1132_v31 = vmax.f32 %v1130_v29, 0.0 }
 0x177   : > { %v1370_v32 = vpack.c.bf16 %v1132_v31, %v1131_v30 }
 0x179   : > { %1141 = vst [vmem:[%s611_s27] sm:$0xff] %v1370_v32 }
 0x17a PF: > { %s14_s19 = sadd.s32 1, %s1549_s19   ;;  %s1872_s15 = smov %s1537_s16 }
 0x17b   : > { %p11_p10 = scmp.ge.s32.totalorder %s14_s19, 10   ;;  %s1873_s16 = smov %s1611_s23 }
 0x17c   : > { %s1874_s17 = smov %s1545_s18  ;;  %s1875_s18 = smov %s1877_s20 }
 0x17d   :  { %13 = sbr.rel (!%p11_p10) target bundleno = 3 (0x3), region = 126 }

// kernel: resnet_forward.36
= control target key start
LH: loop header
LB: loop body
LE: loop exit
PB: predicated region body
PF: predicated region fallthrough
CT: control target
= control target key end

     0   :  { %vm41_vm0 = vcmask 1041409   ;;  %vm43_vm1 = vcmask 1043459   ;;  %vm45_vm2 = vcmask 1045509   ;;  %vm47_vm3 = vcmask 1047559   ;;  %s132_s0 = inlined_call_operand.vmem [shape: bf16[2,1,2048], index: 0, kind: input, shape index: {}]   ;;  %s133_s1 = inlined_call_operand.vmem [shape: f32[2,2048], index: 1, kind: output, shape index: {}]  }
   0x1   :  { %v8_v0 = vld [vmem:[%s132_s0] sm:$0xff]  ;;  %v10_v1 = vld [vmem:[%s132_s0 + $0x10] sm:$0xff]  ;;  %v9_v2 = vld [vmem:[%s132_s0 + $0x8] sm:$0xff] }
   0x2   :  { %v12_v3 = vunpack.c.l.bf16 %v8_v0  ;;  %v16_v4 = vunpack.c.l.bf16 %v10_v1  ;;  %v13_v5 = vunpack.c.h.bf16 %v8_v0  ;;  %v17_v6 = vunpack.c.h.bf16 %v10_v1  ;;  %v11_v7 = vld [vmem:[%s132_s0 + $0x18] sm:$0xff] }
   0x3   :  { %v14_v8 = vunpack.c.l.bf16 %v9_v2  ;;  %v18_v9 = vunpack.c.l.bf16 %v11_v7  ;;  %v15_v10 = vunpack.c.h.bf16 %v9_v2  ;;  %v19_v11 = vunpack.c.h.bf16 %v11_v7 }
   0x4   :  { %v40_v12 = vrot.slane %v16_v4, 7  ;;  %v51_v13 = vrot.slane %v17_v6, 7 }
   0x5   :  { %v58_v14 = vrot.slane %v18_v9, 7  ;;  %v65_v15 = vrot.slane %v19_v11, 7 }
   0x6   :  { %v42_v16 = vsel %vm41_vm0, %v40_v12, %v12_v3  ;;  %v52_v17 = vsel %vm41_vm0, %v51_v13, %v13_v5 }
   0x7   :  { %v44_v18 = vsel %vm43_vm1, %v40_v12, %v42_v16  ;;  %v53_v19 = vsel %vm43_vm1, %v51_v13, %v52_v17  ;;  %v59_v20 = vsel %vm41_vm0, %v58_v14, %v14_v8  ;;  %v66_v21 = vsel %vm41_vm0, %v65_v15, %v15_v10 }
   0x8   :  { %v46_v22 = vsel %vm45_vm2, %v40_v12, %v44_v18  ;;  %v54_v23 = vsel %vm45_vm2, %v51_v13, %v53_v19  ;;  %v60_v24 = vsel %vm43_vm1, %v58_v14, %v59_v20  ;;  %v67_v25 = vsel %vm43_vm1, %v65_v15, %v66_v21 }
   0x9   :  { %v48_v26 = vsel %vm47_vm3, %v40_v12, %v46_v22  ;;  %v55_v27 = vsel %vm47_vm3, %v51_v13, %v54_v23  ;;  %v61_v28 = vsel %vm45_vm2, %v58_v14, %v60_v24  ;;  %v68_v29 = vsel %vm45_vm2, %v65_v15, %v67_v25 }
   0xa   :  { %74 = vst [vmem:[%s133_s1] sm:$0xff] %v48_v26  ;;  %75 = vst [vmem:[%s133_s1 + $0x8] sm:$0xff] %v55_v27  ;;  %v62_v30 = vsel %vm47_vm3, %v58_v14, %v61_v28  ;;  %v69_v31 = vsel %vm47_vm3, %v65_v15, %v68_v29 }
   0xb   :  { %76 = vst [vmem:[%s133_s1 + $0x10] sm:$0xff] %v62_v30  ;;  %77 = vst [vmem:[%s133_s1 + $0x18] sm:$0xff] %v69_v31 }

// kernel: resnet_forward.37
= control target key start
LH: loop header
LB: loop body
LE: loop exit
PB: predicated region body
PF: predicated region fallthrough
CT: control target
= control target key end

     0   :  { %s940_s12 = smov 0   ;;  %s942_s13 = smov 0   ;;  %s1023_s0 = inlined_call_operand.vmem [shape: bf16[8,2048], index: 0, kind: input, shape index: {}]   ;;  %s1024_s1 = inlined_call_operand.vmem [shape: bf16[2048,128], index: 1, kind: input, shape index: {}]   ;;  %s1025_s2 = inlined_call_operand.vmem [shape: f32[1,128], index: 2, kind: input, shape index: {}]   ;;  %s1026_s3 = inlined_call_operand.vmem [shape: f32[8,128], index: 3, kind: output, shape index: {}]  }
   0x1   :  { %s944_s14 = smov 0  }
   0x2 LB: > { %s25_s15 = sadd.s32 1, %s913_s13  ;;  %p743_p0 = scmp.ge.s32.totalorder %s917_s14, 1  ;;  %s917_s14 = sphi %s944_s14, %s13_s14   ;;  %s913_s13 = sphi %s942_s13, %s1028_s13   ;;  %s909_s12 = sphi %s940_s12, %s1027_s12  }
   0x3   : > { %p26_p1 = scmp.ge.s32.totalorder %s25_s15, 4  ;;  %p189_p2 = scmp.lt.s32.totalorder %s917_s14, 5 }
   0x5   : > { %s1030_s15 = smov (%p26_p1, %s25_s15), 0  ;;  %p190_p3 = pnand %p743_p0, %p189_p2 }
   0x6   : > { %s744_s16 = sshll.u32 (!%p190_p3), %s909_s12, 2  ;;  %s746_s17 = sshll.u32 (!%p190_p3), %s909_s12, 6 }
   0x7   : > { %193 = sbr.rel (%p190_p3) target bundleno = 289 (0x121), region = 32  ;;  %p233_p4 = scmp.lt.s32.totalorder (!%p190_p3), %s744_s16, 15 }
   0x8   : > { %p241_p5 = scmp.lt.s32.totalorder (!%p190_p3), %s746_s17, 255  ;;  %p748_p6 = scmp.ne.s32.totalorder (!%p190_p3), %s909_s12, 0 }
   0xe   : > { %s1032_s16 = smov (!%p233_p4, %s744_s16), 15  ;;  %s1034_s17 = smov (!%p241_p5, %s746_s17), 255 }
   0xf   : > { %s745_s18 = sshll.u32 %s1032_s16, 2  ;;  %s747_s22 = sshll.u32 %s1034_s17, 2  ;;  %v919_v0 = vmov (!%p748_p6), 0.0  }
  0x10   : > { %s965_s21 = scalar_lea.vmem %s1023_s0, %s745_s18  ;;  %s970_s25 = scalar_lea.vmem %s1024_s1, %s747_s22  ;;  %264 = vst [vmem:[#allocation2] sm:$0xff] (!%p748_p6), %v919_v0 }
  0x11   : > { %263 = sbr.rel (%p748_p6) target bundleno = 24 (0x18), region = 36 }
  0x18 PF: > { %v859_v1 = vld [vmem:[%s970_s25 + $0x40] sm:$0xff]   ;;  %v863_v5 = vld [vmem:[%s970_s25 + $0x48] sm:$0xff]   ;;  %v867_v9 = vld [vmem:[%s970_s25 + $0x50] sm:$0xff]   ;;  %p785_p7 = scmp.ne.s32.totalorder %s909_s12, 3 }
  0x19   : > { %v860_v2 = vld [vmem:[%s970_s25 + $0xc0] sm:$0xff]   ;;  %790 = vmatprep.subr.bf16.mxu0 %v859_v1  ;;  %v864_v6 = vld [vmem:[%s970_s25 + $0xc8] sm:$0xff]   ;;  %v868_v10 = vld [vmem:[%s970_s25 + $0xd0] sm:$0xff]  }
  0x1a   : > { %v861_v3 = vld [vmem:[%s970_s25] sm:$0xff]   ;;  %812 = vmatprep.subr.bf16.mxu1 %v860_v2  ;;  %v865_v7 = vld [vmem:[%s970_s25 + $0x8] sm:$0xff]   ;;  %v869_v11 = vld [vmem:[%s970_s25 + $0x10] sm:$0xff]  }
  0x1b   : > { %v862_v4 = vld [vmem:[%s970_s25 + $0x80] sm:$0xff]   ;;  %791 = vmatpush3.bf16.msra.mxu0 %v861_v3  ;;  %v866_v8 = vld [vmem:[%s970_s25 + $0x88] sm:$0xff]   ;;  %v870_v12 = vld [vmem:[%s970_s25 + $0x90] sm:$0xff]  }
  0x1c   : > { %813 = vmatpush3.bf16.msra.mxu1 %v862_v4  ;;  %792 = vmatprep.subr.bf16.mxu0 %v863_v5  ;;  %v871_v13 = vld [vmem:[%s970_s25 + $0x58] sm:$0xff]   ;;  %v875_v17 = vld [vmem:[%s970_s25 + $0x60] sm:$0xff]   ;;  %v879_v21 = vld [vmem:[%s970_s25 + $0x68] sm:$0xff]  }
  0x1d   : > { %814 = vmatprep.subr.bf16.mxu1 %v864_v6  ;;  %v872_v14 = vld [vmem:[%s970_s25 + $0xd8] sm:$0xff]   ;;  %v876_v18 = vld [vmem:[%s970_s25 + $0xe0] sm:$0xff]   ;;  %v880_v22 = vld [vmem:[%s970_s25 + $0xe8] sm:$0xff]  }
  0x1e   : > { %v873_v15 = vld [vmem:[%s970_s25 + $0x18] sm:$0xff]   ;;  %v877_v19 = vld [vmem:[%s970_s25 + $0x20] sm:$0xff]   ;;  %v881_v23 = vld [vmem:[%s970_s25 + $0x28] sm:$0xff]  }
  0x1f   : > { %793 = vmatpush3.bf16.msra.mxu0 %v865_v7  ;;  %v874_v16 = vld [vmem:[%s970_s25 + $0x98] sm:$0xff]   ;;  %v878_v20 = vld [vmem:[%s970_s25 + $0xa0] sm:$0xff]   ;;  %v882_v24 = vld [vmem:[%s970_s25 + $0xa8] sm:$0xff]  }
  0x20   : > { %815 = vmatpush3.bf16.msra.mxu1 %v866_v8  ;;  %794 = vmatprep.subr.bf16.mxu0 %v867_v9  ;;  %v883_v25 = vld [vmem:[%s970_s25 + $0x70] sm:$0xff]   ;;  %v887_v29 = vld [vmem:[%s970_s25 + $0x78] sm:$0xff]   ;;  %v266_v33 = vld [vmem:[%s965_s21] sm:$0xff] }
  0x21   : > { %816 = vmatprep.subr.bf16.mxu1 %v868_v10  ;;  %v884_v26 = vld [vmem:[%s970_s25 + $0xf0] sm:$0xff]   ;;  %v888_v30 = vld [vmem:[%s970_s25 + $0xf8] sm:$0xff]   ;;  %v267_v34 = vld [vmem:[%s965_s21 + $0x8] sm:$0xff]  ;;  %v749_v35 = vcombine.low %v266_v33, %v266_v33  ;;  %v750_v36 = vcombine.high %v266_v33, %v266_v33 }
  0x22   : > { %v885_v27 = vld [vmem:[%s970_s25 + $0x30] sm:$0xff]   ;;  %v889_v31 = vld [vmem:[%s970_s25 + $0x38] sm:$0xff]   ;;  %v751_v37 = vcombine.low %v267_v34, %v267_v34  ;;  %v752_v38 = vcombine.high %v267_v34, %v267_v34  ;;  %v265_v47 = vld [vmem:[#allocation2] sm:$0xff] }
  0x23   : > { %795 = vmatpush3.bf16.msra.mxu0 %v869_v11  ;;  %v886_v28 = vld [vmem:[%s970_s25 + $0xb0] sm:$0xff]   ;;  %v890_v32 = vld [vmem:[%s970_s25 + $0xb8] sm:$0xff]   ;;  %570 = vmatprep.mubr.bf16.mxu0 %v750_v36  ;;  %v786_v53 = vld [vmem:[%s1025_s2] ss:$0 sm:$0xff] (!%p785_p7) }
  0x24   : > { %817 = vmatpush3.bf16.msra.mxu1 %v870_v12  ;;  %796 = vmatprep.subr.bf16.mxu0 %v871_v13 }
  0x25   : > { %818 = vmatprep.subr.bf16.mxu1 %v872_v14  ;;  %610 = vmatprep.mubr.bf16.mxu1 %v752_v38 }
  0x27   : > { %797 = vmatpush3.bf16.msra.mxu0 %v873_v15 }
  0x28   : > { %819 = vmatpush3.bf16.msra.mxu1 %v874_v16  ;;  %798 = vmatprep.subr.bf16.mxu0 %v875_v17 }
  0x29   : > { %820 = vmatprep.subr.bf16.mxu1 %v876_v18 }
  0x2b   : > { %799 = vmatpush3.bf16.msra.mxu0 %v877_v19 }
  0x2c   : > { %821 = vmatpush3.bf16.msra.mxu1 %v878_v20  ;;  %800 = vmatprep.subr.bf16.mxu0 %v879_v21 }
  0x2d   : > { %822 = vmatprep.subr.bf16.mxu1 %v880_v22 }
  0x2f   : > { %801 = vmatpush3.bf16.msra.mxu0 %v881_v23 }
  0x30   : > { %823 = vmatpush3.bf16.msra.mxu1 %v882_v24  ;;  %802 = vmatprep.subr.bf16.mxu0 %v883_v25 }
  0x31   : > { %824 = vmatprep.subr.bf16.mxu1 %v884_v26 }
  0x33   : > { %803 = vmatpush3.bf16.msra.mxu0 %v885_v27 }
  0x34   : > { %825 = vmatpush3.bf16.msra.mxu1 %v886_v28  ;;  %804 = vmatprep.subr.bf16.mxu0 %v887_v29 }
  0x35   : > { %826 = vmatprep.subr.bf16.mxu1 %v888_v30 }
  0x37   : > { %805 = vmatpush3.bf16.msra.mxu0 %v889_v31 }
  0x38   : > { %827 = vmatpush3.bf16.msra.mxu1 %v890_v32 }
  0x3a   : > { %571 = vmatmul.mubr.bf16.vlgmr.msra.gmra.mrb[0].mxu0 %v749_v35 }
  0x3b   : > { %611 = vmatmul.mubr.bf16.vlgmr.msra.gmra.mrb[0].mxu1 %v751_v37 }
 0x10d   : > { %v806_v39 = vpop.f32.mrb[0].mxu0 }
 0x10e   : > { %v828_v40 = vpop.f32.mrb[0].mxu1  ;;  %v807_v41 = vpop.f32.mrb[1].mxu0 }
 0x10f   : > { %v829_v42 = vpop.f32.mrb[1].mxu1  ;;  %v808_v43 = vadd.f32 %v807_v41, %v806_v39  ;;  %v809_v45 = vpop.f32.mrb[2].mxu0 }
 0x110   : > { %v830_v44 = vadd.f32 %v829_v42, %v828_v40  ;;  %v831_v46 = vpop.f32.mrb[2].mxu1  ;;  %v810_v48 = vpop.f32.mrb[3].mxu0  ;;  %623 = sbr.rel (%p785_p7) target bundleno = 289 (0x121), region = 40 }
 0x111   : > { %v832_v49 = vpop.f32.mrb[3].mxu1 }
 0x112   : > { %v613_v50 = vadd.f32 %v830_v44, %v808_v43 }
 0x114   : > { %v618_v51 = vadd.f32 %v613_v50, %v265_v47 }
 0x116   : > { %619 = vst [vmem:[#allocation2] sm:$0xff] %v618_v51 }
 0x11d   : > { %v624_v52 = vld [vmem:[#allocation2] sm:$0xff] }
 0x11e   : > { %v632_v54 = vadd.f32 %v786_v53, %v624_v52 }
 0x120   : > { %633 = vst [vmem:[%s1026_s3] sm:$0xff] %v632_v54 }
 0x121 PF: > { %s13_s14 = sadd.s32 1, %s917_s14   ;;  %s1027_s12 = smov %s913_s13 }
 0x122   : > { %p10_p8 = scmp.ge.s32.totalorder %s13_s14, 6   ;;  %s1028_s13 = smov %s1030_s15 }
 0x124   :  { %12 = sbr.rel (!%p10_p8) target bundleno = 2 (0x2), region = 76 }

</bundles_post_ra>
